<compile_context>
chip_gen: v7x
topology: tpu7x:2x2x1
jax: 0.10.0
libtpu: 0.0.40
codegen_flags: <defaults>
</compile_context>

<pallas_src>
import math
from functools import partial

import jax
import jax.numpy as jnp
from jax.experimental import pallas as pl
from jax.experimental.pallas import tpu as pltpu

# ----------------------------- config ---------------------------------------
IN_CHANNELS = 32
NUM_CLASSES = 4
NUM_ANCHORS = 2
CLS_NUM_CONVS = 2
REG_NUM_CONVS = 2
PRIOR_PROB = 0.01
INF = 100000000.0
BN_EPS = 1e-5
# BatchNorm in eval mode with running_mean=0, running_var=1, gamma=1, beta=0
# is a constant scale; it is folded into the conv weights/biases at prep time.
BN_SCALE = 1.0 / math.sqrt(1.0 + BN_EPS)


# ---------------------------- fused kernel -----------------------------------
def decoder_kernel(x_ref, cls_w_ref, cls_b_ref, reg_w_ref, reg_b_ref,
                   hcls_w_ref, hcls_b_ref, hbo_w_ref, hbo_b_ref,
                   out_ref, pad_ref, *, N, H, W, Cin, A, C):
    """Whole YOLOF decoder for the full batch in one grid step.

    x_ref      : (N, H, W, Cin)        input feature (NHWC)
    cls_w_ref  : (n_cls, 9*Cin, Cin)   im2col weights, BN folded
    cls_b_ref  : (n_cls, 1, Cin)
    reg_w_ref  : (n_reg, 9*Cin, Cin)
    reg_b_ref  : (n_reg, 1, Cin)
    hcls_w_ref : (9*Cin, A*C)          cls_score head
    hcls_b_ref : (1, A*C)
    hbo_w_ref  : (9*Cin, A*4 + A)      bbox_pred & object_pred fused along Cout
    hbo_b_ref  : (1, A*4 + A)
    out_ref    : (N*H*W, A*C + A*4)    [normalized_cls | bbox_reg]
    pad_ref    : (N, H+2, W+2, Cin)    VMEM scratch; 1-px border stays zero
    """
    M = N * H * W

    # Zero the padded scratch once; every conv only rewrites the interior.
    pad_ref[...] = jnp.zeros_like(pad_ref)

    def conv3x3(feat, w, b, relu):
        """SAME 3x3 conv via im2col. feat: (N,H,W,Cin) -> (M, Cout)."""
        pad_ref[:, 1:H + 1, 1:W + 1, :] = feat
        xp = pad_ref[...]                                       # (N,H+2,W+2,Cin)
        taps = [xp[:, dy:dy + H, dx:dx + W, :].reshape(M, Cin)
                for dy in range(3) for dx in range(3)]
        xs = jnp.concatenate(taps, axis=1)                      # (M, 9*Cin)
        y = jnp.dot(xs, w, preferred_element_type=jnp.float32) + b
        if relu:
            y = jnp.maximum(y, 0.0)
        return y                                                # (M, Cout)

    feat = x_ref[...].astype(jnp.float32)                       # (N, H, W, Cin)

    # ---- classification tower ----
    cls_feat = feat
    for i in range(cls_w_ref.shape[0]):
        cls_feat = conv3x3(cls_feat, cls_w_ref[i], cls_b_ref[i],
                           relu=True).reshape(N, H, W, Cin)
    cls_logits = conv3x3(cls_feat, hcls_w_ref[...], hcls_b_ref[...],
                         relu=False)                            # (M, A*C)

    # ---- regression tower (bbox + objectness in one fused head matmul) ----
    reg_feat = feat
    for i in range(reg_w_ref.shape[0]):
        reg_feat = conv3x3(reg_feat, reg_w_ref[i], reg_b_ref[i],
                           relu=True).reshape(N, H, W, Cin)
    boxobj = conv3x3(reg_feat, hbo_w_ref[...], hbo_b_ref[...],
                     relu=False)                                # (M, A*4 + A)
    bbox = boxobj[:, :A * 4]                                    # (M, A*4)
    obj = boxobj[:, A * 4:]                                     # (M, A)

    # ---- fused normalization epilogue ----
    # broadcast each anchor's objectness across its C class logits
    obj_b = jnp.concatenate(
        [jnp.broadcast_to(obj[:, a:a + 1], (M, C)) for a in range(A)], axis=1)
    norm = cls_logits + obj_b - jnp.log(
        1.0 + jnp.minimum(jnp.exp(cls_logits), INF)
        + jnp.minimum(jnp.exp(obj_b), INF))

    out_ref[...] = jnp.concatenate([norm, bbox], axis=1).astype(out_ref.dtype)


# --------------------------- parameters --------------------------------------
def init_params(key):
    n_convs = CLS_NUM_CONVS + REG_NUM_CONVS + 3
    keys = jax.random.split(key, n_convs)
    ki = iter(keys)

    def conv_w(k, cin, cout):
        # nn.init.normal_(weight, mean=0, std=0.01); stored as HWIO
        return 0.01 * jax.random.normal(k, (3, 3, cin, cout), jnp.float32)

    params = {"cls_subnet": [], "bbox_subnet": []}
    for _ in range(CLS_NUM_CONVS):
        params["cls_subnet"].append(
            (conv_w(next(ki), IN_CHANNELS, IN_CHANNELS),
             jnp.zeros((IN_CHANNELS,), jnp.float32)))
    for _ in range(REG_NUM_CONVS):
        params["bbox_subnet"].append(
            (conv_w(next(ki), IN_CHANNELS, IN_CHANNELS),
             jnp.zeros((IN_CHANNELS,), jnp.float32)))

    bias_value = -math.log((1.0 - PRIOR_PROB) / PRIOR_PROB)
    params["cls_score"] = (
        conv_w(next(ki), IN_CHANNELS, NUM_ANCHORS * NUM_CLASSES),
        jnp.full((NUM_ANCHORS * NUM_CLASSES,), bias_value, jnp.float32))
    params["bbox_pred"] = (
        conv_w(next(ki), IN_CHANNELS, NUM_ANCHORS * 4),
        jnp.zeros((NUM_ANCHORS * 4,), jnp.float32))
    params["object_pred"] = (
        conv_w(next(ki), IN_CHANNELS, NUM_ANCHORS),
        jnp.zeros((NUM_ANCHORS,), jnp.float32))
    return params


def prepare_kernel_params(params):
    """One-time static weight transform: im2col layout + BN fold + head fusion."""
    cin = IN_CHANNELS

    def prep(w_hwio, b, fold_bn):
        w2 = w_hwio.reshape(9 * cin, -1).astype(jnp.float32)   # (dy,dx,ci) -> K
        b2 = b.reshape(1, -1).astype(jnp.float32)
        if fold_bn:
            w2 = w2 * BN_SCALE
            b2 = b2 * BN_SCALE
        return w2, b2

    cls = [prep(w, b, True) for (w, b) in params["cls_subnet"]]
    reg = [prep(w, b, True) for (w, b) in params["bbox_subnet"]]
    hcls_w, hcls_b = prep(*params["cls_score"], fold_bn=False)
    bw, bb = prep(*params["bbox_pred"], fold_bn=False)
    ow, ob = prep(*params["object_pred"], fold_bn=False)
    return {
        "cls_w": jnp.stack([w for w, _ in cls]),      # (n_cls, 288, 32)
        "cls_b": jnp.stack([b for _, b in cls]),      # (n_cls, 1, 32)
        "reg_w": jnp.stack([w for w, _ in reg]),
        "reg_b": jnp.stack([b for _, b in reg]),
        "hcls_w": hcls_w, "hcls_b": hcls_b,           # (288, A*C), (1, A*C)
        "hbo_w": jnp.concatenate([bw, ow], axis=1),   # (288, A*4 + A)
        "hbo_b": jnp.concatenate([bb, ob], axis=1),   # (1, A*4 + A)
    }


# ------------------------------ forward ---------------------------------------
def decoder_forward(kparams, feature_nchw):
    x = jnp.transpose(feature_nchw, (0, 2, 3, 1))               # NCHW -> NHWC
    N, H, W, Cin = x.shape
    A, C = NUM_ANCHORS, NUM_CLASSES
    M = N * H * W
    cout = A * C + A * 4

    n_cls = kparams["cls_w"].shape[0]
    n_reg = kparams["reg_w"].shape[0]
    kern = partial(decoder_kernel, N=N, H=H, W=W, Cin=Cin, A=A, C=C)

    def full(shape):
        return pl.BlockSpec(shape, lambda i, _s=len(shape): (0,) * _s)

    out = pl.pallas_call(
        kern,
        out_shape=jax.ShapeDtypeStruct((M, cout), jnp.float32),
        grid=(1,),
        in_specs=[
            full((N, H, W, Cin)),
            full((n_cls, 9 * Cin, Cin)),
            full((n_cls, 1, Cin)),
            full((n_reg, 9 * Cin, Cin)),
            full((n_reg, 1, Cin)),
            full((9 * Cin, A * C)),
            full((1, A * C)),
            full((9 * Cin, A * 4 + A)),
            full((1, A * 4 + A)),
        ],
        out_specs=full((M, cout)),
        scratch_shapes=[pltpu.VMEM((N, H + 2, W + 2, Cin), jnp.float32)],
    )(x, kparams["cls_w"], kparams["cls_b"], kparams["reg_w"], kparams["reg_b"],
      kparams["hcls_w"], kparams["hcls_b"], kparams["hbo_w"], kparams["hbo_b"])

    norm_flat = out[:, :A * C]                                  # (M, A*C)
    bbox_flat = out[:, A * C:]                                  # (M, A*4)
    normalized_cls_score = jnp.transpose(
        norm_flat.reshape(N, H, W, A * C), (0, 3, 1, 2))        # (N, A*C, H, W)
    bbox_reg = jnp.transpose(
        bbox_flat.reshape(N, H, W, A * 4), (0, 3, 1, 2))        # (N, A*4, H, W)
    return normalized_cls_score, bbox_reg


# ------------------------- pure-JAX reference ---------------------------------
def _conv_ref(x, w, b, apply_bn_relu):
    y = jax.lax.conv_general_dilated(
        x, w, (1, 1), "SAME",
        dimension_numbers=("NHWC", "HWIO", "NHWC")) + b
    if apply_bn_relu:
        y = jnp.maximum(y * BN_SCALE, 0.0)
    return y


def decoder_forward_ref(params, feature_nchw):
    x = jnp.transpose(feature_nchw, (0, 2, 3, 1))
    N, H, W, _ = x.shape
    A, C = NUM_ANCHORS, NUM_CLASSES
    cls_feat = x
    for (w, b) in params["cls_subnet"]:
        cls_feat = _conv_ref(cls_feat, w, b, True)
    cls_score = _conv_ref(cls_feat, *params["cls_score"], apply_bn_relu=False)
    reg_feat = x
    for (w, b) in params["bbox_subnet"]:
        reg_feat = _conv_ref(reg_feat, w, b, True)
    bbox_reg = _conv_ref(reg_feat, *params["bbox_pred"], apply_bn_relu=False)
    obj = _conv_ref(reg_feat, *params["object_pred"], apply_bn_relu=False)
    cls5 = cls_score.reshape(N, H, W, A, C)
    obj5 = obj.reshape(N, H, W, A, 1)
    norm = cls5 + obj5 - jnp.log(1.0 + jnp.minimum(jnp.exp(cls5), INF)
                                 + jnp.minimum(jnp.exp(obj5), INF))
    return (jnp.transpose(norm.reshape(N, H, W, A * C), (0, 3, 1, 2)),
            jnp.transpose(bbox_reg, (0, 3, 1, 2)))


# -------------------------------- main -----------------------------------------
if __name__ == "__main__":
    key = jax.random.PRNGKey(0)
    k_param, k_feat = jax.random.split(key)
    params = init_params(k_param)
    kparams = prepare_kernel_params(params)   # static prep (BN fold, im2col, fuse)

    N, H, W = 2, 8, 8
    feature = jax.random.normal(k_feat, (N, IN_CHANNELS, H, W), jnp.float32)

    fwd = jax.jit(decoder_forward)
    cls_out, box_out = fwd(kparams, feature)
    jax.block_until_ready((cls_out, box_out))

    cls_ref, box_ref = decoder_forward_ref(params, feature)
    assert cls_out.shape == (N, NUM_ANCHORS * NUM_CLASSES, H, W)
    assert box_out.shape == (N, NUM_ANCHORS * 4, H, W)
    assert jnp.allclose(cls_out, cls_ref, atol=1e-4, rtol=1e-4)
    assert jnp.allclose(box_out, box_ref, atol=1e-4, rtol=1e-4)

    print("KERNEL_OK")
</pallas_src>

<mosaic_0001>
module attributes {stable_mosaic.version = 11 : i64} {
  func.func @decoder_kernel(%arg0: i32, %arg1: memref<2x8x8x32xf32, #tpu.memory_space<vmem>>, %arg2: memref<2x288x32xf32, #tpu.memory_space<vmem>>, %arg3: memref<2x1x32xf32, #tpu.memory_space<vmem>>, %arg4: memref<2x288x32xf32, #tpu.memory_space<vmem>>, %arg5: memref<2x1x32xf32, #tpu.memory_space<vmem>>, %arg6: memref<288x8xf32, #tpu.memory_space<vmem>>, %arg7: memref<1x8xf32, #tpu.memory_space<vmem>>, %arg8: memref<288x10xf32, #tpu.memory_space<vmem>>, %arg9: memref<1x10xf32, #tpu.memory_space<vmem>>, %arg10: memref<128x16xf32, #tpu.memory_space<vmem>>, %arg11: memref<2x10x10x32xf32, #tpu.memory_space<vmem>>) attributes {dimension_semantics = [#tpu.dimension_semantics<arbitrary>], iteration_bounds = array<i64: 1>, scalar_prefetch = 0 : i64, scratch_operands = 1 : i64, tpu.core_type = #tpu.core_type<tc>, window_params = [{pipeline_mode = #tpu.pipeline_mode<synchronous>, transform_indices = @transform_0, window_bounds = array<i64: 2, 8, 8, 32>}, {pipeline_mode = #tpu.pipeline_mode<synchronous>, transform_indices = @transform_1, window_bounds = array<i64: 2, 288, 32>}, {pipeline_mode = #tpu.pipeline_mode<synchronous>, transform_indices = @transform_2, window_bounds = array<i64: 2, 1, 32>}, {pipeline_mode = #tpu.pipeline_mode<synchronous>, transform_indices = @transform_3, window_bounds = array<i64: 2, 288, 32>}, {pipeline_mode = #tpu.pipeline_mode<synchronous>, transform_indices = @transform_4, window_bounds = array<i64: 2, 1, 32>}, {pipeline_mode = #tpu.pipeline_mode<synchronous>, transform_indices = @transform_5, window_bounds = array<i64: 288, 8>}, {pipeline_mode = #tpu.pipeline_mode<synchronous>, transform_indices = @transform_6, window_bounds = array<i64: 1, 8>}, {pipeline_mode = #tpu.pipeline_mode<synchronous>, transform_indices = @transform_7, window_bounds = array<i64: 288, 10>}, {pipeline_mode = #tpu.pipeline_mode<synchronous>, transform_indices = @transform_8, window_bounds = array<i64: 1, 10>}, {pipeline_mode = #tpu.pipeline_mode<synchronous>, transform_indices = @transform_9, window_bounds = array<i64: 128, 16>}]} {
    %cst = arith.constant 0.000000e+00 : f32
    %0 = vector.broadcast %cst : f32 to vector<2x10x10x32xf32>
    %c0 = arith.constant 0 : index
    %c0_0 = arith.constant 0 : index
    %c0_1 = arith.constant 0 : index
    %c0_2 = arith.constant 0 : index
    %1 = vector.load %arg11[%c0, %c0_0, %c0_1, %c0_2] : memref<2x10x10x32xf32, #tpu.memory_space<vmem>>, vector<2x10x10x32xf32>
    tpu.vector_store %arg11[%c0, %c0_0, %c0_1, %c0_2], %0 {strides = array<i32>} : memref<2x10x10x32xf32, #tpu.memory_space<vmem>>, vector<2x10x10x32xf32>,
    %c0_3 = arith.constant 0 : index
    %c0_4 = arith.constant 0 : index
    %c0_5 = arith.constant 0 : index
    %c0_6 = arith.constant 0 : index
    %2 = vector.load %arg1[%c0_3, %c0_4, %c0_5, %c0_6] : memref<2x8x8x32xf32, #tpu.memory_space<vmem>>, vector<2x8x8x32xf32>
    %c0_7 = arith.constant 0 : index
    %c0_8 = arith.constant 0 : index
    %c0_9 = arith.constant 0 : index
    %3 = vector.load %arg2[%c0_7, %c0_8, %c0_9] : memref<2x288x32xf32, #tpu.memory_space<vmem>>, vector<1x288x32xf32>
    %4 = vector.shape_cast %3 : vector<1x288x32xf32> to vector<288x32xf32>
    %c0_10 = arith.constant 0 : index
    %c0_11 = arith.constant 0 : index
    %c0_12 = arith.constant 0 : index
    %5 = vector.load %arg3[%c0_10, %c0_11, %c0_12] : memref<2x1x32xf32, #tpu.memory_space<vmem>>, vector<1x1x32xf32>
    %6 = vector.shape_cast %5 : vector<1x1x32xf32> to vector<1x32xf32>
    %c0_13 = arith.constant 0 : index
    %c1 = arith.constant 1 : index
    %c1_14 = arith.constant 1 : index
    %c0_15 = arith.constant 0 : index
    %7 = vector.load %arg11[%c0_13, %c1, %c1_14, %c0_15] : memref<2x10x10x32xf32, #tpu.memory_space<vmem>>, vector<2x8x8x32xf32>
    tpu.vector_store %arg11[%c0_13, %c1, %c1_14, %c0_15], %2 {strides = array<i32>} : memref<2x10x10x32xf32, #tpu.memory_space<vmem>>, vector<2x8x8x32xf32>,
    %c0_16 = arith.constant 0 : index
    %c0_17 = arith.constant 0 : index
    %c0_18 = arith.constant 0 : index
    %c0_19 = arith.constant 0 : index
    %8 = vector.load %arg11[%c0_16, %c0_17, %c0_18, %c0_19] : memref<2x10x10x32xf32, #tpu.memory_space<vmem>>, vector<2x10x10x32xf32>
    %9 = vector.extract_strided_slice %8 {offsets = [0, 0, 0, 0], sizes = [2, 8, 8, 32], strides = [1, 1, 1, 1]} : vector<2x10x10x32xf32> to vector<2x8x8x32xf32>
    %10 = vector.shape_cast %9 : vector<2x8x8x32xf32> to vector<128x32xf32>
    %11 = vector.extract_strided_slice %8 {offsets = [0, 0, 1, 0], sizes = [2, 8, 8, 32], strides = [1, 1, 1, 1]} : vector<2x10x10x32xf32> to vector<2x8x8x32xf32>
    %12 = vector.shape_cast %11 : vector<2x8x8x32xf32> to vector<128x32xf32>
    %13 = vector.extract_strided_slice %8 {offsets = [0, 0, 2, 0], sizes = [2, 8, 8, 32], strides = [1, 1, 1, 1]} : vector<2x10x10x32xf32> to vector<2x8x8x32xf32>
    %14 = vector.shape_cast %13 : vector<2x8x8x32xf32> to vector<128x32xf32>
    %15 = vector.extract_strided_slice %8 {offsets = [0, 1, 0, 0], sizes = [2, 8, 8, 32], strides = [1, 1, 1, 1]} : vector<2x10x10x32xf32> to vector<2x8x8x32xf32>
    %16 = vector.shape_cast %15 : vector<2x8x8x32xf32> to vector<128x32xf32>
    %17 = vector.extract_strided_slice %8 {offsets = [0, 1, 1, 0], sizes = [2, 8, 8, 32], strides = [1, 1, 1, 1]} : vector<2x10x10x32xf32> to vector<2x8x8x32xf32>
    %18 = vector.shape_cast %17 : vector<2x8x8x32xf32> to vector<128x32xf32>
    %19 = vector.extract_strided_slice %8 {offsets = [0, 1, 2, 0], sizes = [2, 8, 8, 32], strides = [1, 1, 1, 1]} : vector<2x10x10x32xf32> to vector<2x8x8x32xf32>
    %20 = vector.shape_cast %19 : vector<2x8x8x32xf32> to vector<128x32xf32>
    %21 = vector.extract_strided_slice %8 {offsets = [0, 2, 0, 0], sizes = [2, 8, 8, 32], strides = [1, 1, 1, 1]} : vector<2x10x10x32xf32> to vector<2x8x8x32xf32>
    %22 = vector.shape_cast %21 : vector<2x8x8x32xf32> to vector<128x32xf32>
    %23 = vector.extract_strided_slice %8 {offsets = [0, 2, 1, 0], sizes = [2, 8, 8, 32], strides = [1, 1, 1, 1]} : vector<2x10x10x32xf32> to vector<2x8x8x32xf32>
    %24 = vector.shape_cast %23 : vector<2x8x8x32xf32> to vector<128x32xf32>
    %25 = vector.extract_strided_slice %8 {offsets = [0, 2, 2, 0], sizes = [2, 8, 8, 32], strides = [1, 1, 1, 1]} : vector<2x10x10x32xf32> to vector<2x8x8x32xf32>
    %26 = vector.shape_cast %25 : vector<2x8x8x32xf32> to vector<128x32xf32>
    %27 = tpu.concatenate %10, %12, %14, %16, %18, %20, %22, %24, %26 in 1 : vector<128x32xf32>, vector<128x32xf32>, vector<128x32xf32>, vector<128x32xf32>, vector<128x32xf32>, vector<128x32xf32>, vector<128x32xf32>, vector<128x32xf32>, vector<128x32xf32> -> vector<128x288xf32>
    %cst_20 = arith.constant dense<0.000000e+00> : vector<128x32xf32>
    %28 = tpu.matmul %27, %4, %cst_20 {dimension_numbers = #tpu.dot_dimension_numbers<[1], [0], [0], [1], [0, 0, 1, 1], [], []>} : vector<128x288xf32>, vector<288x32xf32>, vector<128x32xf32> -> vector<128x32xf32>
    %29 = vector.broadcast %6 : vector<1x32xf32> to vector<128x32xf32>
    %30 = arith.addf %28, %29 : vector<128x32xf32>
    %cst_21 = arith.constant 0.000000e+00 : f32
    %31 = vector.broadcast %cst_21 : f32 to vector<128x32xf32>
    %32 = arith.maximumf %30, %31 : vector<128x32xf32>
    %33 = vector.shape_cast %32 : vector<128x32xf32> to vector<2x8x8x32xf32>
    %c1_22 = arith.constant 1 : index
    %c0_23 = arith.constant 0 : index
    %c0_24 = arith.constant 0 : index
    %34 = vector.load %arg2[%c1_22, %c0_23, %c0_24] : memref<2x288x32xf32, #tpu.memory_space<vmem>>, vector<1x288x32xf32>
    %35 = vector.shape_cast %34 : vector<1x288x32xf32> to vector<288x32xf32>
    %c1_25 = arith.constant 1 : index
    %c0_26 = arith.constant 0 : index
    %c0_27 = arith.constant 0 : index
    %36 = vector.load %arg3[%c1_25, %c0_26, %c0_27] : memref<2x1x32xf32, #tpu.memory_space<vmem>>, vector<1x1x32xf32>
    %37 = vector.shape_cast %36 : vector<1x1x32xf32> to vector<1x32xf32>
    %c0_28 = arith.constant 0 : index
    %c1_29 = arith.constant 1 : index
    %c1_30 = arith.constant 1 : index
    %c0_31 = arith.constant 0 : index
    %38 = vector.load %arg11[%c0_28, %c1_29, %c1_30, %c0_31] : memref<2x10x10x32xf32, #tpu.memory_space<vmem>>, vector<2x8x8x32xf32>
    tpu.vector_store %arg11[%c0_28, %c1_29, %c1_30, %c0_31], %33 {strides = array<i32>} : memref<2x10x10x32xf32, #tpu.memory_space<vmem>>, vector<2x8x8x32xf32>,
    %c0_32 = arith.constant 0 : index
    %c0_33 = arith.constant 0 : index
    %c0_34 = arith.constant 0 : index
    %c0_35 = arith.constant 0 : index
    %39 = vector.load %arg11[%c0_32, %c0_33, %c0_34, %c0_35] : memref<2x10x10x32xf32, #tpu.memory_space<vmem>>, vector<2x10x10x32xf32>
    %40 = vector.extract_strided_slice %39 {offsets = [0, 0, 0, 0], sizes = [2, 8, 8, 32], strides = [1, 1, 1, 1]} : vector<2x10x10x32xf32> to vector<2x8x8x32xf32>
    %41 = vector.shape_cast %40 : vector<2x8x8x32xf32> to vector<128x32xf32>
    %42 = vector.extract_strided_slice %39 {offsets = [0, 0, 1, 0], sizes = [2, 8, 8, 32], strides = [1, 1, 1, 1]} : vector<2x10x10x32xf32> to vector<2x8x8x32xf32>
    %43 = vector.shape_cast %42 : vector<2x8x8x32xf32> to vector<128x32xf32>
    %44 = vector.extract_strided_slice %39 {offsets = [0, 0, 2, 0], sizes = [2, 8, 8, 32], strides = [1, 1, 1, 1]} : vector<2x10x10x32xf32> to vector<2x8x8x32xf32>
    %45 = vector.shape_cast %44 : vector<2x8x8x32xf32> to vector<128x32xf32>
    %46 = vector.extract_strided_slice %39 {offsets = [0, 1, 0, 0], sizes = [2, 8, 8, 32], strides = [1, 1, 1, 1]} : vector<2x10x10x32xf32> to vector<2x8x8x32xf32>
    %47 = vector.shape_cast %46 : vector<2x8x8x32xf32> to vector<128x32xf32>
    %48 = vector.extract_strided_slice %39 {offsets = [0, 1, 1, 0], sizes = [2, 8, 8, 32], strides = [1, 1, 1, 1]} : vector<2x10x10x32xf32> to vector<2x8x8x32xf32>
    %49 = vector.shape_cast %48 : vector<2x8x8x32xf32> to vector<128x32xf32>
    %50 = vector.extract_strided_slice %39 {offsets = [0, 1, 2, 0], sizes = [2, 8, 8, 32], strides = [1, 1, 1, 1]} : vector<2x10x10x32xf32> to vector<2x8x8x32xf32>
    %51 = vector.shape_cast %50 : vector<2x8x8x32xf32> to vector<128x32xf32>
    %52 = vector.extract_strided_slice %39 {offsets = [0, 2, 0, 0], sizes = [2, 8, 8, 32], strides = [1, 1, 1, 1]} : vector<2x10x10x32xf32> to vector<2x8x8x32xf32>
    %53 = vector.shape_cast %52 : vector<2x8x8x32xf32> to vector<128x32xf32>
    %54 = vector.extract_strided_slice %39 {offsets = [0, 2, 1, 0], sizes = [2, 8, 8, 32], strides = [1, 1, 1, 1]} : vector<2x10x10x32xf32> to vector<2x8x8x32xf32>
    %55 = vector.shape_cast %54 : vector<2x8x8x32xf32> to vector<128x32xf32>
    %56 = vector.extract_strided_slice %39 {offsets = [0, 2, 2, 0], sizes = [2, 8, 8, 32], strides = [1, 1, 1, 1]} : vector<2x10x10x32xf32> to vector<2x8x8x32xf32>
    %57 = vector.shape_cast %56 : vector<2x8x8x32xf32> to vector<128x32xf32>
    %58 = tpu.concatenate %41, %43, %45, %47, %49, %51, %53, %55, %57 in 1 : vector<128x32xf32>, vector<128x32xf32>, vector<128x32xf32>, vector<128x32xf32>, vector<128x32xf32>, vector<128x32xf32>, vector<128x32xf32>, vector<128x32xf32>, vector<128x32xf32> -> vector<128x288xf32>
    %cst_36 = arith.constant dense<0.000000e+00> : vector<128x32xf32>
    %59 = tpu.matmul %58, %35, %cst_36 {dimension_numbers = #tpu.dot_dimension_numbers<[1], [0], [0], [1], [0, 0, 1, 1], [], []>} : vector<128x288xf32>, vector<288x32xf32>, vector<128x32xf32> -> vector<128x32xf32>
    %60 = vector.broadcast %37 : vector<1x32xf32> to vector<128x32xf32>
    %61 = arith.addf %59, %60 : vector<128x32xf32>
    %cst_37 = arith.constant 0.000000e+00 : f32
    %62 = vector.broadcast %cst_37 : f32 to vector<128x32xf32>
    %63 = arith.maximumf %61, %62 : vector<128x32xf32>
    %64 = vector.shape_cast %63 : vector<128x32xf32> to vector<2x8x8x32xf32>
    %c0_38 = arith.constant 0 : index
    %c0_39 = arith.constant 0 : index
    %65 = vector.load %arg6[%c0_38, %c0_39] : memref<288x8xf32, #tpu.memory_space<vmem>>, vector<288x8xf32>
    %c0_40 = arith.constant 0 : index
    %c0_41 = arith.constant 0 : index
    %66 = vector.load %arg7[%c0_40, %c0_41] : memref<1x8xf32, #tpu.memory_space<vmem>>, vector<1x8xf32>
    %c0_42 = arith.constant 0 : index
    %c1_43 = arith.constant 1 : index
    %c1_44 = arith.constant 1 : index
    %c0_45 = arith.constant 0 : index
    %67 = vector.load %arg11[%c0_42, %c1_43, %c1_44, %c0_45] : memref<2x10x10x32xf32, #tpu.memory_space<vmem>>, vector<2x8x8x32xf32>
    tpu.vector_store %arg11[%c0_42, %c1_43, %c1_44, %c0_45], %64 {strides = array<i32>} : memref<2x10x10x32xf32, #tpu.memory_space<vmem>>, vector<2x8x8x32xf32>,
    %c0_46 = arith.constant 0 : index
    %c0_47 = arith.constant 0 : index
    %c0_48 = arith.constant 0 : index
    %c0_49 = arith.constant 0 : index
    %68 = vector.load %arg11[%c0_46, %c0_47, %c0_48, %c0_49] : memref<2x10x10x32xf32, #tpu.memory_space<vmem>>, vector<2x10x10x32xf32>
    %69 = vector.extract_strided_slice %68 {offsets = [0, 0, 0, 0], sizes = [2, 8, 8, 32], strides = [1, 1, 1, 1]} : vector<2x10x10x32xf32> to vector<2x8x8x32xf32>
    %70 = vector.shape_cast %69 : vector<2x8x8x32xf32> to vector<128x32xf32>
    %71 = vector.extract_strided_slice %68 {offsets = [0, 0, 1, 0], sizes = [2, 8, 8, 32], strides = [1, 1, 1, 1]} : vector<2x10x10x32xf32> to vector<2x8x8x32xf32>
    %72 = vector.shape_cast %71 : vector<2x8x8x32xf32> to vector<128x32xf32>
    %73 = vector.extract_strided_slice %68 {offsets = [0, 0, 2, 0], sizes = [2, 8, 8, 32], strides = [1, 1, 1, 1]} : vector<2x10x10x32xf32> to vector<2x8x8x32xf32>
    %74 = vector.shape_cast %73 : vector<2x8x8x32xf32> to vector<128x32xf32>
    %75 = vector.extract_strided_slice %68 {offsets = [0, 1, 0, 0], sizes = [2, 8, 8, 32], strides = [1, 1, 1, 1]} : vector<2x10x10x32xf32> to vector<2x8x8x32xf32>
    %76 = vector.shape_cast %75 : vector<2x8x8x32xf32> to vector<128x32xf32>
    %77 = vector.extract_strided_slice %68 {offsets = [0, 1, 1, 0], sizes = [2, 8, 8, 32], strides = [1, 1, 1, 1]} : vector<2x10x10x32xf32> to vector<2x8x8x32xf32>
    %78 = vector.shape_cast %77 : vector<2x8x8x32xf32> to vector<128x32xf32>
    %79 = vector.extract_strided_slice %68 {offsets = [0, 1, 2, 0], sizes = [2, 8, 8, 32], strides = [1, 1, 1, 1]} : vector<2x10x10x32xf32> to vector<2x8x8x32xf32>
    %80 = vector.shape_cast %79 : vector<2x8x8x32xf32> to vector<128x32xf32>
    %81 = vector.extract_strided_slice %68 {offsets = [0, 2, 0, 0], sizes = [2, 8, 8, 32], strides = [1, 1, 1, 1]} : vector<2x10x10x32xf32> to vector<2x8x8x32xf32>
    %82 = vector.shape_cast %81 : vector<2x8x8x32xf32> to vector<128x32xf32>
    %83 = vector.extract_strided_slice %68 {offsets = [0, 2, 1, 0], sizes = [2, 8, 8, 32], strides = [1, 1, 1, 1]} : vector<2x10x10x32xf32> to vector<2x8x8x32xf32>
    %84 = vector.shape_cast %83 : vector<2x8x8x32xf32> to vector<128x32xf32>
    %85 = vector.extract_strided_slice %68 {offsets = [0, 2, 2, 0], sizes = [2, 8, 8, 32], strides = [1, 1, 1, 1]} : vector<2x10x10x32xf32> to vector<2x8x8x32xf32>
    %86 = vector.shape_cast %85 : vector<2x8x8x32xf32> to vector<128x32xf32>
    %87 = tpu.concatenate %70, %72, %74, %76, %78, %80, %82, %84, %86 in 1 : vector<128x32xf32>, vector<128x32xf32>, vector<128x32xf32>, vector<128x32xf32>, vector<128x32xf32>, vector<128x32xf32>, vector<128x32xf32>, vector<128x32xf32>, vector<128x32xf32> -> vector<128x288xf32>
    %cst_50 = arith.constant dense<0.000000e+00> : vector<128x8xf32>
    %88 = tpu.matmul %87, %65, %cst_50 {dimension_numbers = #tpu.dot_dimension_numbers<[1], [0], [0], [1], [0, 0, 1, 1], [], []>} : vector<128x288xf32>, vector<288x8xf32>, vector<128x8xf32> -> vector<128x8xf32>
    %89 = vector.broadcast %66 : vector<1x8xf32> to vector<128x8xf32>
    %90 = arith.addf %88, %89 : vector<128x8xf32>
    %c0_51 = arith.constant 0 : index
    %c0_52 = arith.constant 0 : index
    %c0_53 = arith.constant 0 : index
    %91 = vector.load %arg4[%c0_51, %c0_52, %c0_53] : memref<2x288x32xf32, #tpu.memory_space<vmem>>, vector<1x288x32xf32>
    %92 = vector.shape_cast %91 : vector<1x288x32xf32> to vector<288x32xf32>
    %c0_54 = arith.constant 0 : index
    %c0_55 = arith.constant 0 : index
    %c0_56 = arith.constant 0 : index
    %93 = vector.load %arg5[%c0_54, %c0_55, %c0_56] : memref<2x1x32xf32, #tpu.memory_space<vmem>>, vector<1x1x32xf32>
    %94 = vector.shape_cast %93 : vector<1x1x32xf32> to vector<1x32xf32>
    %c0_57 = arith.constant 0 : index
    %c1_58 = arith.constant 1 : index
    %c1_59 = arith.constant 1 : index
    %c0_60 = arith.constant 0 : index
    %95 = vector.load %arg11[%c0_57, %c1_58, %c1_59, %c0_60] : memref<2x10x10x32xf32, #tpu.memory_space<vmem>>, vector<2x8x8x32xf32>
    tpu.vector_store %arg11[%c0_57, %c1_58, %c1_59, %c0_60], %2 {strides = array<i32>} : memref<2x10x10x32xf32, #tpu.memory_space<vmem>>, vector<2x8x8x32xf32>,
    %c0_61 = arith.constant 0 : index
    %c0_62 = arith.constant 0 : index
    %c0_63 = arith.constant 0 : index
    %c0_64 = arith.constant 0 : index
    %96 = vector.load %arg11[%c0_61, %c0_62, %c0_63, %c0_64] : memref<2x10x10x32xf32, #tpu.memory_space<vmem>>, vector<2x10x10x32xf32>
    %97 = vector.extract_strided_slice %96 {offsets = [0, 0, 0, 0], sizes = [2, 8, 8, 32], strides = [1, 1, 1, 1]} : vector<2x10x10x32xf32> to vector<2x8x8x32xf32>
    %98 = vector.shape_cast %97 : vector<2x8x8x32xf32> to vector<128x32xf32>
    %99 = vector.extract_strided_slice %96 {offsets = [0, 0, 1, 0], sizes = [2, 8, 8, 32], strides = [1, 1, 1, 1]} : vector<2x10x10x32xf32> to vector<2x8x8x32xf32>
    %100 = vector.shape_cast %99 : vector<2x8x8x32xf32> to vector<128x32xf32>
    %101 = vector.extract_strided_slice %96 {offsets = [0, 0, 2, 0], sizes = [2, 8, 8, 32], strides = [1, 1, 1, 1]} : vector<2x10x10x32xf32> to vector<2x8x8x32xf32>
    %102 = vector.shape_cast %101 : vector<2x8x8x32xf32> to vector<128x32xf32>
    %103 = vector.extract_strided_slice %96 {offsets = [0, 1, 0, 0], sizes = [2, 8, 8, 32], strides = [1, 1, 1, 1]} : vector<2x10x10x32xf32> to vector<2x8x8x32xf32>
    %104 = vector.shape_cast %103 : vector<2x8x8x32xf32> to vector<128x32xf32>
    %105 = vector.extract_strided_slice %96 {offsets = [0, 1, 1, 0], sizes = [2, 8, 8, 32], strides = [1, 1, 1, 1]} : vector<2x10x10x32xf32> to vector<2x8x8x32xf32>
    %106 = vector.shape_cast %105 : vector<2x8x8x32xf32> to vector<128x32xf32>
    %107 = vector.extract_strided_slice %96 {offsets = [0, 1, 2, 0], sizes = [2, 8, 8, 32], strides = [1, 1, 1, 1]} : vector<2x10x10x32xf32> to vector<2x8x8x32xf32>
    %108 = vector.shape_cast %107 : vector<2x8x8x32xf32> to vector<128x32xf32>
    %109 = vector.extract_strided_slice %96 {offsets = [0, 2, 0, 0], sizes = [2, 8, 8, 32], strides = [1, 1, 1, 1]} : vector<2x10x10x32xf32> to vector<2x8x8x32xf32>
    %110 = vector.shape_cast %109 : vector<2x8x8x32xf32> to vector<128x32xf32>
    %111 = vector.extract_strided_slice %96 {offsets = [0, 2, 1, 0], sizes = [2, 8, 8, 32], strides = [1, 1, 1, 1]} : vector<2x10x10x32xf32> to vector<2x8x8x32xf32>
    %112 = vector.shape_cast %111 : vector<2x8x8x32xf32> to vector<128x32xf32>
    %113 = vector.extract_strided_slice %96 {offsets = [0, 2, 2, 0], sizes = [2, 8, 8, 32], strides = [1, 1, 1, 1]} : vector<2x10x10x32xf32> to vector<2x8x8x32xf32>
    %114 = vector.shape_cast %113 : vector<2x8x8x32xf32> to vector<128x32xf32>
    %115 = tpu.concatenate %98, %100, %102, %104, %106, %108, %110, %112, %114 in 1 : vector<128x32xf32>, vector<128x32xf32>, vector<128x32xf32>, vector<128x32xf32>, vector<128x32xf32>, vector<128x32xf32>, vector<128x32xf32>, vector<128x32xf32>, vector<128x32xf32> -> vector<128x288xf32>
    %cst_65 = arith.constant dense<0.000000e+00> : vector<128x32xf32>
    %116 = tpu.matmul %115, %92, %cst_65 {dimension_numbers = #tpu.dot_dimension_numbers<[1], [0], [0], [1], [0, 0, 1, 1], [], []>} : vector<128x288xf32>, vector<288x32xf32>, vector<128x32xf32> -> vector<128x32xf32>
    %117 = vector.broadcast %94 : vector<1x32xf32> to vector<128x32xf32>
    %118 = arith.addf %116, %117 : vector<128x32xf32>
    %cst_66 = arith.constant 0.000000e+00 : f32
    %119 = vector.broadcast %cst_66 : f32 to vector<128x32xf32>
    %120 = arith.maximumf %118, %119 : vector<128x32xf32>
    %121 = vector.shape_cast %120 : vector<128x32xf32> to vector<2x8x8x32xf32>
    %c1_67 = arith.constant 1 : index
    %c0_68 = arith.constant 0 : index
    %c0_69 = arith.constant 0 : index
    %122 = vector.load %arg4[%c1_67, %c0_68, %c0_69] : memref<2x288x32xf32, #tpu.memory_space<vmem>>, vector<1x288x32xf32>
    %123 = vector.shape_cast %122 : vector<1x288x32xf32> to vector<288x32xf32>
    %c1_70 = arith.constant 1 : index
    %c0_71 = arith.constant 0 : index
    %c0_72 = arith.constant 0 : index
    %124 = vector.load %arg5[%c1_70, %c0_71, %c0_72] : memref<2x1x32xf32, #tpu.memory_space<vmem>>, vector<1x1x32xf32>
    %125 = vector.shape_cast %124 : vector<1x1x32xf32> to vector<1x32xf32>
    %c0_73 = arith.constant 0 : index
    %c1_74 = arith.constant 1 : index
    %c1_75 = arith.constant 1 : index
    %c0_76 = arith.constant 0 : index
    %126 = vector.load %arg11[%c0_73, %c1_74, %c1_75, %c0_76] : memref<2x10x10x32xf32, #tpu.memory_space<vmem>>, vector<2x8x8x32xf32>
    tpu.vector_store %arg11[%c0_73, %c1_74, %c1_75, %c0_76], %121 {strides = array<i32>} : memref<2x10x10x32xf32, #tpu.memory_space<vmem>>, vector<2x8x8x32xf32>,
    %c0_77 = arith.constant 0 : index
    %c0_78 = arith.constant 0 : index
    %c0_79 = arith.constant 0 : index
    %c0_80 = arith.constant 0 : index
    %127 = vector.load %arg11[%c0_77, %c0_78, %c0_79, %c0_80] : memref<2x10x10x32xf32, #tpu.memory_space<vmem>>, vector<2x10x10x32xf32>
    %128 = vector.extract_strided_slice %127 {offsets = [0, 0, 0, 0], sizes = [2, 8, 8, 32], strides = [1, 1, 1, 1]} : vector<2x10x10x32xf32> to vector<2x8x8x32xf32>
    %129 = vector.shape_cast %128 : vector<2x8x8x32xf32> to vector<128x32xf32>
    %130 = vector.extract_strided_slice %127 {offsets = [0, 0, 1, 0], sizes = [2, 8, 8, 32], strides = [1, 1, 1, 1]} : vector<2x10x10x32xf32> to vector<2x8x8x32xf32>
    %131 = vector.shape_cast %130 : vector<2x8x8x32xf32> to vector<128x32xf32>
    %132 = vector.extract_strided_slice %127 {offsets = [0, 0, 2, 0], sizes = [2, 8, 8, 32], strides = [1, 1, 1, 1]} : vector<2x10x10x32xf32> to vector<2x8x8x32xf32>
    %133 = vector.shape_cast %132 : vector<2x8x8x32xf32> to vector<128x32xf32>
    %134 = vector.extract_strided_slice %127 {offsets = [0, 1, 0, 0], sizes = [2, 8, 8, 32], strides = [1, 1, 1, 1]} : vector<2x10x10x32xf32> to vector<2x8x8x32xf32>
    %135 = vector.shape_cast %134 : vector<2x8x8x32xf32> to vector<128x32xf32>
    %136 = vector.extract_strided_slice %127 {offsets = [0, 1, 1, 0], sizes = [2, 8, 8, 32], strides = [1, 1, 1, 1]} : vector<2x10x10x32xf32> to vector<2x8x8x32xf32>
    %137 = vector.shape_cast %136 : vector<2x8x8x32xf32> to vector<128x32xf32>
    %138 = vector.extract_strided_slice %127 {offsets = [0, 1, 2, 0], sizes = [2, 8, 8, 32], strides = [1, 1, 1, 1]} : vector<2x10x10x32xf32> to vector<2x8x8x32xf32>
    %139 = vector.shape_cast %138 : vector<2x8x8x32xf32> to vector<128x32xf32>
    %140 = vector.extract_strided_slice %127 {offsets = [0, 2, 0, 0], sizes = [2, 8, 8, 32], strides = [1, 1, 1, 1]} : vector<2x10x10x32xf32> to vector<2x8x8x32xf32>
    %141 = vector.shape_cast %140 : vector<2x8x8x32xf32> to vector<128x32xf32>
    %142 = vector.extract_strided_slice %127 {offsets = [0, 2, 1, 0], sizes = [2, 8, 8, 32], strides = [1, 1, 1, 1]} : vector<2x10x10x32xf32> to vector<2x8x8x32xf32>
    %143 = vector.shape_cast %142 : vector<2x8x8x32xf32> to vector<128x32xf32>
    %144 = vector.extract_strided_slice %127 {offsets = [0, 2, 2, 0], sizes = [2, 8, 8, 32], strides = [1, 1, 1, 1]} : vector<2x10x10x32xf32> to vector<2x8x8x32xf32>
    %145 = vector.shape_cast %144 : vector<2x8x8x32xf32> to vector<128x32xf32>
    %146 = tpu.concatenate %129, %131, %133, %135, %137, %139, %141, %143, %145 in 1 : vector<128x32xf32>, vector<128x32xf32>, vector<128x32xf32>, vector<128x32xf32>, vector<128x32xf32>, vector<128x32xf32>, vector<128x32xf32>, vector<128x32xf32>, vector<128x32xf32> -> vector<128x288xf32>
    %cst_81 = arith.constant dense<0.000000e+00> : vector<128x32xf32>
    %147 = tpu.matmul %146, %123, %cst_81 {dimension_numbers = #tpu.dot_dimension_numbers<[1], [0], [0], [1], [0, 0, 1, 1], [], []>} : vector<128x288xf32>, vector<288x32xf32>, vector<128x32xf32> -> vector<128x32xf32>
    %148 = vector.broadcast %125 : vector<1x32xf32> to vector<128x32xf32>
    %149 = arith.addf %147, %148 : vector<128x32xf32>
    %cst_82 = arith.constant 0.000000e+00 : f32
    %150 = vector.broadcast %cst_82 : f32 to vector<128x32xf32>
    %151 = arith.maximumf %149, %150 : vector<128x32xf32>
    %152 = vector.shape_cast %151 : vector<128x32xf32> to vector<2x8x8x32xf32>
    %c0_83 = arith.constant 0 : index
    %c0_84 = arith.constant 0 : index
    %153 = vector.load %arg8[%c0_83, %c0_84] : memref<288x10xf32, #tpu.memory_space<vmem>>, vector<288x10xf32>
    %c0_85 = arith.constant 0 : index
    %c0_86 = arith.constant 0 : index
    %154 = vector.load %arg9[%c0_85, %c0_86] : memref<1x10xf32, #tpu.memory_space<vmem>>, vector<1x10xf32>
    %c0_87 = arith.constant 0 : index
    %c1_88 = arith.constant 1 : index
    %c1_89 = arith.constant 1 : index
    %c0_90 = arith.constant 0 : index
    %155 = vector.load %arg11[%c0_87, %c1_88, %c1_89, %c0_90] : memref<2x10x10x32xf32, #tpu.memory_space<vmem>>, vector<2x8x8x32xf32>
    tpu.vector_store %arg11[%c0_87, %c1_88, %c1_89, %c0_90], %152 {strides = array<i32>} : memref<2x10x10x32xf32, #tpu.memory_space<vmem>>, vector<2x8x8x32xf32>,
    %c0_91 = arith.constant 0 : index
    %c0_92 = arith.constant 0 : index
    %c0_93 = arith.constant 0 : index
    %c0_94 = arith.constant 0 : index
    %156 = vector.load %arg11[%c0_91, %c0_92, %c0_93, %c0_94] : memref<2x10x10x32xf32, #tpu.memory_space<vmem>>, vector<2x10x10x32xf32>
    %157 = vector.extract_strided_slice %156 {offsets = [0, 0, 0, 0], sizes = [2, 8, 8, 32], strides = [1, 1, 1, 1]} : vector<2x10x10x32xf32> to vector<2x8x8x32xf32>
    %158 = vector.shape_cast %157 : vector<2x8x8x32xf32> to vector<128x32xf32>
    %159 = vector.extract_strided_slice %156 {offsets = [0, 0, 1, 0], sizes = [2, 8, 8, 32], strides = [1, 1, 1, 1]} : vector<2x10x10x32xf32> to vector<2x8x8x32xf32>
    %160 = vector.shape_cast %159 : vector<2x8x8x32xf32> to vector<128x32xf32>
    %161 = vector.extract_strided_slice %156 {offsets = [0, 0, 2, 0], sizes = [2, 8, 8, 32], strides = [1, 1, 1, 1]} : vector<2x10x10x32xf32> to vector<2x8x8x32xf32>
    %162 = vector.shape_cast %161 : vector<2x8x8x32xf32> to vector<128x32xf32>
    %163 = vector.extract_strided_slice %156 {offsets = [0, 1, 0, 0], sizes = [2, 8, 8, 32], strides = [1, 1, 1, 1]} : vector<2x10x10x32xf32> to vector<2x8x8x32xf32>
    %164 = vector.shape_cast %163 : vector<2x8x8x32xf32> to vector<128x32xf32>
    %165 = vector.extract_strided_slice %156 {offsets = [0, 1, 1, 0], sizes = [2, 8, 8, 32], strides = [1, 1, 1, 1]} : vector<2x10x10x32xf32> to vector<2x8x8x32xf32>
    %166 = vector.shape_cast %165 : vector<2x8x8x32xf32> to vector<128x32xf32>
    %167 = vector.extract_strided_slice %156 {offsets = [0, 1, 2, 0], sizes = [2, 8, 8, 32], strides = [1, 1, 1, 1]} : vector<2x10x10x32xf32> to vector<2x8x8x32xf32>
    %168 = vector.shape_cast %167 : vector<2x8x8x32xf32> to vector<128x32xf32>
    %169 = vector.extract_strided_slice %156 {offsets = [0, 2, 0, 0], sizes = [2, 8, 8, 32], strides = [1, 1, 1, 1]} : vector<2x10x10x32xf32> to vector<2x8x8x32xf32>
    %170 = vector.shape_cast %169 : vector<2x8x8x32xf32> to vector<128x32xf32>
    %171 = vector.extract_strided_slice %156 {offsets = [0, 2, 1, 0], sizes = [2, 8, 8, 32], strides = [1, 1, 1, 1]} : vector<2x10x10x32xf32> to vector<2x8x8x32xf32>
    %172 = vector.shape_cast %171 : vector<2x8x8x32xf32> to vector<128x32xf32>
    %173 = vector.extract_strided_slice %156 {offsets = [0, 2, 2, 0], sizes = [2, 8, 8, 32], strides = [1, 1, 1, 1]} : vector<2x10x10x32xf32> to vector<2x8x8x32xf32>
    %174 = vector.shape_cast %173 : vector<2x8x8x32xf32> to vector<128x32xf32>
    %175 = tpu.concatenate %158, %160, %162, %164, %166, %168, %170, %172, %174 in 1 : vector<128x32xf32>, vector<128x32xf32>, vector<128x32xf32>, vector<128x32xf32>, vector<128x32xf32>, vector<128x32xf32>, vector<128x32xf32>, vector<128x32xf32>, vector<128x32xf32> -> vector<128x288xf32>
    %cst_95 = arith.constant dense<0.000000e+00> : vector<128x10xf32>
    %176 = tpu.matmul %175, %153, %cst_95 {dimension_numbers = #tpu.dot_dimension_numbers<[1], [0], [0], [1], [0, 0, 1, 1], [], []>} : vector<128x288xf32>, vector<288x10xf32>, vector<128x10xf32> -> vector<128x10xf32>
    %177 = vector.broadcast %154 : vector<1x10xf32> to vector<128x10xf32>
    %178 = arith.addf %176, %177 : vector<128x10xf32>
    %179 = vector.extract_strided_slice %178 {offsets = [0, 0], sizes = [128, 8], strides = [1, 1]} : vector<128x10xf32> to vector<128x8xf32>
    %180 = vector.extract_strided_slice %178 {offsets = [0, 8], sizes = [128, 2], strides = [1, 1]} : vector<128x10xf32> to vector<128x2xf32>
    %181 = vector.extract_strided_slice %180 {offsets = [0, 0], sizes = [128, 1], strides = [1, 1]} : vector<128x2xf32> to vector<128x1xf32>
    %182 = vector.shape_cast %181 : vector<128x1xf32> to vector<128x1xf32>
    %183 = vector.broadcast %182 : vector<128x1xf32> to vector<128x4xf32>
    %184 = vector.extract_strided_slice %180 {offsets = [0, 1], sizes = [128, 1], strides = [1, 1]} : vector<128x2xf32> to vector<128x1xf32>
    %185 = vector.shape_cast %184 : vector<128x1xf32> to vector<128x1xf32>
    %186 = vector.broadcast %185 : vector<128x1xf32> to vector<128x4xf32>
    %187 = tpu.concatenate %183, %186 in 1 : vector<128x4xf32>, vector<128x4xf32> -> vector<128x8xf32>
    %188 = arith.addf %90, %187 : vector<128x8xf32>
    %189 = math.exp %90 : vector<128x8xf32>
    %cst_96 = arith.constant 1.000000e+08 : f32
    %190 = vector.broadcast %cst_96 : f32 to vector<128x8xf32>
    %191 = arith.minimumf %189, %190 : vector<128x8xf32>
    %cst_97 = arith.constant 1.000000e+00 : f32
    %192 = vector.broadcast %cst_97 : f32 to vector<128x8xf32>
    %193 = arith.addf %192, %191 : vector<128x8xf32>
    %194 = math.exp %187 : vector<128x8xf32>
    %cst_98 = arith.constant 1.000000e+08 : f32
    %195 = vector.broadcast %cst_98 : f32 to vector<128x8xf32>
    %196 = arith.minimumf %194, %195 : vector<128x8xf32>
    %197 = arith.addf %193, %196 : vector<128x8xf32>
    %198 = math.log %197 : vector<128x8xf32>
    %199 = arith.subf %188, %198 : vector<128x8xf32>
    %200 = tpu.concatenate %199, %179 in 1 : vector<128x8xf32>, vector<128x8xf32> -> vector<128x16xf32>
    %c0_99 = arith.constant 0 : index
    %c0_100 = arith.constant 0 : index
    %201 = vector.load %arg10[%c0_99, %c0_100] : memref<128x16xf32, #tpu.memory_space<vmem>>, vector<128x16xf32>
    tpu.vector_store %arg10[%c0_99, %c0_100], %200 {strides = array<i32>} : memref<128x16xf32, #tpu.memory_space<vmem>>, vector<128x16xf32>,
    return
  }
  func.func @transform_0(%arg0: i32) -> (i32, i32, i32, i32) {
    %c0_i32 = arith.constant 0 : i32
    %c0_i32_0 = arith.constant 0 : i32
    %c0_i32_1 = arith.constant 0 : i32
    %c0_i32_2 = arith.constant 0 : i32
    %c0_i32_3 = arith.constant 0 : i32
    return %c0_i32, %c0_i32_0, %c0_i32_1, %c0_i32_2 : i32, i32, i32, i32
  }
  func.func @transform_1(%arg0: i32) -> (i32, i32, i32) {
    %c0_i32 = arith.constant 0 : i32
    %c0_i32_0 = arith.constant 0 : i32
    %c0_i32_1 = arith.constant 0 : i32
    %c0_i32_2 = arith.constant 0 : i32
    return %c0_i32, %c0_i32_0, %c0_i32_1 : i32, i32, i32
  }
  func.func @transform_2(%arg0: i32) -> (i32, i32, i32) {
    %c0_i32 = arith.constant 0 : i32
    %c0_i32_0 = arith.constant 0 : i32
    %c0_i32_1 = arith.constant 0 : i32
    %c0_i32_2 = arith.constant 0 : i32
    return %c0_i32, %c0_i32_0, %c0_i32_1 : i32, i32, i32
  }
  func.func @transform_3(%arg0: i32) -> (i32, i32, i32) {
    %c0_i32 = arith.constant 0 : i32
    %c0_i32_0 = arith.constant 0 : i32
    %c0_i32_1 = arith.constant 0 : i32
    %c0_i32_2 = arith.constant 0 : i32
    return %c0_i32, %c0_i32_0, %c0_i32_1 : i32, i32, i32
  }
  func.func @transform_4(%arg0: i32) -> (i32, i32, i32) {
    %c0_i32 = arith.constant 0 : i32
    %c0_i32_0 = arith.constant 0 : i32
    %c0_i32_1 = arith.constant 0 : i32
    %c0_i32_2 = arith.constant 0 : i32
    return %c0_i32, %c0_i32_0, %c0_i32_1 : i32, i32, i32
  }
  func.func @transform_5(%arg0: i32) -> (i32, i32) {
    %c0_i32 = arith.constant 0 : i32
    %c0_i32_0 = arith.constant 0 : i32
    %c0_i32_1 = arith.constant 0 : i32
    return %c0_i32, %c0_i32_0 : i32, i32
  }
  func.func @transform_6(%arg0: i32) -> (i32, i32) {
    %c0_i32 = arith.constant 0 : i32
    %c0_i32_0 = arith.constant 0 : i32
    %c0_i32_1 = arith.constant 0 : i32
    return %c0_i32, %c0_i32_0 : i32, i32
  }
  func.func @transform_7(%arg0: i32) -> (i32, i32) {
    %c0_i32 = arith.constant 0 : i32
    %c0_i32_0 = arith.constant 0 : i32
    %c0_i32_1 = arith.constant 0 : i32
    return %c0_i32, %c0_i32_0 : i32, i32
  }
  func.func @transform_8(%arg0: i32) -> (i32, i32) {
    %c0_i32 = arith.constant 0 : i32
    %c0_i32_0 = arith.constant 0 : i32
    %c0_i32_1 = arith.constant 0 : i32
    return %c0_i32, %c0_i32_0 : i32, i32
  }
  func.func @transform_9(%arg0: i32) -> (i32, i32) {
    %c0_i32 = arith.constant 0 : i32
    %c0_i32_0 = arith.constant 0 : i32
    %c0_i32_1 = arith.constant 0 : i32
    return %c0_i32, %c0_i32_0 : i32, i32
  }
}

</mosaic_0001>

<bundles_post_ra>
// kernel: decoder_forward.1
= control target key start
LH: loop header
LB: loop body
LE: loop exit
PB: predicated region body
PF: predicated region fallthrough
CT: control target
= control target key end

     0   :  { %vm32_vm0 = vcmask 261120   ;;  %vm34_vm1 = vcmask 254976   ;;  %v9302_v0 = vmov 0.0   ;;  %vm265_vm2 = vcmask 1045504   ;;  %s9304_s28 = smov 96   ;;  %s9305_s29 = smov 32   ;;  %s13873_s0 = inlined_call_operand.vmem [shape: f32[2,8,8,32], index: 0, kind: input, shape index: {}]   ;;  %s13874_s1 = inlined_call_operand.vmem [shape: f32[2,288,32], index: 1, kind: input, shape index: {}]   ;;  %s13875_s2 = inlined_call_operand.vmem [shape: f32[2,1,32], index: 2, kind: input, shape index: {}]   ;;  %s13876_s5 = inlined_call_operand.vmem [shape: f32[288,8], index: 5, kind: input, shape index: {}]   ;;  %s13877_s3 = inlined_call_operand.vmem [shape: f32[2,288,32], index: 3, kind: input, shape index: {}]   ;;  %s13878_s6 = inlined_call_operand.vmem [shape: f32[1,8], index: 6, kind: input, shape index: {}]   ;;  %s13879_s4 = inlined_call_operand.vmem [shape: f32[2,1,32], index: 4, kind: input, shape index: {}]   ;;  %s13880_s7 = inlined_call_operand.vmem [shape: f32[288,10], index: 7, kind: input, shape index: {}]   ;;  %s13881_s8 = inlined_call_operand.vmem [shape: f32[1,10], index: 8, kind: input, shape index: {}]   ;;  %s13882_s9 = inlined_call_operand.vmem [shape: f32[128,16], index: 9, kind: output, shape index: {}]  }
   0x1   :  { %33 = vst.msk [vmem:[#allocation2] sm:$0xff] %vm32_vm0, %v9302_v0  ;;  %38 = vst.msk [vmem:[#allocation2 + $0x20] sm:$0xff] %vm32_vm0, %v9302_v0  ;;  %v9366_v1 = vld [vmem:[%s13873_s0 + $0x8] sm:$0xff]  ;;  %v9407_v2 = vld [vmem:[%s13873_s0] sm:$0xff]  ;;  %vm216_vm3 = vcmask 1046528   ;;  %vm666_vm4 = vcmask 523264  }
   0x2   :  { %35 = vst.msk [vmem:[#allocation2 + $0x8] sm:$0x3] %vm34_vm1, %v9302_v0  ;;  %39 = vst.msk [vmem:[#allocation2 + $0x28] sm:$0x3] %vm34_vm1, %v9302_v0  ;;  %v9412_v3 = vld [vmem:[%s13873_s0 + $0x10] sm:$0xff]  ;;  %v9423_v4 = vld [vmem:[%s13873_s0 + $0x18] sm:$0xff] }
   0x3   :  { %36 = vst.msk [vmem:[#allocation2 + $0x10] sm:$0xff] %vm32_vm0, %v9302_v0  ;;  %40 = vst.msk [vmem:[#allocation2 + $0x30] sm:$0xff] %vm32_vm0, %v9302_v0  ;;  %v9428_v5 = vld [vmem:[%s13873_s0 + $0x20] sm:$0xff]  ;;  %v9433_v6 = vld [vmem:[%s13873_s0 + $0x28] sm:$0xff]  ;;  %vm683_vm5 = vcmask 785408   ;;  %vm6193_vm6 = vcmask 31744  }
   0x4   :  { %37 = vst.msk [vmem:[#allocation2 + $0x18] sm:$0x3] %vm34_vm1, %v9302_v0  ;;  %41 = vst.msk [vmem:[#allocation2 + $0x38] sm:$0x3] %vm34_vm1, %v9302_v0  ;;  %v9444_v7 = vld [vmem:[%s13873_s0 + $0x30] sm:$0xff]  ;;  %v9449_v8 = vld [vmem:[%s13873_s0 + $0x38] sm:$0xff] }
   0x5   :  { %42 = vst.msk [vmem:[#allocation2 + $0x40] sm:$0xff] %vm32_vm0, %v9302_v0  ;;  %44 = vst.msk [vmem:[#allocation2 + $0x50] sm:$0xff] %vm32_vm0, %v9302_v0  ;;  %v9454_v9 = vld [vmem:[%s13873_s0 + $0x40] sm:$0xff]  ;;  %v9465_v10 = vld [vmem:[%s13873_s0 + $0x48] sm:$0xff]  ;;  %vm6450_vm7 = vcmask 64512   ;;  %vm6467_vm8 = vcmask 130048  }
   0x6   :  { %43 = vst.msk [vmem:[#allocation2 + $0x48] sm:$0x3] %vm34_vm1, %v9302_v0  ;;  %45 = vst.msk [vmem:[#allocation2 + $0x58] sm:$0x3] %vm34_vm1, %v9302_v0  ;;  %v9470_v11 = vld [vmem:[%s13873_s0 + $0x50] sm:$0xff]  ;;  %v9475_v12 = vld [vmem:[%s13873_s0 + $0x58] sm:$0xff] }
   0x7   :  { %46 = vst.msk [vmem:[#allocation2 + $0x60] sm:$0xff] %vm32_vm0, %v9302_v0  ;;  %48 = vst.msk [vmem:[#allocation2 + $0x70] sm:$0xff] %vm32_vm0, %v9302_v0  ;;  %v9486_v13 = vld [vmem:[%s13873_s0 + $0x60] sm:$0xff]  ;;  %v9491_v14 = vld [vmem:[%s13873_s0 + $0x68] sm:$0xff] }
   0x8   :  { %47 = vst.msk [vmem:[#allocation2 + $0x68] sm:$0x3] %vm34_vm1, %v9302_v0  ;;  %49 = vst.msk [vmem:[#allocation2 + $0x78] sm:$0x3] %vm34_vm1, %v9302_v0  ;;  %v9496_v15 = vld [vmem:[%s13873_s0 + $0x70] sm:$0xff]  ;;  %v9507_v16 = vld [vmem:[%s13873_s0 + $0x78] sm:$0xff] }
   0x9   :  { %50 = vst.msk [vmem:[#allocation2 + $0x80] sm:$0xff] %vm32_vm0, %v9302_v0  ;;  %52 = vst.msk [vmem:[#allocation2 + $0x90] sm:$0xff] %vm32_vm0, %v9302_v0  ;;  %v106_v17 = vld [vmem:[%s13874_s1 + $0x80] sm:$0xff]  ;;  %v107_v18 = vld [vmem:[%s13874_s1 + $0x88] sm:$0xff]  ;;  %s9303_s0 = smov 64  }
   0xa   :  { %51 = vst.msk [vmem:[#allocation2 + $0x88] sm:$0x3] %vm34_vm1, %v9302_v0  ;;  %53 = vst.msk [vmem:[#allocation2 + $0x98] sm:$0x3] %vm34_vm1, %v9302_v0  ;;  %v7456_v19 = vpack.c.bf16 %v107_v18, %v106_v17  ;;  %v90_v20 = vld [vmem:[%s13874_s1] sm:$0xff]  ;;  %v91_v21 = vld [vmem:[%s13874_s1 + $0x8] sm:$0xff] }
   0xb   :  { %54 = vst.msk [vmem:[#allocation2 + $0xa0] sm:$0xff] %vm32_vm0, %v9302_v0  ;;  %56 = vst.msk [vmem:[#allocation2 + $0xb0] sm:$0xff] %vm32_vm0, %v9302_v0  ;;  %v9523_v22 = vld [vmem:[#allocation2] sm:$0xff]  ;;  %v145_v23 = vld [vmem:[#allocation2 + $0x8] sm:$0x3]  ;;  %v7458_v24 = vpack.c.bf16 %v91_v21, %v90_v20 }
   0xc   :  { %55 = vst.msk [vmem:[#allocation2 + $0xa8] sm:$0x3] %vm34_vm1, %v9302_v0  ;;  %57 = vst.msk [vmem:[#allocation2 + $0xb8] sm:$0x3] %vm34_vm1, %v9302_v0  ;;  %v218_v26 = vrot.slane %v145_v23, 1  ;;  %v266_v27 = vrot.slane %v9523_v22, 2  ;;  %7457 = vmatprep.subr.bf16.mxu0 %v7456_v19 }
   0xd   :  { %58 = vst.msk [vmem:[#allocation2 + $0xc0] sm:$0xff] %vm32_vm0, %v9302_v0  ;;  %60 = vst.msk [vmem:[#allocation2 + $0xd0] sm:$0xff] %vm32_vm0, %v9302_v0  ;;  %v267_v28 = vrot.slane %v145_v23, 2  ;;  %v217_v30 = vrot.slane %v9523_v22, 1  ;;  %7459 = vmatpush3.bf16.msra.mxu0 %v7458_v24 }
   0xe   :  { %59 = vst.msk [vmem:[#allocation2 + $0xc8] sm:$0x3] %vm34_vm1, %v9302_v0  ;;  %61 = vst.msk [vmem:[#allocation2 + $0xd8] sm:$0x3] %vm34_vm1, %v9302_v0 }
   0xf   :  { %62 = vst.msk [vmem:[#allocation2 + $0xe0] sm:$0xff] %vm32_vm0, %v9302_v0  ;;  %64 = vst.msk [vmem:[#allocation2 + $0xf0] sm:$0xff] %vm32_vm0, %v9302_v0  ;;  %v268_v35 = vsel %vm265_vm2, %v266_v27, %v267_v28  ;;  %v219_v37 = vsel %vm216_vm3, %v217_v30, %v218_v26 }
  0x10   :  { %63 = vst.msk [vmem:[#allocation2 + $0xe8] sm:$0x3] %vm34_vm1, %v9302_v0  ;;  %65 = vst.msk [vmem:[#allocation2 + $0xf8] sm:$0x3] %vm34_vm1, %v9302_v0 }
  0x11   :  { %66 = vst.msk [vmem:[#allocation2 + $0x100] sm:$0xff] %vm32_vm0, %v9302_v0  ;;  %68 = vst.msk [vmem:[#allocation2 + $0x110] sm:$0xff] %vm32_vm0, %v9302_v0 }
  0x12   :  { %67 = vst.msk [vmem:[#allocation2 + $0x108] sm:$0x3] %vm34_vm1, %v9302_v0  ;;  %69 = vst.msk [vmem:[#allocation2 + $0x118] sm:$0x3] %vm34_vm1, %v9302_v0 }
  0x13   :  { %70 = vst.msk [vmem:[#allocation2 + $0x120] sm:$0xff] %vm32_vm0, %v9302_v0  ;;  %72 = vst.msk [vmem:[#allocation2 + $0x130] sm:$0xff] %vm32_vm0, %v9302_v0 }
  0x14   :  { %71 = vst.msk [vmem:[#allocation2 + $0x128] sm:$0x3] %vm34_vm1, %v9302_v0  ;;  %73 = vst.msk [vmem:[#allocation2 + $0x138] sm:$0x3] %vm34_vm1, %v9302_v0 }
  0x15   :  { %129 = vst.msk [vmem:[#allocation2 + $0x21] sm:$0xff] %vm32_vm0, %v9366_v1  ;;  %128 = vst.msk [vmem:[#allocation2 + $0x11] sm:$0xff] %vm32_vm0, %v9407_v2 }
  0x16   :  { %130 = vst.msk [vmem:[#allocation2 + $0x31] sm:$0xff] %vm32_vm0, %v9412_v3  ;;  %131 = vst.msk [vmem:[#allocation2 + $0x41] sm:$0xff] %vm32_vm0, %v9423_v4 }
  0x17   :  { %132 = vst.msk [vmem:[#allocation2 + $0x51] sm:$0xff] %vm32_vm0, %v9428_v5  ;;  %133 = vst.msk [vmem:[#allocation2 + $0x61] sm:$0xff] %vm32_vm0, %v9433_v6 }
  0x18   :  { %13932 = vst [vmem:[#allocation3_spill] sm:$0xff] %v9449_v8  ;;  %13933 = vst [vmem:[#allocation4_spill] sm:$0xff] %v9454_v9 }
  0x19   :  { %134 = vst.msk [vmem:[#allocation2 + $0x71] sm:$0xff] %vm32_vm0, %v9444_v7  ;;  %135 = vst.msk [vmem:[#allocation2 + $0x81] sm:$0xff] %vm32_vm0, %v9449_v8 }
  0x1a   :  { %136 = vst.msk [vmem:[#allocation2 + $0xb1] sm:$0xff] %vm32_vm0, %v9454_v9  ;;  %13934 = vst [vmem:[#allocation5_spill] sm:$0xff] %v9465_v10 }
  0x1b   :  { %13935 = vst [vmem:[#allocation6_spill] sm:$0xff] %v9470_v11  ;;  %13936 = vst [vmem:[#allocation7_spill] sm:$0xff] %v9475_v12 }
  0x1c   :  { %137 = vst.msk [vmem:[#allocation2 + $0xc1] sm:$0xff] %vm32_vm0, %v9465_v10  ;;  %138 = vst.msk [vmem:[#allocation2 + $0xd1] sm:$0xff] %vm32_vm0, %v9470_v11  ;;  %v9525_v25 = vld [vmem:[#allocation2 + $0x20] sm:$0xff]  ;;  %v9528_v29 = vld [vmem:[#allocation2 + $0x10] sm:$0xff] }
  0x1d   :  { %139 = vst.msk [vmem:[#allocation2 + $0xe1] sm:$0xff] %vm32_vm0, %v9475_v12  ;;  %13937 = vst [vmem:[#allocation8_spill] sm:$0xff] %v9486_v13  ;;  %v149_v31 = vld [vmem:[#allocation2 + $0x28] sm:$0x3]  ;;  %v223_v32 = vrot.slane %v9525_v25, 1  ;;  %v269_v34 = vrot.slane %v9528_v29, 2  ;;  %v7719_v40 = vpack.i.bf16 %v268_v35, %v9525_v25 }
  0x1e   :  { %13938 = vst [vmem:[#allocation9_spill] sm:$0xff] %v9491_v14  ;;  %13939 = vst [vmem:[#allocation10_spill] sm:$0xff] %v9496_v15  ;;  %v147_v33 = vld [vmem:[#allocation2 + $0x18] sm:$0x3]  ;;  %v224_v36 = vrot.slane %v149_v31, 1  ;;  %v9535_v39 = vld [vmem:[#allocation2 + $0x30] sm:$0xff] }
  0x1f   :  { %140 = vst.msk [vmem:[#allocation2 + $0xf1] sm:$0xff] %vm32_vm0, %v9486_v13  ;;  %141 = vst.msk [vmem:[#allocation2 + $0x101] sm:$0xff] %vm32_vm0, %v9491_v14  ;;  %v270_v38 = vrot.slane %v147_v33, 2  ;;  %v220_v41 = vrot.slane %v9528_v29, 1  ;;  %v221_v42 = vrot.slane %v147_v33, 1  ;;  %v272_v43 = vrot.slane %v9525_v25, 2  ;;  %7720 = vrot.lane.b32.xlu0 %v7719_v40, %s9303_s0 }
  0x20   :  { %142 = vst.msk [vmem:[#allocation2 + $0x111] sm:$0xff] %vm32_vm0, %v9496_v15  ;;  %13940 = vst [vmem:[#allocation11_spill] sm:$0xff] %v9507_v16  ;;  %v151_v44 = vld [vmem:[#allocation2 + $0x38] sm:$0x3]  ;;  %v9541_v45 = vsel %vm216_vm3, %v223_v32, %v224_v36  ;;  %v273_v47 = vrot.slane %v149_v31, 2  ;;  %v226_v48 = vrot.slane %v9535_v39, 1 }
  0x21   :  { %143 = vst.msk [vmem:[#allocation2 + $0x121] sm:$0xff] %vm32_vm0, %v9507_v16  ;;  %v271_v46 = vsel %vm265_vm2, %v269_v34, %v270_v38  ;;  %v7729_v49 = vpack.i.bf16 %v9528_v29, %v9541_v45  ;;  %v9549_v51 = vsel %vm216_vm3, %v220_v41, %v221_v42  ;;  %v227_v53 = vrot.slane %v151_v44, 1  ;;  %v9555_v57 = vld [vmem:[#allocation2 + $0x40] sm:$0xff]  ;;  %v153_v58 = vld [vmem:[#allocation2 + $0x48] sm:$0x3]  ;;  %v9574_v20 = vld [vmem:[#allocation2 + $0x50] sm:$0xff] }
  0x22   :  { %v7724_v50 = vpack.i.bf16 %v219_v37, %v271_v46  ;;  %v274_v52 = vsel %vm265_vm2, %v272_v43, %v273_v47  ;;  %v275_v54 = vrot.slane %v9535_v39, 2  ;;  %v276_v55 = vrot.slane %v151_v44, 2  ;;  %v155_v21 = vld [vmem:[#allocation2 + $0x58] sm:$0x3]  ;;  %v9592_v34 = vld [vmem:[#allocation2 + $0x60] sm:$0xff]  ;;  %v9611_v47 = vld [vmem:[#allocation2 + $0x70] sm:$0xff] }
  0x23   :  { %7730 = vrot.lane.b32.xlu1 %v7729_v49, %s9304_s28  ;;  %v7734_v56 = vpack.i.bf16 %v9549_v51, %v274_v52  ;;  %7272 = vmatprep.mubr.msk.f32.mxu1 %vm32_vm0, %v274_v52  ;;  %v9559_v59 = vsel %vm216_vm3, %v226_v48, %v227_v53  ;;  %v7739_v60 = vpack.i.bf16 %v271_v46, %v9535_v39  ;;  %v229_v62 = vrot.slane %v9555_v57, 1  ;;  %v157_v35 = vld [vmem:[#allocation2 + $0x68] sm:$0x3]  ;;  %v159_v48 = vld [vmem:[#allocation2 + $0x78] sm:$0x3] }
  0x24   :  { %7725 = vrot.lane.b32.xlu0 %v7724_v50, %s9305_s29  ;;  %v9564_v61 = vsel %vm265_vm2, %v275_v54, %v276_v55  ;;  %v230_v63 = vrot.slane %v153_v58, 1  ;;  %v7744_v0 = vpack.i.bf16 %v9525_v25, %v9559_v59  ;;  %v278_v17 = vrot.slane %v9555_v57, 2  ;;  %v125_v16 = vld [vmem:[%s13874_s1 + $0x118] sm:$0xff]  ;;  %v169_v14 = vld [vmem:[#allocation2 + $0xc8] sm:$0x3] }
  0x25   :  { %v279_v18 = vrot.slane %v153_v58, 2  ;;  %v7749_v19 = vpack.i.bf16 %v9541_v45, %v9564_v61  ;;  %v7754_v24 = vpack.i.bf16 %v274_v52, %v9555_v57  ;;  %v232_v27 = vrot.slane %v9574_v20, 1 }
  0x26   :  { %v9577_v23 = vsel %vm216_vm3, %v229_v62, %v230_v63  ;;  %v233_v28 = vrot.slane %v155_v21, 1  ;;  %v281_v31 = vrot.slane %v9574_v20, 2  ;;  %v282_v32 = vrot.slane %v155_v21, 2  ;;  %v9630_v62 = vld [vmem:[#allocation2 + $0x80] sm:$0xff]  ;;  %v161_v63 = vld [vmem:[#allocation2 + $0x88] sm:$0x3] }
  0x27   :  { %7735 = vrot.lane.b32.xlu1 %v7734_v56, %s9305_s29  ;;  %v9582_v26 = vsel %vm265_vm2, %v278_v17, %v279_v18  ;;  %v7759_v30 = vpack.i.bf16 %v9535_v39, %v9577_v23  ;;  %v7769_v37 = vpack.i.bf16 %v9564_v61, %v9574_v20  ;;  %v235_v40 = vrot.slane %v9592_v34, 1 }
  0x28   :  { %7740 = vrot.lane.b32.xlu0 %v7739_v60, %s9303_s0  ;;  %v7764_v33 = vpack.i.bf16 %v9559_v59, %v9582_v26  ;;  %v9595_v36 = vsel %vm216_vm3, %v232_v27, %v233_v28  ;;  %v9601_v38 = vsel %vm265_vm2, %v281_v31, %v282_v32  ;;  %v236_v41 = vrot.slane %v157_v35, 1  ;;  %v9645_v27 = vld [vmem:[#allocation2 + $0x90] sm:$0xff]  ;;  %v109_v32 = vld [vmem:[%s13874_s1 + $0x98] sm:$0xff] }
  0x29   :  { %v7774_v42 = vpack.i.bf16 %v9555_v57, %v9595_v36  ;;  %v284_v43 = vrot.slane %v9592_v34, 2  ;;  %v285_v44 = vrot.slane %v157_v35, 2  ;;  %v7779_v46 = vpack.i.bf16 %v9577_v23, %v9601_v38  ;;  %v108_v28 = vld [vmem:[%s13874_s1 + $0x90] sm:$0xff]  ;;  %v93_v35 = vld [vmem:[%s13874_s1 + $0x18] sm:$0xff] }
  0x2a   :  { %v9614_v49 = vsel %vm216_vm3, %v235_v40, %v236_v41  ;;  %v7784_v50 = vpack.i.bf16 %v9582_v26, %v9592_v34  ;;  %v238_v53 = vrot.slane %v9611_v47, 1  ;;  %v239_v54 = vrot.slane %v159_v48, 1  ;;  %v9663_v40 = vld [vmem:[#allocation2 + $0x98] sm:$0x3]  ;;  %v110_v41 = vld [vmem:[%s13874_s1 + $0xa0] sm:$0xff] }
  0x2b   :  { %7745 = vrot.lane.b32.xlu1 %v7744_v0, %s9304_s28  ;;  %v9620_v52 = vsel %vm265_vm2, %v284_v43, %v285_v44  ;;  %v7789_v55 = vpack.i.bf16 %v9574_v20, %v9614_v49  ;;  %v287_v56 = vrot.slane %v9611_v47, 2  ;;  %v288_v58 = vrot.slane %v159_v48, 2  ;;  %v9674_v44 = vld [vmem:[#allocation2 + $0xa0] sm:$0xff]  ;;  %v9676_v48 = vld [vmem:[#allocation2 + $0xb0] sm:$0xff] }
  0x2c   :  { %7750 = vrot.lane.b32.xlu0 %v7749_v19, %s9305_s29  ;;  %v7794_v60 = vpack.i.bf16 %v9595_v36, %v9620_v52  ;;  %v9633_v0 = vsel %vm216_vm3, %v238_v53, %v239_v54  ;;  %v7799_v17 = vpack.i.bf16 %v9601_v38, %v9611_v47  ;;  %v318_v19 = vrot.slane %v9630_v62, 1  ;;  %v9681_v53 = vld [vmem:[#allocation2 + $0xb8] sm:$0x3] }
  0x2d   :  { %v9639_v18 = vsel %vm265_vm2, %v287_v56, %v288_v58  ;;  %v319_v21 = vrot.slane %v161_v63, 1  ;;  %v341_v31 = vrot.slane %v161_v63, 2  ;;  %v7460_v54 = vpack.c.bf16 %v109_v32, %v108_v28  ;;  %v94_v56 = vld [vmem:[%s13874_s1 + $0x20] sm:$0xff]  ;;  %v95_v58 = vld [vmem:[%s13874_s1 + $0x28] sm:$0xff] }
  0x2e   :  { %v350_v63 = vrot.slane %v9645_v27, 1  ;;  %v122_v32 = vld [vmem:[%s13874_s1 + $0x100] sm:$0xff]  ;;  %v290_v12 = vrot.slane %v9674_v44, 2  ;;  %v248_v9 = vrot.slane %v169_v14, 1 }
  0x2f   :  { %7755 = vrot.lane.b32.xlu1 %v7754_v24, %s9303_s0  ;;  %v7804_v24 = vpack.i.bf16 %v9592_v34, %v9633_v0  ;;  %v9672_v43 = vsel %vm216_vm3, %v318_v19, %v319_v21  ;;  %v112_v21 = vld [vmem:[%s13874_s1 + $0xb0] sm:$0xff]  ;;  %7461 = vmatprep.subr.bf16.mxu0 %v7460_v54 }
  0x30   :  { %7760 = vrot.lane.b32.xlu0 %v7759_v30, %s9304_s28  ;;  %v340_v30 = vrot.slane %v9630_v62, 2  ;;  %v7819_v28 = vpack.i.bf16 %v9611_v47, %v9672_v43  ;;  %v124_v54 = vld [vmem:[%s13874_s1 + $0x110] sm:$0xff] }
  0x33   :  { %7765 = vrot.lane.b32.xlu1 %v7764_v33, %s9305_s29  ;;  %v92_v33 = vld [vmem:[%s13874_s1 + $0x10] sm:$0xff] }
  0x34   :  { %7770 = vrot.lane.b32.xlu0 %v7769_v37, %s9303_s0  ;;  %v7809_v37 = vpack.i.bf16 %v9614_v49, %v9639_v18 }
  0x37   :  { %7775 = vrot.lane.b32.xlu1 %v7774_v42, %s9304_s28  ;;  %v111_v42 = vld [vmem:[%s13874_s1 + $0xa8] sm:$0xff] }
  0x38   :  { %7780 = vrot.lane.b32.xlu0 %v7779_v46, %s9305_s29  ;;  %v165_v46 = vld [vmem:[#allocation2 + $0xa8] sm:$0x3]  ;;  %v7464_v19 = vpack.c.bf16 %v111_v42, %v110_v41  ;;  %v294_v41 = vrot.slane %v9681_v53, 2  ;;  %v7466_v42 = vpack.c.bf16 %v95_v58, %v94_v56  ;;  %v97_v56 = vld [vmem:[%s13874_s1 + $0x38] sm:$0xff] }
  0x39   :  { %v291_v11 = vrot.slane %v165_v46, 2 }
  0x3b   :  { %7785 = vrot.lane.b32.xlu1 %v7784_v50, %s9303_s0  ;;  %v7814_v50 = vpack.i.bf16 %v9620_v52, %v9630_v62 }
  0x3c   :  { %7790 = vrot.lane.b32.xlu0 %v7789_v55, %s9304_s28  ;;  %v7462_v55 = vpack.c.bf16 %v93_v35, %v92_v33  ;;  %v123_v33 = vld [vmem:[%s13874_s1 + $0x108] sm:$0xff]  ;;  %v293_v35 = vrot.slane %v9676_v48, 2 }
  0x3e   :  { %7463 = vmatpush3.bf16.msra.mxu0 %v7462_v55  ;;  %v96_v55 = vld [vmem:[%s13874_s1 + $0x30] sm:$0xff] }
  0x3f   :  { %7795 = vrot.lane.b32.xlu1 %v7794_v60, %s9305_s29  ;;  %v9690_v60 = vsel %vm265_vm2, %v340_v30, %v341_v31  ;;  %v241_v30 = vrot.slane %v9674_v44, 1  ;;  %v242_v31 = vrot.slane %v165_v46, 1  ;;  %7465 = vmatprep.subr.bf16.mxu0 %v7464_v19  ;;  %v115_v19 = vld [vmem:[%s13874_s1 + $0xc8] sm:$0xff]  ;;  %v7470_v8 = vpack.c.bf16 %v97_v56, %v96_v55  ;;  %v100_v56 = vld [vmem:[%s13874_s1 + $0x50] sm:$0xff] }
  0x40   :  { %7800 = vrot.lane.b32.xlu0 %v7799_v17, %s9303_s0  ;;  %v351_v17 = vrot.slane %v9663_v40, 1  ;;  %v7824_v15 = vpack.i.bf16 %v9633_v0, %v9690_v60 }
  0x41   :  { %v243_v10 = vsel %vm216_vm3, %v241_v30, %v242_v31  ;;  %v99_v30 = vld [vmem:[%s13874_s1 + $0x48] sm:$0xff]  ;;  %v292_v31 = vsel %vm265_vm2, %v290_v12, %v291_v11  ;;  %v171_v11 = vld [vmem:[#allocation2 + $0xd8] sm:$0x3] }
  0x42   :  { %v352_v58 = vsel %vm216_vm3, %v350_v63, %v351_v17  ;;  %v7492_v63 = vpack.c.bf16 %v125_v16, %v124_v54  ;;  %v9742_v17 = vsel %vm265_vm2, %v293_v35, %v294_v41  ;;  %7467 = vmatpush3.bf16.msra.mxu0 %v7466_v42  ;;  %v98_v16 = vld [vmem:[%s13874_s1 + $0x40] sm:$0xff]  ;;  %v245_v35 = vrot.slane %v9681_v53, 1  ;;  %v9765_v54 = vld [vmem:[#allocation2 + $0xd0] sm:$0xff] }
  0x43   :  { %7805 = vrot.lane.b32.xlu1 %v7804_v24, %s9304_s28  ;;  %v113_v24 = vld [vmem:[%s13874_s1 + $0xb8] sm:$0xff]  ;;  %v297_v41 = vrot.slane %v169_v14, 2  ;;  %v7839_v42 = vpack.i.bf16 %v243_v10, %v9742_v17  ;;  %v7474_v14 = vpack.c.bf16 %v99_v30, %v98_v16  ;;  %v173_v30 = vld [vmem:[#allocation2 + $0xe8] sm:$0x3] }
  0x44   :  { %7810 = vrot.lane.b32.xlu0 %v7809_v37, %s9305_s29  ;;  %v9712_v37 = vld [vmem:[#allocation2 + $0xc0] sm:$0xff]  ;;  %v7468_v13 = vpack.c.bf16 %v113_v24, %v112_v21  ;;  %v7488_v21 = vpack.c.bf16 %v123_v33, %v122_v32  ;;  %v7829_v24 = vpack.i.bf16 %v9639_v18, %v9645_v27  ;;  %v7834_v32 = vpack.i.bf16 %v9630_v62, %v352_v58  ;;  %v117_v62 = vld [vmem:[%s13874_s1 + $0xd8] sm:$0xff] }
  0x45   :  { %v247_v46 = vrot.slane %v9712_v37, 1  ;;  %v7844_v53 = vpack.i.bf16 %v292_v31, %v9712_v37  ;;  %v101_v10 = vld [vmem:[%s13874_s1 + $0x58] sm:$0xff]  ;;  %v102_v31 = vld [vmem:[%s13874_s1 + $0x60] sm:$0xff] }
  0x46   :  { %7489 = vmatprep.subr.bf16.mxu1 %v7488_v21  ;;  %7469 = vmatprep.subr.bf16.mxu0 %v7468_v13  ;;  %v116_v13 = vld [vmem:[%s13874_s1 + $0xd0] sm:$0xff] }
  0x47   :  { %7815 = vrot.lane.b32.xlu1 %v7814_v50, %s9303_s0  ;;  %v114_v50 = vld [vmem:[%s13874_s1 + $0xc0] sm:$0xff]  ;;  %7491 = vmatpush3.bf16.msra.mxu1 %v7488_v21  ;;  %v9768_v12 = vsel %vm216_vm3, %v247_v46, %v248_v9  ;;  %v7476_v55 = vpack.c.bf16 %v117_v62, %v116_v13  ;;  %v250_v9 = vrot.slane %v9765_v54, 1  ;;  %v119_v21 = vld [vmem:[%s13874_s1 + $0xe8] sm:$0xff]  ;;  %v299_v46 = vrot.slane %v9765_v54, 2  ;;  %v121_v13 = vld [vmem:[%s13874_s1 + $0xf8] sm:$0xff] }
  0x48   :  { %7820 = vrot.lane.b32.xlu0 %v7819_v28, %s9304_s28  ;;  %v244_v28 = vrot.slane %v9676_v48, 1  ;;  %v7472_v33 = vpack.c.bf16 %v115_v19, %v114_v50  ;;  %7493 = vmatprep.subr.bf16.mxu1 %v7492_v63  ;;  %v251_v50 = vrot.slane %v171_v11, 1  ;;  %v118_v19 = vld [vmem:[%s13874_s1 + $0xe0] sm:$0xff]  ;;  %v7859_v62 = vpack.i.bf16 %v9742_v17, %v9765_v54  ;;  %v104_v17 = vld [vmem:[%s13874_s1 + $0x70] sm:$0xff] }
  0x49   :  { %7471 = vmatpush3.bf16.msra.mxu0 %v7470_v8 }
  0x4a   :  { %7473 = vmatprep.subr.bf16.mxu0 %v7472_v33  ;;  %v9779_v58 = vsel %vm216_vm3, %v244_v28, %v245_v35  ;;  %v9795_v28 = vld [vmem:[#allocation2 + $0xe0] sm:$0xff]  ;;  %v7478_v33 = vpack.c.bf16 %v101_v10, %v100_v56  ;;  %v103_v35 = vld [vmem:[%s13874_s1 + $0x68] sm:$0xff]  ;;  %v303_v10 = vrot.slane %v173_v30, 2 }
  0x4b   :  { %7825 = vrot.lane.b32.xlu1 %v7824_v15, %s9305_s29  ;;  %v296_v15 = vrot.slane %v9712_v37, 2  ;;  %7495 = vmatpush3.bf16.msra.mxu1 %v7492_v63  ;;  %v7480_v63 = vpack.c.bf16 %v119_v21, %v118_v19  ;;  %v302_v56 = vrot.slane %v9795_v28, 2  ;;  %v175_v19 = vld [vmem:[#allocation2 + $0xf8] sm:$0x3]  ;;  %v356_v21 = vrot.slane %v9645_v27, 2 }
  0x4c   :  { %7830 = vrot.lane.b32.xlu0 %v7829_v24, %s9303_s0  ;;  %v7849_v24 = vpack.i.bf16 %v9676_v48, %v9768_v12 }
  0x4d   :  { %v9782_v8 = vsel %vm265_vm2, %v296_v15, %v297_v41  ;;  %7475 = vmatpush3.bf16.msra.mxu0 %v7474_v14  ;;  %v9807_v15 = vsel %vm216_vm3, %v250_v9, %v251_v50  ;;  %v120_v41 = vld [vmem:[%s13874_s1 + $0xf0] sm:$0xff]  ;;  %v254_v14 = vrot.slane %v173_v30, 1 }
  0x4e   :  { %v7854_v16 = vpack.i.bf16 %v9779_v58, %v9782_v8  ;;  %7477 = vmatprep.subr.bf16.mxu0 %v7476_v55  ;;  %7273 = vmatmul.mubr.msk.f32.vlgmr.msra.gmra.mrb[0].mxu1 %vm32_vm0, %v9564_v61  ;;  %v7864_v61 = vpack.i.bf16 %v9712_v37, %v9807_v15  ;;  %v7484_v55 = vpack.c.bf16 %v121_v13, %v120_v41  ;;  %v9838_v50 = vld [vmem:[#allocation2 + $0xf0] sm:$0xff] }
  0x4f   :  { %7835 = vrot.lane.b32.xlu1 %v7834_v32, %s9304_s28  ;;  %v300_v32 = vrot.slane %v171_v11, 2  ;;  %7275 = vmatprep.mubr.msk.f32.mxu1 %vm32_vm0, %v9582_v26  ;;  %v253_v11 = vrot.slane %v9795_v28, 1  ;;  %v105_v26 = vld [vmem:[%s13874_s1 + $0x78] sm:$0xff]  ;;  %v305_v30 = vrot.slane %v9838_v50, 2 }
  0x50   :  { %7840 = vrot.lane.b32.xlu0 %v7839_v42, %s9305_s29 }
  0x51   :  { %v301_v42 = vsel %vm265_vm2, %v299_v46, %v300_v32  ;;  %7479 = vmatpush3.bf16.msra.mxu0 %v7478_v33  ;;  %v9845_v46 = vsel %vm216_vm3, %v253_v11, %v254_v14  ;;  %v7486_v32 = vpack.c.bf16 %v105_v26, %v104_v17  ;;  %v304_v33 = vsel %vm265_vm2, %v302_v56, %v303_v10  ;;  %v179_v17 = vld [vmem:[#allocation2 + $0x118] sm:$0x3] }
  0x52   :  { %7481 = vmatprep.subr.bf16.mxu0 %v7480_v63  ;;  %7276 = vmatmul.mubr.msk.f32.gmra.mrb[2].mxu1 %vm32_vm0, %v9601_v38  ;;  %v7869_v9 = vpack.i.bf16 %v9768_v12, %v301_v42  ;;  %v7874_v38 = vpack.i.bf16 %v9782_v8, %v9795_v28  ;;  %v7879_v27 = vpack.i.bf16 %v9765_v54, %v9845_v46  ;;  %v306_v63 = vrot.slane %v175_v19, 2 }
  0x53   :  { %7845 = vrot.lane.b32.xlu1 %v7844_v53, %s9303_s0  ;;  %v7482_v53 = vpack.c.bf16 %v103_v35, %v102_v31  ;;  %7278 = vmatprep.mubr.msk.f32.mxu1 %vm32_vm0, %v9620_v52  ;;  %v257_v52 = vrot.slane %v175_v19, 1  ;;  %v7884_v31 = vpack.i.bf16 %v9807_v15, %v304_v33  ;;  %v9863_v35 = vld [vmem:[#allocation2 + $0x100] sm:$0xff]  ;;  %v312_v19 = vrot.slane %v179_v17, 2 }
  0x54   :  { %7850 = vrot.lane.b32.xlu0 %v7849_v24, %s9304_s28  ;;  %v357_v24 = vrot.slane %v9663_v40, 2  ;;  %v307_v13 = vsel %vm265_vm2, %v305_v30, %v306_v63  ;;  %v7904_v56 = vpack.i.bf16 %v304_v33, %v9863_v35 }
  0x55   :  { %7483 = vmatpush3.bf16.msra.mxu0 %v7482_v53  ;;  %v308_v53 = vrot.slane %v9863_v35, 2 }
  0x56   :  { %7485 = vmatprep.subr.bf16.mxu0 %v7484_v55  ;;  %7279 = vmatmul.mubr.msk.f32.gmra.mrb[4].mxu1 %vm32_vm0, %v9639_v18  ;;  %v358_v40 = vsel %vm265_vm2, %v356_v21, %v357_v24  ;;  %v177_v18 = vld [vmem:[#allocation2 + $0x108] sm:$0x3]  ;;  %v9879_v55 = vld [vmem:[#allocation2 + $0x110] sm:$0xff] }
  0x57   :  { %7855 = vrot.lane.b32.xlu1 %v7854_v16, %s9305_s29  ;;  %v256_v16 = vrot.slane %v9838_v50, 1  ;;  %7281 = vmatprep.mubr.msk.f32.mxu1 %vm32_vm0, %v9690_v60  ;;  %v7889_v60 = vpack.i.bf16 %v301_v42, %v9838_v50  ;;  %v260_v11 = vrot.slane %v177_v18, 1  ;;  %v262_v10 = vrot.slane %v9879_v55, 1  ;;  %v181_v21 = vld [vmem:[#allocation2 + $0x128] sm:$0x3] }
  0x58   :  { %7860 = vrot.lane.b32.xlu0 %v7859_v62, %s9303_s0  ;;  %v259_v62 = vrot.slane %v9863_v35, 1  ;;  %v7919_v63 = vpack.i.bf16 %v307_v13, %v9879_v55 }
  0x59   :  { %7487 = vmatpush3.bf16.msra.mxu0 %v7486_v32  ;;  %v9866_v41 = vsel %vm216_vm3, %v256_v16, %v257_v52  ;;  %v263_v32 = vrot.slane %v179_v17, 1  ;;  %v344_v16 = vrot.slane %v181_v21, 2 }
  0x5a   :  { %7282 = vmatmul.mubr.msk.f32.gmra.mrb[6].mxu1 %vm32_vm0, %v358_v40  ;;  %v7894_v14 = vpack.i.bf16 %v9795_v28, %v9866_v41  ;;  %v9886_v26 = vsel %vm216_vm3, %v259_v62, %v260_v11  ;;  %v182_v11 = vld [vmem:[#allocation2 + $0x130] sm:$0xff] }
  0x5b   :  { %7865 = vrot.lane.b32.xlu1 %v7864_v61, %s9304_s28  ;;  %7284 = vmatprep.mubr.msk.f32.mxu1 %vm32_vm0, %v9782_v8  ;;  %v309_v61 = vrot.slane %v177_v18, 2  ;;  %v7899_v8 = vpack.i.bf16 %v9845_v46, %v307_v13  ;;  %v7909_v52 = vpack.i.bf16 %v9838_v50, %v9886_v26  ;;  %v9902_v40 = vsel %vm216_vm3, %v262_v10, %v263_v32 }
  0x5c   :  { %7870 = vrot.lane.b32.xlu0 %v7869_v9, %s9305_s29  ;;  %v311_v9 = vrot.slane %v9879_v55, 2  ;;  %v322_v18 = vrot.slane %v181_v21, 1  ;;  %v353_v17 = vrot.slane %v182_v11, 1 }
  0x5d   :  { %v310_v24 = vsel %vm265_vm2, %v308_v53, %v309_v61  ;;  %v359_v61 = vrot.slane %v182_v11, 2 }
  0x5e   :  { %7285 = vmatmul.mubr.msk.f32.gmra.mrb[8].mxu1 %vm32_vm0, %v301_v42  ;;  %v180_v42 = vld [vmem:[#allocation2 + $0x120] sm:$0xff] }
  0x5f   :  { %7875 = vrot.lane.b32.xlu1 %v7874_v38, %s9303_s0  ;;  %7287 = vmatprep.mubr.msk.f32.mxu1 %vm32_vm0, %v304_v33  ;;  %v343_v38 = vrot.slane %v180_v42, 2  ;;  %v7914_v33 = vpack.i.bf16 %v9866_v41, %v310_v24 }
  0x60   :  { %7880 = vrot.lane.b32.xlu0 %v7879_v27, %s9304_s28  ;;  %v313_v27 = vsel %vm265_vm2, %v311_v9, %v312_v19 }
  0x61   :  { %v345_v30 = vsel %vm265_vm2, %v343_v38, %v344_v16  ;;  %v7929_v62 = vpack.i.bf16 %v9886_v26, %v313_v27 }
  0x62   :  { %7288 = vmatmul.mubr.msk.f32.gmra.mrb[10].mxu1 %vm32_vm0, %v307_v13  ;;  %v7944_v19 = vpack.i.bf16 %v9902_v40, %v345_v30 }
  0x63   :  { %7885 = vrot.lane.b32.xlu1 %v7884_v31, %s9305_s29  ;;  %7290 = vmatprep.mubr.msk.f32.mxu1 %vm32_vm0, %v310_v24  ;;  %v321_v31 = vrot.slane %v180_v42, 1 }
  0x64   :  { %7890 = vrot.lane.b32.xlu0 %v7889_v60, %s9303_s0  ;;  %v7924_v60 = vpack.i.bf16 %v9863_v35, %v9902_v40 }
  0x65   :  { %v9915_v53 = vsel %vm216_vm3, %v321_v31, %v322_v18 }
  0x66   :  { %7291 = vmatmul.mubr.msk.f32.gmra.mrb[12].mxu1 %vm32_vm0, %v313_v27  ;;  %v7939_v9 = vpack.i.bf16 %v9879_v55, %v9915_v53 }
  0x67   :  { %7895 = vrot.lane.b32.xlu1 %v7894_v14, %s9304_s28  ;;  %7293 = vmatprep.mubr.msk.f32.mxu1 %vm32_vm0, %v345_v30  ;;  %v183_v14 = vld [vmem:[#allocation2 + $0x138] sm:$0x3] }
  0x68   :  { %7900 = vrot.lane.b32.xlu0 %v7899_v8, %s9305_s29  ;;  %v360_v13 = vrot.slane %v183_v14, 2  ;;  %v7934_v8 = vpack.i.bf16 %v310_v24, %v180_v42  ;;  %v7949_v24 = vpack.i.bf16 %v313_v27, %v182_v11 }
  0x6a   :  { %v361_v10 = vsel %vm265_vm2, %v359_v61, %v360_v13 }
  0x6b   :  { %7905 = vrot.lane.b32.xlu1 %v7904_v56, %s9303_s0  ;;  %v354_v56 = vrot.slane %v183_v14, 1  ;;  %7294 = vmatmul.mubr.msk.f32.gmra.mrb[14].mxu1 %vm32_vm0, %v361_v10 }
  0x6c   :  { %7910 = vrot.lane.b32.xlu0 %v7909_v52, %s9304_s28 }
  0x6d   :  { %v355_v21 = vsel %vm216_vm3, %v353_v17, %v354_v56 }
  0x6e   :  { %v7954_v32 = vpack.i.bf16 %v180_v42, %v355_v21 }
  0x6f   :  { %7915 = vrot.lane.b32.xlu1 %v7914_v33, %s9305_s29 }
  0x70   :  { %7920 = vrot.lane.b32.xlu0 %v7919_v63, %s9303_s0 }
  0x73   :  { %7925 = vrot.lane.b32.xlu1 %v7924_v60, %s9304_s28 }
  0x74   :  { %7930 = vrot.lane.b32.xlu0 %v7929_v62, %s9305_s29 }
  0x77   :  { %7935 = vrot.lane.b32.xlu1 %v7934_v8, %s9303_s0 }
  0x78   :  { %7940 = vrot.lane.b32.xlu0 %v7939_v9, %s9304_s28 }
  0x7b   :  { %7945 = vrot.lane.b32.xlu1 %v7944_v19, %s9305_s29 }
  0x7c   :  { %7950 = vrot.lane.b32.xlu0 %v7949_v24, %s9303_s0 }
  0x7f   :  { %7955 = vrot.lane.b32.xlu1 %v7954_v32, %s9304_s28 }
  0x91   :  { %v7721_v38 = vpop.permute.xlu0 %7720 }
  0x92   :  { %v7723_v30 = vunpack.i.h.bf16 %v7721_v38  ;;  %v7722_v31 = vunpack.i.l.bf16 %v7721_v38 }
  0x95   :  { %v7731_v16 = vpop.permute.xlu1 %7730 }
  0x96   :  { %v7726_v52 = vpop.permute.xlu0 %7725  ;;  %v7733_v18 = vunpack.i.h.bf16 %v7731_v16  ;;  %v7732_v60 = vunpack.i.l.bf16 %v7731_v16 }
  0x97   :  { %v7728_v33 = vunpack.i.h.bf16 %v7726_v52  ;;  %v7727_v63 = vunpack.i.l.bf16 %v7726_v52 }
  0x99   :  { %v7736_v62 = vpop.permute.xlu1 %7735  ;;  %v700_v42 = vsel %vm32_vm0, %v9549_v51, %v7727_v63  ;;  %v650_v14 = vsel %vm32_vm0, %v9523_v22, %v7728_v33 }
  0x9a   :  { %v7738_v27 = vunpack.i.h.bf16 %v7736_v62  ;;  %v7737_v11 = vunpack.i.l.bf16 %v7736_v62  ;;  %v7741_v61 = vpop.permute.xlu0 %7740  ;;  %v716_v13 = vsel %vm666_vm4, %v700_v42, %v7722_v31  ;;  %v667_v8 = vsel %vm666_vm4, %v650_v14, %v7723_v30 }
  0x9b   :  { %v7743_v17 = vunpack.i.h.bf16 %v7741_v61  ;;  %v7742_v56 = vunpack.i.l.bf16 %v7741_v61  ;;  %v732_v10 = vsel %vm683_vm5, %v716_v13, %v7732_v60  ;;  %v684_v9 = vsel %vm683_vm5, %v667_v8, %v7733_v18 }
  0x9c   :  { %850 = vmatprep.mubr.f32.mxu0 %v732_v10  ;;  %v701_v21 = vsel %vm32_vm0, %v9541_v45, %v7737_v11  ;;  %v651_v51 = vsel %vm32_vm0, %v9528_v29, %v7738_v27 }
  0x9d   :  { %v7746_v19 = vpop.permute.xlu1 %7745  ;;  %851 = vmatmul.mubr.f32.vlgmr.msra.gmra.mrb[0].mxu0 %v684_v9  ;;  %v717_v32 = vsel %vm666_vm4, %v701_v21, %v7742_v56  ;;  %v668_v38 = vsel %vm666_vm4, %v651_v51, %v7743_v17 }
  0x9e   :  { %v7748_v22 = vunpack.i.h.bf16 %v7746_v19  ;;  %v7747_v24 = vunpack.i.l.bf16 %v7746_v19  ;;  %v7751_v16 = vpop.permute.xlu0 %7750 }
  0x9f   :  { %v7753_v52 = vunpack.i.h.bf16 %v7751_v16  ;;  %v7752_v33 = vunpack.i.l.bf16 %v7751_v16 }
  0xa0   :  { %v733_v63 = vsel %vm683_vm5, %v717_v32, %v7747_v24  ;;  %v685_v31 = vsel %vm683_vm5, %v668_v38, %v7748_v22 }
  0xa1   :  { %v7756_v30 = vpop.permute.xlu1 %7755  ;;  %855 = vmatprep.mubr.f32.mxu0 %v733_v63  ;;  %v702_v29 = vsel %vm32_vm0, %v9559_v59, %v7752_v33  ;;  %v652_v60 = vsel %vm32_vm0, %v9525_v25, %v7753_v52 }
  0xa2   :  { %v7758_v45 = vunpack.i.h.bf16 %v7756_v30  ;;  %v7757_v18 = vunpack.i.l.bf16 %v7756_v30  ;;  %856 = vmatmul.mubr.f32.gmra.mrb[2].mxu0 %v685_v31  ;;  %v7761_v62 = vpop.permute.xlu0 %7760 }
  0xa3   :  { %v7763_v27 = vunpack.i.h.bf16 %v7761_v62  ;;  %v7762_v11 = vunpack.i.l.bf16 %v7761_v62 }
  0xa4   :  { %v718_v42 = vsel %vm666_vm4, %v702_v29, %v7757_v18  ;;  %v669_v14 = vsel %vm666_vm4, %v652_v60, %v7758_v45 }
  0xa5   :  { %v7766_v61 = vpop.permute.xlu1 %7765  ;;  %v734_v17 = vsel %vm683_vm5, %v718_v42, %v7762_v11  ;;  %v686_v56 = vsel %vm683_vm5, %v669_v14, %v7763_v27 }
  0xa6   :  { %v7768_v13 = vunpack.i.h.bf16 %v7766_v61  ;;  %v7767_v8 = vunpack.i.l.bf16 %v7766_v61  ;;  %v7771_v10 = vpop.permute.xlu0 %7770  ;;  %860 = vmatprep.mubr.f32.mxu0 %v734_v17 }
  0xa7   :  { %v7773_v59 = vunpack.i.h.bf16 %v7771_v10  ;;  %v7772_v9 = vunpack.i.l.bf16 %v7771_v10  ;;  %861 = vmatmul.mubr.f32.gmra.mrb[4].mxu0 %v686_v56 }
  0xa8   :  { %v703_v25 = vsel %vm32_vm0, %v9577_v23, %v7767_v8  ;;  %v653_v19 = vsel %vm32_vm0, %v9535_v39, %v7768_v13 }
  0xa9   :  { %v7776_v21 = vpop.permute.xlu1 %7775  ;;  %v719_v24 = vsel %vm666_vm4, %v703_v25, %v7772_v9  ;;  %v670_v32 = vsel %vm666_vm4, %v653_v19, %v7773_v59 }
  0xaa   :  { %v7778_v51 = vunpack.i.h.bf16 %v7776_v21  ;;  %v7777_v22 = vunpack.i.l.bf16 %v7776_v21  ;;  %v7781_v38 = vpop.permute.xlu0 %7780 }
  0xab   :  { %v7783_v16 = vunpack.i.h.bf16 %v7781_v38  ;;  %v7782_v52 = vunpack.i.l.bf16 %v7781_v38 }
  0xac   :  { %v735_v33 = vsel %vm683_vm5, %v719_v24, %v7777_v22  ;;  %v687_v63 = vsel %vm683_vm5, %v670_v32, %v7778_v51 }
  0xad   :  { %v7786_v30 = vpop.permute.xlu1 %7785  ;;  %865 = vmatprep.mubr.f32.mxu0 %v735_v33  ;;  %v704_v39 = vsel %vm32_vm0, %v9595_v36, %v7782_v52  ;;  %v654_v45 = vsel %vm32_vm0, %v9555_v57, %v7783_v16 }
  0xae   :  { %v7788_v23 = vunpack.i.h.bf16 %v7786_v30  ;;  %v7787_v31 = vunpack.i.l.bf16 %v7786_v30  ;;  %866 = vmatmul.mubr.f32.gmra.mrb[6].mxu0 %v687_v63  ;;  %v7791_v18 = vpop.permute.xlu0 %7790 }
  0xaf   :  { %v7793_v29 = vunpack.i.h.bf16 %v7791_v18  ;;  %v7792_v60 = vunpack.i.l.bf16 %v7791_v18 }
  0xb0   :  { %v720_v62 = vsel %vm666_vm4, %v704_v39, %v7787_v31  ;;  %v671_v27 = vsel %vm666_vm4, %v654_v45, %v7788_v23 }
  0xb1   :  { %v7796_v11 = vpop.permute.xlu1 %7795  ;;  %v736_v61 = vsel %vm683_vm5, %v720_v62, %v7792_v60  ;;  %v688_v13 = vsel %vm683_vm5, %v671_v27, %v7793_v29 }
  0xb2   :  { %v7798_v42 = vunpack.i.h.bf16 %v7796_v11  ;;  %v7797_v14 = vunpack.i.l.bf16 %v7796_v11  ;;  %v7801_v8 = vpop.permute.xlu0 %7800  ;;  %870 = vmatprep.mubr.f32.mxu0 %v736_v61 }
  0xb3   :  { %v7803_v36 = vunpack.i.h.bf16 %v7801_v8  ;;  %v7802_v17 = vunpack.i.l.bf16 %v7801_v8  ;;  %871 = vmatmul.mubr.f32.gmra.mrb[8].mxu0 %v688_v13 }
  0xb4   :  { %v705_v57 = vsel %vm32_vm0, %v9614_v49, %v7797_v14  ;;  %v655_v56 = vsel %vm32_vm0, %v9574_v20, %v7798_v42 }
  0xb5   :  { %v7806_v10 = vpop.permute.xlu1 %7805  ;;  %v721_v25 = vsel %vm666_vm4, %v705_v57, %v7802_v17  ;;  %v672_v19 = vsel %vm666_vm4, %v655_v56, %v7803_v36 }
  0xb6   :  { %v7808_v59 = vunpack.i.h.bf16 %v7806_v10  ;;  %v7807_v9 = vunpack.i.l.bf16 %v7806_v10  ;;  %v7811_v21 = vpop.permute.xlu0 %7810 }
  0xb7   :  { %v7813_v51 = vunpack.i.h.bf16 %v7811_v21  ;;  %v7812_v22 = vunpack.i.l.bf16 %v7811_v21 }
  0xb8   :  { %v737_v24 = vsel %vm683_vm5, %v721_v25, %v7807_v9  ;;  %v689_v32 = vsel %vm683_vm5, %v672_v19, %v7808_v59 }
  0xb9   :  { %v7816_v38 = vpop.permute.xlu1 %7815  ;;  %875 = vmatprep.mubr.f32.mxu0 %v737_v24  ;;  %v706_v20 = vsel %vm32_vm0, %v9633_v0, %v7812_v22  ;;  %v656_v52 = vsel %vm32_vm0, %v9592_v34, %v7813_v51 }
  0xba   :  { %v7818_v49 = vunpack.i.h.bf16 %v7816_v38  ;;  %v7817_v16 = vunpack.i.l.bf16 %v7816_v38  ;;  %876 = vmatmul.mubr.f32.gmra.mrb[10].mxu0 %v689_v32  ;;  %v7821_v33 = vpop.permute.xlu0 %7820 }
  0xbb   :  { %v7823_v63 = vunpack.i.h.bf16 %v7821_v33  ;;  %v7822_v30 = vunpack.i.l.bf16 %v7821_v33 }
  0xbc   :  { %v722_v23 = vsel %vm666_vm4, %v706_v20, %v7817_v16  ;;  %v673_v31 = vsel %vm666_vm4, %v656_v52, %v7818_v49 }
  0xbd   :  { %v7826_v39 = vpop.permute.xlu1 %7825  ;;  %v738_v29 = vsel %vm683_vm5, %v722_v23, %v7822_v30  ;;  %v690_v60 = vsel %vm683_vm5, %v673_v31, %v7823_v63 }
  0xbe   :  { %v7828_v45 = vunpack.i.h.bf16 %v7826_v39  ;;  %v7827_v18 = vunpack.i.l.bf16 %v7826_v39  ;;  %v7831_v62 = vpop.permute.xlu0 %7830  ;;  %880 = vmatprep.mubr.f32.mxu0 %v738_v29 }
  0xbf   :  { %v7833_v0 = vunpack.i.h.bf16 %v7831_v62  ;;  %v7832_v27 = vunpack.i.l.bf16 %v7831_v62  ;;  %881 = vmatmul.mubr.f32.gmra.mrb[12].mxu0 %v690_v60 }
  0xc0   :  { %v707_v34 = vsel %vm32_vm0, %v9672_v43, %v7827_v18  ;;  %v657_v11 = vsel %vm32_vm0, %v9611_v47, %v7828_v45 }
  0xc1   :  { %v7836_v42 = vpop.permute.xlu1 %7835  ;;  %v723_v13 = vsel %vm666_vm4, %v707_v34, %v7832_v27  ;;  %v674_v8 = vsel %vm666_vm4, %v657_v11, %v7833_v0 }
  0xc2   :  { %v7838_v14 = vunpack.i.h.bf16 %v7836_v42  ;;  %v7837_v61 = vunpack.i.l.bf16 %v7836_v42  ;;  %v7841_v36 = vpop.permute.xlu0 %7840 }
  0xc3   :  { %v7843_v17 = vunpack.i.h.bf16 %v7841_v36  ;;  %v7842_v57 = vunpack.i.l.bf16 %v7841_v36 }
  0xc4   :  { %v739_v56 = vsel %vm683_vm5, %v723_v13, %v7837_v61  ;;  %v691_v10 = vsel %vm683_vm5, %v674_v8, %v7838_v14 }
  0xc5   :  { %885 = vmatprep.mubr.f32.mxu0 %v739_v56  ;;  %v7846_v59 = vpop.permute.xlu1 %7845  ;;  %v708_v47 = vsel %vm32_vm0, %v9779_v58, %v7842_v57  ;;  %v658_v25 = vsel %vm32_vm0, %v9674_v44, %v7843_v17 }
  0xc6   :  { %v7848_v43 = vunpack.i.h.bf16 %v7846_v59  ;;  %v7847_v9 = vunpack.i.l.bf16 %v7846_v59  ;;  %886 = vmatmul.mubr.f32.gmra.mrb[14].mxu0 %v691_v10  ;;  %v7851_v19 = vpop.permute.xlu0 %7850 }
  0xc7   :  { %v7853_v21 = vunpack.i.h.bf16 %v7851_v19  ;;  %v7852_v51 = vunpack.i.l.bf16 %v7851_v19 }
  0xc8   :  { %v724_v22 = vsel %vm666_vm4, %v708_v47, %v7847_v9  ;;  %v675_v24 = vsel %vm666_vm4, %v658_v25, %v7848_v43 }
  0xc9   :  { %v7856_v32 = vpop.permute.xlu1 %7855  ;;  %v740_v16 = vsel %vm683_vm5, %v724_v22, %v7852_v51  ;;  %v692_v20 = vsel %vm683_vm5, %v675_v24, %v7853_v21 }
  0xca   :  { %v7858_v38 = vunpack.i.h.bf16 %v7856_v32  ;;  %v7857_v49 = vunpack.i.l.bf16 %v7856_v32  ;;  %v7861_v52 = vpop.permute.xlu0 %7860  ;;  %890 = vmatprep.mubr.f32.mxu0 %v740_v16 }
  0xcb   :  { %v7863_v58 = vunpack.i.h.bf16 %v7861_v52  ;;  %v7862_v33 = vunpack.i.l.bf16 %v7861_v52  ;;  %891 = vmatmul.mubr.f32.gmra.mrb[16].mxu0 %v692_v20 }
  0xcc   :  { %v709_v44 = vsel %vm32_vm0, %v9768_v12, %v7857_v49  ;;  %v659_v63 = vsel %vm32_vm0, %v9676_v48, %v7858_v38 }
  0xcd   :  { %v7866_v30 = vpop.permute.xlu1 %7865  ;;  %v725_v39 = vsel %vm666_vm4, %v709_v44, %v7862_v33  ;;  %v676_v45 = vsel %vm666_vm4, %v659_v63, %v7863_v58 }
  0xce   :  { %v7868_v23 = vunpack.i.h.bf16 %v7866_v30  ;;  %v7867_v31 = vunpack.i.l.bf16 %v7866_v30  ;;  %v7871_v18 = vpop.permute.xlu0 %7870 }
  0xcf   :  { %v7873_v29 = vunpack.i.h.bf16 %v7871_v18  ;;  %v7872_v60 = vunpack.i.l.bf16 %v7871_v18 }
  0xd0   :  { %v741_v62 = vsel %vm683_vm5, %v725_v39, %v7867_v31  ;;  %v693_v0 = vsel %vm683_vm5, %v676_v45, %v7868_v23 }
  0xd1   :  { %v7876_v27 = vpop.permute.xlu1 %7875  ;;  %895 = vmatprep.mubr.f32.mxu0 %v741_v62  ;;  %v710_v48 = vsel %vm32_vm0, %v9807_v15, %v7872_v60  ;;  %v660_v11 = vsel %vm32_vm0, %v9712_v37, %v7873_v29 }
  0xd2   :  { %v7878_v12 = vunpack.i.h.bf16 %v7876_v27  ;;  %v7877_v34 = vunpack.i.l.bf16 %v7876_v27  ;;  %896 = vmatmul.mubr.f32.gmra.mrb[18].mxu0 %v693_v0  ;;  %v7881_v42 = vpop.permute.xlu0 %7880 }
  0xd3   :  { %v7883_v14 = vunpack.i.h.bf16 %v7881_v42  ;;  %v7882_v61 = vunpack.i.l.bf16 %v7881_v42 }
  0xd4   :  { %v726_v13 = vsel %vm666_vm4, %v710_v48, %v7877_v34  ;;  %v677_v8 = vsel %vm666_vm4, %v660_v11, %v7878_v12 }
  0xd5   :  { %v7886_v36 = vpop.permute.xlu1 %7885  ;;  %v742_v56 = vsel %vm683_vm5, %v726_v13, %v7882_v61  ;;  %v694_v10 = vsel %vm683_vm5, %v677_v8, %v7883_v14 }
  0xd6   :  { %v7888_v17 = vunpack.i.h.bf16 %v7886_v36  ;;  %v7887_v57 = vunpack.i.l.bf16 %v7886_v36  ;;  %v7891_v59 = vpop.permute.xlu0 %7890  ;;  %900 = vmatprep.mubr.f32.mxu0 %v742_v56 }
  0xd7   :  { %v7893_v15 = vunpack.i.h.bf16 %v7891_v59  ;;  %v7892_v43 = vunpack.i.l.bf16 %v7891_v59  ;;  %901 = vmatmul.mubr.f32.gmra.mrb[20].mxu0 %v694_v10 }
  0xd8   :  { %v711_v37 = vsel %vm32_vm0, %v9845_v46, %v7887_v57  ;;  %v661_v9 = vsel %vm32_vm0, %v9765_v54, %v7888_v17 }
  0xd9   :  { %v7896_v47 = vpop.permute.xlu1 %7895  ;;  %v727_v21 = vsel %vm666_vm4, %v711_v37, %v7892_v43  ;;  %v678_v51 = vsel %vm666_vm4, %v661_v9, %v7893_v15 }
  0xda   :  { %v7898_v25 = vunpack.i.h.bf16 %v7896_v47  ;;  %v7897_v19 = vunpack.i.l.bf16 %v7896_v47  ;;  %v7901_v22 = vpop.permute.xlu0 %7900 }
  0xdb   :  { %v7903_v24 = vunpack.i.h.bf16 %v7901_v22  ;;  %v7902_v32 = vunpack.i.l.bf16 %v7901_v22 }
  0xdc   :  { %v743_v38 = vsel %vm683_vm5, %v727_v21, %v7897_v19  ;;  %v695_v49 = vsel %vm683_vm5, %v678_v51, %v7898_v25 }
  0xdd   :  { %v7906_v16 = vpop.permute.xlu1 %7905  ;;  %905 = vmatprep.mubr.f32.mxu0 %v743_v38  ;;  %v712_v54 = vsel %vm32_vm0, %v9866_v41, %v7902_v32  ;;  %v662_v52 = vsel %vm32_vm0, %v9795_v28, %v7903_v24 }
  0xde   :  { %v7908_v46 = vunpack.i.h.bf16 %v7906_v16  ;;  %v7907_v20 = vunpack.i.l.bf16 %v7906_v16  ;;  %906 = vmatmul.mubr.f32.gmra.mrb[22].mxu0 %v695_v49  ;;  %v7911_v58 = vpop.permute.xlu0 %7910 }
  0xdf   :  { %v7913_v33 = vunpack.i.h.bf16 %v7911_v58  ;;  %v7912_v44 = vunpack.i.l.bf16 %v7911_v58 }
  0xe0   :  { %v728_v63 = vsel %vm666_vm4, %v712_v54, %v7907_v20  ;;  %v679_v30 = vsel %vm666_vm4, %v662_v52, %v7908_v46  ;;  %v6539_v54 = vld [vmem:[%s13874_s1 + $0x230] sm:$0xff]  ;;  %v6540_v52 = vld [vmem:[%s13874_s1 + $0x238] sm:$0xff] }
  0xe1   :  { %v7916_v23 = vpop.permute.xlu1 %7915  ;;  %v744_v45 = vsel %vm683_vm5, %v728_v63, %v7912_v44  ;;  %v696_v18 = vsel %vm683_vm5, %v679_v30, %v7913_v33  ;;  %v7532_v58 = vpack.c.bf16 %v6540_v52, %v6539_v54  ;;  %v6516_v54 = vld [vmem:[%s13874_s1 + $0x178] sm:$0xff] }
  0xe2   :  { %v7918_v31 = vunpack.i.h.bf16 %v7916_v23  ;;  %v7917_v39 = vunpack.i.l.bf16 %v7916_v23  ;;  %v7921_v29 = vpop.permute.xlu0 %7920  ;;  %910 = vmatprep.mubr.f32.mxu0 %v744_v45 }
  0xe3   :  { %v7923_v41 = vunpack.i.h.bf16 %v7921_v29  ;;  %v7922_v60 = vunpack.i.l.bf16 %v7921_v29  ;;  %911 = vmatmul.mubr.f32.gmra.mrb[24].mxu0 %v696_v18 }
  0xe4   :  { %v713_v28 = vsel %vm32_vm0, %v9886_v26, %v7917_v39  ;;  %v663_v62 = vsel %vm32_vm0, %v9838_v50, %v7918_v31 }
  0xe5   :  { %v7926_v0 = vpop.permute.xlu1 %7925  ;;  %v729_v34 = vsel %vm666_vm4, %v713_v28, %v7922_v60  ;;  %v680_v48 = vsel %vm666_vm4, %v663_v62, %v7923_v41 }
  0xe6   :  { %v7928_v27 = vunpack.i.h.bf16 %v7926_v0  ;;  %v7927_v12 = vunpack.i.l.bf16 %v7926_v0  ;;  %v7931_v11 = vpop.permute.xlu0 %7930 }
  0xe7   :  { %v7933_v42 = vunpack.i.h.bf16 %v7931_v11  ;;  %v7932_v14 = vunpack.i.l.bf16 %v7931_v11  ;;  %v6505_v11 = vld [vmem:[%s13874_s1 + $0x120] sm:$0xff] }
  0xe8   :  { %v745_v61 = vsel %vm683_vm5, %v729_v34, %v7927_v12  ;;  %v697_v13 = vsel %vm683_vm5, %v680_v48, %v7928_v27  ;;  %v6521_v12 = vld [vmem:[%s13874_s1 + $0x1a0] sm:$0xff]  ;;  %v6522_v34 = vld [vmem:[%s13874_s1 + $0x1a8] sm:$0xff] }
  0xe9   :  { %v7936_v8 = vpop.permute.xlu1 %7935  ;;  %915 = vmatprep.mubr.f32.mxu0 %v745_v61  ;;  %v714_v50 = vsel %vm32_vm0, %v9902_v40, %v7932_v14  ;;  %v664_v17 = vsel %vm32_vm0, %v9863_v35, %v7933_v42  ;;  %v7496_v48 = vpack.c.bf16 %v6522_v34, %v6521_v12  ;;  %v6506_v42 = vld [vmem:[%s13874_s1 + $0x128] sm:$0xff]  ;;  %v6523_v61 = vld [vmem:[%s13874_s1 + $0x1b0] sm:$0xff] }
  0xea   :  { %v7938_v26 = vunpack.i.h.bf16 %v7936_v8  ;;  %v7937_v36 = vunpack.i.l.bf16 %v7936_v8  ;;  %916 = vmatmul.mubr.f32.gmra.mrb[26].mxu0 %v697_v13  ;;  %v7941_v57 = vpop.permute.xlu0 %7940  ;;  %v7498_v14 = vpack.c.bf16 %v6506_v42, %v6505_v11  ;;  %v6524_v13 = vld [vmem:[%s13874_s1 + $0x1b8] sm:$0xff] }
  0xeb   :  { %v7943_v56 = vunpack.i.h.bf16 %v7941_v57  ;;  %v7942_v10 = vunpack.i.l.bf16 %v7941_v57  ;;  %7497 = vmatprep.subr.bf16.mxu1 %v7496_v48  ;;  %v7500_v8 = vpack.c.bf16 %v6524_v13, %v6523_v61  ;;  %v6526_v57 = vld [vmem:[%s13874_s1 + $0x1c8] sm:$0xff]  ;;  %v10182_v61 = vld [vmem:[#allocation2] sm:$0xff] }
  0xec   :  { %v730_v59 = vsel %vm666_vm4, %v714_v50, %v7937_v36  ;;  %v681_v15 = vsel %vm666_vm4, %v664_v17, %v7938_v26  ;;  %7499 = vmatpush3.bf16.msra.mxu1 %v7498_v14  ;;  %v6507_v26 = vld [vmem:[%s13874_s1 + $0x130] sm:$0xff]  ;;  %v6508_v36 = vld [vmem:[%s13874_s1 + $0x138] sm:$0xff]  ;;  %v6525_v50 = vld [vmem:[%s13874_s1 + $0x1c0] sm:$0xff] }
  0xed   :  { %v7946_v43 = vpop.permute.xlu1 %7945  ;;  %v746_v47 = vsel %vm683_vm5, %v730_v59, %v7942_v10  ;;  %v698_v25 = vsel %vm683_vm5, %v681_v15, %v7943_v56  ;;  %v7502_v17 = vpack.c.bf16 %v6508_v36, %v6507_v26  ;;  %v6509_v56 = vld [vmem:[%s13874_s1 + $0x140] sm:$0xff]  ;;  %v6510_v10 = vld [vmem:[%s13874_s1 + $0x148] sm:$0xff]  ;;  %7501 = vmatprep.subr.bf16.mxu1 %v7500_v8  ;;  %v7504_v59 = vpack.c.bf16 %v6526_v57, %v6525_v50  ;;  %v6527_v15 = vld [vmem:[%s13874_s1 + $0x1d0] sm:$0xff] }
  0xee   :  { %v7948_v37 = vunpack.i.h.bf16 %v7946_v43  ;;  %v7947_v9 = vunpack.i.l.bf16 %v7946_v43  ;;  %920 = vmatprep.mubr.f32.mxu0 %v746_v47  ;;  %v7951_v19 = vpop.permute.xlu0 %7950  ;;  %v6528_v43 = vld [vmem:[%s13874_s1 + $0x1d8] sm:$0xff]  ;;  %v6511_v47 = vld [vmem:[%s13874_s1 + $0x150] sm:$0xff]  ;;  %v6533_v13 = vld [vmem:[%s13874_s1 + $0x200] sm:$0xff] }
  0xef   :  { %v7953_v40 = vunpack.i.h.bf16 %v7951_v19  ;;  %v7952_v21 = vunpack.i.l.bf16 %v7951_v19  ;;  %921 = vmatmul.mubr.f32.gmra.mrb[28].mxu0 %v698_v25  ;;  %v6512_v25 = vld [vmem:[%s13874_s1 + $0x158] sm:$0xff]  ;;  %v6529_v19 = vld [vmem:[%s13874_s1 + $0x1e0] sm:$0xff]  ;;  %v6534_v8 = vld [vmem:[%s13874_s1 + $0x208] sm:$0xff] }
  0xf0   :  { %v715_v35 = vsel %vm32_vm0, %v9915_v53, %v7947_v9  ;;  %v665_v51 = vsel %vm32_vm0, %v9879_v55, %v7948_v37  ;;  %v6537_v53 = vld [vmem:[%s13874_s1 + $0x220] sm:$0xff]  ;;  %v6538_v55 = vld [vmem:[%s13874_s1 + $0x228] sm:$0xff]  ;;  %7503 = vmatpush3.bf16.msra.mxu1 %v7502_v17  ;;  %v7506_v37 = vpack.c.bf16 %v6510_v10, %v6509_v56  ;;  %v7508_v9 = vpack.c.bf16 %v6528_v43, %v6527_v15 }
  0xf1   :  { %v7956_v22 = vpop.permute.xlu1 %7955  ;;  %v731_v38 = vsel %vm666_vm4, %v715_v35, %v7952_v21  ;;  %v682_v49 = vsel %vm666_vm4, %v665_v51, %v7953_v40  ;;  %v7528_v20 = vpack.c.bf16 %v6538_v55, %v6537_v53  ;;  %7505 = vmatprep.subr.bf16.mxu1 %v7504_v59  ;;  %v6530_v40 = vld [vmem:[%s13874_s1 + $0x1e8] sm:$0xff]  ;;  %v7510_v21 = vpack.c.bf16 %v6512_v25, %v6511_v47  ;;  %v6513_v51 = vld [vmem:[%s13874_s1 + $0x160] sm:$0xff] }
  0xf2   :  { %v7958_v24 = vunpack.i.h.bf16 %v7956_v22  ;;  %v7957_v32 = vunpack.i.l.bf16 %v7956_v22  ;;  %v7512_v35 = vpack.c.bf16 %v6530_v40, %v6529_v19  ;;  %v6514_v22 = vld [vmem:[%s13874_s1 + $0x168] sm:$0xff]  ;;  %v7520_v50 = vpack.c.bf16 %v6534_v8, %v6533_v13  ;;  %v6517_v17 = vld [vmem:[%s13874_s1 + $0x180] sm:$0xff]  ;;  %v6519_v19 = vld [vmem:[%s13874_s1 + $0x190] sm:$0xff] }
  0xf3   :  { %7529 = vmatprep.subr.bf16.mxu0 %v7528_v20  ;;  %v1148_v36 = vld [vmem:[#allocation2 + $0x8] sm:$0x3]  ;;  %v1219_v43 = vrot.slane %v10182_v61, 1  ;;  %v6520_v40 = vld [vmem:[%s13874_s1 + $0x198] sm:$0xff] }
  0xf4   :  { %v747_v16 = vsel %vm683_vm5, %v731_v38, %v7957_v32  ;;  %v699_v46 = vsel %vm683_vm5, %v682_v49, %v7958_v24  ;;  %7531 = vmatpush3.bf16.msra.mxu0 %v7528_v20  ;;  %7507 = vmatpush3.bf16.msra.mxu1 %v7506_v37  ;;  %v6531_v24 = vld [vmem:[%s13874_s1 + $0x1f0] sm:$0xff]  ;;  %v6532_v32 = vld [vmem:[%s13874_s1 + $0x1f8] sm:$0xff]  ;;  %v6518_v57 = vld [vmem:[%s13874_s1 + $0x188] sm:$0xff]  ;;  %v1220_v37 = vrot.slane %v1148_v36, 1 }
  0xf5   :  { %925 = vmatprep.mubr.f32.mxu0 %v747_v16  ;;  %7533 = vmatprep.subr.bf16.mxu0 %v7532_v58  ;;  %v10171_v16 = vld [vmem:[%s13875_s2] ss:$0 sm:$0xff]  ;;  %v7516_v55 = vpack.c.bf16 %v6532_v32, %v6531_v24  ;;  %v6515_v20 = vld [vmem:[%s13874_s1 + $0x170] sm:$0xff]  ;;  %v7522_v10 = vpack.c.bf16 %v6518_v57, %v6517_v17 }
  0xf6   :  { %926 = vmatmul.mubr.f32.gmra.mrb[30].mxu0 %v699_v46  ;;  %7509 = vmatprep.subr.bf16.mxu1 %v7508_v9  ;;  %v7514_v46 = vpack.c.bf16 %v6514_v22, %v6513_v51  ;;  %v7518_v34 = vpack.c.bf16 %v6516_v54, %v6515_v20  ;;  %v6536_v9 = vld [vmem:[%s13874_s1 + $0x218] sm:$0xff]  ;;  %v7526_v51 = vpack.c.bf16 %v6520_v40, %v6519_v19 }
  0xf8   :  { %7535 = vmatpush3.bf16.msra.mxu0 %v7532_v58  ;;  %7511 = vmatpush3.bf16.msra.mxu1 %v7510_v21  ;;  %v1267_v21 = vrot.slane %v10182_v61, 2 }
  0xf9   :  { %7513 = vmatprep.subr.bf16.mxu1 %v7512_v35  ;;  %v1268_v35 = vrot.slane %v1148_v36, 2 }
  0xfc   :  { %7515 = vmatpush3.bf16.msra.mxu1 %v7514_v46  ;;  %v1221_v46 = vsel %vm216_vm3, %v1219_v43, %v1220_v37 }
  0xfd   :  { %7517 = vmatprep.subr.bf16.mxu1 %v7516_v55 }
 0x100   :  { %7519 = vmatpush3.bf16.msra.mxu1 %v7518_v34 }
 0x101   :  { %7521 = vmatprep.subr.bf16.mxu1 %v7520_v50 }
 0x104   :  { %7523 = vmatpush3.bf16.msra.mxu1 %v7522_v10 }
 0x121   :  { %v10070_v33 = vpop.f32.mrb[0].mxu1 }
 0x122   :  { %v10072_v44 = vpop.f32.mrb[1].mxu1 }
 0x125   :  { %v10074_v63 = vpop.f32.mrb[2].mxu1 }
 0x126   :  { %v10076_v30 = vpop.f32.mrb[3].mxu1 }
 0x129   :  { %v10078_v23 = vpop.f32.mrb[4].mxu1 }
 0x12a   :  { %v10080_v31 = vpop.f32.mrb[5].mxu1 }
 0x12d   :  { %v10082_v39 = vpop.f32.mrb[6].mxu1 }
 0x12e   :  { %v10084_v45 = vpop.f32.mrb[7].mxu1 }
 0x131   :  { %v10086_v18 = vpop.f32.mrb[8].mxu1 }
 0x132   :  { %v10088_v29 = vpop.f32.mrb[9].mxu1 }
 0x135   :  { %v10090_v41 = vpop.f32.mrb[10].mxu1 }
 0x136   :  { %v10092_v60 = vpop.f32.mrb[11].mxu1 }
 0x139   :  { %v10094_v28 = vpop.f32.mrb[12].mxu1 }
 0x13a   :  { %v10096_v62 = vpop.f32.mrb[13].mxu1 }
 0x13e   :  { %v10098_v0 = vpop.f32.mrb[14].mxu1 }
 0x13f   :  { %v10100_v27 = vpop.f32.mrb[15].mxu1 }
 0x170   :  { %v6696_v38 = vpop.f32.mrb[0].mxu0 }
 0x171   :  { %v6697_v49 = vpop.f32.mrb[1].mxu0 }
 0x172   :  { %v6698_v53 = vadd.f32 %v6697_v49, %v6696_v38 }
 0x174   :  { %v853_v58 = vadd.f32 %v6698_v53, %v10171_v16 }
 0x175   :  { %v6699_v52 = vpop.f32.mrb[2].mxu0 }
 0x176   :  { %v6700_v12 = vpop.f32.mrb[3].mxu0  ;;  %v998_v48 = vadd.f32 %v10072_v44, %v853_v58 }
 0x177   :  { %v6701_v11 = vadd.f32 %v6700_v12, %v6699_v52  ;;  %v1269_v52 = vsel %vm265_vm2, %v1267_v21, %v1268_v35 }
 0x178   :  { %v1076_v42 = vmax.f32 %v998_v48, 0.0 }
 0x179   :  { %v858_v14 = vadd.f32 %v6701_v11, %v10171_v16 }
 0x17a   :  { %1131 = vst.msk [vmem:[#allocation2 + $0x11] sm:$0xff] %vm32_vm0, %v1076_v42  ;;  %v6702_v26 = vpop.f32.mrb[4].mxu0 }
 0x17b   :  { %v1003_v44 = vadd.f32 %v10070_v33, %v858_v14  ;;  %v6703_v56 = vpop.f32.mrb[5].mxu0  ;;  %v6535_v33 = vld [vmem:[%s13874_s1 + $0x210] sm:$0xff] }
 0x17c   :  { %v6704_v15 = vadd.f32 %v6703_v56, %v6702_v26  ;;  %v7524_v25 = vpack.c.bf16 %v6536_v9, %v6535_v33 }
 0x17d   :  { %v1077_v59 = vmax.f32 %v1003_v44, 0.0 }
 0x17e   :  { %v863_v47 = vadd.f32 %v6704_v15, %v10171_v16  ;;  %7525 = vmatprep.subr.bf16.mxu1 %v7524_v25 }
 0x17f   :  { %1132 = vst.msk [vmem:[#allocation2 + $0x21] sm:$0xff] %vm32_vm0, %v1077_v59  ;;  %7527 = vmatpush3.bf16.msra.mxu1 %v7526_v51 }
 0x180   :  { %v1008_v24 = vadd.f32 %v10076_v30, %v863_v47 }
 0x181   :  { %v6705_v22 = vpop.f32.mrb[6].mxu0  ;;  %v10215_v38 = vld [vmem:[#allocation2 + $0x10] sm:$0xff]  ;;  %v1150_v49 = vld [vmem:[#allocation2 + $0x18] sm:$0x3] }
 0x182   :  { %v6706_v32 = vpop.f32.mrb[7].mxu0  ;;  %v1078_v53 = vmax.f32 %v1008_v24, 0.0  ;;  %v1270_v20 = vrot.slane %v10215_v38, 2  ;;  %v1271_v54 = vrot.slane %v1150_v49, 2  ;;  %v1222_v12 = vrot.slane %v10215_v38, 1 }
 0x183   :  { %v6707_v55 = vadd.f32 %v6706_v32, %v6705_v22  ;;  %v1223_v34 = vrot.slane %v1150_v49, 1 }
 0x184   :  { %1133 = vst.msk [vmem:[#allocation2 + $0x31] sm:$0xff] %vm32_vm0, %v1078_v53  ;;  %v1272_v30 = vsel %vm265_vm2, %v1270_v20, %v1271_v54 }
 0x185   :  { %v868_v58 = vadd.f32 %v6707_v55, %v10171_v16  ;;  %v7959_v48 = vpack.i.bf16 %v1221_v46, %v1272_v30 }
 0x186   :  { %v10224_v11 = vld [vmem:[#allocation2 + $0x20] sm:$0xff]  ;;  %v1152_v42 = vld [vmem:[#allocation2 + $0x28] sm:$0x3]  ;;  %v6708_v13 = vpop.f32.mrb[8].mxu0 }
 0x187   :  { %v1013_v14 = vadd.f32 %v10074_v63, %v868_v58  ;;  %v7964_v8 = vpack.i.bf16 %v1269_v52, %v10224_v11  ;;  %v1273_v44 = vrot.slane %v10224_v11, 2  ;;  %v1274_v26 = vrot.slane %v1152_v42, 2  ;;  %v6709_v36 = vpop.f32.mrb[9].mxu0  ;;  %7960 = vrot.lane.b32.xlu0 %v7959_v48, %s9305_s29 }
 0x188   :  { %v1225_v50 = vrot.slane %v10224_v11, 1  ;;  %v1226_v17 = vrot.slane %v1152_v42, 1  ;;  %v6710_v56 = vadd.f32 %v6709_v36, %v6708_v13  ;;  %v10234_v63 = vsel %vm216_vm3, %v1222_v12, %v1223_v34 }
 0x189   :  { %v1079_v57 = vmax.f32 %v1013_v14, 0.0  ;;  %7965 = vrot.lane.b32.xlu1 %v7964_v8, %s9303_s0  ;;  %v1275_v10 = vsel %vm265_vm2, %v1273_v44, %v1274_v26 }
 0x18a   :  { %7304 = vmatprep.mubr.msk.f32.mxu0 %vm32_vm0, %v1275_v10  ;;  %v10238_v59 = vsel %vm216_vm3, %v1225_v50, %v1226_v17  ;;  %v7974_v15 = vpack.i.bf16 %v10234_v63, %v1275_v10  ;;  %v873_v43 = vadd.f32 %v6710_v56, %v10171_v16 }
 0x18b   :  { %1134 = vst.msk [vmem:[#allocation2 + $0x41] sm:$0xff] %vm32_vm0, %v1079_v57  ;;  %v7969_v37 = vpack.i.bf16 %v10215_v38, %v10238_v59  ;;  %v10245_v33 = vld [vmem:[#allocation2 + $0x30] sm:$0xff]  ;;  %v1154_v9 = vld [vmem:[#allocation2 + $0x38] sm:$0x3] }
 0x18c   :  { %v1018_v25 = vadd.f32 %v10080_v31, %v873_v43  ;;  %v1276_v19 = vrot.slane %v10245_v33, 2  ;;  %v1277_v40 = vrot.slane %v1154_v9, 2  ;;  %v7979_v21 = vpack.i.bf16 %v1272_v30, %v10245_v33 }
 0x18d   :  { %v6711_v47 = vpop.f32.mrb[10].mxu0  ;;  %7970 = vrot.lane.b32.xlu0 %v7969_v37, %s9304_s28  ;;  %7975 = vrot.lane.b32.xlu1 %v7974_v15, %s9305_s29  ;;  %v1228_v51 = vrot.slane %v10245_v33, 1  ;;  %v1229_v22 = vrot.slane %v1154_v9, 1 }
 0x18e   :  { %v6712_v35 = vpop.f32.mrb[11].mxu0  ;;  %v1080_v24 = vmax.f32 %v1018_v25, 0.0  ;;  %v1278_v49 = vsel %vm265_vm2, %v1276_v19, %v1277_v40 }
 0x18f   :  { %v6713_v32 = vadd.f32 %v6712_v35, %v6711_v47  ;;  %7305 = vmatmul.mubr.msk.f32.vlgmr.msra.gmra.mrb[32].mxu0 %vm32_vm0, %v1278_v49  ;;  %v10256_v31 = vsel %vm216_vm3, %v1228_v51, %v1229_v22  ;;  %v7989_v58 = vpack.i.bf16 %v10238_v59, %v1278_v49 }
 0x190   :  { %1135 = vst.msk [vmem:[#allocation2 + $0x51] sm:$0xff] %vm32_vm0, %v1080_v24  ;;  %v7984_v53 = vpack.i.bf16 %v10224_v11, %v10256_v31 }
 0x191   :  { %v878_v46 = vadd.f32 %v6713_v32, %v10171_v16  ;;  %7980 = vrot.lane.b32.xlu0 %v7979_v21, %s9303_s0 }
 0x192   :  { %v10263_v55 = vld [vmem:[#allocation2 + $0x40] sm:$0xff]  ;;  %v1156_v20 = vld [vmem:[#allocation2 + $0x48] sm:$0x3]  ;;  %7985 = vrot.lane.b32.xlu1 %v7984_v53, %s9304_s28  ;;  %v6714_v52 = vpop.f32.mrb[12].mxu0 }
 0x193   :  { %v1023_v54 = vadd.f32 %v10078_v23, %v878_v46  ;;  %v1279_v30 = vrot.slane %v10263_v55, 2  ;;  %v1280_v12 = vrot.slane %v1156_v20, 2  ;;  %v6715_v34 = vpop.f32.mrb[13].mxu0  ;;  %v1231_v48 = vrot.slane %v10263_v55, 1 }
 0x194   :  { %v1232_v42 = vrot.slane %v1156_v20, 1  ;;  %v6716_v13 = vadd.f32 %v6715_v34, %v6714_v52  ;;  %v7994_v23 = vpack.i.bf16 %v1275_v10, %v10263_v55 }
 0x195   :  { %v1081_v14 = vmax.f32 %v1023_v54, 0.0  ;;  %7990 = vrot.lane.b32.xlu0 %v7989_v58, %s9305_s29  ;;  %v1281_v8 = vsel %vm265_vm2, %v1279_v30, %v1280_v12 }
 0x196   :  { %7307 = vmatprep.mubr.msk.f32.mxu0 %vm32_vm0, %v1281_v8  ;;  %v10275_v44 = vsel %vm216_vm3, %v1231_v48, %v1232_v42  ;;  %7995 = vrot.lane.b32.xlu1 %v7994_v23, %s9303_s0  ;;  %v883_v26 = vadd.f32 %v6716_v13, %v10171_v16  ;;  %v8004_v50 = vpack.i.bf16 %v10256_v31, %v1281_v8 }
 0x197   :  { %1136 = vst.msk [vmem:[#allocation2 + $0x61] sm:$0xff] %vm32_vm0, %v1081_v14  ;;  %v7999_v36 = vpack.i.bf16 %v10245_v33, %v10275_v44  ;;  %v10283_v17 = vld [vmem:[#allocation2 + $0x50] sm:$0xff]  ;;  %v1158_v57 = vld [vmem:[#allocation2 + $0x58] sm:$0x3] }
 0x198   :  { %v1028_v10 = vadd.f32 %v10084_v45, %v883_v26  ;;  %v1282_v15 = vrot.slane %v10283_v17, 2  ;;  %v1283_v43 = vrot.slane %v1158_v57, 2  ;;  %v8009_v37 = vpack.i.bf16 %v1278_v49, %v10283_v17 }
 0x199   :  { %v6717_v56 = vpop.f32.mrb[14].mxu0  ;;  %8000 = vrot.lane.b32.xlu0 %v7999_v36, %s9304_s28  ;;  %v1234_v47 = vrot.slane %v10283_v17, 1  ;;  %v1235_v25 = vrot.slane %v1158_v57, 1 }
 0x19a   :  { %v6718_v9 = vpop.f32.mrb[15].mxu0  ;;  %v1082_v19 = vmax.f32 %v1028_v10, 0.0  ;;  %8005 = vrot.lane.b32.xlu1 %v8004_v50, %s9305_s29  ;;  %v1284_v21 = vsel %vm265_vm2, %v1282_v15, %v1283_v43 }
 0x19b   :  { %v6719_v40 = vadd.f32 %v6718_v9, %v6717_v56  ;;  %7308 = vmatmul.mubr.msk.f32.gmra.mrb[34].mxu0 %vm32_vm0, %v1284_v21  ;;  %v10294_v45 = vsel %vm216_vm3, %v1234_v47, %v1235_v25  ;;  %v8019_v49 = vpack.i.bf16 %v10275_v44, %v1284_v21  ;;  %v1165_v25 = vld [vmem:[#allocation2 + $0x90] sm:$0xff] }
 0x19c   :  { %1137 = vst.msk [vmem:[#allocation2 + $0x71] sm:$0xff] %vm32_vm0, %v1082_v19  ;;  %v8014_v51 = vpack.i.bf16 %v10263_v55, %v10294_v45  ;;  %v1166_v19 = vld [vmem:[#allocation2 + $0x98] sm:$0x3] }
 0x19d   :  { %v888_v35 = vadd.f32 %v6719_v40, %v10171_v16  ;;  %8010 = vrot.lane.b32.xlu0 %v8009_v37, %s9303_s0 }
 0x19e   :  { %v10301_v22 = vld [vmem:[#allocation2 + $0x60] sm:$0xff]  ;;  %v1160_v24 = vld [vmem:[#allocation2 + $0x68] sm:$0x3]  ;;  %8015 = vrot.lane.b32.xlu1 %v8014_v51, %s9304_s28  ;;  %v6720_v46 = vpop.f32.mrb[16].mxu0 }
 0x19f   :  { %v1033_v32 = vadd.f32 %v10082_v39, %v888_v35  ;;  %v1285_v53 = vrot.slane %v10301_v22, 2  ;;  %v1286_v20 = vrot.slane %v1160_v24, 2  ;;  %v6721_v54 = vpop.f32.mrb[17].mxu0  ;;  %v1237_v52 = vrot.slane %v10301_v22, 1 }
 0x1a0   :  { %v1238_v58 = vrot.slane %v1160_v24, 1  ;;  %v6722_v34 = vadd.f32 %v6721_v54, %v6720_v46  ;;  %v8024_v39 = vpack.i.bf16 %v1281_v8, %v10301_v22  ;;  %v1358_v35 = vrot.slane %v1166_v19, 2 }
 0x1a1   :  { %v1083_v30 = vmax.f32 %v1033_v32, 0.0  ;;  %8020 = vrot.lane.b32.xlu0 %v8019_v49, %s9305_s29  ;;  %v1287_v12 = vsel %vm265_vm2, %v1285_v53, %v1286_v20  ;;  %v1351_v32 = vrot.slane %v1165_v25, 1  ;;  %v1352_v46 = vrot.slane %v1166_v19, 1 }
 0x1a2   :  { %7310 = vmatprep.mubr.msk.f32.mxu0 %vm32_vm0, %v1287_v12  ;;  %v10313_v48 = vsel %vm216_vm3, %v1237_v52, %v1238_v58  ;;  %8025 = vrot.lane.b32.xlu1 %v8024_v39, %s9303_s0  ;;  %v893_v14 = vadd.f32 %v6722_v34, %v10171_v16  ;;  %v8034_v13 = vpack.i.bf16 %v10294_v45, %v1287_v12  ;;  %v1168_v34 = vld [vmem:[#allocation2 + $0xa8] sm:$0x3] }
 0x1a3   :  { %1138 = vst.msk [vmem:[#allocation2 + $0x81] sm:$0xff] %vm32_vm0, %v1083_v30  ;;  %v8029_v42 = vpack.i.bf16 %v10283_v17, %v10313_v48  ;;  %v10321_v23 = vld [vmem:[#allocation2 + $0x70] sm:$0xff]  ;;  %v1162_v26 = vld [vmem:[#allocation2 + $0x78] sm:$0x3]  ;;  %v10342_v30 = vld [vmem:[#allocation2 + $0xa0] sm:$0xff] }
 0x1a4   :  { %v1038_v36 = vadd.f32 %v10088_v29, %v893_v14  ;;  %v8039_v50 = vpack.i.bf16 %v1284_v21, %v10321_v23  ;;  %v1240_v57 = vrot.slane %v10321_v23, 1  ;;  %v1241_v56 = vrot.slane %v1162_v26, 1 }
 0x1a5   :  { %8030 = vrot.lane.b32.xlu0 %v8029_v42, %s9304_s28  ;;  %v6723_v8 = vpop.f32.mrb[18].mxu0  ;;  %v1288_v15 = vrot.slane %v10321_v23, 2  ;;  %v1289_v43 = vrot.slane %v1162_v26, 2  ;;  %v1357_v21 = vrot.slane %v1165_v25, 2 }
 0x1a6   :  { %v6724_v10 = vpop.f32.mrb[19].mxu0  ;;  %v1084_v9 = vmax.f32 %v1038_v36, 0.0  ;;  %8035 = vrot.lane.b32.xlu1 %v8034_v13, %s9305_s29  ;;  %v10330_v47 = vsel %vm216_vm3, %v1240_v57, %v1241_v56  ;;  %v1353_v57 = vsel %vm216_vm3, %v1351_v32, %v1352_v46  ;;  %v1243_v56 = vrot.slane %v10342_v30, 1 }
 0x1a7   :  { %v6725_v37 = vadd.f32 %v6724_v10, %v6723_v8  ;;  %v8044_v29 = vpack.i.bf16 %v10301_v22, %v10330_v47  ;;  %v1290_v40 = vsel %vm265_vm2, %v1288_v15, %v1289_v43  ;;  %v1359_v26 = vsel %vm265_vm2, %v1357_v21, %v1358_v35 }
 0x1a8   :  { %1139 = vst.msk [vmem:[#allocation2 + $0xb1] sm:$0xff] %vm32_vm0, %v1084_v9  ;;  %7311 = vmatmul.mubr.msk.f32.gmra.mrb[36].mxu0 %vm32_vm0, %v1290_v40  ;;  %v8049_v54 = vpack.i.bf16 %v10313_v48, %v1290_v40  ;;  %v8054_v42 = vpack.i.bf16 %v1290_v40, %v1165_v25  ;;  %v1244_v10 = vrot.slane %v1168_v34, 1  ;;  %v1291_v9 = vrot.slane %v10342_v30, 2 }
 0x1a9   :  { %v898_v51 = vadd.f32 %v6725_v37, %v10171_v16  ;;  %8040 = vrot.lane.b32.xlu0 %v8039_v50, %s9303_s0  ;;  %v1292_v25 = vrot.slane %v1168_v34, 2 }
 0x1aa   :  { %v1163_v24 = vld [vmem:[#allocation2 + $0x80] sm:$0xff]  ;;  %v1164_v49 = vld [vmem:[#allocation2 + $0x88] sm:$0x3]  ;;  %8045 = vrot.lane.b32.xlu1 %v8044_v29, %s9304_s28  ;;  %v6726_v20 = vpop.f32.mrb[20].mxu0  ;;  %v1245_v32 = vsel %vm216_vm3, %v1243_v56, %v1244_v10 }
 0x1ab   :  { %v1043_v53 = vadd.f32 %v10086_v18, %v898_v51  ;;  %v1341_v52 = vrot.slane %v1163_v24, 2  ;;  %v1342_v58 = vrot.slane %v1164_v49, 2  ;;  %v6727_v39 = vpop.f32.mrb[21].mxu0  ;;  %v1319_v14 = vrot.slane %v1163_v24, 1 }
 0x1ac   :  { %v1320_v13 = vrot.slane %v1164_v49, 1  ;;  %v6728_v36 = vadd.f32 %v6727_v39, %v6726_v20  ;;  %v8059_v18 = vpack.i.bf16 %v1287_v12, %v1163_v24  ;;  %v8064_v40 = vpack.i.bf16 %v1163_v24, %v1353_v57 }
 0x1ad   :  { %v1085_v8 = vmax.f32 %v1043_v53, 0.0  ;;  %8050 = vrot.lane.b32.xlu0 %v8049_v54, %s9305_s29  ;;  %v1343_v50 = vsel %vm265_vm2, %v1341_v52, %v1342_v58 }
 0x1ae   :  { %7313 = vmatprep.mubr.msk.f32.mxu0 %vm32_vm0, %v1343_v50  ;;  %8060 = vrot.lane.b32.xlu1 %v8059_v18, %s9303_s0  ;;  %v903_v15 = vadd.f32 %v6728_v36, %v10171_v16  ;;  %v10355_v43 = vsel %vm216_vm3, %v1319_v14, %v1320_v13  ;;  %v8074_v58 = vpack.i.bf16 %v10330_v47, %v1343_v50 }
 0x1af   :  { %1140 = vst.msk [vmem:[#allocation2 + $0xc1] sm:$0xff] %vm32_vm0, %v1085_v8  ;;  %7314 = vmatmul.mubr.msk.f32.gmra.mrb[38].mxu0 %vm32_vm0, %v1359_v26  ;;  %v10357_v12 = vld [vmem:[#allocation2 + $0xb0] sm:$0xff]  ;;  %v1170_v37 = vld [vmem:[#allocation2 + $0xb8] sm:$0x3]  ;;  %v8069_v53 = vpack.i.bf16 %v10321_v23, %v10355_v43 }
 0x1b0   :  { %v1048_v19 = vadd.f32 %v10092_v60, %v903_v15  ;;  %v1294_v21 = vrot.slane %v10357_v12, 2  ;;  %v1295_v35 = vrot.slane %v1170_v37, 2  ;;  %v1293_v60 = vsel %vm265_vm2, %v1291_v9, %v1292_v25 }
 0x1b1   :  { %8055 = vrot.lane.b32.xlu0 %v8054_v42, %s9303_s0  ;;  %v6729_v29 = vpop.f32.mrb[22].mxu0  ;;  %v1246_v54 = vrot.slane %v10357_v12, 1  ;;  %v1247_v24 = vrot.slane %v1170_v37, 1 }
 0x1b2   :  { %v6730_v51 = vpop.f32.mrb[23].mxu0  ;;  %v1086_v49 = vmax.f32 %v1048_v19, 0.0  ;;  %8065 = vrot.lane.b32.xlu1 %v8064_v40, %s9304_s28  ;;  %v1296_v20 = vsel %vm265_vm2, %v1294_v21, %v1295_v35 }
 0x1b3   :  { %v6731_v46 = vadd.f32 %v6730_v51, %v6729_v29  ;;  %v8079_v34 = vpack.i.bf16 %v1245_v32, %v1296_v20  ;;  %v10381_v57 = vsel %vm216_vm3, %v1246_v54, %v1247_v24 }
 0x1b4   :  { %1141 = vst.msk [vmem:[#allocation2 + $0xd1] sm:$0xff] %vm32_vm0, %v1086_v49 }
 0x1b5   :  { %v908_v52 = vadd.f32 %v6731_v46, %v10171_v16  ;;  %8070 = vrot.lane.b32.xlu0 %v8069_v53, %s9304_s28 }
 0x1b6   :  { %v10374_v39 = vld [vmem:[#allocation2 + $0xc0] sm:$0xff]  ;;  %v1172_v42 = vld [vmem:[#allocation2 + $0xc8] sm:$0x3]  ;;  %8075 = vrot.lane.b32.xlu1 %v8074_v58, %s9305_s29  ;;  %v6732_v13 = vpop.f32.mrb[24].mxu0 }
 0x1b7   :  { %v1053_v14 = vadd.f32 %v10090_v41, %v908_v52  ;;  %v8084_v26 = vpack.i.bf16 %v1293_v60, %v10374_v39  ;;  %v1249_v8 = vrot.slane %v10374_v39, 1  ;;  %v1250_v36 = vrot.slane %v1172_v42, 1  ;;  %v6733_v18 = vpop.f32.mrb[25].mxu0 }
 0x1b8   :  { %v1297_v50 = vrot.slane %v10374_v39, 2  ;;  %v1298_v56 = vrot.slane %v1172_v42, 2  ;;  %v6734_v15 = vadd.f32 %v6733_v18, %v6732_v13 }
 0x1b9   :  { %v1087_v10 = vmax.f32 %v1053_v14, 0.0  ;;  %8080 = vrot.lane.b32.xlu0 %v8079_v34, %s9305_s29  ;;  %v10386_v41 = vsel %vm216_vm3, %v1249_v8, %v1250_v36 }
 0x1ba   :  { %v8089_v37 = vpack.i.bf16 %v10357_v12, %v10386_v41  ;;  %v1299_v9 = vsel %vm265_vm2, %v1297_v50, %v1298_v56  ;;  %8085 = vrot.lane.b32.xlu1 %v8084_v26, %s9303_s0  ;;  %v913_v25 = vadd.f32 %v6734_v15, %v10171_v16 }
 0x1bb   :  { %1142 = vst.msk [vmem:[#allocation2 + $0xe1] sm:$0xff] %vm32_vm0, %v1087_v10  ;;  %v8094_v19 = vpack.i.bf16 %v10381_v57, %v1299_v9  ;;  %7316 = vmatprep.mubr.msk.f32.mxu0 %vm32_vm0, %v1299_v9  ;;  %v10396_v29 = vld [vmem:[#allocation2 + $0xd0] sm:$0xff]  ;;  %v1174_v40 = vld [vmem:[#allocation2 + $0xd8] sm:$0x3] }
 0x1bc   :  { %v1058_v21 = vadd.f32 %v10096_v62, %v913_v25  ;;  %v8099_v51 = vpack.i.bf16 %v1296_v20, %v10396_v29  ;;  %v1252_v32 = vrot.slane %v10396_v29, 1  ;;  %v1253_v49 = vrot.slane %v1174_v40, 1 }
 0x1bd   :  { %8090 = vrot.lane.b32.xlu0 %v8089_v37, %s9304_s28  ;;  %v6735_v35 = vpop.f32.mrb[26].mxu0  ;;  %v1300_v53 = vrot.slane %v10396_v29, 2  ;;  %v1301_v60 = vrot.slane %v1174_v40, 2 }
 0x1be   :  { %v6736_v46 = vpop.f32.mrb[27].mxu0  ;;  %v1088_v54 = vmax.f32 %v1058_v21, 0.0  ;;  %8095 = vrot.lane.b32.xlu1 %v8094_v19, %s9305_s29  ;;  %v10405_v52 = vsel %vm216_vm3, %v1252_v32, %v1253_v49 }
 0x1bf   :  { %v6737_v24 = vadd.f32 %v6736_v46, %v6735_v35  ;;  %v8104_v62 = vpack.i.bf16 %v10374_v39, %v10405_v52  ;;  %v1302_v58 = vsel %vm265_vm2, %v1300_v53, %v1301_v60 }
 0x1c0   :  { %1143 = vst.msk [vmem:[#allocation2 + $0xf1] sm:$0xff] %vm32_vm0, %v1088_v54  ;;  %v8109_v34 = vpack.i.bf16 %v10386_v41, %v1302_v58  ;;  %7317 = vmatmul.mubr.msk.f32.gmra.mrb[40].mxu0 %vm32_vm0, %v1302_v58 }
 0x1c1   :  { %v918_v20 = vadd.f32 %v6737_v24, %v10171_v16  ;;  %8100 = vrot.lane.b32.xlu0 %v8099_v51, %s9303_s0 }
 0x1c2   :  { %v10415_v42 = vld [vmem:[#allocation2 + $0xe0] sm:$0xff]  ;;  %v1176_v14 = vld [vmem:[#allocation2 + $0xe8] sm:$0x3]  ;;  %8105 = vrot.lane.b32.xlu1 %v8104_v62, %s9304_s28  ;;  %v6738_v26 = vpop.f32.mrb[28].mxu0 }
 0x1c3   :  { %v1063_v13 = vadd.f32 %v10094_v28, %v918_v20  ;;  %v8114_v8 = vpack.i.bf16 %v1299_v9, %v10415_v42  ;;  %v1255_v36 = vrot.slane %v10415_v42, 1  ;;  %v1256_v18 = vrot.slane %v1176_v14, 1  ;;  %v6739_v50 = vpop.f32.mrb[29].mxu0 }
 0x1c4   :  { %v1303_v56 = vrot.slane %v10415_v42, 2  ;;  %v1304_v10 = vrot.slane %v1176_v14, 2  ;;  %v6740_v37 = vadd.f32 %v6739_v50, %v6738_v26 }
 0x1c5   :  { %v1089_v15 = vmax.f32 %v1063_v13, 0.0  ;;  %8110 = vrot.lane.b32.xlu0 %v8109_v34, %s9305_s29  ;;  %v10424_v25 = vsel %vm216_vm3, %v1255_v36, %v1256_v18 }
 0x1c6   :  { %v8119_v28 = vpack.i.bf16 %v10396_v29, %v10424_v25  ;;  %v1305_v19 = vsel %vm265_vm2, %v1303_v56, %v1304_v10  ;;  %8115 = vrot.lane.b32.xlu1 %v8114_v8, %s9303_s0  ;;  %v923_v9 = vadd.f32 %v6740_v37, %v10171_v16 }
 0x1c7   :  { %1144 = vst.msk [vmem:[#allocation2 + $0x101] sm:$0xff] %vm32_vm0, %v1089_v15  ;;  %v8124_v40 = vpack.i.bf16 %v10405_v52, %v1305_v19  ;;  %7319 = vmatprep.mubr.msk.f32.mxu0 %vm32_vm0, %v1305_v19  ;;  %v10434_v21 = vld [vmem:[#allocation2 + $0xf0] sm:$0xff]  ;;  %v1178_v35 = vld [vmem:[#allocation2 + $0xf8] sm:$0x3] }
 0x1c8   :  { %v1068_v51 = vadd.f32 %v10100_v27, %v923_v9  ;;  %v8129_v49 = vpack.i.bf16 %v1302_v58, %v10434_v21  ;;  %v1258_v46 = vrot.slane %v10434_v21, 1  ;;  %v1259_v53 = vrot.slane %v1178_v35, 1 }
 0x1c9   :  { %8120 = vrot.lane.b32.xlu0 %v8119_v28, %s9304_s28  ;;  %v6741_v32 = vpop.f32.mrb[30].mxu0  ;;  %v1306_v54 = vrot.slane %v10434_v21, 2  ;;  %v1307_v24 = vrot.slane %v1178_v35, 2 }
 0x1ca   :  { %v6742_v60 = vpop.f32.mrb[31].mxu0  ;;  %v1090_v62 = vmax.f32 %v1068_v51, 0.0  ;;  %8125 = vrot.lane.b32.xlu1 %v8124_v40, %s9305_s29  ;;  %v10443_v34 = vsel %vm216_vm3, %v1258_v46, %v1259_v53 }
 0x1cb   :  { %v6743_v20 = vadd.f32 %v6742_v60, %v6741_v32  ;;  %v8134_v27 = vpack.i.bf16 %v10415_v42, %v10443_v34  ;;  %v1308_v14 = vsel %vm265_vm2, %v1306_v54, %v1307_v24 }
 0x1cc   :  { %1145 = vst.msk [vmem:[#allocation2 + $0x111] sm:$0xff] %vm32_vm0, %v1090_v62  ;;  %v8139_v13 = vpack.i.bf16 %v10424_v25, %v1308_v14  ;;  %7320 = vmatmul.mubr.msk.f32.gmra.mrb[42].mxu0 %vm32_vm0, %v1308_v14  ;;  %v1185_v62 = vld [vmem:[#allocation2 + $0x130] sm:$0xff] }
 0x1cd   :  { %v928_v58 = vadd.f32 %v6743_v20, %v10171_v16  ;;  %8130 = vrot.lane.b32.xlu0 %v8129_v49, %s9303_s0  ;;  %v1186_v20 = vld [vmem:[#allocation2 + $0x138] sm:$0x3] }
 0x1ce   :  { %v10453_v26 = vld [vmem:[#allocation2 + $0x100] sm:$0xff]  ;;  %v1180_v8 = vld [vmem:[#allocation2 + $0x108] sm:$0x3]  ;;  %8135 = vrot.lane.b32.xlu1 %v8134_v27, %s9304_s28 }
 0x1cf   :  { %v1073_v36 = vadd.f32 %v10098_v0, %v928_v58  ;;  %v8144_v18 = vpack.i.bf16 %v1305_v19, %v10453_v26  ;;  %v1261_v50 = vrot.slane %v10453_v26, 1  ;;  %v1262_v56 = vrot.slane %v1180_v8, 1 }
 0x1d0   :  { %v1309_v16 = vrot.slane %v10453_v26, 2  ;;  %v1310_v10 = vrot.slane %v1180_v8, 2  ;;  %v1360_v58 = vrot.slane %v1185_v62, 2 }
 0x1d1   :  { %v1091_v15 = vmax.f32 %v1073_v36, 0.0  ;;  %8140 = vrot.lane.b32.xlu0 %v8139_v13, %s9305_s29  ;;  %v10462_v37 = vsel %vm216_vm3, %v1261_v50, %v1262_v56  ;;  %v1361_v13 = vrot.slane %v1186_v20, 2 }
 0x1d2   :  { %v8149_v28 = vpack.i.bf16 %v10434_v21, %v10462_v37  ;;  %v1311_v0 = vsel %vm265_vm2, %v1309_v16, %v1310_v10  ;;  %8145 = vrot.lane.b32.xlu1 %v8144_v18, %s9303_s0  ;;  %v1354_v16 = vrot.slane %v1185_v62, 1  ;;  %v1355_v10 = vrot.slane %v1186_v20, 1 }
 0x1d3   :  { %1146 = vst.msk [vmem:[#allocation2 + $0x121] sm:$0xff] %vm32_vm0, %v1091_v15  ;;  %v8154_v19 = vpack.i.bf16 %v10443_v34, %v1311_v0  ;;  %7322 = vmatprep.mubr.msk.f32.mxu0 %vm32_vm0, %v1311_v0  ;;  %v10471_v9 = vld [vmem:[#allocation2 + $0x110] sm:$0xff]  ;;  %v1182_v40 = vld [vmem:[#allocation2 + $0x118] sm:$0x3] }
 0x1d4   :  { %v8159_v35 = vpack.i.bf16 %v1308_v14, %v10471_v9  ;;  %v1264_v51 = vrot.slane %v10471_v9, 1  ;;  %v1265_v32 = vrot.slane %v1182_v40, 1  ;;  %v1312_v49 = vrot.slane %v10471_v9, 2 }
 0x1d5   :  { %8150 = vrot.lane.b32.xlu0 %v8149_v28, %s9304_s28  ;;  %v1313_v46 = vrot.slane %v1182_v40, 2  ;;  %v1362_v28 = vsel %vm265_vm2, %v1360_v58, %v1361_v13 }
 0x1d6   :  { %8155 = vrot.lane.b32.xlu1 %v8154_v19, %s9305_s29  ;;  %v10479_v53 = vsel %vm216_vm3, %v1264_v51, %v1265_v32 }
 0x1d7   :  { %v8164_v60 = vpack.i.bf16 %v10453_v26, %v10479_v53  ;;  %v1314_v54 = vsel %vm265_vm2, %v1312_v49, %v1313_v46 }
 0x1d8   :  { %v8169_v24 = vpack.i.bf16 %v10462_v37, %v1314_v54  ;;  %7323 = vmatmul.mubr.msk.f32.gmra.mrb[44].mxu0 %vm32_vm0, %v1314_v54  ;;  %v8184_v51 = vpack.i.bf16 %v1314_v54, %v1185_v62 }
 0x1d9   :  { %8160 = vrot.lane.b32.xlu0 %v8159_v35, %s9303_s0  ;;  %v1356_v35 = vsel %vm216_vm3, %v1354_v16, %v1355_v10 }
 0x1da   :  { %v1183_v27 = vld [vmem:[#allocation2 + $0x120] sm:$0xff]  ;;  %v1184_v14 = vld [vmem:[#allocation2 + $0x128] sm:$0x3]  ;;  %8165 = vrot.lane.b32.xlu1 %v8164_v60, %s9304_s28 }
 0x1db   :  { %v8174_v8 = vpack.i.bf16 %v1311_v0, %v1183_v27  ;;  %v1322_v36 = vrot.slane %v1183_v27, 1  ;;  %v1323_v18 = vrot.slane %v1184_v14, 1  ;;  %v1344_v50 = vrot.slane %v1183_v27, 2 }
 0x1dc   :  { %v1345_v56 = vrot.slane %v1184_v14, 2  ;;  %v8194_v32 = vpack.i.bf16 %v1183_v27, %v1356_v35 }
 0x1dd   :  { %8170 = vrot.lane.b32.xlu0 %v8169_v24, %s9305_s29  ;;  %v10490_v15 = vsel %vm216_vm3, %v1322_v36, %v1323_v18 }
 0x1de   :  { %v8179_v19 = vpack.i.bf16 %v10471_v9, %v10490_v15  ;;  %v1346_v40 = vsel %vm265_vm2, %v1344_v50, %v1345_v56  ;;  %8175 = vrot.lane.b32.xlu1 %v8174_v8, %s9303_s0 }
 0x1df   :  { %v8189_v0 = vpack.i.bf16 %v10479_v53, %v1346_v40  ;;  %7325 = vmatprep.mubr.msk.f32.mxu0 %vm32_vm0, %v1346_v40 }
 0x1e0   :  { %7326 = vmatmul.mubr.msk.f32.gmra.mrb[46].mxu0 %vm32_vm0, %v1362_v28 }
 0x1e1   :  { %8180 = vrot.lane.b32.xlu0 %v8179_v19, %s9304_s28 }
 0x1e2   :  { %8190 = vrot.lane.b32.xlu1 %v8189_v0, %s9305_s29 }
 0x1e5   :  { %8185 = vrot.lane.b32.xlu0 %v8184_v51, %s9303_s0 }
 0x1e6   :  { %8195 = vrot.lane.b32.xlu1 %v8194_v32, %s9304_s28 }
 0x1f9   :  { %v7961_v49 = vpop.permute.xlu0 %7960 }
 0x1fa   :  { %v7963_v46 = vunpack.i.h.bf16 %v7961_v49  ;;  %v7962_v60 = vunpack.i.l.bf16 %v7961_v49 }
 0x1fb   :  { %v7966_v24 = vpop.permute.xlu1 %7965 }
 0x1fc   :  { %v7968_v20 = vunpack.i.h.bf16 %v7966_v24  ;;  %v7967_v14 = vunpack.i.l.bf16 %v7966_v24  ;;  %v1651_v58 = vsel %vm32_vm0, %v10182_v61, %v7963_v46  ;;  %v1699_v13 = vsel %vm32_vm0, %v10234_v63, %v7962_v60 }
 0x1fe   :  { %v1715_v50 = vsel %vm666_vm4, %v1699_v13, %v7967_v14  ;;  %v1667_v56 = vsel %vm666_vm4, %v1651_v58, %v7968_v20 }
 0x1ff   :  { %v7971_v54 = vpop.permute.xlu0 %7970  ;;  %v7976_v62 = vpop.permute.xlu1 %7975 }
 0x200   :  { %v7973_v8 = vunpack.i.h.bf16 %v7971_v54  ;;  %v7972_v27 = vunpack.i.l.bf16 %v7971_v54  ;;  %v7978_v36 = vunpack.i.h.bf16 %v7976_v62  ;;  %v7977_v18 = vunpack.i.l.bf16 %v7976_v62 }
 0x202   :  { %v1731_v16 = vsel %vm683_vm5, %v1715_v50, %v7972_v27  ;;  %v1683_v10 = vsel %vm683_vm5, %v1667_v56, %v7973_v8  ;;  %v1700_v40 = vsel %vm32_vm0, %v10238_v59, %v7977_v18  ;;  %v1652_v0 = vsel %vm32_vm0, %v10215_v38, %v7978_v36 }
 0x203   :  { %v7981_v28 = vpop.permute.xlu0 %7980  ;;  %1849 = vmatprep.mubr.f32.mxu1 %v1731_v16 }
 0x204   :  { %v7983_v61 = vunpack.i.h.bf16 %v7981_v28  ;;  %v7982_v19 = vunpack.i.l.bf16 %v7981_v28  ;;  %1850 = vmatmul.mubr.f32.vlgmr.msra.gmra.mrb[16].mxu1 %v1683_v10  ;;  %v7986_v63 = vpop.permute.xlu1 %7985 }
 0x205   :  { %v7988_v35 = vunpack.i.h.bf16 %v7986_v63  ;;  %v7987_v51 = vunpack.i.l.bf16 %v7986_v63 }
 0x206   :  { %v1716_v32 = vsel %vm666_vm4, %v1700_v40, %v7982_v19  ;;  %v1668_v49 = vsel %vm666_vm4, %v1652_v0, %v7983_v61 }
 0x207   :  { %v7991_v46 = vpop.permute.xlu0 %7990  ;;  %v1732_v20 = vsel %vm683_vm5, %v1716_v32, %v7987_v51  ;;  %v1684_v14 = vsel %vm683_vm5, %v1668_v49, %v7988_v35 }
 0x208   :  { %v7993_v60 = vunpack.i.h.bf16 %v7991_v46  ;;  %v7992_v24 = vunpack.i.l.bf16 %v7991_v46  ;;  %v7996_v58 = vpop.permute.xlu1 %7995  ;;  %1854 = vmatprep.mubr.f32.mxu1 %v1732_v20 }
 0x209   :  { %v7998_v13 = vunpack.i.h.bf16 %v7996_v58  ;;  %v7997_v59 = vunpack.i.l.bf16 %v7996_v58  ;;  %1855 = vmatmul.mubr.f32.gmra.mrb[18].mxu1 %v1684_v14 }
 0x20a   :  { %v1701_v38 = vsel %vm32_vm0, %v10256_v31, %v7992_v24  ;;  %v1653_v54 = vsel %vm32_vm0, %v10224_v11, %v7993_v60 }
 0x20b   :  { %v8001_v62 = vpop.permute.xlu0 %8000  ;;  %v1717_v36 = vsel %vm666_vm4, %v1701_v38, %v7997_v59  ;;  %v1669_v18 = vsel %vm666_vm4, %v1653_v54, %v7998_v13 }
 0x20c   :  { %v8003_v8 = vunpack.i.h.bf16 %v8001_v62  ;;  %v8002_v27 = vunpack.i.l.bf16 %v8001_v62  ;;  %v8006_v50 = vpop.permute.xlu1 %8005 }
 0x20d   :  { %v8008_v56 = vunpack.i.h.bf16 %v8006_v50  ;;  %v8007_v16 = vunpack.i.l.bf16 %v8006_v50 }
 0x20e   :  { %v1733_v10 = vsel %vm683_vm5, %v1717_v36, %v8002_v27  ;;  %v1685_v28 = vsel %vm683_vm5, %v1669_v18, %v8003_v8 }
 0x20f   :  { %v8011_v61 = vpop.permute.xlu0 %8010  ;;  %1859 = vmatprep.mubr.f32.mxu1 %v1733_v10  ;;  %v1702_v11 = vsel %vm32_vm0, %v10275_v44, %v8007_v16  ;;  %v1654_v63 = vsel %vm32_vm0, %v10245_v33, %v8008_v56 }
 0x210   :  { %v8013_v31 = vunpack.i.h.bf16 %v8011_v61  ;;  %v8012_v19 = vunpack.i.l.bf16 %v8011_v61  ;;  %1860 = vmatmul.mubr.f32.gmra.mrb[20].mxu1 %v1685_v28  ;;  %v8016_v40 = vpop.permute.xlu1 %8015 }
 0x211   :  { %v8018_v0 = vunpack.i.h.bf16 %v8016_v40  ;;  %v8017_v35 = vunpack.i.l.bf16 %v8016_v40 }
 0x212   :  { %v1718_v51 = vsel %vm666_vm4, %v1702_v11, %v8012_v19  ;;  %v1670_v32 = vsel %vm666_vm4, %v1654_v63, %v8013_v31 }
 0x213   :  { %v8021_v49 = vpop.permute.xlu0 %8020  ;;  %v1734_v24 = vsel %vm683_vm5, %v1718_v51, %v8017_v35  ;;  %v1686_v20 = vsel %vm683_vm5, %v1670_v32, %v8018_v0 }
 0x214   :  { %v8023_v46 = vunpack.i.h.bf16 %v8021_v49  ;;  %v8022_v60 = vunpack.i.l.bf16 %v8021_v49  ;;  %v8026_v14 = vpop.permute.xlu1 %8025  ;;  %1864 = vmatprep.mubr.f32.mxu1 %v1734_v24 }
 0x215   :  { %v8028_v44 = vunpack.i.h.bf16 %v8026_v14  ;;  %v8027_v58 = vunpack.i.l.bf16 %v8026_v14  ;;  %1865 = vmatmul.mubr.f32.gmra.mrb[22].mxu1 %v1686_v20 }
 0x216   :  { %v1703_v33 = vsel %vm32_vm0, %v10294_v45, %v8022_v60  ;;  %v1655_v13 = vsel %vm32_vm0, %v10263_v55, %v8023_v46 }
 0x217   :  { %v8031_v59 = vpop.permute.xlu0 %8030  ;;  %v1719_v62 = vsel %vm666_vm4, %v1703_v33, %v8027_v58  ;;  %v1671_v8 = vsel %vm666_vm4, %v1655_v13, %v8028_v44 }
 0x218   :  { %v8033_v38 = vunpack.i.h.bf16 %v8031_v59  ;;  %v8032_v54 = vunpack.i.l.bf16 %v8031_v59  ;;  %v8036_v27 = vpop.permute.xlu1 %8035 }
 0x219   :  { %v8038_v36 = vunpack.i.h.bf16 %v8036_v27  ;;  %v8037_v18 = vunpack.i.l.bf16 %v8036_v27 }
 0x21a   :  { %v1735_v50 = vsel %vm683_vm5, %v1719_v62, %v8032_v54  ;;  %v1687_v56 = vsel %vm683_vm5, %v1671_v8, %v8033_v38 }
 0x21b   :  { %v8041_v16 = vpop.permute.xlu0 %8040  ;;  %1869 = vmatprep.mubr.f32.mxu1 %v1735_v50  ;;  %v1704_v55 = vsel %vm32_vm0, %v10313_v48, %v8037_v18  ;;  %v1656_v28 = vsel %vm32_vm0, %v10283_v17, %v8038_v36 }
 0x21c   :  { %v8043_v45 = vunpack.i.h.bf16 %v8041_v16  ;;  %v8042_v10 = vunpack.i.l.bf16 %v8041_v16  ;;  %1870 = vmatmul.mubr.f32.gmra.mrb[24].mxu1 %v1687_v56  ;;  %v8046_v61 = vpop.permute.xlu1 %8045 }
 0x21d   :  { %v8048_v31 = vunpack.i.h.bf16 %v8046_v61  ;;  %v8047_v19 = vunpack.i.l.bf16 %v8046_v61 }
 0x21e   :  { %v1720_v11 = vsel %vm666_vm4, %v1704_v55, %v8042_v10  ;;  %v1672_v63 = vsel %vm666_vm4, %v1656_v28, %v8043_v45 }
 0x21f   :  { %v8051_v40 = vpop.permute.xlu0 %8050  ;;  %v1736_v0 = vsel %vm683_vm5, %v1720_v11, %v8047_v19  ;;  %v1688_v35 = vsel %vm683_vm5, %v1672_v63, %v8048_v31 }
 0x220   :  { %v8061_v51 = vpop.permute.xlu1 %8060  ;;  %1874 = vmatprep.mubr.f32.mxu1 %v1736_v0  ;;  %v8053_v32 = vunpack.i.h.bf16 %v8051_v40  ;;  %v8052_v49 = vunpack.i.l.bf16 %v8051_v40 }
 0x221   :  { %1875 = vmatmul.mubr.f32.gmra.mrb[26].mxu1 %v1688_v35  ;;  %v8063_v46 = vunpack.i.h.bf16 %v8061_v51  ;;  %v8062_v17 = vunpack.i.l.bf16 %v8061_v51 }
 0x222   :  { %v1705_v24 = vsel %vm32_vm0, %v10330_v47, %v8052_v49  ;;  %v1657_v20 = vsel %vm32_vm0, %v10301_v22, %v8053_v32 }
 0x223   :  { %v8056_v48 = vpop.permute.xlu0 %8055  ;;  %v1721_v13 = vsel %vm666_vm4, %v1705_v24, %v8062_v17  ;;  %v1673_v59 = vsel %vm666_vm4, %v1657_v20, %v8063_v46 }
 0x224   :  { %v8066_v60 = vpop.permute.xlu1 %8065  ;;  %v8058_v27 = vunpack.i.h.bf16 %v8056_v48  ;;  %v8057_v36 = vunpack.i.l.bf16 %v8056_v48 }
 0x225   :  { %v8068_v47 = vunpack.i.h.bf16 %v8066_v60  ;;  %v8067_v18 = vunpack.i.l.bf16 %v8066_v60 }
 0x227   :  { %v8071_v14 = vpop.permute.xlu0 %8070 }
 0x228   :  { %v8073_v44 = vunpack.i.h.bf16 %v8071_v14  ;;  %v8072_v58 = vunpack.i.l.bf16 %v8071_v14  ;;  %v8076_v33 = vpop.permute.xlu1 %8075 }
 0x229   :  { %v8078_v38 = vunpack.i.h.bf16 %v8076_v33  ;;  %v8077_v54 = vunpack.i.l.bf16 %v8076_v33 }
 0x22a   :  { %v1737_v62 = vsel %vm683_vm5, %v1721_v13, %v8072_v58  ;;  %v1689_v8 = vsel %vm683_vm5, %v1673_v59, %v8073_v44 }
 0x22b   :  { %v8081_v50 = vpop.permute.xlu0 %8080  ;;  %1879 = vmatprep.mubr.f32.mxu1 %v1737_v62  ;;  %v1706_v16 = vsel %vm32_vm0, %v10355_v43, %v8077_v54  ;;  %v1658_v45 = vsel %vm32_vm0, %v10321_v23, %v8078_v38 }
 0x22c   :  { %v8083_v22 = vunpack.i.h.bf16 %v8081_v50  ;;  %v8082_v56 = vunpack.i.l.bf16 %v8081_v50  ;;  %1880 = vmatmul.mubr.f32.gmra.mrb[28].mxu1 %v1689_v8  ;;  %v8086_v10 = vpop.permute.xlu1 %8085  ;;  %v1722_v55 = vsel %vm666_vm4, %v1706_v16, %v8057_v36  ;;  %v1674_v28 = vsel %vm666_vm4, %v1658_v45, %v8058_v27 }
 0x22d   :  { %v8088_v61 = vunpack.i.h.bf16 %v8086_v10  ;;  %v8087_v31 = vunpack.i.l.bf16 %v8086_v10  ;;  %v1738_v19 = vsel %vm683_vm5, %v1722_v55, %v8067_v18  ;;  %v1690_v11 = vsel %vm683_vm5, %v1674_v28, %v8068_v47 }
 0x22e   :  { %1884 = vmatprep.mubr.f32.mxu1 %v1738_v19  ;;  %v1707_v40 = vsel %vm32_vm0, %v10381_v57, %v8082_v56  ;;  %v1659_v43 = vsel %vm32_vm0, %v10342_v30, %v8083_v22 }
 0x22f   :  { %v8091_v63 = vpop.permute.xlu0 %8090  ;;  %v1723_v35 = vsel %vm666_vm4, %v1707_v40, %v8087_v31  ;;  %v1675_v51 = vsel %vm666_vm4, %v1659_v43, %v8088_v61 }
 0x230   :  { %v8093_v23 = vunpack.i.h.bf16 %v8091_v63  ;;  %v8092_v0 = vunpack.i.l.bf16 %v8091_v63  ;;  %1885 = vmatmul.mubr.f32.gmra.mrb[30].mxu1 %v1690_v11  ;;  %v8096_v32 = vpop.permute.xlu1 %8095 }
 0x231   :  { %v8098_v49 = vunpack.i.h.bf16 %v8096_v32  ;;  %v8097_v48 = vunpack.i.l.bf16 %v8096_v32 }
 0x232   :  { %v1739_v46 = vsel %vm683_vm5, %v1723_v35, %v8092_v0  ;;  %v1691_v17 = vsel %vm683_vm5, %v1675_v51, %v8093_v23 }
 0x233   :  { %v8101_v60 = vpop.permute.xlu0 %8100  ;;  %1889 = vmatprep.mubr.f32.mxu1 %v1739_v46  ;;  %v1708_v30 = vsel %vm32_vm0, %v10386_v41, %v8097_v48  ;;  %v1660_v20 = vsel %vm32_vm0, %v10357_v12, %v8098_v49 }
 0x234   :  { %v8103_v57 = vunpack.i.h.bf16 %v8101_v60  ;;  %v8102_v24 = vunpack.i.l.bf16 %v8101_v60  ;;  %1890 = vmatmul.mubr.f32.gmra.mrb[32].mxu1 %v1691_v17  ;;  %v8106_v14 = vpop.permute.xlu1 %8105 }
 0x235   :  { %v8108_v44 = vunpack.i.h.bf16 %v8106_v14  ;;  %v8107_v58 = vunpack.i.l.bf16 %v8106_v14 }
 0x236   :  { %v1724_v33 = vsel %vm666_vm4, %v1708_v30, %v8102_v24  ;;  %v1676_v13 = vsel %vm666_vm4, %v1660_v20, %v8103_v57 }
 0x237   :  { %v8111_v59 = vpop.permute.xlu0 %8110  ;;  %v1740_v62 = vsel %vm683_vm5, %v1724_v33, %v8107_v58  ;;  %v1692_v8 = vsel %vm683_vm5, %v1676_v13, %v8108_v44 }
 0x238   :  { %v8113_v38 = vunpack.i.h.bf16 %v8111_v59  ;;  %v8112_v54 = vunpack.i.l.bf16 %v8111_v59  ;;  %v8116_v27 = vpop.permute.xlu1 %8115  ;;  %1894 = vmatprep.mubr.f32.mxu1 %v1740_v62 }
 0x239   :  { %v8118_v41 = vunpack.i.h.bf16 %v8116_v27  ;;  %v8117_v36 = vunpack.i.l.bf16 %v8116_v27  ;;  %1895 = vmatmul.mubr.f32.gmra.mrb[34].mxu1 %v1692_v8 }
 0x23a   :  { %v1709_v12 = vsel %vm32_vm0, %v10405_v52, %v8112_v54  ;;  %v1661_v47 = vsel %vm32_vm0, %v10374_v39, %v8113_v38 }
 0x23b   :  { %v8121_v18 = vpop.permute.xlu0 %8120  ;;  %v1725_v56 = vsel %vm666_vm4, %v1709_v12, %v8117_v36  ;;  %v1677_v16 = vsel %vm666_vm4, %v1661_v47, %v8118_v41 }
 0x23c   :  { %v8123_v50 = vunpack.i.h.bf16 %v8121_v18  ;;  %v8122_v22 = vunpack.i.l.bf16 %v8121_v18  ;;  %v8126_v45 = vpop.permute.xlu1 %8125 }
 0x23d   :  { %v8128_v10 = vunpack.i.h.bf16 %v8126_v45  ;;  %v8127_v55 = vunpack.i.l.bf16 %v8126_v45 }
 0x23e   :  { %v1741_v28 = vsel %vm683_vm5, %v1725_v56, %v8122_v22  ;;  %v1693_v61 = vsel %vm683_vm5, %v1677_v16, %v8123_v50 }
 0x23f   :  { %v8131_v31 = vpop.permute.xlu0 %8130  ;;  %1899 = vmatprep.mubr.f32.mxu1 %v1741_v28  ;;  %v1710_v39 = vsel %vm32_vm0, %v10424_v25, %v8127_v55  ;;  %v1662_v11 = vsel %vm32_vm0, %v10396_v29, %v8128_v10 }
 0x240   :  { %v8133_v52 = vunpack.i.h.bf16 %v8131_v31  ;;  %v8132_v19 = vunpack.i.l.bf16 %v8131_v31  ;;  %1900 = vmatmul.mubr.f32.gmra.mrb[36].mxu1 %v1693_v61  ;;  %v8136_v63 = vpop.permute.xlu1 %8135 }
 0x241   :  { %v8138_v40 = vunpack.i.h.bf16 %v8136_v63  ;;  %v8137_v43 = vunpack.i.l.bf16 %v8136_v63 }
 0x242   :  { %v1726_v23 = vsel %vm666_vm4, %v1710_v39, %v8132_v19  ;;  %v1678_v0 = vsel %vm666_vm4, %v1662_v11, %v8133_v52 }
 0x243   :  { %v8141_v35 = vpop.permute.xlu0 %8140  ;;  %v1742_v49 = vsel %vm683_vm5, %v1726_v23, %v8137_v43  ;;  %v1694_v48 = vsel %vm683_vm5, %v1678_v0, %v8138_v40 }
 0x244   :  { %v8143_v51 = vunpack.i.h.bf16 %v8141_v35  ;;  %v8142_v32 = vunpack.i.l.bf16 %v8141_v35  ;;  %v8146_v46 = vpop.permute.xlu1 %8145  ;;  %1904 = vmatprep.mubr.f32.mxu1 %v1742_v49 }
 0x245   :  { %v8148_v25 = vunpack.i.h.bf16 %v8146_v46  ;;  %v8147_v17 = vunpack.i.l.bf16 %v8146_v46  ;;  %1905 = vmatmul.mubr.f32.gmra.mrb[38].mxu1 %v1694_v48 }
 0x246   :  { %v1711_v29 = vsel %vm32_vm0, %v10443_v34, %v8142_v32  ;;  %v1663_v60 = vsel %vm32_vm0, %v10415_v42, %v8143_v51 }
 0x247   :  { %v8151_v57 = vpop.permute.xlu0 %8150  ;;  %v1727_v20 = vsel %vm666_vm4, %v1711_v29, %v8147_v17  ;;  %v1679_v14 = vsel %vm666_vm4, %v1663_v60, %v8148_v25 }
 0x248   :  { %v8153_v24 = vunpack.i.h.bf16 %v8151_v57  ;;  %v8152_v30 = vunpack.i.l.bf16 %v8151_v57  ;;  %v8156_v44 = vpop.permute.xlu1 %8155 }
 0x249   :  { %v8158_v58 = vunpack.i.h.bf16 %v8156_v44  ;;  %v8157_v33 = vunpack.i.l.bf16 %v8156_v44 }
 0x24a   :  { %v1743_v13 = vsel %vm683_vm5, %v1727_v20, %v8152_v30  ;;  %v1695_v59 = vsel %vm683_vm5, %v1679_v14, %v8153_v24  ;;  %v2125_v30 = vld [vmem:[%s13876_s5 + $0x110] sm:$0xff]  ;;  %v2126_v20 = vld [vmem:[%s13876_s5 + $0x118] sm:$0xff] }
 0x24b   :  { %v8161_v38 = vpop.permute.xlu0 %8160  ;;  %1909 = vmatprep.mubr.f32.mxu1 %v1743_v13  ;;  %v1712_v42 = vsel %vm32_vm0, %v10462_v37, %v8157_v33  ;;  %v1664_v62 = vsel %vm32_vm0, %v10434_v21, %v8158_v58  ;;  %v7572_v14 = vpack.c.bf16 %v2126_v20, %v2125_v30  ;;  %v2117_v30 = vld [vmem:[%s13876_s5 + $0xd0] sm:$0xff]  ;;  %v2118_v20 = vld [vmem:[%s13876_s5 + $0xd8] sm:$0xff] }
 0x24c   :  { %v8163_v34 = vunpack.i.h.bf16 %v8161_v38  ;;  %v8162_v54 = vunpack.i.l.bf16 %v8161_v38  ;;  %1910 = vmatmul.mubr.f32.gmra.mrb[40].mxu1 %v1695_v59  ;;  %v8166_v8 = vpop.permute.xlu1 %8165 }
 0x24d   :  { %v8168_v27 = vunpack.i.h.bf16 %v8166_v8  ;;  %v8167_v41 = vunpack.i.l.bf16 %v8166_v8 }
 0x24e   :  { %v1728_v36 = vsel %vm666_vm4, %v1712_v42, %v8162_v54  ;;  %v1680_v12 = vsel %vm666_vm4, %v1664_v62, %v8163_v34 }
 0x24f   :  { %v8171_v47 = vpop.permute.xlu0 %8170  ;;  %v1744_v22 = vsel %vm683_vm5, %v1728_v36, %v8167_v41  ;;  %v1696_v56 = vsel %vm683_vm5, %v1680_v12, %v8168_v27  ;;  %v2107_v41 = vld [vmem:[%s13876_s5 + $0x80] sm:$0xff]  ;;  %v2108_v36 = vld [vmem:[%s13876_s5 + $0x88] sm:$0xff] }
 0x250   :  { %v8173_v18 = vunpack.i.h.bf16 %v8171_v47  ;;  %v8172_v50 = vunpack.i.l.bf16 %v8171_v47  ;;  %v8176_v16 = vpop.permute.xlu1 %8175  ;;  %1914 = vmatprep.mubr.f32.mxu1 %v1744_v22  ;;  %v7536_v12 = vpack.c.bf16 %v2108_v36, %v2107_v41  ;;  %v2091_v47 = vld [vmem:[%s13876_s5] sm:$0xff]  ;;  %v2109_v22 = vld [vmem:[%s13876_s5 + $0x90] sm:$0xff]  ;;  %v7556_v36 = vpack.c.bf16 %v2118_v20, %v2117_v30 }
 0x251   :  { %v8178_v37 = vunpack.i.h.bf16 %v8176_v16  ;;  %v8177_v45 = vunpack.i.l.bf16 %v8176_v16  ;;  %1915 = vmatmul.mubr.f32.gmra.mrb[42].mxu1 %v1696_v56  ;;  %v2110_v56 = vld [vmem:[%s13876_s5 + $0x98] sm:$0xff] }
 0x252   :  { %v1713_v21 = vsel %vm32_vm0, %v10479_v53, %v8172_v50  ;;  %v1665_v10 = vsel %vm32_vm0, %v10453_v26, %v8173_v18  ;;  %v2092_v18 = vld [vmem:[%s13876_s5 + $0x8] sm:$0xff]  ;;  %7537 = vmatprep.subr.bf16.mxu1 %v7536_v12  ;;  %v7540_v16 = vpack.c.bf16 %v2110_v56, %v2109_v22  ;;  %v2101_v12 = vld [vmem:[%s13876_s5 + $0x50] sm:$0xff]  ;;  %v2119_v56 = vld [vmem:[%s13876_s5 + $0xe0] sm:$0xff] }
 0x253   :  { %v8181_v55 = vpop.permute.xlu0 %8180  ;;  %v1729_v31 = vsel %vm666_vm4, %v1713_v21, %v8177_v45  ;;  %v1681_v52 = vsel %vm666_vm4, %v1665_v10, %v8178_v37  ;;  %v7538_v50 = vpack.c.bf16 %v2092_v18, %v2091_v47  ;;  %v2093_v37 = vld [vmem:[%s13876_s5 + $0x10] sm:$0xff]  ;;  %v2094_v45 = vld [vmem:[%s13876_s5 + $0x18] sm:$0xff]  ;;  %v2111_v10 = vld [vmem:[%s13876_s5 + $0xa0] sm:$0xff] }
 0x254   :  { %v8183_v28 = vunpack.i.h.bf16 %v8181_v55  ;;  %v8182_v61 = vunpack.i.l.bf16 %v8181_v55  ;;  %v8191_v19 = vpop.permute.xlu1 %8190  ;;  %v7542_v21 = vpack.c.bf16 %v2094_v45, %v2093_v37  ;;  %v2112_v55 = vld [vmem:[%s13876_s5 + $0xa8] sm:$0xff] }
 0x255   :  { %v8193_v39 = vunpack.i.h.bf16 %v8191_v19  ;;  %v8192_v11 = vunpack.i.l.bf16 %v8191_v19  ;;  %7539 = vmatpush3.bf16.msra.mxu1 %v7538_v50  ;;  %v2113_v19 = vld [vmem:[%s13876_s5 + $0xb0] sm:$0xff]  ;;  %v10758_v50 = vld [vmem:[#allocation2] sm:$0xff]  ;;  %v2145_v22 = vld [vmem:[#allocation2 + $0x8] sm:$0x3] }
 0x256   :  { %v1745_v63 = vsel %vm683_vm5, %v1729_v31, %v8182_v61  ;;  %v1697_v40 = vsel %vm683_vm5, %v1681_v52, %v8183_v28  ;;  %7541 = vmatprep.subr.bf16.mxu1 %v7540_v16  ;;  %v7544_v28 = vpack.c.bf16 %v2112_v55, %v2111_v10  ;;  %v2095_v61 = vld [vmem:[%s13876_s5 + $0x20] sm:$0xff]  ;;  %v2096_v31 = vld [vmem:[%s13876_s5 + $0x28] sm:$0xff] }
 0x257   :  { %v8186_v43 = vpop.permute.xlu0 %8185  ;;  %1919 = vmatprep.mubr.f32.mxu1 %v1745_v63  ;;  %v1714_v26 = vsel %vm32_vm0, %v10490_v15, %v8192_v11  ;;  %v1666_v0 = vsel %vm32_vm0, %v10471_v9, %v8193_v39  ;;  %v2123_v9 = vld [vmem:[%s13876_s5 + $0x100] sm:$0xff]  ;;  %v2124_v15 = vld [vmem:[%s13876_s5 + $0x108] sm:$0xff]  ;;  %v7546_v52 = vpack.c.bf16 %v2096_v31, %v2095_v61  ;;  %v2114_v39 = vld [vmem:[%s13876_s5 + $0xb8] sm:$0xff]  ;;  %v2216_v61 = vrot.slane %v10758_v50, 1 }
 0x258   :  { %v8188_v53 = vunpack.i.h.bf16 %v8186_v43  ;;  %v8187_v23 = vunpack.i.l.bf16 %v8186_v43  ;;  %1920 = vmatmul.mubr.f32.gmra.mrb[44].mxu1 %v1697_v40  ;;  %v8196_v35 = vpop.permute.xlu1 %8195  ;;  %v7568_v57 = vpack.c.bf16 %v2124_v15, %v2123_v9  ;;  %v7548_v63 = vpack.c.bf16 %v2114_v39, %v2113_v19  ;;  %v2097_v40 = vld [vmem:[%s13876_s5 + $0x30] sm:$0xff]  ;;  %v2098_v43 = vld [vmem:[%s13876_s5 + $0x38] sm:$0xff]  ;;  %v2120_v16 = vld [vmem:[%s13876_s5 + $0xe8] sm:$0xff] }
 0x259   :  { %v8198_v51 = vunpack.i.h.bf16 %v8196_v35  ;;  %v8197_v32 = vunpack.i.l.bf16 %v8196_v35  ;;  %7543 = vmatpush3.bf16.msra.mxu1 %v7542_v21  ;;  %v2115_v35 = vld [vmem:[%s13876_s5 + $0xc0] sm:$0xff]  ;;  %v7560_v21 = vpack.c.bf16 %v2120_v16, %v2119_v56  ;;  %v2104_v55 = vld [vmem:[%s13876_s5 + $0x68] sm:$0xff] }
 0x25a   :  { %v1730_v49 = vsel %vm666_vm4, %v1714_v26, %v8187_v23  ;;  %v1682_v48 = vsel %vm666_vm4, %v1666_v0, %v8188_v53  ;;  %7569 = vmatprep.subr.bf16.mxu0 %v7568_v57  ;;  %7545 = vmatprep.subr.bf16.mxu1 %v7544_v28  ;;  %v10728_v53 = vld [vmem:[%s13875_s2 + $0x1] ss:$0 sm:$0xff]  ;;  %v7550_v26 = vpack.c.bf16 %v2098_v43, %v2097_v40  ;;  %v2121_v40 = vld [vmem:[%s13876_s5 + $0xf0] sm:$0xff]  ;;  %v2122_v43 = vld [vmem:[%s13876_s5 + $0xf8] sm:$0xff] }
 0x25b   :  { %v1746_v46 = vsel %vm683_vm5, %v1730_v49, %v8197_v32  ;;  %v1698_v25 = vsel %vm683_vm5, %v1682_v48, %v8198_v51  ;;  %7571 = vmatpush3.bf16.msra.mxu0 %v7568_v57  ;;  %v2116_v51 = vld [vmem:[%s13876_s5 + $0xc8] sm:$0xff]  ;;  %v2099_v48 = vld [vmem:[%s13876_s5 + $0x40] sm:$0xff] }
 0x25c   :  { %1924 = vmatprep.mubr.f32.mxu1 %v1746_v46  ;;  %7573 = vmatprep.subr.bf16.mxu0 %v7572_v14  ;;  %v7552_v49 = vpack.c.bf16 %v2116_v51, %v2115_v35  ;;  %v2100_v46 = vld [vmem:[%s13876_s5 + $0x48] sm:$0xff]  ;;  %v2103_v10 = vld [vmem:[%s13876_s5 + $0x60] sm:$0xff]  ;;  %v2106_v35 = vld [vmem:[%s13876_s5 + $0x78] sm:$0xff] }
 0x25d   :  { %1925 = vmatmul.mubr.f32.gmra.mrb[46].mxu1 %v1698_v25  ;;  %v7554_v25 = vpack.c.bf16 %v2100_v46, %v2099_v48  ;;  %v7562_v31 = vpack.c.bf16 %v2104_v55, %v2103_v10  ;;  %v2265_v48 = vrot.slane %v2145_v22, 2  ;;  %v10822_v10 = vld [vmem:[#allocation2 + $0x8] sm:$0x3] }
 0x25e   :  { %7547 = vmatpush3.bf16.msra.mxu1 %v7546_v52  ;;  %v3088_v52 = vld [vmem:[%s13877_s3 + $0x80] sm:$0xff] }
 0x25f   :  { %7575 = vmatpush3.bf16.msra.mxu0 %v7572_v14  ;;  %7549 = vmatprep.subr.bf16.mxu1 %v7548_v63 }
 0x262   :  { %v10633_v17 = vpop.f32.mrb[32].mxu0  ;;  %7551 = vmatpush3.bf16.msra.mxu1 %v7550_v26  ;;  %v7564_v26 = vpack.c.bf16 %v2122_v43, %v2121_v40 }
 0x263   :  { %v10635_v29 = vpop.f32.mrb[33].mxu0  ;;  %7553 = vmatprep.subr.bf16.mxu1 %v7552_v49  ;;  %v2264_v49 = vrot.slane %v10758_v50, 2 }
 0x266   :  { %7555 = vmatpush3.bf16.msra.mxu1 %v7554_v25 }
 0x267   :  { %7557 = vmatprep.subr.bf16.mxu1 %v7556_v36 }
 0x26e   :  { %v10643_v60 = vpop.f32.mrb[34].mxu0 }
 0x26f   :  { %v10645_v24 = vpop.f32.mrb[35].mxu0 }
 0x27b   :  { %v10653_v44 = vpop.f32.mrb[36].mxu0 }
 0x27c   :  { %v10655_v58 = vpop.f32.mrb[37].mxu0 }
 0x282   :  { %v10657_v33 = vpop.f32.mrb[38].mxu0 }
 0x283   :  { %v10659_v13 = vpop.f32.mrb[39].mxu0 }
 0x293   :  { %v10661_v59 = vpop.f32.mrb[40].mxu0 }
 0x294   :  { %v10663_v38 = vpop.f32.mrb[41].mxu0 }
 0x29f   :  { %v10665_v34 = vpop.f32.mrb[42].mxu0 }
 0x2a0   :  { %v10667_v54 = vpop.f32.mrb[43].mxu0 }
 0x2ab   :  { %v10669_v42 = vpop.f32.mrb[44].mxu0 }
 0x2ac   :  { %v10671_v62 = vpop.f32.mrb[45].mxu0 }
 0x2b3   :  { %v10673_v8 = vpop.f32.mrb[46].mxu0 }
 0x2b4   :  { %v10675_v27 = vpop.f32.mrb[47].mxu0 }
 0x2d7   :  { %v6796_v11 = vpop.f32.mrb[16].mxu1 }
 0x2d8   :  { %v6797_v23 = vpop.f32.mrb[17].mxu1 }
 0x2d9   :  { %v6798_v0 = vadd.f32 %v6797_v23, %v6796_v11  ;;  %v2217_v11 = vrot.slane %v2145_v22, 1 }
 0x2db   :  { %v1852_v32 = vadd.f32 %v6798_v0, %v10728_v53  ;;  %v2105_v0 = vld [vmem:[%s13876_s5 + $0x70] sm:$0xff] }
 0x2dc   :  { %v6799_v15 = vpop.f32.mrb[18].mxu1  ;;  %v7566_v46 = vpack.c.bf16 %v2106_v35, %v2105_v0 }
 0x2dd   :  { %v1997_v9 = vadd.f32 %v10635_v29, %v1852_v32  ;;  %v6800_v57 = vpop.f32.mrb[19].mxu1  ;;  %v2102_v29 = vld [vmem:[%s13876_s5 + $0x58] sm:$0xff] }
 0x2de   :  { %v6801_v41 = vadd.f32 %v6800_v57, %v6799_v15  ;;  %v7558_v47 = vpack.c.bf16 %v2102_v29, %v2101_v12  ;;  %v2218_v15 = vsel %vm216_vm3, %v2216_v61, %v2217_v11  ;;  %v2266_v12 = vsel %vm265_vm2, %v2264_v49, %v2265_v48  ;;  %v3090_v48 = vld [vmem:[%s13877_s3 + $0x90] sm:$0xff] }
 0x2df   :  { %v2075_v14 = vmax.f32 %v1997_v9, 0.0 }
 0x2e0   :  { %v1857_v18 = vadd.f32 %v6801_v41, %v10728_v53  ;;  %7559 = vmatpush3.bf16.msra.mxu1 %v7558_v47 }
 0x2e1   :  { %2128 = vst.msk [vmem:[#allocation2 + $0x11] sm:$0xff] %vm32_vm0, %v2075_v14  ;;  %7561 = vmatprep.subr.bf16.mxu1 %v7560_v21 }
 0x2e2   :  { %v2002_v37 = vadd.f32 %v10633_v17, %v1857_v18  ;;  %v3089_v17 = vld [vmem:[%s13877_s3 + $0x88] sm:$0xff] }
 0x2e3   :  { %v6802_v45 = vpop.f32.mrb[20].mxu1  ;;  %v7576_v63 = vpack.c.bf16 %v3089_v17, %v3088_v52 }
 0x2e4   :  { %v6803_v28 = vpop.f32.mrb[21].mxu1  ;;  %v2076_v19 = vmax.f32 %v2002_v37, 0.0  ;;  %7563 = vmatpush3.bf16.msra.mxu1 %v7562_v31 }
 0x2e5   :  { %v6804_v39 = vadd.f32 %v6803_v28, %v6802_v45  ;;  %7577 = vmatprep.subr.bf16.mxu0 %v7576_v63  ;;  %7565 = vmatprep.subr.bf16.mxu1 %v7564_v26 }
 0x2e6   :  { %2129 = vst.msk [vmem:[#allocation2 + $0x21] sm:$0xff] %vm32_vm0, %v2076_v19 }
 0x2e7   :  { %v1862_v23 = vadd.f32 %v6804_v39, %v10728_v53 }
 0x2e8   :  { %v10794_v51 = vld [vmem:[#allocation2 + $0x10] sm:$0xff]  ;;  %v2147_v32 = vld [vmem:[#allocation2 + $0x18] sm:$0x3]  ;;  %v6805_v9 = vpop.f32.mrb[22].mxu1  ;;  %7567 = vmatpush3.bf16.msra.mxu1 %v7566_v46 }
 0x2e9   :  { %v2007_v25 = vadd.f32 %v10645_v24, %v1862_v23  ;;  %v2267_v57 = vrot.slane %v10794_v51, 2  ;;  %v2268_v30 = vrot.slane %v2147_v32, 2  ;;  %3109 = vst.msk [vmem:[#allocation2 + $0x11] sm:$0xff] %vm32_vm0, %v9407_v2  ;;  %v6806_v20 = vpop.f32.mrb[23].mxu1  ;;  %7696 = vmatprep.subr.bf16.mxu1 %v7576_v63  ;;  %v2219_v2 = vrot.slane %v10794_v51, 1  ;;  %v3073_v63 = vld [vmem:[%s13877_s3 + $0x8] sm:$0xff] }
 0x2ea   :  { %v6807_v41 = vadd.f32 %v6806_v20, %v6805_v9  ;;  %v2220_v47 = vrot.slane %v2147_v32, 1  ;;  %v3198_v23 = vrot.slane %v10822_v10, 1  ;;  %v3091_v46 = vld [vmem:[%s13877_s3 + $0x98] sm:$0xff] }
 0x2eb   :  { %v2077_v14 = vmax.f32 %v2007_v25, 0.0  ;;  %v10805_v36 = vsel %vm265_vm2, %v2267_v57, %v2268_v30 }
 0x2ec   :  { %v8199_v24 = vpack.i.bf16 %v2218_v15, %v10805_v36  ;;  %v1867_v29 = vadd.f32 %v6807_v41, %v10728_v53  ;;  %v10834_v11 = vsel %vm216_vm3, %v2219_v2, %v2220_v47  ;;  %v3074_v2 = vld [vmem:[%s13877_s3 + $0x10] sm:$0xff]  ;;  %v3075_v47 = vld [vmem:[%s13877_s3 + $0x18] sm:$0xff] }
 0x2ed   :  { %2130 = vst.msk [vmem:[#allocation2 + $0x31] sm:$0xff] %vm32_vm0, %v2077_v14  ;;  %v10815_v18 = vld [vmem:[#allocation2 + $0x20] sm:$0xff]  ;;  %v2149_v22 = vld [vmem:[#allocation2 + $0x28] sm:$0x3] }
 0x2ee   :  { %8200 = vrot.lane.b32.xlu0 %v8199_v24, %s9305_s29  ;;  %v2012_v56 = vadd.f32 %v10643_v60, %v1867_v29  ;;  %v8204_v37 = vpack.i.bf16 %v2266_v12, %v10815_v18  ;;  %v2270_v45 = vrot.slane %v10815_v18, 2  ;;  %v2271_v21 = vrot.slane %v2149_v22, 2  ;;  %3110 = vst.msk [vmem:[#allocation2 + $0x21] sm:$0xff] %vm32_vm0, %v9366_v1  ;;  %v3072_v1 = vld [vmem:[%s13877_s3] sm:$0xff] }
 0x2ef   :  { %v6808_v16 = vpop.f32.mrb[24].mxu1  ;;  %v2222_v28 = vrot.slane %v10815_v18, 1  ;;  %v2223_v31 = vrot.slane %v2149_v22, 1  ;;  %v10864_v15 = vpack.c.bf16 %v3073_v63, %v3072_v1  ;;  %v3246_v63 = vrot.slane %v10822_v10, 2  ;;  %v3094_v10 = vld [vmem:[%s13877_s3 + $0xb0] sm:$0xff] }
 0x2f0   :  { %v6809_v55 = vpop.f32.mrb[25].mxu1  ;;  %v10825_v52 = vld [vmem:[#allocation2 + $0x10] sm:$0xff]  ;;  %v10827_v17 = vld [vmem:[#allocation2 + $0x18] sm:$0x3]  ;;  %v2078_v60 = vmax.f32 %v2012_v56, 0.0  ;;  %8205 = vrot.lane.b32.xlu1 %v8204_v37, %s9303_s0  ;;  %v10831_v39 = vsel %vm265_vm2, %v2270_v45, %v2271_v21  ;;  %v3093_v37 = vld [vmem:[%s13877_s3 + $0xa8] sm:$0xff] }
 0x2f1   :  { %v6810_v19 = vadd.f32 %v6809_v55, %v6808_v16  ;;  %7336 = vmatprep.mubr.msk.f32.mxu0 %vm32_vm0, %v10831_v39  ;;  %v8214_v40 = vpack.i.bf16 %v10834_v11, %v10831_v39  ;;  %v10847_v43 = vsel %vm216_vm3, %v2222_v28, %v2223_v31  ;;  %v3248_v35 = vrot.slane %v10825_v52, 2  ;;  %v3076_v31 = vld [vmem:[%s13877_s3 + $0x20] sm:$0xff] }
 0x2f2   :  { %2131 = vst.msk [vmem:[#allocation2 + $0x41] sm:$0xff] %vm32_vm0, %v2078_v60  ;;  %v8209_v0 = vpack.i.bf16 %v10794_v51, %v10847_v43  ;;  %v3249_v32 = vrot.slane %v10827_v17, 2  ;;  %v10909_v28 = vpack.c.bf16 %v3075_v47, %v3074_v2  ;;  %v3247_v47 = vsel %vm265_vm2, %v2264_v49, %v3246_v63 }
 0x2f3   :  { %v1872_v26 = vadd.f32 %v6810_v19, %v10728_v53 }
 0x2f4   :  { %v10862_v25 = vld [vmem:[#allocation2 + $0x30] sm:$0xff]  ;;  %v2151_v9 = vld [vmem:[#allocation2 + $0x38] sm:$0x3]  ;;  %8210 = vrot.lane.b32.xlu0 %v8209_v0, %s9304_s28  ;;  %v6811_v20 = vpop.f32.mrb[26].mxu1  ;;  %8215 = vrot.lane.b32.xlu1 %v8214_v40, %s9305_s29  ;;  %v10890_v16 = vsel %vm265_vm2, %v3248_v35, %v3249_v32 }
 0x2f5   :  { %13941 = vst [vmem:[#allocation12_spill] sm:$0xff] %v10862_v25  ;;  %v8219_v57 = vpack.i.bf16 %v10805_v36, %v10862_v25  ;;  %v2017_v30 = vadd.f32 %v10655_v58, %v1872_v26  ;;  %v2273_v14 = vrot.slane %v10862_v25, 2  ;;  %v2274_v41 = vrot.slane %v2151_v9, 2  ;;  %3111 = vst.msk [vmem:[#allocation2 + $0x31] sm:$0xff] %vm32_vm0, %v9412_v3  ;;  %v6812_v24 = vpop.f32.mrb[27].mxu1  ;;  %v10966_v2 = vld [vmem:[#allocation2 + $0x20] sm:$0xff] }
 0x2f6   :  { %v2225_v12 = vrot.slane %v10862_v25, 1  ;;  %v2226_v29 = vrot.slane %v2151_v9, 1  ;;  %v3199_v36 = vsel %vm216_vm3, %v2216_v61, %v3198_v23  ;;  %v10878_v58 = vpack.c.bf16 %v3091_v46, %v3090_v48  ;;  %v3092_v61 = vld [vmem:[%s13877_s3 + $0xa0] sm:$0xff]  ;;  %v3077_v23 = vld [vmem:[%s13877_s3 + $0x28] sm:$0xff]  ;;  %v3095_v48 = vld [vmem:[%s13877_s3 + $0xb8] sm:$0xff] }
 0x2f7   :  { %v2079_v22 = vmax.f32 %v2017_v30, 0.0  ;;  %v6813_v3 = vadd.f32 %v6812_v24, %v6811_v20  ;;  %v10887_v56 = vsel %vm265_vm2, %v2273_v14, %v2274_v41  ;;  %v8234_v1 = vpack.i.bf16 %v3199_v36, %v10890_v16  ;;  %v3078_v9 = vld [vmem:[%s13877_s3 + $0x30] sm:$0xff]  ;;  %v3079_v41 = vld [vmem:[%s13877_s3 + $0x38] sm:$0xff] }
 0x2f8   :  { %7337 = vmatmul.mubr.msk.f32.vlgmr.msra.gmra.mrb[48].mxu0 %vm32_vm0, %v10887_v56  ;;  %v10901_v45 = vsel %vm216_vm3, %v2225_v12, %v2226_v29  ;;  %8220 = vrot.lane.b32.xlu0 %v8219_v57, %s9303_s0  ;;  %v10919_v40 = vpack.c.bf16 %v3093_v37, %v3092_v61  ;;  %v8229_v0 = vpack.i.bf16 %v10847_v43, %v10887_v56 }
 0x2f9   :  { %2132 = vst.msk [vmem:[#allocation2 + $0x51] sm:$0xff] %vm32_vm0, %v2079_v22  ;;  %v1877_v21 = vadd.f32 %v6813_v3, %v10728_v53  ;;  %v8224_v55 = vpack.i.bf16 %v10815_v18, %v10901_v45  ;;  %7579 = vmatpush3.bf16.msra.mxu0 %v10864_v15  ;;  %v10914_v60 = vld [vmem:[#allocation2 + $0x40] sm:$0xff]  ;;  %v2153_v19 = vld [vmem:[#allocation2 + $0x48] sm:$0x3]  ;;  %v10950_v14 = vpack.c.bf16 %v3077_v23, %v3076_v31 }
 0x2fa   :  { %13942 = vst [vmem:[#allocation13_spill] sm:$0xff] %v10914_v60  ;;  %7581 = vmatprep.subr.bf16.mxu0 %v10878_v58  ;;  %v2276_v35 = vrot.slane %v10914_v60, 2  ;;  %v2277_v32 = vrot.slane %v2153_v19, 2  ;;  %3112 = vst.msk [vmem:[#allocation2 + $0x41] sm:$0xff] %vm32_vm0, %v9423_v4  ;;  %v2229_v46 = vrot.slane %v2153_v19, 1  ;;  %v10960_v12 = vpack.c.bf16 %v3095_v48, %v3094_v10  ;;  %v3096_v22 = vld [vmem:[%s13877_s3 + $0xc0] sm:$0xff] }
 0x2fb   :  { %v2022_v26 = vadd.f32 %v10653_v44, %v1877_v21  ;;  %8225 = vrot.lane.b32.xlu1 %v8224_v55, %s9304_s28  ;;  %v2228_v44 = vrot.slane %v10914_v60, 1  ;;  %v3097_v3 = vld [vmem:[%s13877_s3 + $0xc8] sm:$0xff]  ;;  %v8239_v61 = vpack.i.bf16 %v10831_v39, %v10914_v60  ;;  %v10986_v31 = vpack.c.bf16 %v3079_v41, %v3078_v9  ;;  %v3098_v48 = vld [vmem:[%s13877_s3 + $0xd0] sm:$0xff] }
 0x2fc   :  { %8230 = vrot.lane.b32.xlu0 %v8229_v0, %s9305_s29  ;;  %v10943_v4 = vsel %vm265_vm2, %v2276_v35, %v2277_v32  ;;  %v10945_v30 = vld [vmem:[#allocation2 + $0x30] sm:$0xff]  ;;  %v10947_v20 = vld [vmem:[#allocation2 + $0x38] sm:$0x3]  ;;  %v3130_v23 = vld [vmem:[#allocation2 + $0x28] sm:$0x3]  ;;  %v11003_v35 = vpack.c.bf16 %v3097_v3, %v3096_v22  ;;  %v8244_v10 = vpack.i.bf16 %v3247_v47, %v10966_v2  ;;  %v3203_v9 = vrot.slane %v10966_v2, 1 }
 0x2fd   :  { %v2080_v57 = vmax.f32 %v2022_v26, 0.0  ;;  %7583 = vmatpush3.bf16.msra.mxu0 %v10909_v28  ;;  %7339 = vmatprep.mubr.msk.f32.mxu0 %vm32_vm0, %v10943_v4  ;;  %v10958_v24 = vsel %vm216_vm3, %v2228_v44, %v2229_v46  ;;  %v3206_v50 = vrot.slane %v10945_v30, 1  ;;  %v3207_v49 = vrot.slane %v10947_v20, 1  ;;  %v3080_v26 = vld [vmem:[%s13877_s3 + $0x40] sm:$0xff]  ;;  %v3081_v0 = vld [vmem:[%s13877_s3 + $0x48] sm:$0xff]  ;;  %v3099_v44 = vld [vmem:[%s13877_s3 + $0xd8] sm:$0xff] }
 0x2fe   :  { %13943 = vst [vmem:[#allocation14_spill] sm:$0xff] %v10958_v24  ;;  %v8249_v36 = vpack.i.bf16 %v10862_v25, %v10958_v24  ;;  %7585 = vmatprep.subr.bf16.mxu0 %v10919_v40  ;;  %v3200_v41 = vrot.slane %v10825_v52, 1  ;;  %v3201_v3 = vrot.slane %v10827_v17, 1  ;;  %v3083_v17 = vld [vmem:[%s13877_s3 + $0x58] sm:$0xff] }
 0x2ff   :  { %2133 = vst.msk [vmem:[#allocation2 + $0x61] sm:$0xff] %vm32_vm0, %v2080_v57  ;;  %8235 = vrot.lane.b32.xlu1 %v8234_v1, %s9305_s29  ;;  %v6814_v29 = vpop.f32.mrb[28].mxu1  ;;  %v3204_v57 = vrot.slane %v3130_v23, 1  ;;  %v11026_v22 = vsel %vm216_vm3, %v3206_v50, %v3207_v49 }
 0x300   :  { %v6815_v37 = vpop.f32.mrb[29].mxu1  ;;  %v10980_v21 = vld [vmem:[#allocation2 + $0x50] sm:$0xff]  ;;  %v10982_v55 = vld [vmem:[#allocation2 + $0x58] sm:$0x3]  ;;  %8250 = vrot.lane.b32.xlu0 %v8249_v36, %s9304_s28  ;;  %13945 = vst [vmem:[#allocation16_spill] sm:$0xff] %v11026_v22 }
 0x301   :  { %13944 = vst [vmem:[#allocation15_spill] sm:$0xff] %v10980_v21  ;;  %v6816_v19 = vadd.f32 %v6815_v37, %v6814_v29  ;;  %v2279_v1 = vrot.slane %v10980_v21, 2  ;;  %v2280_v63 = vrot.slane %v10982_v55, 2  ;;  %3113 = vst.msk [vmem:[#allocation2 + $0x51] sm:$0xff] %vm32_vm0, %v9428_v5  ;;  %v8269_v39 = vpack.i.bf16 %v10887_v56, %v10980_v21  ;;  %7587 = vmatpush3.bf16.msra.mxu0 %v10950_v14 }
 0x302   :  { %7589 = vmatprep.subr.bf16.mxu0 %v10960_v12  ;;  %v11021_v29 = vpack.c.bf16 %v3081_v0, %v3080_v26 }
 0x303   :  { %v1882_v5 = vadd.f32 %v6816_v19, %v10728_v53  ;;  %8240 = vrot.lane.b32.xlu1 %v8239_v61, %s9303_s0  ;;  %v6817_v56 = vpop.f32.mrb[30].mxu1  ;;  %v11008_v32 = vsel %vm265_vm2, %v2279_v1, %v2280_v63  ;;  %v3082_v61 = vld [vmem:[%s13877_s3 + $0x50] sm:$0xff]  ;;  %v3252_v1 = vrot.slane %v3130_v23, 2  ;;  %v11039_v63 = vpack.c.bf16 %v3099_v44, %v3098_v48  ;;  %v3100_v23 = vld [vmem:[%s13877_s3 + $0xe0] sm:$0xff] }
 0x304   :  { %v6818_v46 = vpop.f32.mrb[31].mxu1  ;;  %7340 = vmatmul.mubr.msk.f32.gmra.mrb[50].mxu0 %vm32_vm0, %v11008_v32  ;;  %8270 = vrot.lane.b32.xlu0 %v8269_v39, %s9303_s0  ;;  %v8284_v39 = vpack.i.bf16 %v10958_v24, %v11008_v32  ;;  %v8289_v44 = vpack.i.bf16 %v10966_v2, %v11026_v22  ;;  %v11074_v24 = vld [vmem:[#allocation2 + $0x40] sm:$0xff] }
 0x305   :  { %v2027_v36 = vadd.f32 %v10659_v13, %v1882_v5  ;;  %v6819_v47 = vadd.f32 %v6818_v46, %v6817_v56  ;;  %7591 = vmatpush3.bf16.msra.mxu0 %v10986_v31  ;;  %v3251_v13 = vrot.slane %v10966_v2, 2  ;;  %v3101_v5 = vld [vmem:[%s13877_s3 + $0xe8] sm:$0xff]  ;;  %v8254_v56 = vpack.i.bf16 %v10901_v45, %v10943_v4 }
 0x306   :  { %v11033_v37 = vld [vmem:[#allocation2 + $0x60] sm:$0xff]  ;;  %v11035_v19 = vld [vmem:[#allocation2 + $0x68] sm:$0x3]  ;;  %7593 = vmatprep.subr.bf16.mxu0 %v11003_v35  ;;  %v11063_v46 = vsel %vm216_vm3, %v3203_v9, %v3204_v57  ;;  %v11080_v9 = vpack.c.bf16 %v3101_v5, %v3100_v23 }
 0x307   :  { %v2081_v50 = vmax.f32 %v2027_v36, 0.0  ;;  %v1887_v49 = vadd.f32 %v6819_v47, %v10728_v53  ;;  %8245 = vrot.lane.b32.xlu1 %v8244_v10, %s9303_s0  ;;  %v6820_v26 = vpop.f32.mrb[32].mxu1  ;;  %v2282_v0 = vrot.slane %v11033_v37, 2  ;;  %3114 = vst.msk [vmem:[#allocation2 + $0x61] sm:$0xff] %vm32_vm0, %v9433_v6  ;;  %v2283_v10 = vrot.slane %v11035_v19, 2  ;;  %13946 = vst [vmem:[#allocation17_spill] sm:$0xff] %v11063_v46 }
 0x308   :  { %v6821_v48 = vpop.f32.mrb[33].mxu1  ;;  %8285 = vrot.lane.b32.xlu0 %v8284_v39, %s9305_s29  ;;  %v11069_v47 = vpack.c.bf16 %v3083_v17, %v3082_v61  ;;  %v11077_v2 = vsel %vm265_vm2, %v3251_v13, %v3252_v1  ;;  %13949 = vst [vmem:[#allocation20_spill] sm:$0xff] %v11080_v9  ;;  %v3085_v57 = vld [vmem:[%s13877_s3 + $0x68] sm:$0xff]  ;;  %v8259_v13 = vpack.i.bf16 %v10825_v52, %v11063_v46 }
 0x309   :  { %2134 = vst.msk [vmem:[#allocation2 + $0x71] sm:$0xff] %vm32_vm0, %v2081_v50  ;;  %v2032_v6 = vadd.f32 %v10657_v33, %v1887_v49  ;;  %v6822_v36 = vadd.f32 %v6821_v48, %v6820_v26  ;;  %7595 = vmatpush3.bf16.msra.mxu0 %v11021_v29  ;;  %v11072_v25 = vsel %vm265_vm2, %v2282_v0, %v2283_v10  ;;  %13948 = vst [vmem:[#allocation19_spill] sm:$0xff] %v11077_v2  ;;  %v3084_v33 = vld [vmem:[%s13877_s3 + $0x60] sm:$0xff]  ;;  %v11094_v1 = vld [vmem:[#allocation2 + $0x48] sm:$0x3] }
 0x30a   :  { %13947 = vst [vmem:[#allocation18_spill] sm:$0xff] %v11069_v47  ;;  %7597 = vmatprep.subr.bf16.mxu0 %v11039_v63  ;;  %7342 = vmatprep.mubr.msk.f32.mxu0 %vm32_vm0, %v11072_v25  ;;  %v3102_v50 = vld [vmem:[%s13877_s3 + $0xf0] sm:$0xff]  ;;  %v3103_v49 = vld [vmem:[%s13877_s3 + $0xf8] sm:$0xff]  ;;  %v11103_v39 = vsel %vm216_vm3, %v3200_v41, %v3201_v3  ;;  %v2234_v26 = vrot.slane %v11033_v37, 1  ;;  %v2235_v0 = vrot.slane %v11035_v19, 1  ;;  %v8304_v5 = vpack.i.bf16 %v11077_v2, %v11074_v24 }
 0x30b   :  { %v2082_v61 = vmax.f32 %v2032_v6, 0.0  ;;  %v1892_v17 = vadd.f32 %v6822_v36, %v10728_v53  ;;  %8255 = vrot.lane.b32.xlu1 %v8254_v56, %s9305_s29  ;;  %v11113_v56 = vpack.c.bf16 %v3085_v57, %v3084_v33  ;;  %v3257_v3 = vrot.slane %v11074_v24, 2  ;;  %v3087_v10 = vld [vmem:[%s13877_s3 + $0x78] sm:$0xff]  ;;  %v11129_v33 = vld [vmem:[#allocation2 + $0x90] sm:$0xff] }
 0x30c   :  { %8290 = vrot.lane.b32.xlu0 %v8289_v44, %s9304_s28  ;;  %v6823_v23 = vpop.f32.mrb[34].mxu1  ;;  %v3258_v48 = vrot.slane %v11094_v1, 2  ;;  %v11118_v19 = vpack.c.bf16 %v3103_v49, %v3102_v50  ;;  %v8264_v36 = vpack.i.bf16 %v11103_v39, %v11077_v2  ;;  %v2354_v50 = vrot.slane %v11129_v33, 2 }
 0x30d   :  { %2135 = vst.msk [vmem:[#allocation2 + $0x81] sm:$0xff] %vm32_vm0, %v2082_v61  ;;  %v2037_v52 = vadd.f32 %v10663_v38, %v1892_v17  ;;  %7599 = vmatpush3.bf16.msra.mxu0 %v11069_v47  ;;  %13950 = vst [vmem:[#allocation21_spill] sm:$0xff] %v11113_v56  ;;  %v6824_v41 = vpop.f32.mrb[35].mxu1  ;;  %v3086_v38 = vld [vmem:[%s13877_s3 + $0x70] sm:$0xff]  ;;  %v11136_v17 = vsel %vm216_vm3, %v2234_v26, %v2235_v0  ;;  %v2231_v0 = vrot.slane %v10980_v21, 1 }
 0x30e   :  { %7601 = vmatprep.subr.bf16.mxu0 %v11080_v9  ;;  %13951 = vst [vmem:[#allocation22_spill] sm:$0xff] %v11118_v19  ;;  %v6825_v6 = vadd.f32 %v6824_v41, %v6823_v23  ;;  %13952 = vst [vmem:[#allocation23_spill] sm:$0xff] %v11136_v17  ;;  %v11146_v23 = vld [vmem:[#allocation2 + $0x98] sm:$0x3]  ;;  %v11149_v26 = vpack.c.bf16 %v3087_v10, %v3086_v38  ;;  %v2232_v41 = vrot.slane %v10982_v55, 1 }
 0x30f   :  { %v2083_v44 = vmax.f32 %v2037_v52, 0.0  ;;  %8260 = vrot.lane.b32.xlu1 %v8259_v13, %s9304_s28  ;;  %v8309_v38 = vpack.i.bf16 %v10980_v21, %v11136_v17  ;;  %v8274_v55 = vpack.i.bf16 %v10890_v16, %v10945_v30  ;;  %v13955_v21 = vld [vmem:[#allocation3_spill] sm:$0xff] }
 0x310   :  { %v11131_v57 = vld [vmem:[#allocation2 + $0x70] sm:$0xff]  ;;  %v11133_v61 = vld [vmem:[#allocation2 + $0x78] sm:$0x3]  ;;  %v1897_v49 = vadd.f32 %v6825_v6, %v10728_v53  ;;  %8305 = vrot.lane.b32.xlu0 %v8304_v5, %s9303_s0  ;;  %13953 = vst [vmem:[#allocation24_spill] sm:$0xff] %v11149_v26  ;;  %v2355_v5 = vrot.slane %v11146_v23, 2 }
 0x311   :  { %2136 = vst.msk [vmem:[#allocation2 + $0xb1] sm:$0xff] %vm32_vm0, %v2083_v44  ;;  %v2285_v13 = vrot.slane %v11131_v57, 2  ;;  %v2286_v52 = vrot.slane %v11133_v61, 2  ;;  %3115 = vst.msk [vmem:[#allocation2 + $0x71] sm:$0xff] %vm32_vm0, %v9444_v7  ;;  %7603 = vmatpush3.bf16.msra.mxu0 %v11113_v56  ;;  %v11154_v44 = vsel %vm265_vm2, %v3257_v3, %v3258_v48 }
 0x312   :  { %13954 = vst [vmem:[#allocation25_spill] sm:$0xff] %v11154_v44  ;;  %7605 = vmatprep.subr.bf16.mxu0 %v11118_v19  ;;  %v2042_v6 = vadd.f32 %v10661_v59, %v1897_v49  ;;  %v3254_v59 = vrot.slane %v10945_v30, 2  ;;  %v8324_v16 = vpack.i.bf16 %v11026_v22, %v11154_v44  ;;  %v11183_v19 = vsel %vm216_vm3, %v2231_v0, %v2232_v41 }
 0x313   :  { %8265 = vrot.lane.b32.xlu1 %v8264_v36, %s9305_s29  ;;  %v6826_v7 = vpop.f32.mrb[36].mxu1  ;;  %v11161_v2 = vsel %vm265_vm2, %v2285_v13, %v2286_v52  ;;  %v3255_v36 = vrot.slane %v10947_v20, 2  ;;  %13956 = vst [vmem:[#allocation3_spill] sm:$0xff] %v11183_v19  ;;  %v3210_v22 = vrot.slane %v11094_v1, 1  ;;  %v8314_v1 = vpack.i.bf16 %v11183_v19, %v11072_v25 }
 0x314   :  { %v11167_v3 = vld [vmem:[#allocation2 + $0x80] sm:$0xff]  ;;  %v6827_v48 = vpop.f32.mrb[37].mxu1  ;;  %7343 = vmatmul.mubr.msk.f32.gmra.mrb[52].mxu0 %vm32_vm0, %v11161_v2  ;;  %v11171_v10 = vld [vmem:[#allocation2 + $0x88] sm:$0x3]  ;;  %v2084_v49 = vmax.f32 %v2042_v6, 0.0  ;;  %8310 = vrot.lane.b32.xlu0 %v8309_v38, %s9304_s28  ;;  %v2356_v6 = vsel %vm265_vm2, %v2354_v50, %v2355_v5  ;;  %v8279_v50 = vpack.i.bf16 %v10914_v60, %v11183_v19 }
 0x315   :  { %v6828_v13 = vadd.f32 %v6827_v48, %v6826_v7  ;;  %v2338_v52 = vrot.slane %v11167_v3, 2  ;;  %3116 = vst.msk [vmem:[#allocation2 + $0x81] sm:$0xff] %vm32_vm0, %v13955_v21  ;;  %7607 = vmatpush3.bf16.msra.mxu0 %v11149_v26  ;;  %v2339_v56 = vrot.slane %v11171_v10, 2  ;;  %v11194_v7 = vsel %vm265_vm2, %v3254_v59, %v3255_v36  ;;  %v13965_v19 = vld [vmem:[#allocation7_spill] sm:$0xff] }
 0x316   :  { %2137 = vst.msk [vmem:[#allocation2 + $0xc1] sm:$0xff] %vm32_vm0, %v2084_v49  ;;  %13957 = vst [vmem:[#allocation26_spill] sm:$0xff] %v11194_v7  ;;  %v8329_v48 = vpack.i.bf16 %v11008_v32, %v11131_v57  ;;  %v8294_v36 = vpack.i.bf16 %v11063_v46, %v11194_v7  ;;  %v11214_v49 = vld [vmem:[#allocation2 + $0x50] sm:$0xff] }
 0x317   :  { %v1902_v20 = vadd.f32 %v6828_v13, %v10728_v53  ;;  %8275 = vrot.lane.b32.xlu1 %v8274_v55, %s9303_s0  ;;  %v11191_v21 = vsel %vm265_vm2, %v2338_v52, %v2339_v56  ;;  %v13959_v56 = vld [vmem:[#allocation4_spill] sm:$0xff]  ;;  %v11216_v13 = vld [vmem:[#allocation2 + $0x58] sm:$0x3] }
 0x318   :  { %v11196_v38 = vld [vmem:[#allocation2 + $0xb0] sm:$0xff]  ;;  %v11198_v0 = vld [vmem:[#allocation2 + $0xb8] sm:$0x3]  ;;  %7345 = vmatprep.mubr.msk.f32.mxu0 %vm32_vm0, %v11191_v21  ;;  %8325 = vrot.lane.b32.xlu0 %v8324_v16, %s9305_s29  ;;  %v6829_v55 = vpop.f32.mrb[38].mxu1 }
 0x319   :  { %13958 = vst [vmem:[#allocation27_spill] sm:$0xff] %v11196_v38  ;;  %v2047_v41 = vadd.f32 %v10667_v54, %v1902_v20  ;;  %3117 = vst.msk [vmem:[#allocation2 + $0xb1] sm:$0xff] %vm32_vm0, %v13959_v56  ;;  %v6830_v5 = vpop.f32.mrb[39].mxu1  ;;  %7346 = vmatmul.mubr.msk.f32.gmra.mrb[54].mxu0 %vm32_vm0, %v2356_v6  ;;  %v3212_v20 = vrot.slane %v11214_v49, 1  ;;  %v3213_v6 = vrot.slane %v11216_v13, 1 }
 0x31a   :  { %v6831_v54 = vadd.f32 %v6830_v5, %v6829_v55 }
 0x31b   :  { %v2085_v59 = vmax.f32 %v2047_v41, 0.0  ;;  %8280 = vrot.lane.b32.xlu1 %v8279_v50, %s9304_s28  ;;  %v8344_v41 = vpack.i.bf16 %v11136_v17, %v11161_v2  ;;  %v8299_v17 = vpack.i.bf16 %v10943_v4, %v11033_v37 }
 0x31c   :  { %v1907_v52 = vadd.f32 %v6831_v54, %v10728_v53  ;;  %8330 = vrot.lane.b32.xlu0 %v8329_v48, %s9303_s0  ;;  %v13961_v48 = vld [vmem:[#allocation5_spill] sm:$0xff]  ;;  %v3209_v54 = vrot.slane %v11074_v24, 1 }
 0x31d   :  { %2138 = vst.msk [vmem:[#allocation2 + $0xd1] sm:$0xff] %vm32_vm0, %v2085_v59  ;;  %v11221_v16 = vld [vmem:[#allocation2 + $0xc0] sm:$0xff]  ;;  %v11223_v32 = vld [vmem:[#allocation2 + $0xc8] sm:$0x3] }
 0x31e   :  { %13960 = vst [vmem:[#allocation4_spill] sm:$0xff] %v11221_v16  ;;  %v2052_v55 = vadd.f32 %v10665_v34, %v1907_v52  ;;  %v2294_v56 = vrot.slane %v11221_v16, 2  ;;  %v2295_v5 = vrot.slane %v11223_v32, 2  ;;  %3118 = vst.msk [vmem:[#allocation2 + $0xc1] sm:$0xff] %vm32_vm0, %v13961_v48  ;;  %v11246_v52 = vsel %vm216_vm3, %v3212_v20, %v3213_v6 }
 0x31f   :  { %8295 = vrot.lane.b32.xlu1 %v8294_v36, %s9305_s29  ;;  %v6832_v50 = vpop.f32.mrb[40].mxu1  ;;  %v8349_v48 = vpack.i.bf16 %v11161_v2, %v11129_v33 }
 0x320   :  { %v6833_v59 = vpop.f32.mrb[41].mxu1  ;;  %v2086_v60 = vmax.f32 %v2052_v55, 0.0  ;;  %8345 = vrot.lane.b32.xlu0 %v8344_v41, %s9305_s29  ;;  %v11241_v36 = vsel %vm265_vm2, %v2294_v56, %v2295_v5  ;;  %v8354_v56 = vpack.i.bf16 %v11074_v24, %v11246_v52  ;;  %v2316_v24 = vrot.slane %v11167_v3, 1 }
 0x321   :  { %v6834_v34 = vadd.f32 %v6833_v59, %v6832_v50  ;;  %7348 = vmatprep.mubr.msk.f32.mxu0 %vm32_vm0, %v11241_v36  ;;  %v11260_v50 = vsel %vm216_vm3, %v3209_v54, %v3210_v22  ;;  %v11270_v59 = vld [vmem:[#allocation2 + $0x60] sm:$0xff] }
 0x322   :  { %2139 = vst.msk [vmem:[#allocation2 + $0xe1] sm:$0xff] %vm32_vm0, %v2086_v60  ;;  %v11272_v22 = vld [vmem:[#allocation2 + $0xa0] sm:$0xff] }
 0x323   :  { %v1912_v4 = vadd.f32 %v6834_v34, %v10728_v53  ;;  %8300 = vrot.lane.b32.xlu1 %v8299_v17, %s9303_s0  ;;  %v13963_v17 = vld [vmem:[#allocation6_spill] sm:$0xff] }
 0x324   :  { %v11255_v41 = vld [vmem:[#allocation2 + $0xd0] sm:$0xff]  ;;  %v11257_v55 = vld [vmem:[#allocation2 + $0xd8] sm:$0x3]  ;;  %8350 = vrot.lane.b32.xlu0 %v8349_v48, %s9303_s0  ;;  %v6835_v2 = vpop.f32.mrb[42].mxu1  ;;  %v8319_v48 = vpack.i.bf16 %v10945_v30, %v11260_v50 }
 0x325   :  { %13962 = vst [vmem:[#allocation5_spill] sm:$0xff] %v11255_v41  ;;  %v2057_v20 = vadd.f32 %v10671_v62, %v1912_v4  ;;  %v2297_v60 = vrot.slane %v11255_v41, 2  ;;  %v2298_v6 = vrot.slane %v11257_v55, 2  ;;  %3119 = vst.msk [vmem:[#allocation2 + $0xd1] sm:$0xff] %vm32_vm0, %v13963_v17  ;;  %v6836_v5 = vpop.f32.mrb[43].mxu1  ;;  %v2317_v4 = vrot.slane %v11171_v10, 1 }
 0x326   :  { %v6837_v62 = vadd.f32 %v6836_v5, %v6835_v2  ;;  %v11289_v2 = vld [vmem:[#allocation2 + $0xa8] sm:$0x3]  ;;  %v8334_v5 = vpack.i.bf16 %v11194_v7, %v11214_v49 }
 0x327   :  { %v2087_v54 = vmax.f32 %v2057_v20, 0.0  ;;  %8315 = vrot.lane.b32.xlu1 %v8314_v1, %s9305_s29  ;;  %v11276_v34 = vsel %vm265_vm2, %v2297_v60, %v2298_v6  ;;  %v8374_v1 = vpack.i.bf16 %v11154_v44, %v11270_v59  ;;  %v2237_v60 = vrot.slane %v11131_v57, 1 }
 0x328   :  { %7349 = vmatmul.mubr.msk.f32.gmra.mrb[56].mxu0 %vm32_vm0, %v11276_v34  ;;  %v1917_v20 = vadd.f32 %v6837_v62, %v10728_v53  ;;  %8355 = vrot.lane.b32.xlu0 %v8354_v56, %s9304_s28  ;;  %v2238_v6 = vrot.slane %v11133_v61, 1  ;;  %v3260_v56 = vrot.slane %v11214_v49, 2  ;;  %v3261_v61 = vrot.slane %v11216_v13, 2 }
 0x329   :  { %2140 = vst.msk [vmem:[#allocation2 + $0xf1] sm:$0xff] %vm32_vm0, %v2087_v54  ;;  %v11294_v17 = vld [vmem:[#allocation2 + $0xe0] sm:$0xff]  ;;  %v11296_v10 = vld [vmem:[#allocation2 + $0xe8] sm:$0x3]  ;;  %v11309_v46 = vsel %vm216_vm3, %v2316_v24, %v2317_v4  ;;  %v2241_v7 = vrot.slane %v11289_v2, 1  ;;  %v2246_v4 = vrot.slane %v11221_v16, 1 }
 0x32a   :  { %13964 = vst [vmem:[#allocation6_spill] sm:$0xff] %v11294_v17  ;;  %v2062_v54 = vadd.f32 %v10669_v42, %v1917_v20  ;;  %v2300_v30 = vrot.slane %v11294_v17, 2  ;;  %v2301_v44 = vrot.slane %v11296_v10, 2  ;;  %3120 = vst.msk [vmem:[#allocation2 + $0xe1] sm:$0xff] %vm32_vm0, %v13965_v19  ;;  %v2291_v42 = vrot.slane %v11196_v38, 2 }
 0x32b   :  { %8320 = vrot.lane.b32.xlu1 %v8319_v48, %s9304_s28  ;;  %v6838_v62 = vpop.f32.mrb[44].mxu1  ;;  %v2292_v48 = vrot.slane %v11198_v0, 2  ;;  %v11319_v19 = vsel %vm216_vm3, %v2237_v60, %v2238_v6  ;;  %v11329_v24 = vsel %vm265_vm2, %v3260_v56, %v3261_v61  ;;  %v13967_v60 = vrot.slane %v11272_v22, 1  ;;  %v13968_v61 = vld [vmem:[#allocation8_spill] sm:$0xff] }
 0x32c   :  { %v6839_v26 = vpop.f32.mrb[45].mxu1  ;;  %v2088_v20 = vmax.f32 %v2062_v54, 0.0  ;;  %8375 = vrot.lane.b32.xlu0 %v8374_v1, %s9303_s0  ;;  %v11316_v47 = vsel %vm265_vm2, %v2300_v30, %v2301_v44  ;;  %v2247_v1 = vrot.slane %v11223_v32, 1  ;;  %v8339_v54 = vpack.i.bf16 %v11033_v37, %v11319_v19 }
 0x32d   :  { %v6840_v9 = vadd.f32 %v6839_v26, %v6838_v62  ;;  %7351 = vmatprep.mubr.msk.f32.mxu0 %vm32_vm0, %v11316_v47  ;;  %v8379_v26 = vpack.i.bf16 %v11131_v57, %v11309_v46  ;;  %v2242_v6 = vsel %vm216_vm3, %v13967_v60, %v2241_v7  ;;  %v8359_v7 = vpack.i.bf16 %v11260_v50, %v11329_v24 }
 0x32e   :  { %2141 = vst.msk [vmem:[#allocation2 + $0x101] sm:$0xff] %vm32_vm0, %v2088_v20 }
 0x32f   :  { %8335 = vrot.lane.b32.xlu1 %v8334_v5, %s9303_s0  ;;  %v1922_v13 = vadd.f32 %v6840_v9, %v10728_v53  ;;  %v2293_v9 = vsel %vm265_vm2, %v2291_v42, %v2292_v48 }
 0x330   :  { %v11331_v44 = vld [vmem:[#allocation2 + $0xf0] sm:$0xff]  ;;  %v11335_v30 = vld [vmem:[#allocation2 + $0xf8] sm:$0x3]  ;;  %8380 = vrot.lane.b32.xlu0 %v8379_v26, %s9304_s28  ;;  %v6841_v56 = vpop.f32.mrb[46].mxu1  ;;  %v11356_v26 = vsel %vm216_vm3, %v2246_v4, %v2247_v1 }
 0x331   :  { %13966 = vst [vmem:[#allocation7_spill] sm:$0xff] %v11331_v44  ;;  %v2067_v5 = vadd.f32 %v10675_v27, %v1922_v13  ;;  %v2303_v62 = vrot.slane %v11331_v44, 2  ;;  %v2304_v32 = vrot.slane %v11335_v30, 2  ;;  %3121 = vst.msk [vmem:[#allocation2 + $0xf1] sm:$0xff] %vm32_vm0, %v13968_v61  ;;  %v6842_v20 = vpop.f32.mrb[47].mxu1  ;;  %v8389_v13 = vpack.i.bf16 %v2242_v6, %v2293_v9 }
 0x332   :  { %v6843_v48 = vadd.f32 %v6842_v20, %v6841_v56  ;;  %13969 = vst [vmem:[#allocation8_spill] sm:$0xff] %v11356_v26  ;;  %v2349_v56 = vrot.slane %v11146_v23, 1  ;;  %v8399_v1 = vpack.i.bf16 %v11196_v38, %v11356_v26  ;;  %v8409_v20 = vpack.i.bf16 %v2293_v9, %v11255_v41 }
 0x333   :  { %v2089_v42 = vmax.f32 %v2067_v5, 0.0  ;;  %8340 = vrot.lane.b32.xlu1 %v8339_v54, %s9304_s28  ;;  %v11353_v27 = vsel %vm265_vm2, %v2303_v62, %v2304_v32  ;;  %v2348_v5 = vrot.slane %v11129_v33, 1  ;;  %v13971_v32 = vld [vmem:[#allocation9_spill] sm:$0xff]  ;;  %v8364_v33 = vpack.i.bf16 %v11072_v25, %v11167_v3 }
 0x334   :  { %7352 = vmatmul.mubr.msk.f32.gmra.mrb[58].mxu0 %vm32_vm0, %v11353_v27  ;;  %v1927_v60 = vadd.f32 %v6843_v48, %v10728_v53  ;;  %8390 = vrot.lane.b32.xlu0 %v8389_v13, %s9305_s29  ;;  %v2252_v25 = vrot.slane %v11294_v17, 1  ;;  %v13908_v9 = vrot.slane %v11272_v22, 2 }
 0x335   :  { %2142 = vst.msk [vmem:[#allocation2 + $0x111] sm:$0xff] %vm32_vm0, %v2089_v42  ;;  %v11365_v54 = vld [vmem:[#allocation2 + $0x100] sm:$0xff]  ;;  %v11367_v62 = vld [vmem:[#allocation2 + $0x108] sm:$0x3]  ;;  %v2350_v61 = vsel %vm216_vm3, %v2348_v5, %v2349_v56  ;;  %v2253_v42 = vrot.slane %v11296_v10, 1  ;;  %v13973_v56 = vld [vmem:[#allocation10_spill] sm:$0xff]  ;;  %v8419_v10 = vpack.i.bf16 %v11356_v26, %v11276_v34 }
 0x336   :  { %13970 = vst [vmem:[#allocation28_spill] sm:$0xff] %v11365_v54  ;;  %v2072_v4 = vadd.f32 %v10673_v8, %v1927_v60  ;;  %v2306_v6 = vrot.slane %v11365_v54, 2  ;;  %v2307_v53 = vrot.slane %v11367_v62, 2  ;;  %3122 = vst.msk [vmem:[#allocation2 + $0x101] sm:$0xff] %vm32_vm0, %v13971_v32  ;;  %v8369_v13 = vpack.i.bf16 %v11167_v3, %v2350_v61 }
 0x337   :  { %8360 = vrot.lane.b32.xlu1 %v8359_v7, %s9305_s29 }
 0x338   :  { %v2090_v23 = vmax.f32 %v2072_v4, 0.0  ;;  %8400 = vrot.lane.b32.xlu0 %v8399_v1, %s9304_s28  ;;  %v11381_v8 = vsel %vm265_vm2, %v2306_v6, %v2307_v53  ;;  %v2289_v4 = vrot.slane %v11289_v2, 2  ;;  %v11406_v1 = vld [vmem:[#allocation2 + $0x130] sm:$0xff]  ;;  %v11411_v6 = vld [vmem:[#allocation2 + $0x138] sm:$0x3]  ;;  %v11414_v53 = vsel %vm216_vm3, %v2252_v25, %v2253_v42 }
 0x339   :  { %7354 = vmatprep.mubr.msk.f32.mxu0 %vm32_vm0, %v11381_v8  ;;  %13974 = vst [vmem:[#allocation10_spill] sm:$0xff] %v11414_v53  ;;  %v2357_v2 = vrot.slane %v11406_v1, 2  ;;  %v2358_v32 = vrot.slane %v11411_v6, 2  ;;  %v8429_v25 = vpack.i.bf16 %v11255_v41, %v11414_v53 }
 0x33a   :  { %2143 = vst.msk [vmem:[#allocation2 + $0x121] sm:$0xff] %vm32_vm0, %v2090_v23 }
 0x33b   :  { %8365 = vrot.lane.b32.xlu1 %v8364_v33, %s9303_s0  ;;  %v8384_v33 = vpack.i.bf16 %v11319_v19, %v11191_v21  ;;  %v2243_v21 = vrot.slane %v11196_v38, 1 }
 0x33c   :  { %v11389_v7 = vld [vmem:[#allocation2 + $0x110] sm:$0xff]  ;;  %v11393_v48 = vld [vmem:[#allocation2 + $0x118] sm:$0x3]  ;;  %8410 = vrot.lane.b32.xlu0 %v8409_v20, %s9303_s0  ;;  %v2290_v20 = vsel %vm265_vm2, %v13908_v9, %v2289_v4  ;;  %v2250_v9 = vrot.slane %v11257_v55, 1 }
 0x33d   :  { %13972 = vst [vmem:[#allocation9_spill] sm:$0xff] %v11389_v7  ;;  %v2309_v60 = vrot.slane %v11389_v7, 2  ;;  %v2310_v5 = vrot.slane %v11393_v48, 2  ;;  %3123 = vst.msk [vmem:[#allocation2 + $0x111] sm:$0xff] %vm32_vm0, %v13973_v56  ;;  %v2359_v56 = vsel %vm265_vm2, %v2357_v2, %v2358_v32  ;;  %v2258_v2 = vrot.slane %v11365_v54, 1 }
 0x33e   :  { %v2259_v32 = vrot.slane %v11367_v62, 1 }
 0x33f   :  { %8370 = vrot.lane.b32.xlu1 %v8369_v13, %s9304_s28  ;;  %v11409_v3 = vsel %vm265_vm2, %v2309_v60, %v2310_v5  ;;  %v13975_v60 = vld [vmem:[#allocation11_spill] sm:$0xff]  ;;  %v2244_v5 = vrot.slane %v11198_v0, 1 }
 0x340   :  { %7355 = vmatmul.mubr.msk.f32.gmra.mrb[60].mxu0 %vm32_vm0, %v11409_v3  ;;  %8420 = vrot.lane.b32.xlu0 %v8419_v10, %s9305_s29  ;;  %v8394_v10 = vpack.i.bf16 %v2290_v20, %v11221_v16 }
 0x341   :  { %v11423_v23 = vld [vmem:[#allocation2 + $0x120] sm:$0xff]  ;;  %v2181_v61 = vld [vmem:[#allocation2 + $0x128] sm:$0x3]  ;;  %v11451_v0 = vsel %vm216_vm3, %v2243_v21, %v2244_v5  ;;  %v2256_v21 = vrot.slane %v11335_v30, 1  ;;  %v8469_v5 = vpack.i.bf16 %v11353_v27, %v11389_v7 }
 0x342   :  { %v2341_v42 = vrot.slane %v11423_v23, 2  ;;  %v2342_v13 = vrot.slane %v2181_v61, 2  ;;  %3124 = vst.msk [vmem:[#allocation2 + $0x121] sm:$0xff] %vm32_vm0, %v13975_v60  ;;  %v8439_v60 = vpack.i.bf16 %v11276_v34, %v11331_v44  ;;  %v8404_v55 = vpack.i.bf16 %v11451_v0, %v11241_v36 }
 0x343   :  { %8385 = vrot.lane.b32.xlu1 %v8384_v33, %s9305_s29  ;;  %v2249_v33 = vrot.slane %v11255_v41, 1  ;;  %v8449_v34 = vpack.i.bf16 %v11414_v53, %v11353_v27  ;;  %v11494_v27 = vld [vmem:[#allocation2 + $0x100] sm:$0xff] }
 0x344   :  { %8430 = vrot.lane.b32.xlu0 %v8429_v25, %s9304_s28  ;;  %v11439_v4 = vsel %vm265_vm2, %v2341_v42, %v2342_v13  ;;  %v11465_v25 = vsel %vm216_vm3, %v2258_v2, %v2259_v32  ;;  %v2255_v13 = vrot.slane %v11331_v44, 1  ;;  %v2319_v2 = vrot.slane %v11423_v23, 1 }
 0x345   :  { %7357 = vmatprep.mubr.msk.f32.mxu0 %vm32_vm0, %v11439_v4  ;;  %v11459_v20 = vsel %vm216_vm3, %v2249_v33, %v2250_v9  ;;  %13977 = vst [vmem:[#allocation29_spill] sm:$0xff] %v11465_v25  ;;  %v8459_v42 = vpack.i.bf16 %v11331_v44, %v11465_v25  ;;  %v8424_v9 = vpack.i.bf16 %v11241_v36, %v11294_v17  ;;  %v11487_v36 = vld [vmem:[#allocation2 + $0xf0] sm:$0xff]  ;;  %v11489_v33 = vld [vmem:[#allocation2 + $0xf8] sm:$0x3]  ;;  %v2320_v32 = vrot.slane %v2181_v61, 1 }
 0x346   :  { %7358 = vmatmul.mubr.msk.f32.gmra.mrb[62].mxu0 %vm32_vm0, %v2359_v56  ;;  %13976 = vst [vmem:[#allocation11_spill] sm:$0xff] %v11459_v20  ;;  %v8414_v62 = vpack.i.bf16 %v11221_v16, %v11459_v20  ;;  %v8434_v56 = vpack.i.bf16 %v11459_v20, %v11316_v47  ;;  %v8479_v30 = vpack.i.bf16 %v11465_v25, %v11409_v3  ;;  %v3160_v61 = vld [vmem:[#allocation2 + $0x118] sm:$0x3] }
 0x347   :  { %8395 = vrot.lane.b32.xlu1 %v8394_v10, %s9303_s0  ;;  %v11485_v10 = vsel %vm216_vm3, %v2255_v13, %v2256_v21  ;;  %v8484_v13 = vpack.i.bf16 %v11409_v3, %v11406_v1  ;;  %v11509_v21 = vld [vmem:[#allocation2 + $0x110] sm:$0xff]  ;;  %v2262_v3 = vrot.slane %v11393_v48, 1 }
 0x348   :  { %8440 = vrot.lane.b32.xlu0 %v8439_v60, %s9303_s0  ;;  %13978 = vst [vmem:[#allocation30_spill] sm:$0xff] %v11485_v10  ;;  %v11496_v60 = vld [vmem:[#allocation2 + $0x108] sm:$0x3]  ;;  %v3242_v25 = vrot.slane %v11509_v21, 1 }
 0x34b   :  { %8405 = vrot.lane.b32.xlu1 %v8404_v55, %s9305_s29  ;;  %v8444_v55 = vpack.i.bf16 %v11294_v17, %v11485_v10  ;;  %v3243_v17 = vrot.slane %v3160_v61, 1 }
 0x34c   :  { %8450 = vrot.lane.b32.xlu0 %v8449_v34, %s9305_s29  ;;  %v3236_v34 = vrot.slane %v11487_v36, 1 }
 0x34f   :  { %8415 = vrot.lane.b32.xlu1 %v8414_v62, %s9304_s28  ;;  %v3237_v62 = vrot.slane %v11489_v33, 1 }
 0x350   :  { %8460 = vrot.lane.b32.xlu0 %v8459_v42, %s9304_s28  ;;  %v3287_v42 = vrot.slane %v11494_v27, 2 }
 0x351   :  { %v11519_v44 = vsel %vm216_vm3, %v3236_v34, %v3237_v62  ;;  %v8464_v34 = vpack.i.bf16 %v11485_v10, %v11381_v8  ;;  %v3164_v10 = vld [vmem:[#allocation2 + $0x138] sm:$0x3] }
 0x353   :  { %8425 = vrot.lane.b32.xlu1 %v8424_v9, %s9303_s0  ;;  %v3288_v9 = vrot.slane %v11496_v60, 2 }
 0x354   :  { %8470 = vrot.lane.b32.xlu0 %v8469_v5, %s9303_s0  ;;  %v11512_v5 = vsel %vm216_vm3, %v2319_v2, %v2320_v32  ;;  %v3290_v2 = vrot.slane %v11509_v21, 2  ;;  %v3291_v32 = vrot.slane %v3160_v61, 2 }
 0x355   :  { %13979 = vst [vmem:[#allocation31_spill] sm:$0xff] %v11512_v5 }
 0x357   :  { %8435 = vrot.lane.b32.xlu1 %v8434_v56, %s9305_s29  ;;  %v8454_v56 = vpack.i.bf16 %v11316_v47, %v11365_v54  ;;  %v8499_v47 = vpack.i.bf16 %v11389_v7, %v11512_v5 }
 0x358   :  { %8480 = vrot.lane.b32.xlu0 %v8479_v30, %s9305_s29  ;;  %v2261_v30 = vrot.slane %v11389_v7, 1 }
 0x35b   :  { %8445 = vrot.lane.b32.xlu1 %v8444_v55, %s9304_s28  ;;  %v11523_v55 = vsel %vm265_vm2, %v3287_v42, %v3288_v9  ;;  %v11536_v42 = vsel %vm216_vm3, %v2261_v30, %v2262_v3  ;;  %v11539_v9 = vsel %vm216_vm3, %v3242_v25, %v3243_v17  ;;  %v8489_v30 = vpack.i.bf16 %v11381_v8, %v11423_v23 }
 0x35c   :  { %8485 = vrot.lane.b32.xlu0 %v8484_v13, %s9303_s0  ;;  %v8509_v62 = vpack.i.bf16 %v11519_v44, %v11523_v55  ;;  %v2351_v13 = vrot.slane %v11406_v1, 1  ;;  %v8474_v17 = vpack.i.bf16 %v11365_v54, %v11536_v42  ;;  %v8519_v25 = vpack.i.bf16 %v11494_v27, %v11539_v9 }
 0x35f   :  { %8455 = vrot.lane.b32.xlu1 %v8454_v56, %s9303_s0  ;;  %v2352_v56 = vrot.slane %v11411_v6, 1 }
 0x360   :  { %8500 = vrot.lane.b32.xlu0 %v8499_v47, %s9304_s28  ;;  %v8201_v48 = vpop.permute.xlu0 %8200  ;;  %v11545_v47 = vsel %vm265_vm2, %v3290_v2, %v3291_v32 }
 0x361   :  { %v8203_v7 = vunpack.i.h.bf16 %v8201_v48  ;;  %v8202_v5 = vunpack.i.l.bf16 %v8201_v48  ;;  %v8534_v2 = vpack.i.bf16 %v11545_v47, %v11406_v1  ;;  %v2353_v32 = vsel %vm216_vm3, %v2351_v13, %v2352_v56  ;;  %v11558_v48 = vld [vmem:[#allocation2] sm:$0xff] }
 0x362   :  { %v8206_v61 = vpop.permute.xlu1 %8205  ;;  %v11567_v56 = vld [vmem:[#allocation2 + $0x120] sm:$0xff] }
 0x363   :  { %8465 = vrot.lane.b32.xlu1 %v8464_v34, %s9305_s29  ;;  %v8208_v41 = vunpack.i.h.bf16 %v8206_v61  ;;  %v8207_v53 = vunpack.i.l.bf16 %v8206_v61  ;;  %v3333_v34 = vrot.slane %v3164_v10, 1  ;;  %v2696_v8 = vsel %vm32_vm0, %v10834_v11, %v8202_v5 }
 0x364   :  { %8510 = vrot.lane.b32.xlu0 %v8509_v62, %s9305_s29  ;;  %v2648_v62 = vsel %vm32_vm0, %v11558_v48, %v8203_v7  ;;  %v3162_v7 = vld [vmem:[#allocation2 + $0x128] sm:$0x3]  ;;  %v3284_v5 = vrot.slane %v11487_v36, 2 }
 0x365   :  { %v2664_v1 = vsel %vm666_vm4, %v2648_v62, %v8208_v41  ;;  %v3334_v11 = vsel %vm216_vm3, %v2351_v13, %v3333_v34  ;;  %v8494_v41 = vpack.i.bf16 %v11423_v23, %v2353_v32  ;;  %v3300_v34 = vrot.slane %v11567_v56, 1 }
 0x366   :  { %v8211_v6 = vpop.permute.xlu0 %8210  ;;  %v8216_v3 = vpop.permute.xlu1 %8215  ;;  %v8504_v62 = vpack.i.bf16 %v11536_v42, %v11439_v4 }
 0x367   :  { %8475 = vrot.lane.b32.xlu1 %v8474_v17, %s9304_s28  ;;  %v8213_v61 = vunpack.i.h.bf16 %v8211_v6  ;;  %v8212_v54 = vunpack.i.l.bf16 %v8211_v6  ;;  %v8218_v16 = vunpack.i.h.bf16 %v8216_v3  ;;  %v8217_v20 = vunpack.i.l.bf16 %v8216_v3 }
 0x368   :  { %8520 = vrot.lane.b32.xlu0 %v8519_v25, %s9304_s28  ;;  %v2712_v17 = vsel %vm666_vm4, %v2696_v8, %v8207_v53  ;;  %v3285_v25 = vrot.slane %v11489_v33, 2  ;;  %v3301_v33 = vrot.slane %v3162_v7, 1  ;;  %v3138_v8 = vld [vmem:[#allocation2 + $0x68] sm:$0x3] }
 0x369   :  { %v2728_v10 = vsel %vm683_vm5, %v2712_v17, %v8212_v54  ;;  %v2680_v38 = vsel %vm683_vm5, %v2664_v1, %v8213_v61  ;;  %v8539_v54 = vpack.i.bf16 %v11523_v55, %v11567_v56  ;;  %v2649_v13 = vsel %vm32_vm0, %v10794_v51, %v8218_v16 }
 0x36a   :  { %v8221_v26 = vpop.permute.xlu0 %8220  ;;  %2846 = vmatprep.mubr.f32.mxu1 %v2728_v10  ;;  %v3240_v51 = vrot.slane %v11496_v60, 1  ;;  %v8544_v61 = vpack.i.bf16 %v11567_v56, %v3334_v11  ;;  %v11603_v60 = vsel %vm216_vm3, %v3300_v34, %v3301_v33  ;;  %v3322_v17 = vrot.slane %v11567_v56, 2 }
 0x36b   :  { %8490 = vrot.lane.b32.xlu1 %v8489_v30, %s9303_s0  ;;  %v8223_v53 = vunpack.i.h.bf16 %v8221_v26  ;;  %v8222_v6 = vunpack.i.l.bf16 %v8221_v26  ;;  %2847 = vmatmul.mubr.f32.vlgmr.msra.gmra.mrb[48].mxu1 %v2680_v38  ;;  %v2697_v30 = vsel %vm32_vm0, %v10847_v43, %v8217_v20  ;;  %v3239_v43 = vrot.slane %v11494_v27, 1 }
 0x36c   :  { %8535 = vrot.lane.b32.xlu0 %v8534_v2, %s9303_s0  ;;  %7704 = vmatpush3.bf16.msra.mxu1 %v10864_v15  ;;  %v11594_v15 = vsel %vm265_vm2, %v3284_v5, %v3285_v25  ;;  %v3323_v1 = vrot.slane %v3162_v7, 2  ;;  %v3215_v11 = vrot.slane %v11270_v59, 1  ;;  %v8549_v7 = vpack.i.bf16 %v11509_v21, %v11603_v60 }
 0x36d   :  { %v8226_v3 = vpop.permute.xlu1 %8225  ;;  %v2713_v23 = vsel %vm666_vm4, %v2697_v30, %v8222_v6  ;;  %v2665_v32 = vsel %vm666_vm4, %v2649_v13, %v8223_v53  ;;  %7697 = vmatprep.subr.bf16.mxu1 %v10878_v58  ;;  %v8514_v4 = vpack.i.bf16 %v11594_v15, %v11509_v21  ;;  %v11610_v53 = vsel %vm216_vm3, %v3239_v43, %v3240_v51 }
 0x36e   :  { %v8228_v38 = vunpack.i.h.bf16 %v8226_v3  ;;  %v8227_v26 = vunpack.i.l.bf16 %v8226_v3  ;;  %v8231_v2 = vpop.permute.xlu0 %8230  ;;  %v3216_v6 = vrot.slane %v3138_v8, 1  ;;  %v8524_v13 = vpack.i.bf16 %v11610_v53, %v11545_v47 }
 0x36f   :  { %8495 = vrot.lane.b32.xlu1 %v8494_v41, %s9304_s28  ;;  %v8233_v10 = vunpack.i.h.bf16 %v8231_v2  ;;  %v8232_v5 = vunpack.i.l.bf16 %v8231_v2  ;;  %v3263_v41 = vrot.slane %v11270_v59, 2 }
 0x370   :  { %v2729_v16 = vsel %vm683_vm5, %v2713_v23, %v8227_v26  ;;  %v2681_v20 = vsel %vm683_vm5, %v2665_v32, %v8228_v38  ;;  %8540 = vrot.lane.b32.xlu0 %v8539_v54, %s9303_s0  ;;  %7705 = vmatpush3.bf16.msra.mxu1 %v10909_v28  ;;  %v3264_v54 = vrot.slane %v3138_v8, 2  ;;  %v11622_v28 = vsel %vm265_vm2, %v3322_v17, %v3323_v1  ;;  %v11631_v26 = vld [vmem:[#allocation2 + $0x70] sm:$0xff]  ;;  %v3140_v23 = vld [vmem:[#allocation2 + $0x78] sm:$0x3]  ;;  %v11655_v1 = vld [vmem:[#allocation2 + $0x80] sm:$0xff] }
 0x371   :  { %v11599_v58 = vpop.permute.xlu1 %8235  ;;  %2851 = vmatprep.mubr.f32.mxu1 %v2729_v16  ;;  %7698 = vmatprep.subr.bf16.mxu1 %v10919_v40  ;;  %13980 = vst [vmem:[#allocation32_spill] sm:$0xff] %v11622_v28  ;;  %v2698_v21 = vsel %vm32_vm0, %v10901_v45, %v8232_v5  ;;  %v2650_v38 = vsel %vm32_vm0, %v10815_v18, %v8233_v10  ;;  %v3266_v8 = vrot.slane %v11631_v26, 2  ;;  %v3267_v17 = vrot.slane %v3140_v23, 2  ;;  %v3142_v10 = vld [vmem:[#allocation2 + $0x88] sm:$0x3] }
 0x372   :  { %2852 = vmatmul.mubr.f32.gmra.mrb[50].mxu1 %v2681_v20  ;;  %v8251_v25 = vpop.permute.xlu0 %8250  ;;  %v11637_v43 = vsel %vm216_vm3, %v3215_v11, %v3216_v6  ;;  %v8554_v16 = vpack.i.bf16 %v11539_v9, %v11622_v28  ;;  %v3218_v20 = vrot.slane %v11631_v26, 1  ;;  %v3144_v11 = vld [vmem:[#allocation2 + $0x98] sm:$0x3]  ;;  %v8237_v6 = vunpack.i.l.bf16 %v11599_v58 }
 0x373   :  { %8505 = vrot.lane.b32.xlu1 %v8504_v62, %s9305_s29  ;;  %v8253_v34 = vunpack.i.h.bf16 %v8251_v25  ;;  %v8252_v33 = vunpack.i.l.bf16 %v8251_v25  ;;  %v3219_v62 = vrot.slane %v3140_v23, 1  ;;  %v3320_v23 = vrot.slane %v3142_v10, 2 }
 0x374   :  { %8545 = vrot.lane.b32.xlu0 %v8544_v61, %s9304_s28  ;;  %7706 = vmatpush3.bf16.msra.mxu1 %v10950_v14  ;;  %v11646_v14 = vsel %vm265_vm2, %v3263_v41, %v3264_v54 }
 0x375   :  { %v8241_v56 = vpop.permute.xlu1 %8240  ;;  %7699 = vmatprep.subr.bf16.mxu1 %v10960_v12  ;;  %v8529_v12 = vpack.i.bf16 %v11214_v49, %v11637_v43  ;;  %v8559_v25 = vpack.i.bf16 %v11246_v52, %v11646_v14  ;;  %v8238_v49 = vunpack.i.h.bf16 %v11599_v58 }
 0x376   :  { %v8243_v3 = vunpack.i.h.bf16 %v8241_v56  ;;  %v8242_v30 = vunpack.i.l.bf16 %v8241_v56  ;;  %v11624_v40 = vpop.permute.xlu0 %8270  ;;  %v8564_v56 = vpack.i.bf16 %v11329_v24, %v11631_v26 }
 0x377   :  { %8515 = vrot.lane.b32.xlu1 %v8514_v4, %s9303_s0  ;;  %v11663_v4 = vld [vmem:[#allocation2 + $0x90] sm:$0xff]  ;;  %v8272_v28 = vunpack.i.l.bf16 %v11624_v40 }
 0x378   :  { %v2714_v32 = vsel %vm666_vm4, %v2698_v21, %v8242_v30  ;;  %v2666_v2 = vsel %vm666_vm4, %v2650_v38, %v8243_v3  ;;  %8550 = vrot.lane.b32.xlu0 %v8549_v7, %s9304_s28  ;;  %7707 = vmatpush3.bf16.msra.mxu1 %v10986_v31  ;;  %v11671_v31 = vsel %vm216_vm3, %v3218_v20, %v3219_v62  ;;  %v3146_v7 = vld [vmem:[#allocation2 + $0xa8] sm:$0x3]  ;;  %v3297_v30 = vrot.slane %v11655_v1, 1 }
 0x379   :  { %v8246_v45 = vpop.permute.xlu1 %8245  ;;  %v2730_v51 = vsel %vm683_vm5, %v2714_v32, %v8252_v33  ;;  %v2682_v18 = vsel %vm683_vm5, %v2666_v2, %v8253_v34  ;;  %7700 = vmatprep.subr.bf16.mxu1 %v11003_v35  ;;  %v3298_v35 = vrot.slane %v3142_v10, 1  ;;  %v3329_v58 = vrot.slane %v11663_v4, 1  ;;  %v13981_v10 = vld [vmem:[#allocation18_spill] sm:$0xff] }
 0x37a   :  { %2856 = vmatprep.mubr.f32.mxu1 %v2730_v51  ;;  %v11649_v61 = vpop.permute.xlu0 %8285  ;;  %v8248_v41 = vunpack.i.h.bf16 %v8246_v45  ;;  %v8247_v54 = vunpack.i.l.bf16 %v8246_v45  ;;  %v3330_v34 = vrot.slane %v3144_v11, 1  ;;  %v8569_v21 = vpack.i.bf16 %v11270_v59, %v11671_v31 }
 0x37b   :  { %8525 = vrot.lane.b32.xlu1 %v8524_v13, %s9305_s29  ;;  %2857 = vmatmul.mubr.f32.gmra.mrb[52].mxu1 %v2682_v18  ;;  %v11678_v13 = vsel %vm265_vm2, %v3266_v8, %v3267_v17  ;;  %v3319_v38 = vrot.slane %v11655_v1, 2  ;;  %v3222_v32 = vrot.slane %v3146_v7, 1  ;;  %v3629_v2 = vsel %vm32_vm0, %v11558_v48, %v8238_v49  ;;  %v11691_v18 = vld [vmem:[#allocation2 + $0xb0] sm:$0xff] }
 0x37c   :  { %8555 = vrot.lane.b32.xlu0 %v8554_v16, %s9305_s29  ;;  %7708 = vmatpush3.bf16.msra.mxu1 %v11021_v29  ;;  %v3677_v29 = vsel %vm32_vm0, %v11103_v39, %v8237_v6  ;;  %v11693_v16 = vld [vmem:[#allocation2 + $0xb8] sm:$0x3]  ;;  %v8574_v48 = vpack.i.bf16 %v11637_v43, %v11678_v13  ;;  %v11703_v62 = vsel %vm216_vm3, %v3297_v30, %v3298_v35  ;;  %v3270_v17 = vrot.slane %v3146_v7, 2  ;;  %v11728_v35 = vld [vmem:[#allocation2 + $0xc8] sm:$0x3] }
 0x37d   :  { %v11659_v5 = vpop.permute.xlu1 %8255  ;;  %7701 = vmatprep.subr.bf16.mxu1 %v11039_v63  ;;  %v3693_v59 = vsel %vm666_vm4, %v3677_v29, %v8247_v54  ;;  %v3645_v63 = vsel %vm666_vm4, %v3629_v2, %v8248_v41  ;;  %v11708_v8 = vsel %vm216_vm3, %v3329_v58, %v3330_v34  ;;  %v8579_v11 = vpack.i.bf16 %v11646_v14, %v11655_v1  ;;  %v11719_v41 = vld [vmem:[#allocation2 + $0xc0] sm:$0xff]  ;;  %v13983_v58 = vld [vmem:[#allocation20_spill] sm:$0xff] }
 0x37e   :  { %v11673_v3 = vpop.permute.xlu0 %8290  ;;  %v11715_v49 = vsel %vm265_vm2, %v3319_v38, %v3320_v23  ;;  %v3272_v6 = vrot.slane %v11691_v18, 2  ;;  %v8584_v7 = vpack.i.bf16 %v11631_v26, %v11703_v62  ;;  %v13982_v54 = vrot.slane %v11272_v22, 1  ;;  %v3104_v34 = vld [vmem:[%s13877_s3 + $0x100] sm:$0xff] }
 0x37f   :  { %8530 = vrot.lane.b32.xlu1 %v8529_v12, %s9304_s28  ;;  %v8594_v23 = vpack.i.bf16 %v11678_v13, %v11663_v4  ;;  %v8258_v2 = vunpack.i.h.bf16 %v11659_v5  ;;  %v13984_v29 = vrot.slane %v11272_v22, 2 }
 0x380   :  { %8560 = vrot.lane.b32.xlu0 %v8559_v25, %s9305_s29  ;;  %7709 = vmatpush3.bf16.msra.mxu1 %v13981_v10  ;;  %v11726_v30 = vsel %vm216_vm3, %v13982_v54, %v3222_v32  ;;  %v8599_v32 = vpack.i.bf16 %v11655_v1, %v11708_v8  ;;  %v3227_v1 = vrot.slane %v11719_v41, 1  ;;  %v3225_v10 = vrot.slane %v11693_v16, 1 }
 0x381   :  { %v8261_v33 = vpop.permute.xlu1 %8260  ;;  %7702 = vmatprep.subr.bf16.mxu1 %v13983_v58  ;;  %v9285_v58 = vld [vmem:[#allocation2 + $0x10] sm:$0xff] }
 0x382   :  { %v8263_v45 = vunpack.i.h.bf16 %v8261_v33  ;;  %v8262_v51 = vunpack.i.l.bf16 %v8261_v33  ;;  %v11695_v20 = vpop.permute.xlu0 %8305  ;;  %v3105_v33 = vld [vmem:[%s13877_s3 + $0x108] sm:$0xff] }
 0x383   :  { %8565 = vrot.lane.b32.xlu1 %v8564_v56, %s9303_s0  ;;  %v3273_v56 = vrot.slane %v11693_v16, 2 }
 0x384   :  { %v3709_v39 = vsel %vm683_vm5, %v3693_v59, %v8262_v51  ;;  %v3661_v12 = vsel %vm683_vm5, %v3645_v63, %v8263_v45  ;;  %8570 = vrot.lane.b32.xlu0 %v8569_v21, %s9304_s28  ;;  %v8257_v45 = vunpack.i.l.bf16 %v11659_v5  ;;  %v8589_v51 = vpack.i.bf16 %v11671_v31, %v11715_v49  ;;  %v13985_v63 = vld [vmem:[#allocation21_spill] sm:$0xff] }
 0x385   :  { %v8266_v25 = vpop.permute.xlu1 %8265  ;;  %3827 = vmatprep.mubr.f32.mxu0 %v3709_v39  ;;  %v11751_v59 = vsel %vm265_vm2, %v13984_v29, %v3270_v17  ;;  %7710 = vmatpush3.bf16.msra.mxu1 %v13985_v63  ;;  %v3228_v5 = vrot.slane %v11728_v35, 1  ;;  %v13986_v39 = vld [vmem:[#allocation22_spill] sm:$0xff]  ;;  %v3224_v17 = vrot.slane %v11691_v18, 1 }
 0x386   :  { %3828 = vmatmul.mubr.f32.vlgmr.msra.gmra.mrb[64].mxu0 %v3661_v12  ;;  %v8268_v21 = vunpack.i.h.bf16 %v8266_v25  ;;  %v8267_v38 = vunpack.i.l.bf16 %v8266_v25  ;;  %v11737_v26 = vpop.permute.xlu0 %8310  ;;  %7703 = vmatprep.subr.bf16.mxu1 %v13986_v39  ;;  %v11761_v12 = vpack.c.bf16 %v3105_v33, %v3104_v34  ;;  %v8293_v25 = vunpack.i.h.bf16 %v11673_v3  ;;  %v13988_v63 = vld [vmem:[#allocation14_spill] sm:$0xff]  ;;  %v13990_v39 = vld [vmem:[#allocation24_spill] sm:$0xff] }
 0x387   :  { %8575 = vrot.lane.b32.xlu1 %v8574_v48, %s9305_s29  ;;  %v11756_v48 = vsel %vm265_vm2, %v3272_v6, %v3273_v56  ;;  %v13987_v56 = vld [vmem:[#allocation17_spill] sm:$0xff]  ;;  %v2699_v16 = vsel %vm32_vm0, %v13988_v63, %v8257_v45 }
 0x388   :  { %8580 = vrot.lane.b32.xlu0 %v8579_v11, %s9303_s0  ;;  %v8292_v11 = vunpack.i.l.bf16 %v11673_v3  ;;  %v3678_v54 = vsel %vm32_vm0, %v13987_v56, %v8267_v38  ;;  %v3630_v34 = vsel %vm32_vm0, %v9285_v58, %v8268_v21  ;;  %v3276_v56 = vrot.slane %v11728_v35, 2  ;;  %v3152_v58 = vld [vmem:[#allocation2 + $0xd8] sm:$0x3] }
 0x389   :  { %v8276_v4 = vpop.permute.xlu1 %8275  ;;  %7711 = vmatpush3.bf16.msra.mxu1 %v13990_v39  ;;  %v8609_v35 = vpack.i.bf16 %v11751_v59, %v11719_v41  ;;  %v3231_v63 = vrot.slane %v3152_v58, 1  ;;  %v8288_v59 = vunpack.i.h.bf16 %v11649_v61  ;;  %v11820_v39 = vld [vmem:[#allocation2 + $0xe0] sm:$0xff] }
 0x38a   :  { %v8278_v22 = vunpack.i.h.bf16 %v8276_v4  ;;  %v8277_v8 = vunpack.i.l.bf16 %v8276_v4  ;;  %v11767_v6 = vpop.permute.xlu0 %8325  ;;  %v13989_v4 = vld [vmem:[#allocation12_spill] sm:$0xff]  ;;  %7609 = vmatprep.subr.bf16.mxu1 %v11761_v12 }
 0x38b   :  { %8585 = vrot.lane.b32.xlu1 %v8584_v7, %s9304_s28  ;;  %v2651_v3 = vsel %vm32_vm0, %v13989_v4, %v8258_v2  ;;  %v8273_v7 = vunpack.i.h.bf16 %v11624_v40  ;;  %v3275_v2 = vrot.slane %v11719_v41, 2  ;;  %v11808_v4 = vsel %vm216_vm3, %v3224_v17, %v3225_v10 }
 0x38c   :  { %v3694_v33 = vsel %vm666_vm4, %v3678_v54, %v8277_v8  ;;  %v3646_v29 = vsel %vm666_vm4, %v3630_v34, %v8278_v22  ;;  %8590 = vrot.lane.b32.xlu0 %v8589_v51, %s9305_s29  ;;  %v11788_v54 = vld [vmem:[#allocation2 + $0xd0] sm:$0xff]  ;;  %v2715_v51 = vsel %vm666_vm4, %v2699_v16, %v8272_v28 }
 0x38d   :  { %v8281_v38 = vpop.permute.xlu1 %8280  ;;  %v3710_v21 = vsel %vm683_vm5, %v3694_v33, %v8292_v11  ;;  %v3662_v8 = vsel %vm683_vm5, %v3646_v29, %v8293_v25  ;;  %v2667_v25 = vsel %vm666_vm4, %v2651_v3, %v8273_v7  ;;  %v8604_v11 = vpack.i.bf16 %v11726_v30, %v11756_v48  ;;  %v3154_v7 = vld [vmem:[#allocation2 + $0xe8] sm:$0x3] }
 0x38e   :  { %v8283_v22 = vunpack.i.h.bf16 %v8281_v38  ;;  %v8282_v45 = vunpack.i.l.bf16 %v8281_v38  ;;  %3832 = vmatprep.mubr.f32.mxu0 %v3710_v21  ;;  %v11790_v40 = vpop.permute.xlu0 %8330  ;;  %v11802_v29 = vsel %vm216_vm3, %v3227_v1, %v3228_v5  ;;  %v3230_v28 = vrot.slane %v11788_v54, 1 }
 0x38f   :  { %8595 = vrot.lane.b32.xlu1 %v8594_v23, %s9303_s0  ;;  %3833 = vmatmul.mubr.f32.gmra.mrb[66].mxu0 %v3662_v8  ;;  %v3278_v16 = vrot.slane %v11788_v54, 2  ;;  %v3279_v30 = vrot.slane %v3152_v58, 2  ;;  %v11811_v3 = vsel %vm265_vm2, %v3275_v2, %v3276_v56  ;;  %v8287_v1 = vunpack.i.l.bf16 %v11649_v61 }
 0x390   :  { %v2731_v34 = vsel %vm683_vm5, %v2715_v51, %v8282_v45  ;;  %v2683_v33 = vsel %vm683_vm5, %v2667_v25, %v8283_v22  ;;  %8600 = vrot.lane.b32.xlu0 %v8599_v32, %s9304_s28  ;;  %v8614_v5 = vpack.i.bf16 %v11691_v18, %v11802_v29  ;;  %v8619_v10 = vpack.i.bf16 %v11808_v4, %v11811_v3  ;;  %v13992_v25 = vld [vmem:[#allocation13_spill] sm:$0xff] }
 0x391   :  { %v8296_v23 = vpop.permute.xlu1 %8295  ;;  %2861 = vmatprep.mubr.f32.mxu1 %v2731_v34  ;;  %v8624_v38 = vpack.i.bf16 %v11756_v48, %v11788_v54  ;;  %v11828_v61 = vsel %vm216_vm3, %v3230_v28, %v3231_v63  ;;  %v11831_v21 = vsel %vm265_vm2, %v3278_v16, %v3279_v30  ;;  %v3233_v22 = vrot.slane %v11820_v39, 1  ;;  %v13991_v48 = vld [vmem:[#allocation3_spill] sm:$0xff] }
 0x392   :  { %2862 = vmatmul.mubr.f32.gmra.mrb[54].mxu1 %v2683_v33  ;;  %v11815_v32 = vpop.permute.xlu0 %8345  ;;  %v3234_v45 = vrot.slane %v3154_v7, 1  ;;  %v8313_v2 = vunpack.i.h.bf16 %v11737_v26  ;;  %v8312_v56 = vunpack.i.l.bf16 %v11737_v26  ;;  %v2700_v51 = vsel %vm32_vm0, %v13991_v48, %v8287_v1 }
 0x393   :  { %8605 = vrot.lane.b32.xlu1 %v8604_v11, %s9305_s29  ;;  %v2652_v11 = vsel %vm32_vm0, %v13992_v25, %v8288_v59  ;;  %v8298_v34 = vunpack.i.h.bf16 %v8296_v23  ;;  %v8297_v33 = vunpack.i.l.bf16 %v8296_v23  ;;  %v8629_v30 = vpack.i.bf16 %v11719_v41, %v11828_v61 }
 0x394   :  { %8610 = vrot.lane.b32.xlu0 %v8609_v35, %s9303_s0  ;;  %v3281_v1 = vrot.slane %v11820_v39, 2  ;;  %v3282_v59 = vrot.slane %v3154_v7, 2  ;;  %v8634_v23 = vpack.i.bf16 %v11802_v29, %v11831_v21  ;;  %v8307_v7 = vunpack.i.l.bf16 %v11695_v20 }
 0x395   :  { %v8301_v17 = vpop.permute.xlu1 %8300  ;;  %v8328_v25 = vunpack.i.h.bf16 %v11767_v6 }
 0x396   :  { %v8303_v8 = vunpack.i.h.bf16 %v8301_v17  ;;  %v8302_v18 = vunpack.i.l.bf16 %v8301_v17  ;;  %v11836_v58 = vpop.permute.xlu0 %8350  ;;  %v11855_v17 = vsel %vm216_vm3, %v3233_v22, %v3234_v45  ;;  %v11868_v45 = vsel %vm265_vm2, %v3281_v1, %v3282_v59 }
 0x397   :  { %8615 = vrot.lane.b32.xlu1 %v8614_v5, %s9304_s28  ;;  %v8644_v22 = vpack.i.bf16 %v11788_v54, %v11855_v17 }
 0x398   :  { %v2716_v35 = vsel %vm666_vm4, %v2700_v51, %v8302_v18  ;;  %v2668_v28 = vsel %vm666_vm4, %v2652_v11, %v8303_v8  ;;  %8620 = vrot.lane.b32.xlu0 %v8619_v10, %s9305_s29  ;;  %v13993_v10 = vld [vmem:[#allocation16_spill] sm:$0xff]  ;;  %v9286_v18 = vld [vmem:[#allocation2 + $0x20] sm:$0xff]  ;;  %v8327_v11 = vunpack.i.l.bf16 %v11767_v6  ;;  %v8649_v6 = vpack.i.bf16 %v11828_v61, %v11868_v45 }
 0x399   :  { %v8316_v63 = vpop.permute.xlu1 %8315  ;;  %v2732_v26 = vsel %vm683_vm5, %v2716_v35, %v8312_v56  ;;  %v2684_v16 = vsel %vm683_vm5, %v2668_v28, %v8313_v2  ;;  %v3679_v8 = vsel %vm32_vm0, %v13993_v10, %v8297_v33  ;;  %v3631_v41 = vsel %vm32_vm0, %v9286_v18, %v8298_v34 }
 0x39a   :  { %2866 = vmatprep.mubr.f32.mxu1 %v2732_v26  ;;  %v8356_v5 = vpop.permute.xlu0 %8355  ;;  %v8308_v2 = vunpack.i.h.bf16 %v11695_v20  ;;  %v8639_v56 = vpack.i.bf16 %v11811_v3, %v11820_v39  ;;  %v3695_v20 = vsel %vm666_vm4, %v3679_v8, %v8307_v7  ;;  %v8318_v35 = vunpack.i.h.bf16 %v8316_v63 }
 0x39b   :  { %8625 = vrot.lane.b32.xlu1 %v8624_v38, %s9303_s0  ;;  %2867 = vmatmul.mubr.f32.gmra.mrb[56].mxu1 %v2684_v16  ;;  %v8317_v28 = vunpack.i.l.bf16 %v8316_v63  ;;  %v8659_v63 = vpack.i.bf16 %v11820_v39, %v11519_v44  ;;  %v8358_v10 = vunpack.i.h.bf16 %v8356_v5  ;;  %v8357_v8 = vunpack.i.l.bf16 %v8356_v5 }
 0x39c   :  { %8630 = vrot.lane.b32.xlu0 %v8629_v30, %s9304_s28  ;;  %v3647_v33 = vsel %vm666_vm4, %v3631_v41, %v8308_v2  ;;  %v3680_v41 = vsel %vm32_vm0, %v11260_v50, %v8327_v11  ;;  %v9287_v2 = vld [vmem:[#allocation2 + $0x30] sm:$0xff]  ;;  %v8333_v5 = vunpack.i.h.bf16 %v11790_v40 }
 0x39d   :  { %v8321_v38 = vpop.permute.xlu1 %8320  ;;  %v3632_v7 = vsel %vm32_vm0, %v9287_v2, %v8328_v25  ;;  %v8674_v2 = vpack.i.bf16 %v11487_v36, %v11610_v53 }
 0x39e   :  { %v8323_v48 = vunpack.i.h.bf16 %v8321_v38  ;;  %v8322_v51 = vunpack.i.l.bf16 %v8321_v38  ;;  %v11872_v34 = vpop.permute.xlu0 %8375 }
 0x39f   :  { %8635 = vrot.lane.b32.xlu1 %v8634_v23, %s9305_s29  ;;  %v8654_v23 = vpack.i.bf16 %v11831_v21, %v11487_v36 }
 0x3a0   :  { %v3711_v26 = vsel %vm683_vm5, %v3695_v20, %v8322_v51  ;;  %v3663_v16 = vsel %vm683_vm5, %v3647_v33, %v8323_v48  ;;  %8640 = vrot.lane.b32.xlu0 %v8639_v56, %s9303_s0  ;;  %v13994_v48 = vld [vmem:[#allocation23_spill] sm:$0xff] }
 0x3a1   :  { %v8336_v30 = vpop.permute.xlu1 %8335  ;;  %3837 = vmatprep.mubr.f32.mxu0 %v3711_v26  ;;  %v2701_v51 = vsel %vm32_vm0, %v13994_v48, %v8317_v28  ;;  %v13995_v20 = vld [vmem:[#allocation15_spill] sm:$0xff] }
 0x3a2   :  { %v8338_v1 = vunpack.i.h.bf16 %v8336_v30  ;;  %v8337_v59 = vunpack.i.l.bf16 %v8336_v30  ;;  %3838 = vmatmul.mubr.f32.gmra.mrb[68].mxu0 %v3663_v16  ;;  %v8381_v18 = vpop.permute.xlu0 %8380  ;;  %v2653_v33 = vsel %vm32_vm0, %v13995_v20, %v8318_v35 }
 0x3a3   :  { %8645 = vrot.lane.b32.xlu1 %v8644_v22, %s9304_s28  ;;  %v8332_v22 = vunpack.i.l.bf16 %v11790_v40  ;;  %v2669_v28 = vsel %vm666_vm4, %v2653_v33, %v8333_v5  ;;  %v8664_v40 = vpack.i.bf16 %v11855_v17, %v11594_v15  ;;  %v8382_v48 = vunpack.i.l.bf16 %v8381_v18 }
 0x3a4   :  { %v3696_v38 = vsel %vm666_vm4, %v3680_v41, %v8337_v59  ;;  %v3648_v56 = vsel %vm666_vm4, %v3632_v7, %v8338_v1  ;;  %8650 = vrot.lane.b32.xlu0 %v8649_v6, %s9305_s29 }
 0x3a5   :  { %v8341_v50 = vpop.permute.xlu1 %8340  ;;  %v3712_v11 = vsel %vm683_vm5, %v3696_v38, %v8357_v8  ;;  %v3664_v25 = vsel %vm683_vm5, %v3648_v56, %v8358_v10  ;;  %v2717_v35 = vsel %vm666_vm4, %v2701_v51, %v8332_v22  ;;  %v8348_v10 = vunpack.i.h.bf16 %v11815_v32 }
 0x3a6   :  { %v8343_v26 = vunpack.i.h.bf16 %v8341_v50  ;;  %v8342_v16 = vunpack.i.l.bf16 %v8341_v50  ;;  %3842 = vmatprep.mubr.f32.mxu0 %v3712_v11  ;;  %v8391_v30 = vpop.permute.xlu0 %8390  ;;  %v8347_v8 = vunpack.i.l.bf16 %v11815_v32  ;;  %v8383_v56 = vunpack.i.h.bf16 %v8381_v18 }
 0x3a7   :  { %8655 = vrot.lane.b32.xlu1 %v8654_v23, %s9303_s0  ;;  %3843 = vmatmul.mubr.f32.gmra.mrb[70].mxu0 %v3664_v25  ;;  %v8669_v23 = vpack.i.bf16 %v11868_v45, %v11494_v27  ;;  %v2654_v32 = vsel %vm32_vm0, %v11033_v37, %v8348_v10  ;;  %v8352_v37 = vunpack.i.l.bf16 %v11836_v58 }
 0x3a8   :  { %v2733_v6 = vsel %vm683_vm5, %v2717_v35, %v8342_v16  ;;  %v2685_v1 = vsel %vm683_vm5, %v2669_v28, %v8343_v26  ;;  %8660 = vrot.lane.b32.xlu0 %v8659_v63, %s9304_s28  ;;  %v2702_v27 = vsel %vm32_vm0, %v11319_v19, %v8347_v8  ;;  %v8353_v19 = vunpack.i.h.bf16 %v11836_v58 }
 0x3a9   :  { %v11909_v59 = vpop.permute.xlu1 %8360  ;;  %2871 = vmatprep.mubr.f32.mxu1 %v2733_v6  ;;  %v8393_v26 = vunpack.i.h.bf16 %v8391_v30  ;;  %v8392_v16 = vunpack.i.l.bf16 %v8391_v30 }
 0x3aa   :  { %2872 = vmatmul.mubr.f32.gmra.mrb[58].mxu1 %v2685_v1  ;;  %v8401_v41 = vpop.permute.xlu0 %8400 }
 0x3ab   :  { %8665 = vrot.lane.b32.xlu1 %v8664_v40, %s9305_s29 }
 0x3ac   :  { %8670 = vrot.lane.b32.xlu0 %v8669_v23, %s9303_s0 }
 0x3ad   :  { %v8366_v7 = vpop.permute.xlu1 %8365 }
 0x3ae   :  { %v8368_v63 = vunpack.i.h.bf16 %v8366_v7  ;;  %v8367_v38 = vunpack.i.l.bf16 %v8366_v7  ;;  %v8411_v51 = vpop.permute.xlu0 %8410 }
 0x3af   :  { %8675 = vrot.lane.b32.xlu1 %v8674_v2, %s9304_s28 }
 0x3b0   :  { %v2718_v20 = vsel %vm666_vm4, %v2702_v27, %v8367_v38  ;;  %v2670_v36 = vsel %vm666_vm4, %v2654_v32, %v8368_v63  ;;  %v8402_v63 = vunpack.i.l.bf16 %v8401_v41  ;;  %v8403_v32 = vunpack.i.h.bf16 %v8401_v41 }
 0x3b1   :  { %v8371_v33 = vpop.permute.xlu1 %8370  ;;  %v2734_v5 = vsel %vm683_vm5, %v2718_v20, %v8382_v48  ;;  %v2686_v22 = vsel %vm683_vm5, %v2670_v36, %v8383_v56  ;;  %v11944_v56 = vld [vmem:[#allocation2 + $0xa0] sm:$0xff] }
 0x3b2   :  { %2876 = vmatprep.mubr.f32.mxu1 %v2734_v5  ;;  %v11928_v18 = vpop.permute.xlu0 %8420  ;;  %v8373_v28 = vunpack.i.h.bf16 %v8371_v33  ;;  %v8372_v40 = vunpack.i.l.bf16 %v8371_v33 }
 0x3b3   :  { %2877 = vmatmul.mubr.f32.gmra.mrb[60].mxu1 %v2686_v22 }
 0x3b5   :  { %v8386_v50 = vpop.permute.xlu1 %8385 }
 0x3b6   :  { %v8388_v11 = vunpack.i.h.bf16 %v8386_v50  ;;  %v8387_v25 = vunpack.i.l.bf16 %v8386_v50  ;;  %v8431_v35 = vpop.permute.xlu0 %8430  ;;  %v13996_v50 = vld [vmem:[#allocation8_spill] sm:$0xff] }
 0x3b8   :  { %v2703_v6 = vsel %vm32_vm0, %v11309_v46, %v8387_v25  ;;  %v2655_v1 = vsel %vm32_vm0, %v11131_v57, %v8388_v11  ;;  %v2704_v46 = vsel %vm32_vm0, %v11451_v0, %v8392_v16  ;;  %v2656_v57 = vsel %vm32_vm0, %v11944_v56, %v8393_v26  ;;  %v13997_v25 = vld [vmem:[#allocation27_spill] sm:$0xff] }
 0x3b9   :  { %v8396_v23 = vpop.permute.xlu1 %8395  ;;  %v2719_v10 = vsel %vm666_vm4, %v2703_v6, %v8352_v37  ;;  %v2671_v8 = vsel %vm666_vm4, %v2655_v1, %v8353_v19  ;;  %v8413_v37 = vunpack.i.h.bf16 %v8411_v51  ;;  %v8412_v26 = vunpack.i.l.bf16 %v8411_v51 }
 0x3ba   :  { %v8398_v2 = vunpack.i.h.bf16 %v8396_v23  ;;  %v8397_v7 = vunpack.i.l.bf16 %v8396_v23  ;;  %v2735_v58 = vsel %vm683_vm5, %v2719_v10, %v8372_v40  ;;  %v2687_v30 = vsel %vm683_vm5, %v2671_v8, %v8373_v28  ;;  %v11940_v38 = vpop.permute.xlu0 %8440 }
 0x3bb   :  { %2881 = vmatprep.mubr.f32.mxu1 %v2735_v58  ;;  %v8423_v40 = vunpack.i.h.bf16 %v11928_v18  ;;  %v8422_v6 = vunpack.i.l.bf16 %v11928_v18 }
 0x3bc   :  { %2882 = vmatmul.mubr.f32.gmra.mrb[62].mxu1 %v2687_v30  ;;  %v2720_v48 = vsel %vm666_vm4, %v2704_v46, %v8397_v7  ;;  %v2672_v27 = vsel %vm666_vm4, %v2656_v57, %v8398_v2  ;;  %v8433_v30 = vunpack.i.h.bf16 %v8431_v35  ;;  %v13998_v57 = vld [vmem:[#allocation11_spill] sm:$0xff] }
 0x3bd   :  { %v8406_v20 = vpop.permute.xlu1 %8405  ;;  %v2736_v36 = vsel %vm683_vm5, %v2720_v48, %v8402_v63  ;;  %v2688_v0 = vsel %vm683_vm5, %v2672_v27, %v8403_v32  ;;  %v8432_v63 = vunpack.i.l.bf16 %v8431_v35  ;;  %v2706_v18 = vsel %vm32_vm0, %v13998_v57, %v8422_v6  ;;  %v13999_v48 = vld [vmem:[#allocation4_spill] sm:$0xff] }
 0x3be   :  { %v8408_v33 = vunpack.i.h.bf16 %v8406_v20  ;;  %v8407_v5 = vunpack.i.l.bf16 %v8406_v20  ;;  %2886 = vmatprep.mubr.f32.mxu1 %v2736_v36  ;;  %v11951_v22 = vpop.permute.xlu0 %8450  ;;  %v2658_v27 = vsel %vm32_vm0, %v13999_v48, %v8423_v40 }
 0x3c0   :  { %2887 = vmatmul.mubr.f32.gmra.mrb[64].mxu1 %v2688_v0  ;;  %v2705_v11 = vsel %vm32_vm0, %v13996_v50, %v8407_v5  ;;  %v2657_v19 = vsel %vm32_vm0, %v13997_v25, %v8408_v33 }
 0x3c1   :  { %v8416_v41 = vpop.permute.xlu1 %8415  ;;  %v2721_v23 = vsel %vm666_vm4, %v2705_v11, %v8412_v26  ;;  %v2673_v10 = vsel %vm666_vm4, %v2657_v19, %v8413_v37  ;;  %v14000_v19 = vld [vmem:[#allocation10_spill] sm:$0xff]  ;;  %v14001_v26 = vld [vmem:[#allocation5_spill] sm:$0xff] }
 0x3c2   :  { %v8418_v16 = vunpack.i.h.bf16 %v8416_v41  ;;  %v8417_v28 = vunpack.i.l.bf16 %v8416_v41  ;;  %v8461_v1 = vpop.permute.xlu0 %8460 }
 0x3c3   :  { %v8462_v48 = vunpack.i.l.bf16 %v8461_v1 }
 0x3c4   :  { %v2737_v8 = vsel %vm683_vm5, %v2721_v23, %v8417_v28  ;;  %v2689_v2 = vsel %vm683_vm5, %v2673_v10, %v8418_v16  ;;  %v8443_v16 = vunpack.i.h.bf16 %v11940_v38  ;;  %v8442_v28 = vunpack.i.l.bf16 %v11940_v38 }
 0x3c5   :  { %v8426_v7 = vpop.permute.xlu1 %8425  ;;  %2891 = vmatprep.mubr.f32.mxu1 %v2737_v8  ;;  %v8453_v10 = vunpack.i.h.bf16 %v11951_v22  ;;  %v8452_v8 = vunpack.i.l.bf16 %v11951_v22 }
 0x3c6   :  { %v8428_v58 = vunpack.i.h.bf16 %v8426_v7  ;;  %v8427_v51 = vunpack.i.l.bf16 %v8426_v7  ;;  %2892 = vmatmul.mubr.f32.gmra.mrb[66].mxu1 %v2689_v2  ;;  %v11964_v46 = vpop.permute.xlu0 %8470 }
 0x3c8   :  { %v2722_v32 = vsel %vm666_vm4, %v2706_v18, %v8427_v51  ;;  %v2674_v20 = vsel %vm666_vm4, %v2658_v27, %v8428_v58  ;;  %v8463_v18 = vunpack.i.h.bf16 %v8461_v1 }
 0x3c9   :  { %v8436_v36 = vpop.permute.xlu1 %8435  ;;  %v2738_v33 = vsel %vm683_vm5, %v2722_v32, %v8432_v63  ;;  %v2690_v5 = vsel %vm683_vm5, %v2674_v20, %v8433_v30  ;;  %v14002_v32 = vld [vmem:[#allocation30_spill] sm:$0xff] }
 0x3ca   :  { %v8438_v0 = vunpack.i.h.bf16 %v8436_v36  ;;  %v8437_v50 = vunpack.i.l.bf16 %v8436_v36  ;;  %2896 = vmatprep.mubr.f32.mxu1 %v2738_v33  ;;  %v11974_v35 = vpop.permute.xlu0 %8480  ;;  %v2708_v22 = vsel %vm32_vm0, %v14002_v32, %v8452_v8  ;;  %v14003_v20 = vld [vmem:[#allocation6_spill] sm:$0xff]  ;;  %v8472_v8 = vunpack.i.l.bf16 %v11964_v46 }
 0x3cb   :  { %2897 = vmatmul.mubr.f32.gmra.mrb[68].mxu1 %v2690_v5  ;;  %v11976_v11 = vpop.f32.mrb[48].mxu0  ;;  %v2660_v36 = vsel %vm32_vm0, %v14003_v20, %v8453_v10  ;;  %v8473_v10 = vunpack.i.h.bf16 %v11964_v46 }
 0x3cc   :  { %v11978_v25 = vpop.f32.mrb[49].mxu0  ;;  %v2707_v37 = vsel %vm32_vm0, %v14000_v19, %v8437_v50  ;;  %v2659_v41 = vsel %vm32_vm0, %v14001_v26, %v8438_v0 }
 0x3cd   :  { %v8446_v40 = vpop.permute.xlu1 %8445  ;;  %v2723_v7 = vsel %vm666_vm4, %v2707_v37, %v8442_v28  ;;  %v2675_v58 = vsel %vm666_vm4, %v2659_v41, %v8443_v16  ;;  %v14004_v28 = vld [vmem:[#allocation29_spill] sm:$0xff] }
 0x3ce   :  { %v8448_v6 = vunpack.i.h.bf16 %v8446_v40  ;;  %v8447_v23 = vunpack.i.l.bf16 %v8446_v40  ;;  %v11988_v2 = vpop.permute.xlu0 %8485 }
 0x3d0   :  { %v2739_v51 = vsel %vm683_vm5, %v2723_v7, %v8447_v23  ;;  %v2691_v30 = vsel %vm683_vm5, %v2675_v58, %v8448_v6  ;;  %v14005_v6 = vld [vmem:[#allocation7_spill] sm:$0xff] }
 0x3d1   :  { %v8456_v63 = vpop.permute.xlu1 %8455  ;;  %2901 = vmatprep.mubr.f32.mxu1 %v2739_v51 }
 0x3d2   :  { %v8458_v38 = vunpack.i.h.bf16 %v8456_v63  ;;  %v8457_v57 = vunpack.i.l.bf16 %v8456_v63  ;;  %2902 = vmatmul.mubr.f32.gmra.mrb[70].mxu1 %v2691_v30  ;;  %v8501_v27 = vpop.permute.xlu0 %8500  ;;  %v8483_v30 = vunpack.i.h.bf16 %v11974_v35  ;;  %v8482_v63 = vunpack.i.l.bf16 %v11974_v35 }
 0x3d4   :  { %v2724_v33 = vsel %vm666_vm4, %v2708_v22, %v8457_v57  ;;  %v2676_v5 = vsel %vm666_vm4, %v2660_v36, %v8458_v38  ;;  %v8503_v36 = vunpack.i.h.bf16 %v8501_v27  ;;  %v2710_v35 = vsel %vm32_vm0, %v11536_v42, %v8482_v63 }
 0x3d5   :  { %v8466_v0 = vpop.permute.xlu1 %8465  ;;  %v2740_v50 = vsel %vm683_vm5, %v2724_v33, %v8462_v48  ;;  %v2692_v19 = vsel %vm683_vm5, %v2676_v5, %v8463_v18  ;;  %v8502_v33 = vunpack.i.l.bf16 %v8501_v27 }
 0x3d6   :  { %v8468_v37 = vunpack.i.h.bf16 %v8466_v0  ;;  %v8467_v26 = vunpack.i.l.bf16 %v8466_v0  ;;  %2906 = vmatprep.mubr.f32.mxu1 %v2740_v50  ;;  %v12002_v1 = vpop.permute.xlu0 %8510  ;;  %v14006_v0 = vld [vmem:[#allocation28_spill] sm:$0xff] }
 0x3d7   :  { %2907 = vmatmul.mubr.f32.gmra.mrb[72].mxu1 %v2692_v19  ;;  %v12004_v41 = vpop.f32.mrb[50].mxu0  ;;  %v2662_v50 = vsel %vm32_vm0, %v14006_v0, %v8483_v30  ;;  %v3107_v0 = vld [vmem:[%s13877_s3 + $0x118] sm:$0xff] }
 0x3d8   :  { %v12006_v16 = vpop.f32.mrb[51].mxu0  ;;  %v2709_v40 = vsel %vm32_vm0, %v14004_v28, %v8467_v26  ;;  %v2661_v23 = vsel %vm32_vm0, %v14005_v6, %v8468_v37 }
 0x3d9   :  { %v8476_v7 = vpop.permute.xlu1 %8475  ;;  %v2725_v57 = vsel %vm666_vm4, %v2709_v40, %v8472_v8  ;;  %v2677_v18 = vsel %vm666_vm4, %v2661_v23, %v8473_v10  ;;  %v8362_v23 = vunpack.i.l.bf16 %v11909_v59  ;;  %v8488_v8 = vunpack.i.h.bf16 %v11988_v2 }
 0x3da   :  { %v8478_v58 = vunpack.i.h.bf16 %v8476_v7  ;;  %v8477_v51 = vunpack.i.l.bf16 %v8476_v7  ;;  %v12016_v38 = vpop.permute.xlu0 %8520  ;;  %v8487_v7 = vunpack.i.l.bf16 %v11988_v2  ;;  %v8363_v2 = vunpack.i.h.bf16 %v11909_v59  ;;  %v9289_v59 = vld [vmem:[#allocation2 + $0xf0] sm:$0xff] }
 0x3dc   :  { %v2741_v48 = vsel %vm683_vm5, %v2725_v57, %v8477_v51  ;;  %v2693_v32 = vsel %vm683_vm5, %v2677_v18, %v8478_v58  ;;  %v8513_v58 = vunpack.i.h.bf16 %v12002_v1  ;;  %v8512_v51 = vunpack.i.l.bf16 %v12002_v1 }
 0x3dd   :  { %v8491_v22 = vpop.permute.xlu1 %8490  ;;  %2911 = vmatprep.mubr.f32.mxu1 %v2741_v48 }
 0x3de   :  { %v8493_v46 = vunpack.i.h.bf16 %v8491_v22  ;;  %v8492_v20 = vunpack.i.l.bf16 %v8491_v22  ;;  %2912 = vmatmul.mubr.f32.gmra.mrb[74].mxu1 %v2693_v32  ;;  %v12022_v5 = vpop.permute.xlu0 %8535  ;;  %v14007_v32 = vld [vmem:[#allocation31_spill] sm:$0xff] }
 0x3e0   :  { %v2726_v19 = vsel %vm666_vm4, %v2710_v35, %v8492_v20  ;;  %v2678_v37 = vsel %vm666_vm4, %v2662_v50, %v8493_v46  ;;  %v14008_v46 = vld [vmem:[#allocation9_spill] sm:$0xff] }
 0x3e1   :  { %v8496_v26 = vpop.permute.xlu1 %8495  ;;  %v2742_v28 = vsel %vm683_vm5, %v2726_v19, %v8502_v33  ;;  %v2694_v40 = vsel %vm683_vm5, %v2678_v37, %v8503_v36  ;;  %v3106_v35 = vld [vmem:[%s13877_s3 + $0x110] sm:$0xff] }
 0x3e2   :  { %2916 = vmatprep.mubr.f32.mxu1 %v2742_v28  ;;  %v12032_v6 = vpop.permute.xlu0 %8540  ;;  %v8498_v57 = vunpack.i.h.bf16 %v8496_v26  ;;  %v8497_v18 = vunpack.i.l.bf16 %v8496_v26  ;;  %v3642_v28 = vsel %vm32_vm0, %v9289_v59, %v8513_v58  ;;  %v8378_v58 = vunpack.i.h.bf16 %v11872_v34 }
 0x3e3   :  { %2917 = vmatmul.mubr.f32.gmra.mrb[76].mxu1 %v2694_v40  ;;  %v8522_v40 = vunpack.i.l.bf16 %v12016_v38 }
 0x3e5   :  { %v8506_v27 = vpop.permute.xlu1 %8505 }
 0x3e6   :  { %v8508_v42 = vunpack.i.h.bf16 %v8506_v27  ;;  %v8507_v10 = vunpack.i.l.bf16 %v8506_v27  ;;  %v12039_v30 = vpop.permute.xlu0 %8545 }
 0x3e7   :  { %v12041_v63 = vpop.f32.mrb[52].mxu0 }
 0x3e8   :  { %v12043_v48 = vpop.f32.mrb[53].mxu0  ;;  %v2711_v22 = vsel %vm32_vm0, %v14007_v32, %v8507_v10  ;;  %v2663_v20 = vsel %vm32_vm0, %v14008_v46, %v8508_v42  ;;  %v3690_v42 = vsel %vm32_vm0, %v11610_v53, %v8512_v51  ;;  %v3681_v10 = vsel %vm32_vm0, %v11246_v52, %v8362_v23 }
 0x3e9   :  { %v8516_v36 = vpop.permute.xlu1 %8515  ;;  %v2727_v33 = vsel %vm666_vm4, %v2711_v22, %v8487_v7  ;;  %v2679_v1 = vsel %vm666_vm4, %v2663_v20, %v8488_v8  ;;  %v8377_v8 = vunpack.i.l.bf16 %v11872_v34  ;;  %v8523_v32 = vunpack.i.h.bf16 %v12016_v38  ;;  %v9290_v20 = vld [vmem:[#allocation2 + $0x40] sm:$0xff] }
 0x3ea   :  { %v8518_v50 = vunpack.i.h.bf16 %v8516_v36  ;;  %v8517_v19 = vunpack.i.l.bf16 %v8516_v36  ;;  %v2743_v37 = vsel %vm683_vm5, %v2727_v33, %v8497_v18  ;;  %v2695_v26 = vsel %vm683_vm5, %v2679_v1, %v8498_v57  ;;  %v8551_v27 = vpop.permute.xlu0 %8550 }
 0x3eb   :  { %2921 = vmatprep.mubr.f32.mxu1 %v2743_v37  ;;  %v7612_v18 = vpack.c.bf16 %v3107_v0, %v3106_v35  ;;  %v3633_v53 = vsel %vm32_vm0, %v9290_v20, %v8363_v2  ;;  %v8543_v52 = vunpack.i.h.bf16 %v12032_v6  ;;  %v3697_v33 = vsel %vm666_vm4, %v3681_v10, %v8377_v8 }
 0x3ec   :  { %2922 = vmatmul.mubr.f32.gmra.mrb[78].mxu1 %v2695_v26  ;;  %v3706_v7 = vsel %vm666_vm4, %v3690_v42, %v8517_v19  ;;  %v3658_v57 = vsel %vm666_vm4, %v3642_v28, %v8518_v50  ;;  %v12073_v51 = vpop.f32.mrb[54].mxu0  ;;  %v8542_v34 = vunpack.i.l.bf16 %v12032_v6  ;;  %v8553_v38 = vunpack.i.h.bf16 %v8551_v27  ;;  %v9291_v26 = vld [vmem:[#allocation2 + $0x100] sm:$0xff] }
 0x3ed   :  { %v8526_v22 = vpop.permute.xlu1 %8525  ;;  %v3722_v46 = vsel %vm683_vm5, %v3706_v7, %v8522_v40  ;;  %v12077_v1 = vpop.f32.mrb[55].mxu0  ;;  %v8552_v35 = vunpack.i.l.bf16 %v8551_v27  ;;  %v3674_v50 = vsel %vm683_vm5, %v3658_v57, %v8523_v32  ;;  %v8537_v28 = vunpack.i.l.bf16 %v12022_v5 }
 0x3ee   :  { %v8528_v23 = vunpack.i.h.bf16 %v8526_v22  ;;  %v8527_v36 = vunpack.i.l.bf16 %v8526_v22  ;;  %3892 = vmatprep.mubr.f32.mxu1 %v3722_v46  ;;  %v8556_v0 = vpop.permute.xlu0 %8555  ;;  %v3649_v42 = vsel %vm666_vm4, %v3633_v53, %v8378_v58  ;;  %v8538_v57 = vunpack.i.h.bf16 %v12022_v5  ;;  %v9292_v46 = vld [vmem:[#allocation2 + $0x110] sm:$0xff] }
 0x3ef   :  { %v8558_v19 = vunpack.i.h.bf16 %v8556_v0  ;;  %v8557_v2 = vunpack.i.l.bf16 %v8556_v0  ;;  %v8547_v32 = vunpack.i.l.bf16 %v12039_v30 }
 0x3f0   :  { %3893 = vmatmul.mubr.f32.vlgmr.msra.gmra.mrb[80].mxu1 %v3674_v50  ;;  %v3691_v37 = vsel %vm32_vm0, %v11539_v9, %v8527_v36  ;;  %v3643_v59 = vsel %vm32_vm0, %v9291_v26, %v8528_v23  ;;  %v8548_v36 = vunpack.i.h.bf16 %v12039_v30  ;;  %v9293_v30 = vld [vmem:[#allocation2 + $0x50] sm:$0xff] }
 0x3f1   :  { %7611 = vmatpush3.bf16.msra.mxu1 %v11761_v12  ;;  %v8531_v40 = vpop.permute.xlu1 %8530  ;;  %v3707_v6 = vsel %vm666_vm4, %v3691_v37, %v8542_v34  ;;  %v3659_v27 = vsel %vm666_vm4, %v3643_v59, %v8543_v52  ;;  %v3692_v12 = vsel %vm32_vm0, %v11603_v60, %v8557_v2  ;;  %v3644_v20 = vsel %vm32_vm0, %v9292_v46, %v8558_v19 }
 0x3f2   :  { %v8533_v10 = vunpack.i.h.bf16 %v8531_v40  ;;  %v8532_v8 = vunpack.i.l.bf16 %v8531_v40  ;;  %v3723_v7 = vsel %vm683_vm5, %v3707_v6, %v8552_v35  ;;  %v3675_v9 = vsel %vm683_vm5, %v3659_v27, %v8553_v38  ;;  %7613 = vmatprep.subr.bf16.mxu1 %v7612_v18  ;;  %v8561_v22 = vpop.permute.xlu0 %8560  ;;  %v14009_v40 = vld [vmem:[#allocation19_spill] sm:$0xff] }
 0x3f3   :  { %3897 = vmatprep.mubr.f32.mxu1 %v3723_v7  ;;  %v8563_v58 = vunpack.i.h.bf16 %v8561_v22  ;;  %v8562_v53 = vunpack.i.l.bf16 %v8561_v22  ;;  %v3708_v23 = vsel %vm666_vm4, %v3692_v12, %v8537_v28  ;;  %v3660_v60 = vsel %vm666_vm4, %v3644_v20, %v8538_v57  ;;  %v14010_v57 = vld [vmem:[#allocation26_spill] sm:$0xff]  ;;  %v9294_v12 = vld [vmem:[#allocation2 + $0x60] sm:$0xff] }
 0x3f4   :  { %3898 = vmatmul.mubr.f32.gmra.mrb[82].mxu1 %v3675_v9  ;;  %v3713_v52 = vsel %vm683_vm5, %v3697_v33, %v8532_v8  ;;  %v3724_v34 = vsel %vm683_vm5, %v3708_v23, %v8547_v32  ;;  %v3665_v38 = vsel %vm683_vm5, %v3649_v42, %v8533_v10  ;;  %v3676_v19 = vsel %vm683_vm5, %v3660_v60, %v8548_v36 }
 0x3f5   :  { %v8566_v5 = vpop.permute.xlu1 %8565  ;;  %3847 = vmatprep.mubr.f32.mxu0 %v3713_v52  ;;  %7615 = vmatpush3.bf16.msra.mxu1 %v7612_v18  ;;  %v3682_v33 = vsel %vm32_vm0, %v11637_v43, %v8562_v53  ;;  %v3634_v2 = vsel %vm32_vm0, %v9293_v30, %v8563_v58  ;;  %v14011_v58 = vld [vmem:[#allocation25_spill] sm:$0xff] }
 0x3f6   :  { %v8568_v35 = vunpack.i.h.bf16 %v8566_v5  ;;  %v8567_v0 = vunpack.i.l.bf16 %v8566_v5  ;;  %3902 = vmatprep.mubr.f32.mxu1 %v3724_v34  ;;  %3848 = vmatmul.mubr.f32.gmra.mrb[72].mxu0 %v3665_v38  ;;  %v8571_v50 = vpop.permute.xlu0 %8570 }
 0x3f7   :  { %v8573_v37 = vunpack.i.h.bf16 %v8571_v50  ;;  %v8572_v26 = vunpack.i.l.bf16 %v8571_v50  ;;  %v9296_v50 = vld [vmem:[#allocation2 + $0x98] sm:$0x3] }
 0x3f8   :  { %3903 = vmatmul.mubr.f32.gmra.mrb[84].mxu1 %v3676_v19  ;;  %v3698_v18 = vsel %vm666_vm4, %v3682_v33, %v8567_v0  ;;  %v3650_v59 = vsel %vm666_vm4, %v3634_v2, %v8568_v35  ;;  %v9295_v0 = vld [vmem:[#allocation2 + $0x90] sm:$0xff]  ;;  %v3336_v19 = vrot.slane %v9296_v50, 2 }
 0x3f9   :  { %v8576_v28 = vpop.permute.xlu1 %8575  ;;  %7368 = vmatprep.mubr.msk.f32.mxu1 %vm32_vm0, %v14009_v40  ;;  %v3714_v43 = vsel %vm683_vm5, %v3698_v18, %v8572_v26  ;;  %v3666_v42 = vsel %vm683_vm5, %v3650_v59, %v8573_v37  ;;  %v3335_v33 = vrot.slane %v9295_v0, 2 }
 0x3fa   :  { %v8578_v6 = vunpack.i.h.bf16 %v8576_v28  ;;  %v8577_v27 = vunpack.i.l.bf16 %v8576_v28  ;;  %v8581_v10 = vpop.permute.xlu0 %8580  ;;  %3852 = vmatprep.mubr.f32.mxu0 %v3714_v43 }
 0x3fb   :  { %v12112_v8 = vpop.f32.mrb[56].mxu0  ;;  %v8583_v7 = vunpack.i.h.bf16 %v8581_v10  ;;  %v8582_v9 = vunpack.i.l.bf16 %v8581_v10  ;;  %3853 = vmatmul.mubr.f32.gmra.mrb[74].mxu0 %v3666_v42 }
 0x3fc   :  { %7369 = vmatmul.mubr.msk.f32.vlgmr.msra.gmra.mrb[86].mxu1 %vm32_vm0, %v14010_v57  ;;  %v12116_v32 = vpop.f32.mrb[57].mxu0  ;;  %v3683_v22 = vsel %vm32_vm0, %v11671_v31, %v8577_v27  ;;  %v3635_v46 = vsel %vm32_vm0, %v9294_v12, %v8578_v6  ;;  %v3337_v27 = vsel %vm265_vm2, %v3335_v33, %v3336_v19 }
 0x3fd   :  { %v8586_v20 = vpop.permute.xlu1 %8585  ;;  %7371 = vmatprep.mubr.msk.f32.mxu1 %vm32_vm0, %v14011_v58  ;;  %v3699_v23 = vsel %vm666_vm4, %v3683_v22, %v8582_v9  ;;  %v3651_v36 = vsel %vm666_vm4, %v3635_v46, %v8583_v7 }
 0x3fe   :  { %v8588_v53 = vunpack.i.h.bf16 %v8586_v20  ;;  %v8587_v52 = vunpack.i.l.bf16 %v8586_v20  ;;  %v8591_v5 = vpop.permute.xlu0 %8590 }
 0x3ff   :  { %v8593_v34 = vunpack.i.h.bf16 %v8591_v5  ;;  %v8592_v38 = vunpack.i.l.bf16 %v8591_v5 }
 0x400   :  { %7372 = vmatmul.mubr.msk.f32.gmra.mrb[88].mxu1 %vm32_vm0, %v11329_v24  ;;  %v3715_v31 = vsel %vm683_vm5, %v3699_v23, %v8587_v52  ;;  %v3667_v60 = vsel %vm683_vm5, %v3651_v36, %v8588_v53  ;;  %v9297_v24 = vld [vmem:[#allocation2 + $0x70] sm:$0xff] }
 0x401   :  { %v8596_v35 = vpop.permute.xlu1 %8595  ;;  %3857 = vmatprep.mubr.f32.mxu0 %v3715_v31  ;;  %7374 = vmatprep.mubr.msk.f32.mxu1 %vm32_vm0, %v11646_v14  ;;  %v3684_v37 = vsel %vm32_vm0, %v11703_v62, %v8592_v38  ;;  %v3636_v26 = vsel %vm32_vm0, %v9297_v24, %v8593_v34 }
 0x402   :  { %v8598_v30 = vunpack.i.h.bf16 %v8596_v35  ;;  %v8597_v2 = vunpack.i.l.bf16 %v8596_v35  ;;  %3858 = vmatmul.mubr.f32.gmra.mrb[76].mxu0 %v3667_v60  ;;  %v8601_v18 = vpop.permute.xlu0 %8600  ;;  %v9298_v60 = vld [vmem:[#allocation2 + $0xb0] sm:$0xff] }
 0x403   :  { %v8603_v59 = vunpack.i.h.bf16 %v8601_v18  ;;  %v8602_v28 = vunpack.i.l.bf16 %v8601_v18 }
 0x404   :  { %7375 = vmatmul.mubr.msk.f32.gmra.mrb[90].mxu1 %vm32_vm0, %v11678_v13  ;;  %v3700_v14 = vsel %vm666_vm4, %v3684_v37, %v8597_v2  ;;  %v3652_v40 = vsel %vm666_vm4, %v3636_v26, %v8598_v30  ;;  %v9299_v30 = vld [vmem:[#allocation2 + $0x130] sm:$0xff] }
 0x405   :  { %v8606_v6 = vpop.permute.xlu1 %8605  ;;  %7377 = vmatprep.mubr.msk.f32.mxu1 %vm32_vm0, %v11715_v49  ;;  %v3716_v42 = vsel %vm683_vm5, %v3700_v14, %v8602_v28  ;;  %v3668_v10 = vsel %vm683_vm5, %v3652_v40, %v8603_v59  ;;  %v3338_v2 = vrot.slane %v9299_v30, 2 }
 0x406   :  { %v8608_v62 = vunpack.i.h.bf16 %v8606_v6  ;;  %v8607_v43 = vunpack.i.l.bf16 %v8606_v6  ;;  %v8611_v7 = vpop.permute.xlu0 %8610  ;;  %3862 = vmatprep.mubr.f32.mxu0 %v3716_v42  ;;  %v14012_v42 = vld [vmem:[#allocation32_spill] sm:$0xff] }
 0x407   :  { %v12143_v9 = vpop.f32.mrb[58].mxu0  ;;  %v8613_v13 = vunpack.i.h.bf16 %v8611_v7  ;;  %v8612_v57 = vunpack.i.l.bf16 %v8611_v7  ;;  %3863 = vmatmul.mubr.f32.gmra.mrb[78].mxu0 %v3668_v10 }
 0x408   :  { %7378 = vmatmul.mubr.msk.f32.gmra.mrb[92].mxu1 %vm32_vm0, %v3337_v27  ;;  %v12146_v22 = vpop.f32.mrb[59].mxu0  ;;  %v3685_v49 = vsel %vm32_vm0, %v11808_v4, %v8607_v43  ;;  %v3637_v12 = vsel %vm32_vm0, %v11944_v56, %v8608_v62  ;;  %v9301_v27 = vld [vmem:[#allocation2 + $0xc0] sm:$0xff] }
 0x409   :  { %v8616_v46 = vpop.permute.xlu1 %8615  ;;  %7380 = vmatprep.mubr.msk.f32.mxu1 %vm32_vm0, %v11811_v3  ;;  %v3701_v53 = vsel %vm666_vm4, %v3685_v49, %v8612_v57  ;;  %v3653_v52 = vsel %vm666_vm4, %v3637_v12, %v8613_v13 }
 0x40a   :  { %v8618_v20 = vunpack.i.h.bf16 %v8616_v46  ;;  %v8617_v58 = vunpack.i.l.bf16 %v8616_v46  ;;  %v8621_v23 = vpop.permute.xlu0 %8620 }
 0x40b   :  { %v8623_v36 = vunpack.i.h.bf16 %v8621_v23  ;;  %v8622_v5 = vunpack.i.l.bf16 %v8621_v23 }
 0x40c   :  { %7381 = vmatmul.mubr.msk.f32.gmra.mrb[94].mxu1 %vm32_vm0, %v11831_v21  ;;  %v3717_v4 = vsel %vm683_vm5, %v3701_v53, %v8617_v58  ;;  %v3669_v56 = vsel %vm683_vm5, %v3653_v52, %v8618_v20 }
 0x40d   :  { %v8626_v34 = vpop.permute.xlu1 %8625  ;;  %7383 = vmatprep.mubr.msk.f32.mxu1 %vm32_vm0, %v11868_v45  ;;  %3867 = vmatprep.mubr.f32.mxu0 %v3717_v4  ;;  %v3686_v31 = vsel %vm32_vm0, %v11802_v29, %v8622_v5  ;;  %v3638_v35 = vsel %vm32_vm0, %v9298_v60, %v8623_v36  ;;  %v9300_v29 = vld [vmem:[#allocation2 + $0x138] sm:$0x3] }
 0x40e   :  { %v8628_v3 = vunpack.i.h.bf16 %v8626_v34  ;;  %v8627_v38 = vunpack.i.l.bf16 %v8626_v34  ;;  %3868 = vmatmul.mubr.f32.gmra.mrb[80].mxu0 %v3669_v56  ;;  %v8631_v0 = vpop.permute.xlu0 %8630  ;;  %v3339_v37 = vrot.slane %v9300_v29, 2 }
 0x40f   :  { %v8633_v21 = vunpack.i.h.bf16 %v8631_v0  ;;  %v8632_v33 = vunpack.i.l.bf16 %v8631_v0 }
 0x410   :  { %7384 = vmatmul.mubr.msk.f32.gmra.mrb[96].mxu1 %vm32_vm0, %v11594_v15  ;;  %v3702_v50 = vsel %vm666_vm4, %v3686_v31, %v8627_v38  ;;  %v3654_v45 = vsel %vm666_vm4, %v3638_v35, %v8628_v3  ;;  %v3340_v10 = vsel %vm265_vm2, %v3338_v2, %v3339_v37 }
 0x411   :  { %v8636_v19 = vpop.permute.xlu1 %8635  ;;  %7386 = vmatprep.mubr.msk.f32.mxu1 %vm32_vm0, %v11523_v55  ;;  %v3718_v18 = vsel %vm683_vm5, %v3702_v50, %v8632_v33  ;;  %v3670_v59 = vsel %vm683_vm5, %v3654_v45, %v8633_v21 }
 0x412   :  { %v8638_v24 = vunpack.i.h.bf16 %v8636_v19  ;;  %v8637_v26 = vunpack.i.l.bf16 %v8636_v19  ;;  %v8641_v28 = vpop.permute.xlu0 %8640  ;;  %3872 = vmatprep.mubr.f32.mxu0 %v3718_v18 }
 0x413   :  { %v12173_v15 = vpop.f32.mrb[60].mxu0  ;;  %v8643_v14 = vunpack.i.h.bf16 %v8641_v28  ;;  %v8642_v40 = vunpack.i.l.bf16 %v8641_v28  ;;  %3873 = vmatmul.mubr.f32.gmra.mrb[82].mxu0 %v3670_v59 }
 0x414   :  { %7387 = vmatmul.mubr.msk.f32.gmra.mrb[98].mxu1 %vm32_vm0, %v11545_v47  ;;  %v12177_v55 = vpop.f32.mrb[61].mxu0  ;;  %v3687_v6 = vsel %vm32_vm0, %v11828_v61, %v8637_v26  ;;  %v3639_v62 = vsel %vm32_vm0, %v9301_v27, %v8638_v24 }
 0x415   :  { %v8646_v43 = vpop.permute.xlu1 %8645  ;;  %7389 = vmatprep.mubr.msk.f32.mxu1 %vm32_vm0, %v14012_v42  ;;  %v3703_v57 = vsel %vm666_vm4, %v3687_v6, %v8642_v40  ;;  %v3655_v47 = vsel %vm666_vm4, %v3639_v62, %v8643_v14 }
 0x416   :  { %v8648_v7 = vunpack.i.h.bf16 %v8646_v43  ;;  %v8647_v13 = vunpack.i.l.bf16 %v8646_v43  ;;  %v8651_v49 = vpop.permute.xlu0 %8650 }
 0x417   :  { %v8653_v12 = vunpack.i.h.bf16 %v8651_v49  ;;  %v8652_v46 = vunpack.i.l.bf16 %v8651_v49 }
 0x418   :  { %7390 = vmatmul.mubr.msk.f32.gmra.mrb[100].mxu1 %vm32_vm0, %v3340_v10  ;;  %v3719_v61 = vsel %vm683_vm5, %v3703_v57, %v8647_v13  ;;  %v3671_v20 = vsel %vm683_vm5, %v3655_v47, %v8648_v7 }
 0x419   :  { %v8656_v58 = vpop.permute.xlu1 %8655  ;;  %3877 = vmatprep.mubr.f32.mxu0 %v3719_v61  ;;  %v3688_v23 = vsel %vm32_vm0, %v11855_v17, %v8652_v46  ;;  %v3640_v36 = vsel %vm32_vm0, %v11788_v54, %v8653_v12  ;;  %v12194_v5 = vpop.f32.mrb[62].mxu0  ;;  %v6625_v46 = vld [vmem:[%s13877_s3 + $0x220] sm:$0xff] }
 0x41a   :  { %v8658_v53 = vunpack.i.h.bf16 %v8656_v58  ;;  %v8657_v52 = vunpack.i.l.bf16 %v8656_v58  ;;  %3878 = vmatmul.mubr.f32.gmra.mrb[84].mxu0 %v3671_v20  ;;  %v8661_v4 = vpop.permute.xlu0 %8660  ;;  %v12196_v56 = vpop.f32.mrb[63].mxu0  ;;  %v6628_v20 = vld [vmem:[%s13877_s3 + $0x238] sm:$0xff] }
 0x41b   :  { %v8663_v34 = vunpack.i.h.bf16 %v8661_v4  ;;  %v8662_v3 = vunpack.i.l.bf16 %v8661_v4 }
 0x41c   :  { %v3704_v38 = vsel %vm666_vm4, %v3688_v23, %v8657_v52  ;;  %v3656_v31 = vsel %vm666_vm4, %v3640_v36, %v8658_v53 }
 0x41d   :  { %v8666_v60 = vpop.permute.xlu1 %8665  ;;  %v3720_v21 = vsel %vm683_vm5, %v3704_v38, %v8662_v3  ;;  %v3672_v17 = vsel %vm683_vm5, %v3656_v31, %v8663_v34 }
 0x41e   :  { %v8668_v35 = vunpack.i.h.bf16 %v8666_v60  ;;  %v8667_v0 = vunpack.i.l.bf16 %v8666_v60  ;;  %3882 = vmatprep.mubr.f32.mxu0 %v3720_v21  ;;  %v8671_v54 = vpop.permute.xlu0 %8670 }
 0x41f   :  { %v8673_v33 = vunpack.i.h.bf16 %v8671_v54  ;;  %v8672_v50 = vunpack.i.l.bf16 %v8671_v54  ;;  %3883 = vmatmul.mubr.f32.gmra.mrb[86].mxu0 %v3672_v17 }
 0x420   :  { %v3689_v45 = vsel %vm32_vm0, %v11519_v44, %v8667_v0  ;;  %v3641_v19 = vsel %vm32_vm0, %v11820_v39, %v8668_v35  ;;  %v12213_v44 = vld [vmem:[%s13878_s6] ss:$0 sm:$0xff] }
 0x421   :  { %v8676_v30 = vpop.permute.xlu1 %8675  ;;  %v3705_v37 = vsel %vm666_vm4, %v3689_v45, %v8672_v50  ;;  %v3657_v24 = vsel %vm666_vm4, %v3641_v19, %v8673_v33 }
 0x422   :  { %v8678_v2 = vunpack.i.h.bf16 %v8676_v30  ;;  %v8677_v29 = vunpack.i.l.bf16 %v8676_v30 }
 0x424   :  { %v3721_v26 = vsel %vm683_vm5, %v3705_v37, %v8677_v29  ;;  %v3673_v18 = vsel %vm683_vm5, %v3657_v24, %v8678_v2 }
 0x425   :  { %3887 = vmatprep.mubr.f32.mxu0 %v3721_v26 }
 0x426   :  { %3888 = vmatmul.mubr.f32.gmra.mrb[88].mxu0 %v3673_v18 }
 0x43e   :  { %v6896_v59 = vpop.f32.mrb[48].mxu1 }
 0x43f   :  { %v6897_v39 = vpop.f32.mrb[49].mxu1 }
 0x440   :  { %v6898_v28 = vadd.f32 %v6897_v39, %v6896_v59 }
 0x442   :  { %v2849_v14 = vadd.f32 %v6898_v28, %v12213_v44 }
 0x444   :  { %v12217_v40 = vadd.f32 %v11978_v25, %v2849_v14 }
 0x445   :  { %v6899_v6 = vpop.f32.mrb[50].mxu1 }
 0x446   :  { %v6900_v27 = vpop.f32.mrb[51].mxu1 }
 0x447   :  { %v6901_v62 = vadd.f32 %v6900_v27, %v6899_v6 }
 0x449   :  { %v2854_v43 = vadd.f32 %v6901_v62, %v12213_v44 }
 0x44b   :  { %v12221_v42 = vadd.f32 %v11976_v11, %v2854_v43  ;;  %v6626_v11 = vld [vmem:[%s13877_s3 + $0x228] sm:$0xff] }
 0x44c   :  { %v7648_v61 = vpack.c.bf16 %v6626_v11, %v6625_v46 }
 0x44e   :  { %v6902_v10 = vpop.f32.mrb[52].mxu1  ;;  %7649 = vmatprep.subr.bf16.mxu0 %v7648_v61 }
 0x44f   :  { %v6903_v7 = vpop.f32.mrb[53].mxu1  ;;  %7651 = vmatpush3.bf16.msra.mxu0 %v7648_v61 }
 0x450   :  { %v6904_v13 = vadd.f32 %v6903_v7, %v6902_v10 }
 0x452   :  { %v2859_v57 = vadd.f32 %v6904_v13, %v12213_v44 }
 0x454   :  { %v12225_v47 = vadd.f32 %v12006_v16, %v2859_v57  ;;  %v6627_v16 = vld [vmem:[%s13877_s3 + $0x230] sm:$0xff] }
 0x455   :  { %v7652_v58 = vpack.c.bf16 %v6628_v20, %v6627_v16 }
 0x457   :  { %7653 = vmatprep.subr.bf16.mxu0 %v7652_v58 }
 0x458   :  { %7655 = vmatpush3.bf16.msra.mxu0 %v7652_v58 }
 0x459   :  { %v6996_v49 = vpop.f32.mrb[64].mxu0 }
 0x45a   :  { %v6997_v12 = vpop.f32.mrb[65].mxu0 }
 0x45b   :  { %v12227_v25 = vadd.f32 %v6997_v12, %v6996_v49 }
 0x462   :  { %v6999_v53 = vpop.f32.mrb[66].mxu0 }
 0x463   :  { %v7000_v52 = vpop.f32.mrb[67].mxu0 }
 0x464   :  { %v12241_v23 = vadd.f32 %v7000_v52, %v6999_v53 }
 0x465   :  { %v6905_v36 = vpop.f32.mrb[54].mxu1 }
 0x466   :  { %v6906_v4 = vpop.f32.mrb[55].mxu1 }
 0x467   :  { %v6907_v34 = vadd.f32 %v6906_v4, %v6905_v36 }
 0x469   :  { %v2864_v3 = vadd.f32 %v6907_v34, %v12213_v44 }
 0x46b   :  { %v12245_v38 = vadd.f32 %v12004_v41, %v2864_v3 }
 0x46e   :  { %v6908_v31 = vpop.f32.mrb[56].mxu1 }
 0x46f   :  { %v6909_v60 = vpop.f32.mrb[57].mxu1 }
 0x470   :  { %v6910_v35 = vadd.f32 %v6909_v60, %v6908_v31 }
 0x472   :  { %v2869_v0 = vadd.f32 %v6910_v35, %v12213_v44 }
 0x474   :  { %v12249_v21 = vadd.f32 %v12043_v48, %v2869_v0 }
 0x475   :  { %v7002_v17 = vpop.f32.mrb[68].mxu0 }
 0x476   :  { %v7003_v54 = vpop.f32.mrb[69].mxu0 }
 0x477   :  { %v12251_v33 = vadd.f32 %v7003_v54, %v7002_v17 }
 0x47a   :  { %v7005_v50 = vpop.f32.mrb[70].mxu0 }
 0x47b   :  { %v7006_v45 = vpop.f32.mrb[71].mxu0 }
 0x47c   :  { %v12253_v19 = vadd.f32 %v7006_v45, %v7005_v50 }
 0x47d   :  { %v6911_v30 = vpop.f32.mrb[58].mxu1 }
 0x47e   :  { %v6912_v2 = vpop.f32.mrb[59].mxu1 }
 0x47f   :  { %v6913_v41 = vadd.f32 %v6912_v2, %v6911_v30  ;;  %v6610_v30 = vld [vmem:[%s13877_s3 + $0x1a8] sm:$0xff] }
 0x481   :  { %v2874_v29 = vadd.f32 %v6913_v41, %v12213_v44 }
 0x483   :  { %v12257_v37 = vadd.f32 %v12041_v63, %v2874_v29  ;;  %v6594_v29 = vld [vmem:[%s13877_s3 + $0x128] sm:$0xff] }
 0x486   :  { %v6914_v24 = vpop.f32.mrb[60].mxu1 }
 0x487   :  { %v6915_v26 = vpop.f32.mrb[61].mxu1 }
 0x488   :  { %v6916_v48 = vadd.f32 %v6915_v26, %v6914_v24  ;;  %v6612_v24 = vld [vmem:[%s13877_s3 + $0x1b8] sm:$0xff] }
 0x48a   :  { %v2879_v18 = vadd.f32 %v6916_v48, %v12213_v44 }
 0x48c   :  { %v12261_v59 = vadd.f32 %v12077_v1, %v2879_v18 }
 0x48f   :  { %v6917_v39 = vpop.f32.mrb[62].mxu1 }
 0x490   :  { %v6918_v28 = vpop.f32.mrb[63].mxu1 }
 0x491   :  { %v6919_v14 = vadd.f32 %v6918_v28, %v6917_v39  ;;  %v6595_v39 = vld [vmem:[%s13877_s3 + $0x130] sm:$0xff]  ;;  %v6596_v28 = vld [vmem:[%s13877_s3 + $0x138] sm:$0xff] }
 0x493   :  { %v2884_v6 = vadd.f32 %v6919_v14, %v12213_v44  ;;  %v6920_v27 = vpop.f32.mrb[64].mxu1  ;;  %v6613_v14 = vld [vmem:[%s13877_s3 + $0x1c0] sm:$0xff] }
 0x494   :  { %v6921_v62 = vpop.f32.mrb[65].mxu1 }
 0x495   :  { %v12265_v43 = vadd.f32 %v12073_v51, %v2884_v6  ;;  %v6922_v63 = vadd.f32 %v6921_v62, %v6920_v27  ;;  %v6614_v27 = vld [vmem:[%s13877_s3 + $0x1c8] sm:$0xff]  ;;  %v7622_v62 = vpack.c.bf16 %v6596_v28, %v6595_v39  ;;  %v6619_v28 = vld [vmem:[%s13877_s3 + $0x1f0] sm:$0xff] }
 0x497   :  { %14013 = vst [vmem:[#allocation18_spill] sm:$0xff] %v12265_v43  ;;  %v2889_v10 = vadd.f32 %v6922_v63, %v12213_v44 }
 0x499   :  { %v12269_v7 = vadd.f32 %v12116_v32, %v2889_v10  ;;  %v6923_v13 = vpop.f32.mrb[66].mxu1 }
 0x49a   :  { %v6924_v57 = vpop.f32.mrb[67].mxu1 }
 0x49b   :  { %14014 = vst [vmem:[#allocation20_spill] sm:$0xff] %v12269_v7  ;;  %v6925_v1 = vadd.f32 %v6924_v57, %v6923_v13  ;;  %v7624_v13 = vpack.c.bf16 %v6614_v27, %v6613_v14  ;;  %v6597_v57 = vld [vmem:[%s13877_s3 + $0x140] sm:$0xff]  ;;  %v6603_v14 = vld [vmem:[%s13877_s3 + $0x170] sm:$0xff] }
 0x49c   :  { %v12385_v27 = vld [vmem:[#allocation2] sm:$0xff] }
 0x49d   :  { %v2894_v49 = vadd.f32 %v6925_v1, %v12213_v44  ;;  %v6598_v1 = vld [vmem:[%s13877_s3 + $0x148] sm:$0xff] }
 0x49e   :  { %v6926_v12 = vpop.f32.mrb[68].mxu1 }
 0x49f   :  { %v12273_v46 = vadd.f32 %v12112_v8, %v2894_v49  ;;  %v6927_v11 = vpop.f32.mrb[69].mxu1 }
 0x4a0   :  { %v6928_v61 = vadd.f32 %v6927_v11, %v6926_v12  ;;  %v6615_v12 = vld [vmem:[%s13877_s3 + $0x1d0] sm:$0xff] }
 0x4a1   :  { %14015 = vst [vmem:[#allocation21_spill] sm:$0xff] %v12273_v46 }
 0x4a2   :  { %v2899_v51 = vadd.f32 %v6928_v61, %v12213_v44 }
 0x4a4   :  { %v12277_v16 = vadd.f32 %v12146_v22, %v2899_v51  ;;  %v7626_v51 = vpack.c.bf16 %v6598_v1, %v6597_v57 }
 0x4a5   :  { %v6929_v20 = vpop.f32.mrb[70].mxu1 }
 0x4a6   :  { %14016 = vst [vmem:[#allocation22_spill] sm:$0xff] %v12277_v16  ;;  %v6930_v58 = vpop.f32.mrb[71].mxu1 }
 0x4a7   :  { %v6931_v32 = vadd.f32 %v6930_v58, %v6929_v20 }
 0x4a9   :  { %v2904_v53 = vadd.f32 %v6931_v32, %v12213_v44  ;;  %v6599_v32 = vld [vmem:[%s13877_s3 + $0x150] sm:$0xff] }
 0x4aa   :  { %v6932_v52 = vpop.f32.mrb[72].mxu1 }
 0x4ab   :  { %v12281_v36 = vadd.f32 %v12143_v9, %v2904_v53  ;;  %v6933_v4 = vpop.f32.mrb[73].mxu1  ;;  %v6600_v53 = vld [vmem:[%s13877_s3 + $0x158] sm:$0xff] }
 0x4ac   :  { %v6934_v34 = vadd.f32 %v6933_v4, %v6932_v52  ;;  %v6618_v4 = vld [vmem:[%s13877_s3 + $0x1e8] sm:$0xff] }
 0x4ad   :  { %14017 = vst [vmem:[#allocation17_spill] sm:$0xff] %v12281_v36 }
 0x4ae   :  { %v2909_v8 = vadd.f32 %v6934_v34, %v12213_v44 }
 0x4b0   :  { %v12285_v3 = vadd.f32 %v12177_v55, %v2909_v8  ;;  %v6609_v55 = vld [vmem:[%s13877_s3 + $0x1a0] sm:$0xff] }
 0x4b1   :  { %v6935_v31 = vpop.f32.mrb[74].mxu1  ;;  %v7616_v41 = vpack.c.bf16 %v6610_v30, %v6609_v55  ;;  %v12366_v55 = vld [vmem:[%s13879_s4] ss:$0 sm:$0xff] }
 0x4b2   :  { %14018 = vst [vmem:[#allocation14_spill] sm:$0xff] %v12285_v3  ;;  %v6936_v60 = vpop.f32.mrb[75].mxu1  ;;  %v3840_v1 = vadd.f32 %v12251_v33, %v12366_v55  ;;  %v6621_v33 = vld [vmem:[%s13877_s3 + $0x200] sm:$0xff] }
 0x4b3   :  { %v6937_v22 = vadd.f32 %v6936_v60, %v6935_v31  ;;  %7617 = vmatprep.subr.bf16.mxu1 %v7616_v41  ;;  %v7630_v60 = vpack.c.bf16 %v6600_v53, %v6599_v32 }
 0x4b5   :  { %v2914_v35 = vadd.f32 %v6937_v22, %v12213_v44 }
 0x4b6   :  { %v6938_v0 = vpop.f32.mrb[76].mxu1 }
 0x4b7   :  { %v12289_v17 = vadd.f32 %v12173_v15, %v2914_v35  ;;  %v6939_v54 = vpop.f32.mrb[77].mxu1  ;;  %v6593_v15 = vld [vmem:[%s13877_s3 + $0x120] sm:$0xff] }
 0x4b8   :  { %v6940_v50 = vadd.f32 %v6939_v54, %v6938_v0  ;;  %v7618_v48 = vpack.c.bf16 %v6594_v29, %v6593_v15  ;;  %v6601_v54 = vld [vmem:[%s13877_s3 + $0x160] sm:$0xff]  ;;  %v3835_v15 = vadd.f32 %v12241_v23, %v12366_v55  ;;  %v3830_v29 = vadd.f32 %v12227_v25, %v12366_v55  ;;  %v6620_v23 = vld [vmem:[%s13877_s3 + $0x1f8] sm:$0xff] }
 0x4b9   :  { %14019 = vst [vmem:[#allocation12_spill] sm:$0xff] %v12289_v17 }
 0x4ba   :  { %v2919_v9 = vadd.f32 %v6940_v50, %v12213_v44  ;;  %7619 = vmatpush3.bf16.msra.mxu1 %v7618_v48  ;;  %v6602_v50 = vld [vmem:[%s13877_s3 + $0x168] sm:$0xff] }
 0x4bc   :  { %v12293_v45 = vadd.f32 %v12196_v56, %v2919_v9  ;;  %v6611_v56 = vld [vmem:[%s13877_s3 + $0x1b0] sm:$0xff] }
 0x4bd   :  { %v7620_v18 = vpack.c.bf16 %v6612_v24, %v6611_v56 }
 0x4be   :  { %14020 = vst [vmem:[#allocation24_spill] sm:$0xff] %v12293_v45 }
 0x4bf   :  { %v6941_v2 = vpop.f32.mrb[78].mxu1  ;;  %7621 = vmatprep.subr.bf16.mxu1 %v7620_v18 }
 0x4c0   :  { %v6942_v26 = vpop.f32.mrb[79].mxu1  ;;  %7623 = vmatpush3.bf16.msra.mxu1 %v7622_v62  ;;  %v12387_v62 = vld [vmem:[#allocation2 + $0x8] sm:$0x3] }
 0x4c1   :  { %v6943_v6 = vadd.f32 %v6942_v26, %v6941_v2  ;;  %7625 = vmatprep.subr.bf16.mxu1 %v7624_v13  ;;  %v7634_v2 = vpack.c.bf16 %v6602_v50, %v6601_v54  ;;  %v4245_v32 = vrot.slane %v12387_v62, 2  ;;  %v6606_v54 = vld [vmem:[%s13877_s3 + $0x188] sm:$0xff] }
 0x4c3   :  { %v2924_v63 = vadd.f32 %v6943_v6, %v12213_v44  ;;  %v7035_v10 = vpop.f32.mrb[80].mxu1  ;;  %v6616_v44 = vld [vmem:[%s13877_s3 + $0x1d8] sm:$0xff]  ;;  %v3845_v6 = vadd.f32 %v12253_v19, %v12366_v55 }
 0x4c4   :  { %v7036_v49 = vpop.f32.mrb[81].mxu1  ;;  %v7628_v58 = vpack.c.bf16 %v6616_v44, %v6615_v12  ;;  %7627 = vmatpush3.bf16.msra.mxu1 %v7626_v51 }
 0x4c5   :  { %v12339_v11 = vadd.f32 %v12194_v5, %v2924_v63  ;;  %v12341_v61 = vadd.f32 %v7036_v49, %v7035_v10  ;;  %v6617_v5 = vld [vmem:[%s13877_s3 + $0x1e0] sm:$0xff]  ;;  %v7636_v63 = vpack.c.bf16 %v6620_v23, %v6619_v28  ;;  %v6604_v10 = vld [vmem:[%s13877_s3 + $0x178] sm:$0xff] }
 0x4c6   :  { %7629 = vmatprep.subr.bf16.mxu1 %v7628_v58  ;;  %v7632_v0 = vpack.c.bf16 %v6618_v4, %v6617_v5  ;;  %v7638_v49 = vpack.c.bf16 %v6604_v10, %v6603_v14  ;;  %v4244_v58 = vrot.slane %v12385_v27, 2  ;;  %v6622_v5 = vld [vmem:[%s13877_s3 + $0x208] sm:$0xff]  ;;  %v6605_v4 = vld [vmem:[%s13877_s3 + $0x180] sm:$0xff] }
 0x4c7   :  { %14021 = vst [vmem:[#allocation3_spill] sm:$0xff] %v12339_v11  ;;  %v7038_v20 = vpop.f32.mrb[82].mxu1 }
 0x4c8   :  { %v7039_v52 = vpop.f32.mrb[83].mxu1  ;;  %7631 = vmatpush3.bf16.msra.mxu1 %v7630_v60 }
 0x4c9   :  { %v12355_v34 = vadd.f32 %v7039_v52, %v7038_v20  ;;  %v7008_v8 = vpop.f32.mrb[72].mxu0  ;;  %7633 = vmatprep.subr.bf16.mxu1 %v7632_v0  ;;  %v7640_v0 = vpack.c.bf16 %v6622_v5, %v6621_v33 }
 0x4ca   :  { %v7009_v31 = vpop.f32.mrb[73].mxu0 }
 0x4cb   :  { %v7010_v22 = vadd.f32 %v7009_v31, %v7008_v8  ;;  %v7041_v35 = vpop.f32.mrb[84].mxu1 }
 0x4cc   :  { %v7042_v9 = vpop.f32.mrb[85].mxu1  ;;  %7635 = vmatpush3.bf16.msra.mxu1 %v7634_v2 }
 0x4cd   :  { %v12368_v30 = vadd.f32 %v7042_v9, %v7041_v35  ;;  %7637 = vmatprep.subr.bf16.mxu1 %v7636_v63  ;;  %v3850_v35 = vadd.f32 %v7010_v22, %v12366_v55  ;;  %v4196_v22 = vrot.slane %v12385_v27, 1 }
 0x4ce   :  { %v7011_v56 = vpop.f32.mrb[74].mxu0 }
 0x4cf   :  { %v7370_v41 = vpop.f32.mrb[86].mxu1  ;;  %v7012_v48 = vpop.f32.mrb[75].mxu0 }
 0x4d0   :  { %v3980_v24 = vadd.f32 %v7370_v41, %v3835_v15  ;;  %v3974_v26 = vpop.f32.mrb[87].mxu1  ;;  %v7013_v39 = vadd.f32 %v7012_v48, %v7011_v56  ;;  %7639 = vmatpush3.bf16.msra.mxu1 %v7638_v49  ;;  %v7642_v15 = vpack.c.bf16 %v6606_v54, %v6605_v4 }
 0x4d1   :  { %v3975_v18 = vadd.f32 %v3974_v26, %v3830_v29  ;;  %v4246_v29 = vsel %vm265_vm2, %v4244_v58, %v4245_v32  ;;  %7641 = vmatprep.subr.bf16.mxu1 %v7640_v0 }
 0x4d2   :  { %v4054_v25 = vmax.f32 %v3980_v24, 0.0  ;;  %v3855_v44 = vadd.f32 %v7013_v39, %v12366_v55  ;;  %v4197_v24 = vrot.slane %v12387_v62, 1 }
 0x4d3   :  { %v4053_v13 = vmax.f32 %v3975_v18, 0.0  ;;  %v7373_v57 = vpop.f32.mrb[88].mxu1 }
 0x4d4   :  { %4109 = vst.msk [vmem:[#allocation2 + $0x21] sm:$0xff] %vm32_vm0, %v4054_v25  ;;  %v3990_v12 = vadd.f32 %v7373_v57, %v3845_v6  ;;  %v3984_v19 = vpop.f32.mrb[89].mxu1  ;;  %7643 = vmatpush3.bf16.msra.mxu1 %v7642_v15  ;;  %v4198_v15 = vsel %vm216_vm3, %v4196_v22, %v4197_v24 }
 0x4d5   :  { %4108 = vst.msk [vmem:[#allocation2 + $0x11] sm:$0xff] %vm32_vm0, %v4053_v13  ;;  %v3985_v51 = vadd.f32 %v3984_v19, %v3840_v1  ;;  %v7014_v20 = vpop.f32.mrb[76].mxu0  ;;  %v6623_v19 = vld [vmem:[%s13877_s3 + $0x210] sm:$0xff] }
 0x4d6   :  { %v4056_v53 = vmax.f32 %v3990_v12, 0.0  ;;  %v7015_v52 = vpop.f32.mrb[77].mxu0 }
 0x4d7   :  { %v4055_v8 = vmax.f32 %v3985_v51, 0.0  ;;  %v7376_v31 = vpop.f32.mrb[90].mxu1  ;;  %v7016_v60 = vadd.f32 %v7015_v52, %v7014_v20 }
 0x4d8   :  { %4111 = vst.msk [vmem:[#allocation2 + $0x41] sm:$0xff] %vm32_vm0, %v4056_v53  ;;  %v4000_v50 = vadd.f32 %v7376_v31, %v3855_v44  ;;  %v3994_v9 = vpop.f32.mrb[91].mxu1  ;;  %v6624_v44 = vld [vmem:[%s13877_s3 + $0x218] sm:$0xff] }
 0x4d9   :  { %4110 = vst.msk [vmem:[#allocation2 + $0x31] sm:$0xff] %vm32_vm0, %v4055_v8  ;;  %v3995_v2 = vadd.f32 %v3994_v9, %v3850_v35  ;;  %v3860_v41 = vadd.f32 %v7016_v60, %v12366_v55  ;;  %v7644_v31 = vpack.c.bf16 %v6624_v44, %v6623_v19 }
 0x4da   :  { %v4058_v56 = vmax.f32 %v4000_v50, 0.0  ;;  %v7017_v18 = vpop.f32.mrb[78].mxu0 }
 0x4db   :  { %v4057_v26 = vmax.f32 %v3995_v2, 0.0  ;;  %v7379_v48 = vpop.f32.mrb[92].mxu1  ;;  %v12418_v39 = vld [vmem:[#allocation2 + $0x20] sm:$0xff]  ;;  %v4129_v28 = vld [vmem:[#allocation2 + $0x28] sm:$0x3]  ;;  %v7018_v14 = vpop.f32.mrb[79].mxu0  ;;  %7645 = vmatprep.subr.bf16.mxu1 %v7644_v31 }
 0x4dc   :  { %4113 = vst.msk [vmem:[#allocation2 + $0x61] sm:$0xff] %vm32_vm0, %v4058_v56  ;;  %v4004_v23 = vpop.f32.mrb[93].mxu1  ;;  %v8679_v25 = vpack.i.bf16 %v4246_v29, %v12418_v39  ;;  %v4203_v6 = vrot.slane %v4129_v28, 1  ;;  %v4250_v63 = vrot.slane %v12418_v39, 2  ;;  %v4251_v10 = vrot.slane %v4129_v28, 2  ;;  %v12423_v13 = vld [vmem:[#allocation2 + $0x10] sm:$0xff] }
 0x4dd   :  { %4112 = vst.msk [vmem:[#allocation2 + $0x51] sm:$0xff] %vm32_vm0, %v4057_v26  ;;  %v4005_v62 = vadd.f32 %v4004_v23, %v3860_v41  ;;  %v7019_v57 = vadd.f32 %v7018_v14, %v7017_v18  ;;  %v4127_v1 = vld [vmem:[#allocation2 + $0x18] sm:$0x3]  ;;  %v4199_v49 = vrot.slane %v12423_v13, 1  ;;  %v4202_v12 = vrot.slane %v12418_v39, 1 }
 0x4de   :  { %8680 = vrot.lane.b32.xlu1 %v8679_v25, %s9303_s0  ;;  %v4252_v51 = vsel %vm265_vm2, %v4250_v63, %v4251_v10  ;;  %v4200_v20 = vrot.slane %v4127_v1, 1  ;;  %v4247_v58 = vrot.slane %v12423_v13, 2  ;;  %v4248_v32 = vrot.slane %v4127_v1, 2 }
 0x4df   :  { %v4059_v53 = vmax.f32 %v4005_v62, 0.0  ;;  %v3865_v52 = vadd.f32 %v7019_v57, %v12366_v55  ;;  %v12438_v33 = vld [vmem:[#allocation2 + $0x40] sm:$0xff]  ;;  %7400 = vmatprep.mubr.msk.f32.mxu0 %vm32_vm0, %v4252_v51  ;;  %v12442_v5 = vsel %vm216_vm3, %v4202_v12, %v4203_v6  ;;  %v12444_v4 = vpop.f32.mrb[94].mxu1  ;;  %v4133_v8 = vld [vmem:[#allocation2 + $0x48] sm:$0x3] }
 0x4e0   :  { %v12447_v60 = vsel %vm216_vm3, %v4199_v49, %v4200_v20  ;;  %v8684_v35 = vpack.i.bf16 %v12423_v13, %v12442_v5  ;;  %v4014_v0 = vpop.f32.mrb[95].mxu1  ;;  %v12451_v54 = vld [vmem:[#allocation2 + $0x30] sm:$0xff]  ;;  %v4131_v50 = vld [vmem:[#allocation2 + $0x38] sm:$0x3]  ;;  %v4256_v9 = vrot.slane %v12438_v33, 2  ;;  %v4257_v18 = vrot.slane %v4133_v8, 2 }
 0x4e1   :  { %4114 = vst.msk [vmem:[#allocation2 + $0x71] sm:$0xff] %vm32_vm0, %v4059_v53  ;;  %v4010_v2 = vadd.f32 %v7379_v48, %v3865_v52  ;;  %v8694_v41 = vpack.i.bf16 %v12447_v60, %v4252_v51  ;;  %v4253_v29 = vrot.slane %v12451_v54, 2  ;;  %v4254_v56 = vrot.slane %v4131_v50, 2  ;;  %v7020_v26 = vpop.f32.mrb[80].mxu0 }
 0x4e2   :  { %8685 = vrot.lane.b32.xlu0 %v8684_v35, %s9304_s28  ;;  %v4205_v28 = vrot.slane %v12451_v54, 1  ;;  %v4206_v23 = vrot.slane %v4131_v50, 1  ;;  %v4249_v14 = vsel %vm265_vm2, %v4247_v58, %v4248_v32  ;;  %v7021_v25 = vpop.f32.mrb[81].mxu0  ;;  %v8699_v63 = vpack.i.bf16 %v4252_v51, %v12438_v33 }
 0x4e3   :  { %v4060_v22 = vmax.f32 %v4010_v2, 0.0  ;;  %8695 = vrot.lane.b32.xlu1 %v8694_v41, %s9305_s29  ;;  %v12463_v24 = vsel %vm265_vm2, %v4253_v29, %v4254_v56  ;;  %v12465_v48 = vpop.f32.mrb[96].mxu1  ;;  %v12467_v6 = vld [vmem:[#allocation2 + $0x60] sm:$0xff]  ;;  %v12473_v10 = vsel %vm265_vm2, %v4256_v9, %v4257_v18  ;;  %v8689_v62 = vpack.i.bf16 %v4198_v15, %v4249_v14  ;;  %v12481_v12 = vld [vmem:[#allocation2 + $0x68] sm:$0x3] }
 0x4e4   :  { %7401 = vmatmul.mubr.msk.f32.vlgmr.msra.gmra.mrb[90].mxu0 %vm32_vm0, %v12463_v24  ;;  %v12475_v57 = vpop.f32.mrb[97].mxu1  ;;  %v12477_v1 = vld [vmem:[#allocation2 + $0x50] sm:$0xff]  ;;  %v12479_v49 = vld [vmem:[#allocation2 + $0x58] sm:$0x3]  ;;  %v4208_v19 = vrot.slane %v12438_v33, 1  ;;  %v4209_v44 = vrot.slane %v4133_v8, 1  ;;  %v12490_v58 = vsel %vm216_vm3, %v4205_v28, %v4206_v23  ;;  %v3895_v32 = vadd.f32 %v12341_v61, %v12366_v55 }
 0x4e5   :  { %4115 = vst.msk [vmem:[#allocation2 + $0x81] sm:$0xff] %vm32_vm0, %v4060_v22  ;;  %7403 = vmatprep.mubr.msk.f32.mxu0 %vm32_vm0, %v12473_v10  ;;  %v4259_v51 = vrot.slane %v12477_v1, 2  ;;  %v4260_v20 = vrot.slane %v12479_v49, 2  ;;  %v7022_v53 = vadd.f32 %v7021_v25, %v7020_v26  ;;  %v4262_v52 = vrot.slane %v12467_v6, 2  ;;  %v12522_v22 = vld [vmem:[#allocation2 + $0x90] sm:$0xff] }
 0x4e6   :  { %8690 = vrot.lane.b32.xlu0 %v8689_v62, %s9305_s29  ;;  %v7023_v35 = vpop.f32.mrb[82].mxu0  ;;  %v4263_v50 = vrot.slane %v12481_v12, 2  ;;  %v8704_v15 = vpack.i.bf16 %v4249_v14, %v12451_v54  ;;  %v12508_v29 = vsel %vm216_vm3, %v4208_v19, %v4209_v44  ;;  %v8714_v56 = vpack.i.bf16 %v12418_v39, %v12490_v58 }
 0x4e7   :  { %8700 = vrot.lane.b32.xlu1 %v8699_v63, %s9303_s0  ;;  %v7388_v31 = vpop.f32.mrb[98].mxu1  ;;  %v12498_v8 = vsel %vm265_vm2, %v4259_v51, %v4260_v20  ;;  %v3870_v61 = vadd.f32 %v7022_v53, %v12366_v55  ;;  %v7024_v41 = vpop.f32.mrb[83].mxu0  ;;  %v3905_v14 = vadd.f32 %v12368_v30, %v12366_v55  ;;  %v3900_v62 = vadd.f32 %v12355_v34, %v12366_v55 }
 0x4e8   :  { %v4040_v9 = vadd.f32 %v7388_v31, %v3895_v32  ;;  %7404 = vmatmul.mubr.msk.f32.gmra.mrb[92].mxu0 %vm32_vm0, %v12498_v8  ;;  %v12504_v2 = vpop.f32.mrb[99].mxu1  ;;  %v7025_v26 = vadd.f32 %v7024_v41, %v7023_v35  ;;  %v12513_v18 = vsel %vm265_vm2, %v4262_v52, %v4263_v50  ;;  %v12515_v23 = vld [vmem:[#allocation2 + $0x70] sm:$0xff]  ;;  %v12528_v44 = vld [vmem:[#allocation2 + $0x78] sm:$0x3]  ;;  %v4334_v30 = vrot.slane %v12522_v22, 2 }
 0x4e9   :  { %v4015_v25 = vadd.f32 %v4014_v0, %v3870_v61  ;;  %7406 = vmatprep.mubr.msk.f32.mxu0 %vm32_vm0, %v12513_v18  ;;  %v4265_v51 = vrot.slane %v12515_v23, 2  ;;  %v8709_v53 = vpack.i.bf16 %v12451_v54, %v12508_v29  ;;  %v4266_v52 = vrot.slane %v12528_v44, 2  ;;  %v12536_v31 = vld [vmem:[#allocation2 + $0x98] sm:$0x3] }
 0x4ea   :  { %v4066_v28 = vmax.f32 %v4040_v9, 0.0  ;;  %8705 = vrot.lane.b32.xlu0 %v8704_v15, %s9303_s0  ;;  %v3875_v19 = vadd.f32 %v7025_v26, %v12366_v55  ;;  %v8724_v34 = vpack.i.bf16 %v12490_v58, %v12473_v10  ;;  %v4335_v15 = vrot.slane %v12536_v31, 2 }
 0x4eb   :  { %8715 = vrot.lane.b32.xlu1 %v8714_v56, %s9304_s28  ;;  %v7391_v63 = vpop.f32.mrb[100].mxu1  ;;  %v4061_v32 = vmax.f32 %v4015_v25, 0.0  ;;  %v4211_v41 = vrot.slane %v12477_v1, 1  ;;  %v4212_v56 = vrot.slane %v12479_v49, 1  ;;  %v6608_v49 = vld [vmem:[%s13877_s3 + $0x198] sm:$0xff] }
 0x4ec   :  { %4121 = vst.msk [vmem:[#allocation2 + $0x101] sm:$0xff] %vm32_vm0, %v4066_v28  ;;  %v4050_v0 = vadd.f32 %v7391_v63, %v3905_v14  ;;  %v4044_v20 = vpop.f32.mrb[101].mxu1  ;;  %v4020_v50 = vadd.f32 %v12444_v4, %v3875_v19  ;;  %v12547_v28 = vsel %vm265_vm2, %v4265_v51, %v4266_v52  ;;  %v6607_v63 = vld [vmem:[%s13877_s3 + $0x190] sm:$0xff]  ;;  %v12561_v19 = vld [vmem:[#allocation2 + $0x80] sm:$0xff]  ;;  %v8719_v51 = vpack.i.bf16 %v12442_v5, %v12463_v24 }
 0x4ed   :  { %v4045_v35 = vadd.f32 %v4044_v20, %v3900_v62  ;;  %v7026_v9 = vpop.f32.mrb[84].mxu0  ;;  %4116 = vst.msk [vmem:[#allocation2 + $0xb1] sm:$0xff] %vm32_vm0, %v4061_v32  ;;  %7407 = vmatmul.mubr.msk.f32.gmra.mrb[94].mxu0 %vm32_vm0, %v12547_v28  ;;  %v8729_v62 = vpack.i.bf16 %v12473_v10, %v12467_v6  ;;  %v12566_v20 = vld [vmem:[#allocation2 + $0x88] sm:$0x3]  ;;  %v4318_v10 = vrot.slane %v12561_v19, 2 }
 0x4ee   :  { %v4068_v61 = vmax.f32 %v4050_v0, 0.0  ;;  %8710 = vrot.lane.b32.xlu0 %v8709_v53, %s9304_s28  ;;  %v7027_v26 = vpop.f32.mrb[85].mxu0  ;;  %v4062_v4 = vmax.f32 %v4020_v50, 0.0  ;;  %v4214_v0 = vrot.slane %v12467_v6, 1  ;;  %v4215_v53 = vrot.slane %v12481_v12, 1 }
 0x4ef   :  { %v4067_v14 = vmax.f32 %v4045_v35, 0.0  ;;  %8725 = vrot.lane.b32.xlu1 %v8724_v34, %s9305_s29  ;;  %v7028_v25 = vadd.f32 %v7027_v26, %v7026_v9  ;;  %v4319_v52 = vrot.slane %v12566_v20, 2  ;;  %v12575_v34 = vsel %vm216_vm3, %v4211_v41, %v4212_v56 }
 0x4f0   :  { %4123 = vst.msk [vmem:[#allocation2 + $0x121] sm:$0xff] %vm32_vm0, %v4068_v61  ;;  %4117 = vst.msk [vmem:[#allocation2 + $0xc1] sm:$0xff] %vm32_vm0, %v4062_v4  ;;  %v4336_v35 = vsel %vm265_vm2, %v4334_v30, %v4335_v15  ;;  %v7646_v50 = vpack.c.bf16 %v6608_v49, %v6607_v63  ;;  %v12589_v30 = vsel %vm216_vm3, %v4214_v0, %v4215_v53 }
 0x4f1   :  { %4122 = vst.msk [vmem:[#allocation2 + $0x111] sm:$0xff] %vm32_vm0, %v4067_v14  ;;  %v3880_v32 = vadd.f32 %v7028_v25, %v12366_v55  ;;  %v12582_v26 = vsel %vm265_vm2, %v4318_v10, %v4319_v52  ;;  %v8734_v14 = vpack.i.bf16 %v12463_v24, %v12477_v1  ;;  %v8739_v15 = vpack.i.bf16 %v12477_v1, %v12589_v30 }
 0x4f2   :  { %8720 = vrot.lane.b32.xlu0 %v8719_v51, %s9305_s29  ;;  %v7029_v61 = vpop.f32.mrb[86].mxu0  ;;  %7409 = vmatprep.mubr.msk.f32.mxu0 %vm32_vm0, %v12582_v26  ;;  %v8754_v63 = vpack.i.bf16 %v12575_v34, %v12513_v18  ;;  %v4329_v10 = vrot.slane %v12536_v31, 1 }
 0x4f3   :  { %v4025_v9 = vadd.f32 %v12475_v57, %v3880_v32  ;;  %8730 = vrot.lane.b32.xlu1 %v8729_v62, %s9303_s0  ;;  %v7030_v12 = vpop.f32.mrb[87].mxu0  ;;  %7647 = vmatpush3.bf16.msra.mxu1 %v7646_v50  ;;  %v8744_v57 = vpack.i.bf16 %v12438_v33, %v12575_v34  ;;  %v4328_v32 = vrot.slane %v12522_v22, 1 }
 0x4f4   :  { %v7031_v56 = vadd.f32 %v7030_v12, %v7029_v61  ;;  %7410 = vmatmul.mubr.msk.f32.gmra.mrb[96].mxu0 %vm32_vm0, %v4336_v35  ;;  %v4297_v61 = vrot.slane %v12566_v20, 1  ;;  %v4296_v12 = vrot.slane %v12561_v19, 1 }
 0x4f5   :  { %v4063_v41 = vmax.f32 %v4025_v9, 0.0  ;;  %v8759_v9 = vpack.i.bf16 %v12513_v18, %v12561_v19 }
 0x4f6   :  { %8735 = vrot.lane.b32.xlu0 %v8734_v14, %s9303_s0  ;;  %v3885_v24 = vadd.f32 %v7031_v56, %v12366_v55  ;;  %v4217_v14 = vrot.slane %v12515_v23, 1  ;;  %v4330_v56 = vsel %vm216_vm3, %v4328_v32, %v4329_v10 }
 0x4f7   :  { %4118 = vst.msk [vmem:[#allocation2 + $0xd1] sm:$0xff] %vm32_vm0, %v4063_v41  ;;  %8745 = vrot.lane.b32.xlu1 %v8744_v57, %s9304_s28  ;;  %v12600_v4 = vld [vmem:[#allocation2 + $0xc0] sm:$0xff]  ;;  %v12602_v25 = vld [vmem:[#allocation2 + $0xc8] sm:$0x3]  ;;  %v4218_v41 = vrot.slane %v12528_v44, 1 }
 0x4f8   :  { %v4030_v49 = vadd.f32 %v12465_v48, %v3885_v24  ;;  %v4274_v51 = vrot.slane %v12600_v4, 2  ;;  %v4275_v0 = vrot.slane %v12602_v25, 2  ;;  %v8749_v48 = vpack.i.bf16 %v12508_v29, %v12498_v8  ;;  %v12706_v11 = vld [vmem:[#allocation2 + $0x128] sm:$0x3] }
 0x4f9   :  { %v7032_v62 = vpop.f32.mrb[88].mxu0 }
 0x4fa   :  { %8740 = vrot.lane.b32.xlu0 %v8739_v15, %s9304_s28  ;;  %v7033_v53 = vpop.f32.mrb[89].mxu0  ;;  %v4064_v52 = vmax.f32 %v4030_v49, 0.0  ;;  %v12614_v50 = vsel %vm265_vm2, %v4274_v51, %v4275_v0  ;;  %v8769_v15 = vpack.i.bf16 %v12498_v8, %v12515_v23  ;;  %v12642_v49 = vsel %vm216_vm3, %v4296_v12, %v4297_v61  ;;  %v12655_v8 = vld [vmem:[#allocation2 + $0xa0] sm:$0xff]  ;;  %v12673_v61 = vld [vmem:[#allocation2 + $0x108] sm:$0x3] }
 0x4fb   :  { %v7034_v35 = vadd.f32 %v7033_v53, %v7032_v62  ;;  %8755 = vrot.lane.b32.xlu1 %v8754_v63, %s9305_s29  ;;  %7412 = vmatprep.mubr.msk.f32.mxu0 %vm32_vm0, %v12614_v50  ;;  %v8764_v63 = vpack.i.bf16 %v12561_v19, %v4330_v56  ;;  %v4145_v19 = vld [vmem:[#allocation2 + $0xa8] sm:$0x3]  ;;  %v8774_v51 = vpack.i.bf16 %v12515_v23, %v12642_v49  ;;  %v4268_v53 = vrot.slane %v12655_v8, 2  ;;  %v4147_v12 = vld [vmem:[#allocation2 + $0xb8] sm:$0x3] }
 0x4fc   :  { %4119 = vst.msk [vmem:[#allocation2 + $0xe1] sm:$0xff] %vm32_vm0, %v4064_v52  ;;  %v4269_v10 = vrot.slane %v4145_v19, 2  ;;  %v8784_v56 = vpack.i.bf16 %v12589_v30, %v12547_v28  ;;  %v4221_v3 = vrot.slane %v4145_v19, 1  ;;  %v4272_v36 = vrot.slane %v4147_v12, 2 }
 0x4fd   :  { %v3890_v31 = vadd.f32 %v7034_v35, %v12366_v55 }
 0x4fe   :  { %8750 = vrot.lane.b32.xlu0 %v8749_v48, %s9305_s29  ;;  %v12630_v57 = vld [vmem:[#allocation2 + $0xd0] sm:$0xff]  ;;  %v12632_v24 = vld [vmem:[#allocation2 + $0xd8] sm:$0x3] }
 0x4ff   :  { %v4035_v18 = vadd.f32 %v12504_v2, %v3890_v31  ;;  %8760 = vrot.lane.b32.xlu1 %v8759_v9, %s9303_s0  ;;  %v4277_v55 = vrot.slane %v12630_v57, 2  ;;  %v4278_v20 = vrot.slane %v12632_v24, 2  ;;  %v12648_v2 = vsel %vm216_vm3, %v4217_v14, %v4218_v41  ;;  %v12668_v9 = vld [vmem:[#allocation2 + $0x100] sm:$0xff]  ;;  %v12671_v31 = vld [vmem:[#allocation2 + $0xb0] sm:$0xff] }
 0x500   :  { %v8779_v52 = vpack.i.bf16 %v12467_v6, %v12648_v2  ;;  %v4220_v41 = vrot.slane %v12655_v8, 1  ;;  %v4271_v16 = vrot.slane %v12671_v31, 2 }
 0x501   :  { %v4065_v44 = vmax.f32 %v4035_v18, 0.0  ;;  %v12645_v62 = vsel %vm265_vm2, %v4277_v55, %v4278_v20  ;;  %v8789_v18 = vpack.i.bf16 %v12648_v2, %v12582_v26  ;;  %v4270_v55 = vsel %vm265_vm2, %v4268_v53, %v4269_v10  ;;  %v12699_v53 = vld [vmem:[#allocation2 + $0x118] sm:$0x3] }
 0x502   :  { %8770 = vrot.lane.b32.xlu0 %v8769_v15, %s9303_s0  ;;  %7413 = vmatmul.mubr.msk.f32.gmra.mrb[98].mxu0 %vm32_vm0, %v12645_v62  ;;  %v4286_v20 = vrot.slane %v12668_v9, 2  ;;  %v4223_v15 = vrot.slane %v12671_v31, 1  ;;  %v8799_v17 = vpack.i.bf16 %v4270_v55, %v12600_v4  ;;  %v4290_v43 = vrot.slane %v12699_v53, 2 }
 0x503   :  { %4120 = vst.msk [vmem:[#allocation2 + $0xf1] sm:$0xff] %vm32_vm0, %v4065_v44  ;;  %8765 = vrot.lane.b32.xlu1 %v8764_v63, %s9304_s28  ;;  %v12659_v0 = vld [vmem:[#allocation2 + $0xe0] sm:$0xff]  ;;  %v12661_v32 = vld [vmem:[#allocation2 + $0xe8] sm:$0x3]  ;;  %v4226_v44 = vrot.slane %v12600_v4, 1  ;;  %v4227_v63 = vrot.slane %v12602_v25, 1 }
 0x504   :  { %v4280_v35 = vrot.slane %v12659_v0, 2  ;;  %v4281_v48 = vrot.slane %v12661_v32, 2  ;;  %v12704_v25 = vld [vmem:[#allocation2 + $0x120] sm:$0xff] }
 0x505   :  { %v12713_v46 = vsel %vm216_vm3, %v4226_v44, %v4227_v63  ;;  %v4222_v44 = vsel %vm216_vm3, %v4220_v41, %v4221_v3  ;;  %v4229_v63 = vrot.slane %v12630_v57, 1 }
 0x506   :  { %8775 = vrot.lane.b32.xlu0 %v8774_v51, %s9304_s28  ;;  %v12677_v14 = vsel %vm265_vm2, %v4280_v35, %v4281_v48  ;;  %v12691_v51 = vld [vmem:[#allocation2 + $0x110] sm:$0xff]  ;;  %v4224_v35 = vrot.slane %v4147_v12, 1  ;;  %v4322_v12 = vrot.slane %v12706_v11, 2 }
 0x507   :  { %8780 = vrot.lane.b32.xlu1 %v8779_v52, %s9304_s28  ;;  %7415 = vmatprep.mubr.msk.f32.mxu0 %vm32_vm0, %v12677_v14  ;;  %v4287_v52 = vrot.slane %v12673_v61, 2  ;;  %v4289_v7 = vrot.slane %v12691_v51, 2 }
 0x508   :  { %v12721_v19 = vsel %vm216_vm3, %v4223_v15, %v4224_v35 }
 0x509   :  { %v8814_v55 = vpack.i.bf16 %v12721_v19, %v12614_v50  ;;  %v12736_v15 = vsel %vm265_vm2, %v4289_v7, %v4290_v43  ;;  %v8819_v7 = vpack.i.bf16 %v12614_v50, %v12659_v0 }
 0x50a   :  { %8785 = vrot.lane.b32.xlu0 %v8784_v56, %s9305_s29  ;;  %v12695_v26 = vld [vmem:[#allocation2 + $0xf0] sm:$0xff]  ;;  %v12697_v48 = vld [vmem:[#allocation2 + $0xf8] sm:$0x3]  ;;  %v8794_v56 = vpack.i.bf16 %v12547_v28, %v12522_v22  ;;  %v4288_v22 = vsel %vm265_vm2, %v4286_v20, %v4287_v52  ;;  %v4321_v28 = vrot.slane %v12704_v25, 2  ;;  %v4273_v20 = vsel %vm265_vm2, %v4271_v16, %v4272_v36 }
 0x50b   :  { %8790 = vrot.lane.b32.xlu1 %v8789_v18, %s9305_s29  ;;  %v4283_v10 = vrot.slane %v12695_v26, 2  ;;  %v4284_v45 = vrot.slane %v12697_v48, 2  ;;  %v4230_v52 = vrot.slane %v12632_v24, 1  ;;  %v8809_v43 = vpack.i.bf16 %v4222_v44, %v4273_v20 }
 0x50c   :  { %v4232_v16 = vrot.slane %v12659_v0, 1  ;;  %v4233_v36 = vrot.slane %v12661_v32, 1  ;;  %v8824_v24 = vpack.i.bf16 %v4273_v20, %v12630_v57  ;;  %v8854_v44 = vpack.i.bf16 %v12645_v62, %v12695_v26 }
 0x50d   :  { %v12716_v18 = vsel %vm265_vm2, %v4283_v10, %v4284_v45  ;;  %v8804_v45 = vpack.i.bf16 %v12671_v31, %v12713_v46  ;;  %v12753_v3 = vsel %vm216_vm3, %v4229_v63, %v4230_v52  ;;  %v8839_v10 = vpack.i.bf16 %v12713_v46, %v12645_v62 }
 0x50e   :  { %8795 = vrot.lane.b32.xlu0 %v8794_v56, %s9303_s0  ;;  %7416 = vmatmul.mubr.msk.f32.gmra.mrb[100].mxu0 %vm32_vm0, %v12716_v18  ;;  %v12759_v41 = vsel %vm216_vm3, %v4232_v16, %v4233_v36  ;;  %v8834_v35 = vpack.i.bf16 %v12600_v4, %v12753_v3  ;;  %v8844_v32 = vpack.i.bf16 %v12753_v3, %v12677_v14  ;;  %v4235_v56 = vrot.slane %v12695_v26, 1  ;;  %v4162_v36 = vld [vmem:[#allocation2 + $0x130] sm:$0xff] }
 0x50f   :  { %8800 = vrot.lane.b32.xlu1 %v8799_v17, %s9303_s0  ;;  %7418 = vmatprep.mubr.msk.f32.mxu0 %vm32_vm0, %v4288_v22  ;;  %v4323_v17 = vsel %vm265_vm2, %v4321_v28, %v4322_v12  ;;  %v8829_v50 = vpack.i.bf16 %v12630_v57, %v12759_v41  ;;  %v4236_v28 = vrot.slane %v12697_v48, 1  ;;  %v8849_v12 = vpack.i.bf16 %v12677_v14, %v12668_v9 }
 0x510   :  { %v4241_v62 = vrot.slane %v12691_v51, 1  ;;  %v4242_v52 = vrot.slane %v12699_v53, 1  ;;  %v8884_v53 = vpack.i.bf16 %v12716_v18, %v12691_v51 }
 0x511   :  { %v12784_v20 = vsel %vm216_vm3, %v4235_v56, %v4236_v28 }
 0x512   :  { %8805 = vrot.lane.b32.xlu0 %v8804_v45, %s9304_s28  ;;  %7419 = vmatmul.mubr.msk.f32.gmra.mrb[102].mxu0 %vm32_vm0, %v12736_v15  ;;  %v4238_v45 = vrot.slane %v12668_v9, 1  ;;  %v8864_v48 = vpack.i.bf16 %v12659_v0, %v12784_v20  ;;  %v8874_v63 = vpack.i.bf16 %v12784_v20, %v4288_v22  ;;  %v12804_v16 = vsel %vm216_vm3, %v4241_v62, %v4242_v52 }
 0x513   :  { %8815 = vrot.lane.b32.xlu1 %v8814_v55, %s9305_s29  ;;  %7421 = vmatprep.mubr.msk.f32.mxu0 %vm32_vm0, %v4323_v17  ;;  %v4239_v55 = vrot.slane %v12673_v61, 1  ;;  %v8904_v28 = vpack.i.bf16 %v12804_v16, %v4323_v17 }
 0x515   :  { %v12790_v14 = vsel %vm216_vm3, %v4238_v45, %v4239_v55 }
 0x516   :  { %8810 = vrot.lane.b32.xlu0 %v8809_v43, %s9305_s29  ;;  %v8859_v61 = vpack.i.bf16 %v12695_v26, %v12790_v14  ;;  %v8869_v43 = vpack.i.bf16 %v12759_v41, %v12716_v18  ;;  %v8894_v56 = vpack.i.bf16 %v12790_v14, %v12736_v15 }
 0x517   :  { %8820 = vrot.lane.b32.xlu1 %v8819_v7, %s9303_s0  ;;  %v8879_v7 = vpack.i.bf16 %v4288_v22, %v12704_v25  ;;  %v4331_v22 = vrot.slane %v4162_v36, 1 }
 0x51a   :  { %8825 = vrot.lane.b32.xlu0 %v8824_v24, %s9303_s0  ;;  %v4163_v24 = vld [vmem:[#allocation2 + $0x138] sm:$0x3] }
 0x51b   :  { %8835 = vrot.lane.b32.xlu1 %v8834_v35, %s9304_s28  ;;  %v4300_v35 = vrot.slane %v12706_v11, 1  ;;  %v4337_v11 = vrot.slane %v4162_v36, 2 }
 0x51e   :  { %8830 = vrot.lane.b32.xlu0 %v8829_v50, %s9304_s28  ;;  %v8889_v50 = vpack.i.bf16 %v12668_v9, %v12804_v16 }
 0x51f   :  { %8845 = vrot.lane.b32.xlu1 %v8844_v32, %s9305_s29  ;;  %v4299_v32 = vrot.slane %v12704_v25, 1 }
 0x521   :  { %v12820_v18 = vsel %vm216_vm3, %v4299_v32, %v4300_v35 }
 0x522   :  { %8840 = vrot.lane.b32.xlu0 %v8839_v10, %s9305_s29  ;;  %v4332_v10 = vrot.slane %v4163_v24, 1 }
 0x523   :  { %8850 = vrot.lane.b32.xlu1 %v8849_v12, %s9303_s0  ;;  %v4338_v12 = vrot.slane %v4163_v24, 2 }
 0x524   :  { %v4333_v45 = vsel %vm216_vm3, %v4331_v22, %v4332_v10 }
 0x525   :  { %v4339_v55 = vsel %vm265_vm2, %v4337_v11, %v4338_v12  ;;  %v8914_v17 = vpack.i.bf16 %v12704_v25, %v4333_v45 }
 0x526   :  { %8855 = vrot.lane.b32.xlu0 %v8854_v44, %s9303_s0  ;;  %v8899_v44 = vpack.i.bf16 %v12691_v51, %v12820_v18  ;;  %7422 = vmatmul.mubr.msk.f32.gmra.mrb[104].mxu0 %vm32_vm0, %v4339_v55 }
 0x527   :  { %8865 = vrot.lane.b32.xlu1 %v8864_v48, %s9304_s28  ;;  %v8909_v48 = vpack.i.bf16 %v12736_v15, %v4162_v36 }
 0x52a   :  { %8860 = vrot.lane.b32.xlu0 %v8859_v61, %s9304_s28 }
 0x52b   :  { %8875 = vrot.lane.b32.xlu1 %v8874_v63, %s9305_s29 }
 0x52e   :  { %8870 = vrot.lane.b32.xlu0 %v8869_v43, %s9305_s29 }
 0x52f   :  { %8880 = vrot.lane.b32.xlu1 %v8879_v7, %s9303_s0 }
 0x532   :  { %8885 = vrot.lane.b32.xlu0 %v8884_v53, %s9303_s0 }
 0x533   :  { %8890 = vrot.lane.b32.xlu1 %v8889_v50, %s9304_s28 }
 0x536   :  { %8895 = vrot.lane.b32.xlu0 %v8894_v56, %s9305_s29 }
 0x537   :  { %8905 = vrot.lane.b32.xlu1 %v8904_v28, %s9305_s29 }
 0x53a   :  { %8900 = vrot.lane.b32.xlu0 %v8899_v44, %s9304_s28 }
 0x53b   :  { %8915 = vrot.lane.b32.xlu1 %v8914_v17, %s9304_s28 }
 0x53e   :  { %8910 = vrot.lane.b32.xlu0 %v8909_v48, %s9303_s0 }
 0x550   :  { %v8681_v61 = vpop.permute.xlu1 %8680 }
 0x551   :  { %v8683_v53 = vunpack.i.h.bf16 %v8681_v61  ;;  %v8682_v35 = vunpack.i.l.bf16 %v8681_v61 }
 0x554   :  { %v8686_v63 = vpop.permute.xlu0 %8685 }
 0x555   :  { %v8696_v62 = vpop.permute.xlu1 %8695  ;;  %v8688_v25 = vunpack.i.h.bf16 %v8686_v63  ;;  %v8687_v22 = vunpack.i.l.bf16 %v8686_v63 }
 0x556   :  { %v8698_v50 = vunpack.i.h.bf16 %v8696_v62  ;;  %v8697_v32 = vunpack.i.l.bf16 %v8696_v62 }
 0x558   :  { %v8691_v52 = vpop.permute.xlu0 %8690 }
 0x559   :  { %v8693_v43 = vunpack.i.h.bf16 %v8691_v52  ;;  %v8692_v7 = vunpack.i.l.bf16 %v8691_v52  ;;  %v8701_v24 = vpop.permute.xlu1 %8700 }
 0x55b   :  { %v4628_v10 = vsel %vm32_vm0, %v12385_v27, %v8693_v43  ;;  %v4676_v15 = vsel %vm32_vm0, %v12447_v60, %v8692_v7  ;;  %v4677_v27 = vsel %vm32_vm0, %v12442_v5, %v8697_v32  ;;  %v4629_v60 = vsel %vm32_vm0, %v12423_v13, %v8698_v50 }
 0x55c   :  { %v8706_v36 = vpop.permute.xlu0 %8705  ;;  %v4692_v56 = vsel %vm666_vm4, %v4676_v15, %v8682_v35  ;;  %v4644_v28 = vsel %vm666_vm4, %v4628_v10, %v8683_v53  ;;  %v8703_v32 = vunpack.i.h.bf16 %v8701_v24 }
 0x55d   :  { %v8708_v11 = vunpack.i.h.bf16 %v8706_v36  ;;  %v8707_v12 = vunpack.i.l.bf16 %v8706_v36  ;;  %v8716_v45 = vpop.permute.xlu1 %8715  ;;  %v4708_v55 = vsel %vm683_vm5, %v4692_v56, %v8687_v22  ;;  %v4660_v44 = vsel %vm683_vm5, %v4644_v28, %v8688_v25 }
 0x55e   :  { %v8718_v17 = vunpack.i.h.bf16 %v8716_v45  ;;  %v8717_v48 = vunpack.i.l.bf16 %v8716_v45  ;;  %4826 = vmatprep.mubr.f32.mxu1 %v4708_v55  ;;  %v8702_v22 = vunpack.i.l.bf16 %v8701_v24 }
 0x55f   :  { %4827 = vmatmul.mubr.f32.vlgmr.msra.gmra.mrb[102].mxu1 %v4660_v44  ;;  %v4693_v61 = vsel %vm666_vm4, %v4677_v27, %v8707_v12  ;;  %v4645_v63 = vsel %vm666_vm4, %v4629_v60, %v8708_v11 }
 0x560   :  { %v8711_v62 = vpop.permute.xlu0 %8710  ;;  %v4709_v52 = vsel %vm683_vm5, %v4693_v61, %v8717_v48  ;;  %v4661_v7 = vsel %vm683_vm5, %v4645_v63, %v8718_v17 }
 0x561   :  { %v8726_v43 = vpop.permute.xlu1 %8725  ;;  %4831 = vmatprep.mubr.f32.mxu1 %v4709_v52  ;;  %v8713_v10 = vunpack.i.h.bf16 %v8711_v62  ;;  %v8712_v15 = vunpack.i.l.bf16 %v8711_v62 }
 0x562   :  { %v8728_v13 = vunpack.i.h.bf16 %v8726_v43  ;;  %v8727_v50 = vunpack.i.l.bf16 %v8726_v43 }
 0x563   :  { %4832 = vmatmul.mubr.f32.gmra.mrb[104].mxu1 %v4661_v7 }
 0x564   :  { %v8721_v53 = vpop.permute.xlu0 %8720 }
 0x565   :  { %v8723_v35 = vunpack.i.h.bf16 %v8721_v53  ;;  %v8722_v25 = vunpack.i.l.bf16 %v8721_v53  ;;  %v8731_v5 = vpop.permute.xlu1 %8730 }
 0x567   :  { %v4678_v36 = vsel %vm32_vm0, %v12490_v58, %v8722_v25  ;;  %v4630_v56 = vsel %vm32_vm0, %v12418_v39, %v8723_v35  ;;  %v4679_v58 = vsel %vm32_vm0, %v12508_v29, %v8727_v50  ;;  %v4631_v39 = vsel %vm32_vm0, %v12451_v54, %v8728_v13 }
 0x568   :  { %v8736_v28 = vpop.permute.xlu0 %8735  ;;  %v4694_v11 = vsel %vm666_vm4, %v4678_v36, %v8702_v22  ;;  %v4646_v12 = vsel %vm666_vm4, %v4630_v56, %v8703_v32  ;;  %v8733_v25 = vunpack.i.h.bf16 %v8731_v5  ;;  %v8732_v32 = vunpack.i.l.bf16 %v8731_v5 }
 0x569   :  { %v8738_v45 = vunpack.i.h.bf16 %v8736_v28  ;;  %v8737_v55 = vunpack.i.l.bf16 %v8736_v28  ;;  %v8746_v44 = vpop.permute.xlu1 %8745  ;;  %v4710_v24 = vsel %vm683_vm5, %v4694_v11, %v8712_v15  ;;  %v4662_v17 = vsel %vm683_vm5, %v4646_v12, %v8713_v10 }
 0x56a   :  { %v8748_v48 = vunpack.i.h.bf16 %v8746_v44  ;;  %v8747_v27 = vunpack.i.l.bf16 %v8746_v44  ;;  %4836 = vmatprep.mubr.f32.mxu1 %v4710_v24 }
 0x56b   :  { %4837 = vmatmul.mubr.f32.gmra.mrb[106].mxu1 %v4662_v17  ;;  %v4695_v60 = vsel %vm666_vm4, %v4679_v58, %v8737_v55  ;;  %v4647_v61 = vsel %vm666_vm4, %v4631_v39, %v8738_v45 }
 0x56c   :  { %v8741_v63 = vpop.permute.xlu0 %8740  ;;  %v4711_v62 = vsel %vm683_vm5, %v4695_v60, %v8747_v27  ;;  %v4663_v43 = vsel %vm683_vm5, %v4647_v61, %v8748_v48 }
 0x56d   :  { %v8756_v52 = vpop.permute.xlu1 %8755  ;;  %4841 = vmatprep.mubr.f32.mxu1 %v4711_v62  ;;  %v8743_v54 = vunpack.i.h.bf16 %v8741_v63  ;;  %v8742_v22 = vunpack.i.l.bf16 %v8741_v63 }
 0x56e   :  { %v8758_v12 = vunpack.i.h.bf16 %v8756_v52  ;;  %v8757_v5 = vunpack.i.l.bf16 %v8756_v52 }
 0x56f   :  { %4842 = vmatmul.mubr.f32.gmra.mrb[108].mxu1 %v4663_v43 }
 0x570   :  { %v8751_v7 = vpop.permute.xlu0 %8750  ;;  %v4681_v17 = vsel %vm32_vm0, %v12589_v30, %v8757_v5  ;;  %v4633_v48 = vsel %vm32_vm0, %v12477_v1, %v8758_v12 }
 0x571   :  { %v8753_v53 = vunpack.i.h.bf16 %v8751_v7  ;;  %v8752_v35 = vunpack.i.l.bf16 %v8751_v7  ;;  %v8761_v29 = vpop.permute.xlu1 %8760 }
 0x572   :  { %v8763_v43 = vunpack.i.h.bf16 %v8761_v29  ;;  %v8762_v7 = vunpack.i.l.bf16 %v8761_v29 }
 0x573   :  { %v4680_v13 = vsel %vm32_vm0, %v12575_v34, %v8752_v35  ;;  %v4632_v50 = vsel %vm32_vm0, %v12438_v33, %v8753_v53 }
 0x574   :  { %v8771_v10 = vpop.permute.xlu0 %8770  ;;  %v4696_v15 = vsel %vm666_vm4, %v4680_v13, %v8732_v32  ;;  %v4648_v36 = vsel %vm666_vm4, %v4632_v50, %v8733_v25 }
 0x575   :  { %v8766_v56 = vpop.permute.xlu1 %8765  ;;  %v4712_v28 = vsel %vm683_vm5, %v4696_v15, %v8742_v22  ;;  %v4664_v11 = vsel %vm683_vm5, %v4648_v36, %v8743_v54  ;;  %v8773_v45 = vunpack.i.h.bf16 %v8771_v10  ;;  %v8772_v55 = vunpack.i.l.bf16 %v8771_v10 }
 0x576   :  { %4846 = vmatprep.mubr.f32.mxu1 %v4712_v28  ;;  %v8767_v28 = vunpack.i.l.bf16 %v8766_v56  ;;  %v8768_v5 = vunpack.i.h.bf16 %v8766_v56 }
 0x577   :  { %4847 = vmatmul.mubr.f32.gmra.mrb[110].mxu1 %v4664_v11  ;;  %v4697_v27 = vsel %vm666_vm4, %v4681_v17, %v8772_v55  ;;  %v4649_v58 = vsel %vm666_vm4, %v4633_v48, %v8773_v45 }
 0x578   :  { %v8776_v34 = vpop.permute.xlu0 %8775 }
 0x579   :  { %v8781_v44 = vpop.permute.xlu1 %8780  ;;  %v8778_v35 = vunpack.i.h.bf16 %v8776_v34  ;;  %v8777_v1 = vunpack.i.l.bf16 %v8776_v34 }
 0x57a   :  { %v8783_v24 = vunpack.i.h.bf16 %v8781_v44  ;;  %v8782_v33 = vunpack.i.l.bf16 %v8781_v44 }
 0x57c   :  { %v8786_v39 = vpop.permute.xlu0 %8785  ;;  %v4713_v60 = vsel %vm683_vm5, %v4697_v27, %v8782_v33  ;;  %v4665_v61 = vsel %vm683_vm5, %v4649_v58, %v8783_v24 }
 0x57d   :  { %v8788_v63 = vunpack.i.h.bf16 %v8786_v39  ;;  %v8787_v62 = vunpack.i.l.bf16 %v8786_v39  ;;  %v8791_v52 = vpop.permute.xlu1 %8790  ;;  %4851 = vmatprep.mubr.f32.mxu1 %v4713_v60 }
 0x57e   :  { %v8793_v53 = vunpack.i.h.bf16 %v8791_v52  ;;  %v8792_v30 = vunpack.i.l.bf16 %v8791_v52  ;;  %4852 = vmatmul.mubr.f32.gmra.mrb[112].mxu1 %v4665_v61 }
 0x57f   :  { %v4682_v25 = vsel %vm32_vm0, %v12648_v2, %v8787_v62  ;;  %v4634_v32 = vsel %vm32_vm0, %v12467_v6, %v8788_v63 }
 0x580   :  { %v8796_v54 = vpop.permute.xlu0 %8795  ;;  %v4698_v22 = vsel %vm666_vm4, %v4682_v25, %v8762_v7  ;;  %v4650_v13 = vsel %vm666_vm4, %v4634_v32, %v8763_v43  ;;  %v4683_v2 = vsel %vm32_vm0, %v12642_v49, %v8792_v30  ;;  %v4635_v6 = vsel %vm32_vm0, %v12515_v23, %v8793_v53 }
 0x581   :  { %v8798_v50 = vunpack.i.h.bf16 %v8796_v54  ;;  %v8797_v10 = vunpack.i.l.bf16 %v8796_v54  ;;  %v8801_v15 = vpop.permute.xlu1 %8800  ;;  %v4714_v29 = vsel %vm683_vm5, %v4698_v22, %v8777_v1  ;;  %v4666_v36 = vsel %vm683_vm5, %v4650_v13, %v8778_v35 }
 0x582   :  { %4856 = vmatprep.mubr.f32.mxu1 %v4714_v29  ;;  %v8803_v48 = vunpack.i.h.bf16 %v8801_v15  ;;  %v8802_v23 = vunpack.i.l.bf16 %v8801_v15 }
 0x583   :  { %4857 = vmatmul.mubr.f32.gmra.mrb[114].mxu1 %v4666_v36  ;;  %v4699_v11 = vsel %vm666_vm4, %v4683_v2, %v8797_v10  ;;  %v4651_v12 = vsel %vm666_vm4, %v4635_v6, %v8798_v50 }
 0x584   :  { %v8806_v45 = vpop.permute.xlu0 %8805  ;;  %v4715_v55 = vsel %vm683_vm5, %v4699_v11, %v8767_v28  ;;  %v4667_v44 = vsel %vm683_vm5, %v4651_v12, %v8768_v5 }
 0x585   :  { %v8816_v34 = vpop.permute.xlu1 %8815  ;;  %4861 = vmatprep.mubr.f32.mxu1 %v4715_v55  ;;  %v8808_v39 = vunpack.i.h.bf16 %v8806_v45  ;;  %v8807_v60 = vunpack.i.l.bf16 %v8806_v45 }
 0x586   :  { %v8818_v27 = vunpack.i.h.bf16 %v8816_v34  ;;  %v8817_v58 = vunpack.i.l.bf16 %v8816_v34 }
 0x587   :  { %4862 = vmatmul.mubr.f32.gmra.mrb[116].mxu1 %v4667_v44 }
 0x588   :  { %v8811_v24 = vpop.permute.xlu0 %8810 }
 0x589   :  { %v8813_v33 = vunpack.i.h.bf16 %v8811_v24  ;;  %v8812_v49 = vunpack.i.l.bf16 %v8811_v24  ;;  %v8821_v17 = vpop.permute.xlu1 %8820 }
 0x58a   :  { %v8823_v28 = vunpack.i.h.bf16 %v8821_v17  ;;  %v8822_v2 = vunpack.i.l.bf16 %v8821_v17 }
 0x58b   :  { %v4684_v56 = vsel %vm32_vm0, %v12721_v19, %v8812_v49  ;;  %v4636_v61 = vsel %vm32_vm0, %v12655_v8, %v8813_v33  ;;  %v4685_v19 = vsel %vm32_vm0, %v12713_v46, %v8817_v58  ;;  %v4637_v8 = vsel %vm32_vm0, %v12671_v31, %v8818_v27 }
 0x58c   :  { %v8826_v63 = vpop.permute.xlu0 %8825  ;;  %v4700_v62 = vsel %vm666_vm4, %v4684_v56, %v8802_v23  ;;  %v4652_v52 = vsel %vm666_vm4, %v4636_v61, %v8803_v48 }
 0x58d   :  { %v8828_v43 = vunpack.i.h.bf16 %v8826_v63  ;;  %v8827_v7 = vunpack.i.l.bf16 %v8826_v63  ;;  %v8836_v53 = vpop.permute.xlu1 %8835  ;;  %v4716_v30 = vsel %vm683_vm5, %v4700_v62, %v8807_v60  ;;  %v4668_v35 = vsel %vm683_vm5, %v4652_v52, %v8808_v39 }
 0x58e   :  { %v8838_v1 = vunpack.i.h.bf16 %v8836_v53  ;;  %v8837_v25 = vunpack.i.l.bf16 %v8836_v53  ;;  %4866 = vmatprep.mubr.f32.mxu1 %v4716_v30 }
 0x58f   :  { %4867 = vmatmul.mubr.f32.gmra.mrb[118].mxu1 %v4668_v35  ;;  %v4701_v32 = vsel %vm666_vm4, %v4685_v19, %v8827_v7  ;;  %v4653_v54 = vsel %vm666_vm4, %v4637_v8, %v8828_v43 }
 0x590   :  { %v8831_v22 = vpop.permute.xlu0 %8830  ;;  %v4717_v13 = vsel %vm683_vm5, %v4701_v32, %v8837_v25  ;;  %v4669_v10 = vsel %vm683_vm5, %v4653_v54, %v8838_v1 }
 0x591   :  { %v8846_v50 = vpop.permute.xlu1 %8845  ;;  %4871 = vmatprep.mubr.f32.mxu1 %v4717_v13  ;;  %v8833_v11 = vunpack.i.h.bf16 %v8831_v22  ;;  %v8832_v12 = vunpack.i.l.bf16 %v8831_v22 }
 0x592   :  { %v8848_v31 = vunpack.i.h.bf16 %v8846_v50  ;;  %v8847_v6 = vunpack.i.l.bf16 %v8846_v50 }
 0x593   :  { %4872 = vmatmul.mubr.f32.gmra.mrb[120].mxu1 %v4669_v10 }
 0x594   :  { %v8841_v15 = vpop.permute.xlu0 %8840 }
 0x595   :  { %v8843_v29 = vunpack.i.h.bf16 %v8841_v15  ;;  %v8842_v36 = vunpack.i.l.bf16 %v8841_v15  ;;  %v8851_v46 = vpop.permute.xlu1 %8850 }
 0x596   :  { %v8853_v7 = vunpack.i.h.bf16 %v8851_v46  ;;  %v8852_v53 = vunpack.i.l.bf16 %v8851_v46 }
 0x597   :  { %v4686_v5 = vsel %vm32_vm0, %v12753_v3, %v8842_v36  ;;  %v4638_v45 = vsel %vm32_vm0, %v12600_v4, %v8843_v29  ;;  %v4687_v3 = vsel %vm32_vm0, %v12759_v41, %v8847_v6  ;;  %v4639_v4 = vsel %vm32_vm0, %v12630_v57, %v8848_v31 }
 0x598   :  { %v8856_v55 = vpop.permute.xlu0 %8855  ;;  %v4702_v34 = vsel %vm666_vm4, %v4686_v5, %v8822_v2  ;;  %v4654_v44 = vsel %vm666_vm4, %v4638_v45, %v8823_v28 }
 0x599   :  { %v8858_v24 = vunpack.i.h.bf16 %v8856_v55  ;;  %v8857_v33 = vunpack.i.l.bf16 %v8856_v55  ;;  %v8866_v49 = vpop.permute.xlu1 %8865  ;;  %v4718_v17 = vsel %vm683_vm5, %v4702_v34, %v8832_v12  ;;  %v4670_v48 = vsel %vm683_vm5, %v4654_v44, %v8833_v11 }
 0x59a   :  { %v8868_v23 = vunpack.i.h.bf16 %v8866_v49  ;;  %v8867_v27 = vunpack.i.l.bf16 %v8866_v49  ;;  %4876 = vmatprep.mubr.f32.mxu1 %v4718_v17 }
 0x59b   :  { %4877 = vmatmul.mubr.f32.gmra.mrb[122].mxu1 %v4670_v48  ;;  %v4703_v58 = vsel %vm666_vm4, %v4687_v3, %v8857_v33  ;;  %v4655_v39 = vsel %vm666_vm4, %v4639_v4, %v8858_v24 }
 0x59c   :  { %v8861_v60 = vpop.permute.xlu0 %8860  ;;  %v4719_v56 = vsel %vm683_vm5, %v4703_v58, %v8867_v27  ;;  %v4671_v63 = vsel %vm683_vm5, %v4655_v39, %v8868_v23 }
 0x59d   :  { %4881 = vmatprep.mubr.f32.mxu1 %v4719_v56  ;;  %v8876_v61 = vpop.permute.xlu1 %8875  ;;  %v8863_v35 = vunpack.i.h.bf16 %v8861_v60  ;;  %v8862_v1 = vunpack.i.l.bf16 %v8861_v60 }
 0x59e   :  { %v8878_v57 = vunpack.i.h.bf16 %v8876_v61  ;;  %v8877_v30 = vunpack.i.l.bf16 %v8876_v61 }
 0x59f   :  { %4882 = vmatmul.mubr.f32.gmra.mrb[124].mxu1 %v4671_v63 }
 0x5a0   :  { %v8871_v62 = vpop.permute.xlu0 %8870 }
 0x5a1   :  { %v8873_v52 = vunpack.i.h.bf16 %v8871_v62  ;;  %v8872_v43 = vunpack.i.l.bf16 %v8871_v62  ;;  %v8881_v41 = vpop.permute.xlu1 %8880 }
 0x5a2   :  { %v8883_v45 = vunpack.i.h.bf16 %v8881_v41  ;;  %v8882_v55 = vunpack.i.l.bf16 %v8881_v41 }
 0x5a3   :  { %v4688_v25 = vsel %vm32_vm0, %v12784_v20, %v8872_v43  ;;  %v4640_v19 = vsel %vm32_vm0, %v12659_v0, %v8873_v52  ;;  %v4689_v20 = vsel %vm32_vm0, %v12790_v14, %v8877_v30  ;;  %v4641_v0 = vsel %vm32_vm0, %v12695_v26, %v8878_v57 }
 0x5a4   :  { %v8886_v8 = vpop.permute.xlu0 %8885  ;;  %v4704_v32 = vsel %vm666_vm4, %v4688_v25, %v8852_v53  ;;  %v4656_v54 = vsel %vm666_vm4, %v4640_v19, %v8853_v7  ;;  %v5102_v19 = vld [vmem:[%s13880_s7 + $0x110] sm:$0xff] }
 0x5a5   :  { %v8888_v22 = vunpack.i.h.bf16 %v8886_v8  ;;  %v8887_v13 = vunpack.i.l.bf16 %v8886_v8  ;;  %v8891_v50 = vpop.permute.xlu1 %8890  ;;  %v4720_v10 = vsel %vm683_vm5, %v4704_v32, %v8862_v1  ;;  %v4672_v15 = vsel %vm683_vm5, %v4656_v54, %v8863_v35  ;;  %v5100_v35 = vld [vmem:[%s13880_s7 + $0x100] sm:$0xff]  ;;  %v5101_v1 = vld [vmem:[%s13880_s7 + $0x108] sm:$0xff]  ;;  %v5103_v8 = vld [vmem:[%s13880_s7 + $0x118] sm:$0xff] }
 0x5a6   :  { %v8893_v29 = vunpack.i.h.bf16 %v8891_v50  ;;  %v8892_v36 = vunpack.i.l.bf16 %v8891_v50  ;;  %4886 = vmatprep.mubr.f32.mxu1 %v4720_v10  ;;  %v7688_v25 = vpack.c.bf16 %v5101_v1, %v5100_v35  ;;  %v7692_v54 = vpack.c.bf16 %v5103_v8, %v5102_v19  ;;  %v5079_v19 = vld [vmem:[%s13880_s7 + $0x58] sm:$0xff] }
 0x5a7   :  { %4887 = vmatmul.mubr.f32.gmra.mrb[126].mxu1 %v4672_v15  ;;  %v4705_v46 = vsel %vm666_vm4, %v4689_v20, %v8887_v13  ;;  %v4657_v28 = vsel %vm666_vm4, %v4641_v0, %v8888_v22  ;;  %v5084_v20 = vld [vmem:[%s13880_s7 + $0x80] sm:$0xff]  ;;  %v5085_v0 = vld [vmem:[%s13880_s7 + $0x88] sm:$0xff] }
 0x5a8   :  { %v8896_v2 = vpop.permute.xlu0 %8895  ;;  %v4721_v31 = vsel %vm683_vm5, %v4705_v46, %v8892_v36  ;;  %v4673_v5 = vsel %vm683_vm5, %v4657_v28, %v8893_v29  ;;  %7689 = vmatprep.subr.bf16.mxu1 %v7688_v25  ;;  %v7656_v46 = vpack.c.bf16 %v5085_v0, %v5084_v20  ;;  %v5068_v28 = vld [vmem:[%s13880_s7] sm:$0xff] }
 0x5a9   :  { %v8898_v6 = vunpack.i.h.bf16 %v8896_v2  ;;  %v8897_v11 = vunpack.i.l.bf16 %v8896_v2  ;;  %v8906_v12 = vpop.permute.xlu1 %8905  ;;  %4891 = vmatprep.mubr.f32.mxu1 %v4721_v31  ;;  %7691 = vmatpush3.bf16.msra.mxu1 %v7688_v25  ;;  %v5069_v2 = vld [vmem:[%s13880_s7 + $0x8] sm:$0xff]  ;;  %v5078_v25 = vld [vmem:[%s13880_s7 + $0x50] sm:$0xff] }
 0x5aa   :  { %v8908_v33 = vunpack.i.h.bf16 %v8906_v12  ;;  %v8907_v49 = vunpack.i.l.bf16 %v8906_v12  ;;  %7693 = vmatprep.subr.bf16.mxu1 %v7692_v54  ;;  %7657 = vmatprep.subr.bf16.mxu0 %v7656_v46  ;;  %v7658_v31 = vpack.c.bf16 %v5069_v2, %v5068_v28  ;;  %v7678_v28 = vpack.c.bf16 %v5079_v19, %v5078_v25 }
 0x5ab   :  { %4892 = vmatmul.mubr.f32.gmra.mrb[128].mxu1 %v4673_v5  ;;  %v4690_v14 = vsel %vm32_vm0, %v12804_v16, %v8897_v11  ;;  %v4642_v26 = vsel %vm32_vm0, %v12668_v9, %v8898_v6  ;;  %v5086_v6 = vld [vmem:[%s13880_s7 + $0x90] sm:$0xff]  ;;  %v5087_v11 = vld [vmem:[%s13880_s7 + $0x98] sm:$0xff] }
 0x5ac   :  { %v8901_v34 = vpop.permute.xlu0 %8900  ;;  %v4706_v17 = vsel %vm666_vm4, %v4690_v14, %v8882_v55  ;;  %v4658_v48 = vsel %vm666_vm4, %v4642_v26, %v8883_v45  ;;  %v4691_v60 = vsel %vm32_vm0, %v12820_v18, %v8907_v49  ;;  %v4643_v56 = vsel %vm32_vm0, %v12691_v51, %v8908_v33  ;;  %7659 = vmatpush3.bf16.msra.mxu0 %v7658_v31  ;;  %v5070_v5 = vld [vmem:[%s13880_s7 + $0x10] sm:$0xff]  ;;  %v5071_v14 = vld [vmem:[%s13880_s7 + $0x18] sm:$0xff]  ;;  %v5088_v45 = vld [vmem:[%s13880_s7 + $0xa0] sm:$0xff] }
 0x5ad   :  { %v8903_v44 = vunpack.i.h.bf16 %v8901_v34  ;;  %v8902_v24 = vunpack.i.l.bf16 %v8901_v34  ;;  %v8916_v23 = vpop.permute.xlu1 %8915  ;;  %7695 = vmatpush3.bf16.msra.mxu1 %v7692_v54  ;;  %v7660_v12 = vpack.c.bf16 %v5087_v11, %v5086_v6  ;;  %v7662_v26 = vpack.c.bf16 %v5071_v14, %v5070_v5  ;;  %v5089_v55 = vld [vmem:[%s13880_s7 + $0xa8] sm:$0xff]  ;;  %v5072_v34 = vld [vmem:[%s13880_s7 + $0x20] sm:$0xff]  ;;  %v5090_v33 = vld [vmem:[%s13880_s7 + $0xb0] sm:$0xff] }
 0x5ae   :  { %v8918_v58 = vunpack.i.h.bf16 %v8916_v23  ;;  %v8917_v39 = vunpack.i.l.bf16 %v8916_v23  ;;  %v5091_v49 = vld [vmem:[%s13880_s7 + $0xb8] sm:$0xff]  ;;  %v5074_v23 = vld [vmem:[%s13880_s7 + $0x30] sm:$0xff]  ;;  %v13088_v11 = vld [vmem:[#allocation2] sm:$0xff] }
 0x5af   :  { %v4722_v27 = vsel %vm683_vm5, %v4706_v17, %v8902_v24  ;;  %v4674_v3 = vsel %vm683_vm5, %v4658_v48, %v8903_v44  ;;  %7661 = vmatprep.subr.bf16.mxu0 %v7660_v12  ;;  %v7664_v44 = vpack.c.bf16 %v5089_v55, %v5088_v45  ;;  %v5073_v24 = vld [vmem:[%s13880_s7 + $0x28] sm:$0xff]  ;;  %v7668_v48 = vpack.c.bf16 %v5091_v49, %v5090_v33 }
 0x5b0   :  { %v8911_v16 = vpop.permute.xlu0 %8910  ;;  %4896 = vmatprep.mubr.f32.mxu1 %v4722_v27  ;;  %7663 = vmatpush3.bf16.msra.mxu0 %v7662_v26  ;;  %v7666_v17 = vpack.c.bf16 %v5073_v24, %v5072_v34  ;;  %v5075_v27 = vld [vmem:[%s13880_s7 + $0x38] sm:$0xff]  ;;  %v5122_v12 = vld [vmem:[#allocation2 + $0x8] sm:$0x3]  ;;  %v5193_v55 = vrot.slane %v13088_v11, 1 }
 0x5b1   :  { %v8913_v4 = vunpack.i.h.bf16 %v8911_v16  ;;  %v8912_v9 = vunpack.i.l.bf16 %v8911_v16  ;;  %4897 = vmatmul.mubr.f32.gmra.mrb[130].mxu1 %v4674_v3  ;;  %7665 = vmatprep.subr.bf16.mxu0 %v7664_v44  ;;  %v5092_v3 = vld [vmem:[%s13880_s7 + $0xc0] sm:$0xff]  ;;  %v5093_v16 = vld [vmem:[%s13880_s7 + $0xc8] sm:$0xff]  ;;  %v5194_v34 = vrot.slane %v5122_v12, 1 }
 0x5b2   :  { %v5097_v26 = vld [vmem:[%s13880_s7 + $0xe8] sm:$0xff] }
 0x5b3   :  { %v4707_v61 = vsel %vm666_vm4, %v4691_v60, %v8912_v9  ;;  %v4659_v63 = vsel %vm666_vm4, %v4643_v56, %v8913_v4  ;;  %v7670_v4 = vpack.c.bf16 %v5075_v27, %v5074_v23  ;;  %v7672_v9 = vpack.c.bf16 %v5093_v16, %v5092_v3  ;;  %v5094_v56 = vld [vmem:[%s13880_s7 + $0xd0] sm:$0xff]  ;;  %v5081_v24 = vld [vmem:[%s13880_s7 + $0x68] sm:$0xff]  ;;  %v5099_v27 = vld [vmem:[%s13880_s7 + $0xf8] sm:$0xff] }
 0x5b4   :  { %v4723_v62 = vsel %vm683_vm5, %v4707_v61, %v8917_v39  ;;  %v4675_v52 = vsel %vm683_vm5, %v4659_v63, %v8918_v58  ;;  %7667 = vmatpush3.bf16.msra.mxu0 %v7666_v17  ;;  %v5076_v58 = vld [vmem:[%s13880_s7 + $0x40] sm:$0xff]  ;;  %v5077_v39 = vld [vmem:[%s13880_s7 + $0x48] sm:$0xff]  ;;  %v5095_v61 = vld [vmem:[%s13880_s7 + $0xd8] sm:$0xff]  ;;  %v5241_v17 = vrot.slane %v13088_v11, 2 }
 0x5b5   :  { %4901 = vmatprep.mubr.f32.mxu1 %v4723_v62  ;;  %7669 = vmatprep.subr.bf16.mxu0 %v7668_v48  ;;  %v13075_v63 = vld [vmem:[%s13879_s4 + $0x1] ss:$0 sm:$0xff]  ;;  %v7674_v35 = vpack.c.bf16 %v5077_v39, %v5076_v58  ;;  %v7676_v1 = vpack.c.bf16 %v5095_v61, %v5094_v56  ;;  %v5242_v48 = vrot.slane %v5122_v12, 2  ;;  %v5098_v23 = vld [vmem:[%s13880_s7 + $0xf0] sm:$0xff]  ;;  %v5083_v58 = vld [vmem:[%s13880_s7 + $0x78] sm:$0xff]  ;;  %v5195_v61 = vsel %vm216_vm3, %v5193_v55, %v5194_v34 }
 0x5b6   :  { %4902 = vmatmul.mubr.f32.gmra.mrb[132].mxu1 %v4675_v52  ;;  %v5082_v3 = vld [vmem:[%s13880_s7 + $0x70] sm:$0xff] }
 0x5b7   :  { %v12962_v43 = vpop.f32.mrb[90].mxu0  ;;  %v5243_v19 = vsel %vm265_vm2, %v5241_v17, %v5242_v48 }
 0x5b8   :  { %v12964_v41 = vpop.f32.mrb[91].mxu0  ;;  %7671 = vmatpush3.bf16.msra.mxu0 %v7670_v4 }
 0x5b9   :  { %7673 = vmatprep.subr.bf16.mxu0 %v7672_v9  ;;  %v7684_v9 = vpack.c.bf16 %v5099_v27, %v5098_v23 }
 0x5bb   :  { %v12966_v7 = vpop.f32.mrb[92].mxu0 }
 0x5bc   :  { %v12968_v18 = vpop.f32.mrb[93].mxu0  ;;  %7675 = vmatpush3.bf16.msra.mxu0 %v7674_v35 }
 0x5bd   :  { %7677 = vmatprep.subr.bf16.mxu0 %v7676_v1 }
 0x5c0   :  { %v12970_v53 = vpop.f32.mrb[94].mxu0  ;;  %7679 = vmatpush3.bf16.msra.mxu0 %v7678_v28 }
 0x5c1   :  { %v12972_v51 = vpop.f32.mrb[95].mxu0 }
 0x5c7   :  { %v12974_v57 = vpop.f32.mrb[96].mxu0 }
 0x5c8   :  { %v12976_v30 = vpop.f32.mrb[97].mxu0 }
 0x5d5   :  { %v12990_v32 = vpop.f32.mrb[98].mxu0 }
 0x5d6   :  { %v12992_v22 = vpop.f32.mrb[99].mxu0 }
 0x5e1   :  { %v12994_v13 = vpop.f32.mrb[100].mxu0 }
 0x5e2   :  { %v12996_v50 = vpop.f32.mrb[101].mxu0 }
 0x5e5   :  { %v12998_v10 = vpop.f32.mrb[102].mxu0 }
 0x5e6   :  { %v13000_v15 = vpop.f32.mrb[103].mxu0 }
 0x5f9   :  { %v13002_v29 = vpop.f32.mrb[104].mxu0 }
 0x5fa   :  { %v13004_v36 = vpop.f32.mrb[105].mxu0 }
 0x632   :  { %v7096_v60 = vpop.f32.mrb[102].mxu1 }
 0x633   :  { %v7097_v62 = vpop.f32.mrb[103].mxu1 }
 0x634   :  { %v7098_v52 = vadd.f32 %v7097_v62, %v7096_v60  ;;  %v7686_v62 = vpack.c.bf16 %v5083_v58, %v5082_v3 }
 0x636   :  { %v4829_v8 = vadd.f32 %v7098_v52, %v13075_v63  ;;  %v7099_v54 = vpop.f32.mrb[104].mxu1 }
 0x637   :  { %v7100_v20 = vpop.f32.mrb[105].mxu1 }
 0x638   :  { %v4974_v0 = vadd.f32 %v12964_v41, %v4829_v8  ;;  %v7101_v46 = vadd.f32 %v7100_v20, %v7099_v54  ;;  %v5096_v41 = vld [vmem:[%s13880_s7 + $0xe0] sm:$0xff] }
 0x639   :  { %v7680_v44 = vpack.c.bf16 %v5097_v26, %v5096_v41 }
 0x63a   :  { %v5052_v2 = vmax.f32 %v4974_v0, 0.0  ;;  %v4834_v31 = vadd.f32 %v7101_v46, %v13075_v63 }
 0x63b   :  { %7681 = vmatprep.subr.bf16.mxu0 %v7680_v44 }
 0x63c   :  { %5105 = vst.msk [vmem:[#allocation2 + $0x11] sm:$0xff] %vm32_vm0, %v5052_v2  ;;  %v4979_v6 = vadd.f32 %v12962_v43, %v4834_v31  ;;  %v5080_v43 = vld [vmem:[%s13880_s7 + $0x60] sm:$0xff] }
 0x63d   :  { %v7682_v49 = vpack.c.bf16 %v5081_v24, %v5080_v43 }
 0x63e   :  { %v5053_v5 = vmax.f32 %v4979_v6, 0.0  ;;  %v7102_v14 = vpop.f32.mrb[106].mxu1 }
 0x63f   :  { %v7103_v45 = vpop.f32.mrb[107].mxu1  ;;  %7683 = vmatpush3.bf16.msra.mxu0 %v7682_v49 }
 0x640   :  { %5106 = vst.msk [vmem:[#allocation2 + $0x21] sm:$0xff] %vm32_vm0, %v5053_v5  ;;  %v7104_v33 = vadd.f32 %v7103_v45, %v7102_v14  ;;  %7685 = vmatprep.subr.bf16.mxu0 %v7684_v9 }
 0x642   :  { %v4839_v16 = vadd.f32 %v7104_v33, %v13075_v63  ;;  %v7105_v4 = vpop.f32.mrb[108].mxu1 }
 0x643   :  { %v7106_v39 = vpop.f32.mrb[109].mxu1  ;;  %v13118_v60 = vld [vmem:[#allocation2 + $0x10] sm:$0xff]  ;;  %v5124_v56 = vld [vmem:[#allocation2 + $0x18] sm:$0x3]  ;;  %7687 = vmatpush3.bf16.msra.mxu0 %v7686_v62 }
 0x644   :  { %v4984_v52 = vadd.f32 %v12968_v18, %v4839_v16  ;;  %v7107_v35 = vadd.f32 %v7106_v39, %v7105_v4  ;;  %v5244_v1 = vrot.slane %v13118_v60, 2  ;;  %v5245_v25 = vrot.slane %v5124_v56, 2 }
 0x645   :  { %v5196_v2 = vrot.slane %v13118_v60, 1  ;;  %v5197_v18 = vrot.slane %v5124_v56, 1 }
 0x646   :  { %v5054_v8 = vmax.f32 %v4984_v52, 0.0  ;;  %v4844_v54 = vadd.f32 %v7107_v35, %v13075_v63  ;;  %v5246_v20 = vsel %vm265_vm2, %v5244_v1, %v5245_v25 }
 0x647   :  { %v8919_v0 = vpack.i.bf16 %v5195_v61, %v5246_v20  ;;  %v13126_v46 = vld [vmem:[#allocation2 + $0x20] sm:$0xff]  ;;  %v5126_v28 = vld [vmem:[#allocation2 + $0x28] sm:$0x3]  ;;  %v13138_v44 = vsel %vm216_vm3, %v5196_v2, %v5197_v18 }
 0x648   :  { %5107 = vst.msk [vmem:[#allocation2 + $0x31] sm:$0xff] %vm32_vm0, %v5054_v8  ;;  %v4989_v31 = vadd.f32 %v12966_v7, %v4844_v54  ;;  %v8924_v6 = vpack.i.bf16 %v5243_v19, %v13126_v46  ;;  %v5200_v12 = vrot.slane %v5126_v28, 1  ;;  %v5247_v5 = vrot.slane %v13126_v46, 2 }
 0x649   :  { %8920 = vrot.lane.b32.xlu0 %v8919_v0, %s9305_s29  ;;  %v5248_v14 = vrot.slane %v5126_v28, 2  ;;  %v5199_v41 = vrot.slane %v13126_v46, 1 }
 0x64a   :  { %v5055_v26 = vmax.f32 %v4989_v31, 0.0  ;;  %v7108_v45 = vpop.f32.mrb[110].mxu1  ;;  %8925 = vrot.lane.b32.xlu1 %v8924_v6, %s9303_s0 }
 0x64b   :  { %v7109_v55 = vpop.f32.mrb[111].mxu1  ;;  %v5249_v34 = vsel %vm265_vm2, %v5247_v5, %v5248_v14  ;;  %v13141_v7 = vsel %vm216_vm3, %v5199_v41, %v5200_v12 }
 0x64c   :  { %5108 = vst.msk [vmem:[#allocation2 + $0x41] sm:$0xff] %vm32_vm0, %v5055_v26  ;;  %v7110_v43 = vadd.f32 %v7109_v55, %v7108_v45  ;;  %v8934_v24 = vpack.i.bf16 %v13138_v44, %v5249_v34  ;;  %7432 = vmatprep.mubr.msk.f32.mxu1 %vm32_vm0, %v5249_v34  ;;  %v8929_v33 = vpack.i.bf16 %v13118_v60, %v13141_v7 }
 0x64e   :  { %v4849_v49 = vadd.f32 %v7110_v43, %v13075_v63  ;;  %8930 = vrot.lane.b32.xlu0 %v8929_v33, %s9304_s28  ;;  %8935 = vrot.lane.b32.xlu1 %v8934_v24, %s9305_s29 }
 0x64f   :  { %v13151_v17 = vld [vmem:[#allocation2 + $0x30] sm:$0xff]  ;;  %v5128_v48 = vld [vmem:[#allocation2 + $0x38] sm:$0x3] }
 0x650   :  { %v4994_v23 = vadd.f32 %v12972_v51, %v4849_v49  ;;  %v8939_v27 = vpack.i.bf16 %v5246_v20, %v13151_v17  ;;  %v5250_v3 = vrot.slane %v13151_v17, 2  ;;  %v5251_v16 = vrot.slane %v5128_v48, 2 }
 0x651   :  { %v7111_v4 = vpop.f32.mrb[112].mxu1  ;;  %v5202_v9 = vrot.slane %v13151_v17, 1  ;;  %v5203_v58 = vrot.slane %v5128_v48, 1 }
 0x652   :  { %v5056_v39 = vmax.f32 %v4994_v23, 0.0  ;;  %v7112_v56 = vpop.f32.mrb[113].mxu1  ;;  %8940 = vrot.lane.b32.xlu0 %v8939_v27, %s9303_s0  ;;  %v5252_v61 = vsel %vm265_vm2, %v5250_v3, %v5251_v16 }
 0x653   :  { %v13159_v62 = vld [vmem:[#allocation2 + $0x40] sm:$0xff]  ;;  %v7113_v52 = vadd.f32 %v7112_v56, %v7111_v4  ;;  %7433 = vmatmul.mubr.msk.f32.vlgmr.msra.gmra.mrb[134].mxu1 %vm32_vm0, %v5252_v61  ;;  %v13163_v51 = vsel %vm216_vm3, %v5202_v9, %v5203_v58  ;;  %v8949_v35 = vpack.i.bf16 %v13141_v7, %v5252_v61  ;;  %v5130_v1 = vld [vmem:[#allocation2 + $0x48] sm:$0x3] }
 0x654   :  { %5109 = vst.msk [vmem:[#allocation2 + $0x51] sm:$0xff] %vm32_vm0, %v5056_v39  ;;  %v8944_v25 = vpack.i.bf16 %v13126_v46, %v13163_v51  ;;  %v5206_v19 = vrot.slane %v5130_v1, 1  ;;  %v5253_v8 = vrot.slane %v13159_v62, 2  ;;  %v5254_v20 = vrot.slane %v5130_v1, 2 }
 0x655   :  { %v4854_v54 = vadd.f32 %v7113_v52, %v13075_v63  ;;  %v5205_v0 = vrot.slane %v13159_v62, 1  ;;  %v8954_v12 = vpack.i.bf16 %v5249_v34, %v13159_v62 }
 0x656   :  { %8945 = vrot.lane.b32.xlu1 %v8944_v25, %s9304_s28  ;;  %v7114_v28 = vpop.f32.mrb[114].mxu1  ;;  %8950 = vrot.lane.b32.xlu0 %v8949_v35, %s9305_s29  ;;  %v5255_v31 = vsel %vm265_vm2, %v5253_v8, %v5254_v20 }
 0x657   :  { %v4999_v2 = vadd.f32 %v12970_v53, %v4854_v54  ;;  %v7115_v18 = vpop.f32.mrb[115].mxu1  ;;  %v13177_v6 = vsel %vm216_vm3, %v5205_v0, %v5206_v19  ;;  %7435 = vmatprep.mubr.msk.f32.mxu1 %vm32_vm0, %v5255_v31  ;;  %v8964_v45 = vpack.i.bf16 %v13163_v51, %v5255_v31 }
 0x658   :  { %v7116_v5 = vadd.f32 %v7115_v18, %v7114_v28  ;;  %v8959_v14 = vpack.i.bf16 %v13151_v17, %v13177_v6 }
 0x659   :  { %v5057_v41 = vmax.f32 %v4999_v2, 0.0 }
 0x65a   :  { %v4859_v26 = vadd.f32 %v7116_v5, %v13075_v63  ;;  %8955 = vrot.lane.b32.xlu1 %v8954_v12, %s9303_s0  ;;  %v7117_v53 = vpop.f32.mrb[116].mxu1  ;;  %8960 = vrot.lane.b32.xlu0 %v8959_v14, %s9304_s28 }
 0x65b   :  { %5110 = vst.msk [vmem:[#allocation2 + $0x61] sm:$0xff] %vm32_vm0, %v5057_v41  ;;  %v7118_v55 = vpop.f32.mrb[117].mxu1  ;;  %v13188_v34 = vld [vmem:[#allocation2 + $0x50] sm:$0xff]  ;;  %v5132_v43 = vld [vmem:[#allocation2 + $0x58] sm:$0x3] }
 0x65c   :  { %v5004_v24 = vadd.f32 %v12976_v30, %v4859_v26  ;;  %v7119_v33 = vadd.f32 %v7118_v55, %v7117_v53  ;;  %v8969_v49 = vpack.i.bf16 %v5252_v61, %v13188_v34  ;;  %v5209_v48 = vrot.slane %v5132_v43, 1 }
 0x65d   :  { %v5256_v23 = vrot.slane %v13188_v34, 2  ;;  %v5257_v27 = vrot.slane %v5132_v43, 2  ;;  %v5208_v3 = vrot.slane %v13188_v34, 1  ;;  %v5139_v43 = vld [vmem:[#allocation2 + $0x90] sm:$0xff] }
 0x65e   :  { %v5058_v16 = vmax.f32 %v5004_v24, 0.0  ;;  %v4864_v4 = vadd.f32 %v7119_v33, %v13075_v63  ;;  %8965 = vrot.lane.b32.xlu1 %v8964_v45, %s9305_s29  ;;  %8970 = vrot.lane.b32.xlu0 %v8969_v49, %s9303_s0 }
 0x65f   :  { %v5258_v9 = vsel %vm265_vm2, %v5256_v23, %v5257_v27  ;;  %v13199_v30 = vsel %vm216_vm3, %v5208_v3, %v5209_v48  ;;  %v5140_v48 = vld [vmem:[#allocation2 + $0x98] sm:$0x3]  ;;  %v5331_v3 = vrot.slane %v5139_v43, 2 }
 0x660   :  { %5111 = vst.msk [vmem:[#allocation2 + $0x71] sm:$0xff] %vm32_vm0, %v5058_v16  ;;  %v5009_v58 = vadd.f32 %v12974_v57, %v4864_v4  ;;  %v8979_v39 = vpack.i.bf16 %v13177_v6, %v5258_v9  ;;  %7436 = vmatmul.mubr.msk.f32.gmra.mrb[136].mxu1 %vm32_vm0, %v5258_v9  ;;  %v8974_v56 = vpack.i.bf16 %v13159_v62, %v13199_v30  ;;  %v5332_v16 = vrot.slane %v5140_v48, 2 }
 0x662   :  { %v13207_v61 = vld [vmem:[#allocation2 + $0x60] sm:$0xff]  ;;  %v5059_v52 = vmax.f32 %v5009_v58, 0.0  ;;  %8975 = vrot.lane.b32.xlu1 %v8974_v56, %s9304_s28  ;;  %v7120_v35 = vpop.f32.mrb[118].mxu1  ;;  %8980 = vrot.lane.b32.xlu0 %v8979_v39, %s9305_s29  ;;  %v5134_v1 = vld [vmem:[#allocation2 + $0x68] sm:$0x3] }
 0x663   :  { %v8984_v25 = vpack.i.bf16 %v5255_v31, %v13207_v61  ;;  %v7121_v19 = vpop.f32.mrb[119].mxu1  ;;  %v5212_v57 = vrot.slane %v5134_v1, 1  ;;  %v5259_v8 = vrot.slane %v13207_v61, 2  ;;  %v5260_v54 = vrot.slane %v5134_v1, 2 }
 0x664   :  { %5112 = vst.msk [vmem:[#allocation2 + $0x81] sm:$0xff] %vm32_vm0, %v5059_v52  ;;  %v7122_v20 = vadd.f32 %v7121_v19, %v7120_v35  ;;  %v5211_v0 = vrot.slane %v13207_v61, 1  ;;  %v5325_v19 = vrot.slane %v5139_v43, 1 }
 0x665   :  { %v5261_v28 = vsel %vm265_vm2, %v5259_v8, %v5260_v54  ;;  %v5326_v8 = vrot.slane %v5140_v48, 1  ;;  %v5333_v54 = vsel %vm265_vm2, %v5331_v3, %v5332_v16 }
 0x666   :  { %v4869_v2 = vadd.f32 %v7122_v20, %v13075_v63  ;;  %8985 = vrot.lane.b32.xlu1 %v8984_v25, %s9303_s0  ;;  %v7123_v18 = vpop.f32.mrb[120].mxu1  ;;  %v8994_v12 = vpack.i.bf16 %v13199_v30, %v5261_v28  ;;  %7438 = vmatprep.mubr.msk.f32.mxu1 %vm32_vm0, %v5261_v28  ;;  %v13221_v31 = vsel %vm216_vm3, %v5211_v0, %v5212_v57 }
 0x667   :  { %v13223_v5 = vld [vmem:[#allocation2 + $0x70] sm:$0xff]  ;;  %v7124_v14 = vpop.f32.mrb[121].mxu1  ;;  %v8989_v41 = vpack.i.bf16 %v13188_v34, %v13221_v31  ;;  %v5136_v26 = vld [vmem:[#allocation2 + $0x78] sm:$0x3] }
 0x668   :  { %v5014_v53 = vadd.f32 %v12992_v22, %v4869_v2  ;;  %v7125_v45 = vadd.f32 %v7124_v14, %v7123_v18  ;;  %v5215_v55 = vrot.slane %v5136_v26, 1  ;;  %v5262_v24 = vrot.slane %v13223_v5, 2  ;;  %v13250_v14 = vld [vmem:[#allocation2 + $0xa0] sm:$0xff] }
 0x669   :  { %8990 = vrot.lane.b32.xlu0 %v8989_v41, %s9304_s28  ;;  %v5263_v33 = vrot.slane %v5136_v26, 2  ;;  %v5214_v49 = vrot.slane %v13223_v5, 1  ;;  %v8999_v22 = vpack.i.bf16 %v5258_v9, %v13223_v5  ;;  %v5142_v41 = vld [vmem:[#allocation2 + $0xa8] sm:$0x3] }
 0x66a   :  { %v5060_v23 = vmax.f32 %v5014_v53, 0.0  ;;  %v4874_v27 = vadd.f32 %v7125_v45, %v13075_v63  ;;  %8995 = vrot.lane.b32.xlu1 %v8994_v12, %s9305_s29 }
 0x66b   :  { %v5137_v4 = vld [vmem:[#allocation2 + $0x80] sm:$0xff]  ;;  %v5264_v58 = vsel %vm265_vm2, %v5262_v24, %v5263_v33  ;;  %v13236_v39 = vsel %vm216_vm3, %v5214_v49, %v5215_v55  ;;  %v5138_v56 = vld [vmem:[#allocation2 + $0x88] sm:$0x3]  ;;  %v5327_v55 = vsel %vm216_vm3, %v5325_v19, %v5326_v8 }
 0x66c   :  { %5113 = vst.msk [vmem:[#allocation2 + $0xb1] sm:$0xff] %vm32_vm0, %v5060_v23  ;;  %v5019_v52 = vadd.f32 %v12990_v32, %v4874_v27  ;;  %7439 = vmatmul.mubr.msk.f32.gmra.mrb[138].mxu1 %vm32_vm0, %v5264_v58  ;;  %v9004_v35 = vpack.i.bf16 %v13207_v61, %v13236_v39  ;;  %v5315_v1 = vrot.slane %v5137_v4, 2  ;;  %v5316_v9 = vrot.slane %v5138_v56, 2 }
 0x66d   :  { %9000 = vrot.lane.b32.xlu0 %v8999_v22, %s9303_s0  ;;  %v9009_v20 = vpack.i.bf16 %v13221_v31, %v5264_v58  ;;  %v5294_v18 = vrot.slane %v5138_v56, 1  ;;  %v5293_v12 = vrot.slane %v5137_v4, 1  ;;  %v9019_v26 = vpack.i.bf16 %v5261_v28, %v5137_v4 }
 0x66e   :  { %v5061_v25 = vmax.f32 %v5019_v52, 0.0  ;;  %v7126_v57 = vpop.f32.mrb[122].mxu1  ;;  %9005 = vrot.lane.b32.xlu1 %v9004_v35, %s9304_s28  ;;  %v5317_v0 = vsel %vm265_vm2, %v5315_v1, %v5316_v9  ;;  %v9014_v24 = vpack.i.bf16 %v5264_v58, %v5139_v43  ;;  %v5217_v23 = vrot.slane %v13250_v14, 1 }
 0x66f   :  { %v7127_v32 = vpop.f32.mrb[123].mxu1  ;;  %7441 = vmatprep.mubr.msk.f32.mxu1 %vm32_vm0, %v5317_v0  ;;  %v5218_v27 = vrot.slane %v5142_v41, 1  ;;  %v13262_v16 = vsel %vm216_vm3, %v5293_v12, %v5294_v18  ;;  %v9024_v22 = vpack.i.bf16 %v5137_v4, %v5327_v55  ;;  %v5265_v35 = vrot.slane %v13250_v14, 2 }
 0x670   :  { %5114 = vst.msk [vmem:[#allocation2 + $0xc1] sm:$0xff] %vm32_vm0, %v5061_v25  ;;  %v7128_v2 = vadd.f32 %v7127_v32, %v7126_v57  ;;  %7442 = vmatmul.mubr.msk.f32.gmra.mrb[140].mxu1 %vm32_vm0, %v5333_v54  ;;  %v5266_v1 = vrot.slane %v5142_v41, 2  ;;  %v9034_v32 = vpack.i.bf16 %v13236_v39, %v5317_v0 }
 0x671   :  { %9010 = vrot.lane.b32.xlu0 %v9009_v20, %s9305_s29  ;;  %v5219_v19 = vsel %vm216_vm3, %v5217_v23, %v5218_v27 }
 0x672   :  { %v4879_v53 = vadd.f32 %v7128_v2, %v13075_v63  ;;  %v7129_v45 = vpop.f32.mrb[124].mxu1  ;;  %9020 = vrot.lane.b32.xlu1 %v9019_v26, %s9303_s0  ;;  %v5267_v26 = vsel %vm265_vm2, %v5265_v35, %v5266_v1 }
 0x673   :  { %v7130_v33 = vpop.f32.mrb[125].mxu1  ;;  %v13257_v49 = vld [vmem:[#allocation2 + $0xb0] sm:$0xff]  ;;  %v5144_v48 = vld [vmem:[#allocation2 + $0xb8] sm:$0x3] }
 0x674   :  { %v5024_v28 = vadd.f32 %v12996_v50, %v4879_v53  ;;  %v7131_v3 = vadd.f32 %v7130_v33, %v7129_v45  ;;  %v5268_v43 = vrot.slane %v13257_v49, 2  ;;  %v5269_v58 = vrot.slane %v5144_v48, 2 }
 0x675   :  { %9015 = vrot.lane.b32.xlu0 %v9014_v24, %s9303_s0  ;;  %v9029_v50 = vpack.i.bf16 %v13223_v5, %v13262_v16  ;;  %v5220_v53 = vrot.slane %v13257_v49, 1  ;;  %v5221_v45 = vrot.slane %v5144_v48, 1 }
 0x676   :  { %v5062_v56 = vmax.f32 %v5024_v28, 0.0  ;;  %v4884_v52 = vadd.f32 %v7131_v3, %v13075_v63  ;;  %9025 = vrot.lane.b32.xlu1 %v9024_v22, %s9304_s28  ;;  %v5270_v4 = vsel %vm265_vm2, %v5268_v43, %v5269_v58 }
 0x677   :  { %v13271_v9 = vld [vmem:[#allocation2 + $0xc0] sm:$0xff]  ;;  %v5146_v25 = vld [vmem:[#allocation2 + $0xc8] sm:$0x3]  ;;  %v9039_v0 = vpack.i.bf16 %v5219_v19, %v5270_v4  ;;  %v13297_v28 = vsel %vm216_vm3, %v5220_v53, %v5221_v45 }
 0x678   :  { %5115 = vst.msk [vmem:[#allocation2 + $0xd1] sm:$0xff] %vm32_vm0, %v5062_v56  ;;  %v5029_v57 = vadd.f32 %v12994_v13, %v4884_v52  ;;  %v5224_v8 = vrot.slane %v5146_v25, 1  ;;  %v5271_v54 = vrot.slane %v13271_v9, 2  ;;  %v5272_v20 = vrot.slane %v5146_v25, 2 }
 0x679   :  { %9030 = vrot.lane.b32.xlu0 %v9029_v50, %s9304_s28  ;;  %v5223_v2 = vrot.slane %v13271_v9, 1  ;;  %v9044_v33 = vpack.i.bf16 %v5267_v26, %v13271_v9 }
 0x67a   :  { %v5063_v18 = vmax.f32 %v5029_v57, 0.0  ;;  %v7132_v12 = vpop.f32.mrb[126].mxu1  ;;  %v13282_v41 = vsel %vm265_vm2, %v5271_v54, %v5272_v20  ;;  %9035 = vrot.lane.b32.xlu1 %v9034_v32, %s9305_s29 }
 0x67b   :  { %v7133_v13 = vpop.f32.mrb[127].mxu1  ;;  %7444 = vmatprep.mubr.msk.f32.mxu1 %vm32_vm0, %v13282_v41  ;;  %v13291_v24 = vsel %vm216_vm3, %v5223_v2, %v5224_v8  ;;  %v9054_v1 = vpack.i.bf16 %v13297_v28, %v13282_v41 }
 0x67c   :  { %5116 = vst.msk [vmem:[#allocation2 + $0xe1] sm:$0xff] %vm32_vm0, %v5063_v18  ;;  %v7134_v55 = vadd.f32 %v7133_v13, %v7132_v12  ;;  %v9049_v3 = vpack.i.bf16 %v13257_v49, %v13291_v24 }
 0x67d   :  { %9040 = vrot.lane.b32.xlu0 %v9039_v0, %s9305_s29 }
 0x67e   :  { %v4889_v23 = vadd.f32 %v7134_v55, %v13075_v63  ;;  %v7135_v27 = vpop.f32.mrb[128].mxu1  ;;  %9045 = vrot.lane.b32.xlu1 %v9044_v33, %s9303_s0 }
 0x67f   :  { %v7136_v48 = vpop.f32.mrb[129].mxu1  ;;  %v13302_v22 = vld [vmem:[#allocation2 + $0xd0] sm:$0xff]  ;;  %v5148_v43 = vld [vmem:[#allocation2 + $0xd8] sm:$0x3] }
 0x680   :  { %v5034_v58 = vadd.f32 %v13000_v15, %v4889_v23  ;;  %v7137_v56 = vadd.f32 %v7136_v48, %v7135_v27  ;;  %v5227_v52 = vrot.slane %v5148_v43, 1  ;;  %v5274_v35 = vrot.slane %v13302_v22, 2 }
 0x681   :  { %9050 = vrot.lane.b32.xlu0 %v9049_v3, %s9304_s28  ;;  %v5275_v50 = vrot.slane %v5148_v43, 2  ;;  %v5226_v25 = vrot.slane %v13302_v22, 1  ;;  %v9059_v54 = vpack.i.bf16 %v5270_v4, %v13302_v22 }
 0x682   :  { %v5064_v19 = vmax.f32 %v5034_v58, 0.0  ;;  %v4894_v57 = vadd.f32 %v7137_v56, %v13075_v63  ;;  %9055 = vrot.lane.b32.xlu1 %v9054_v1, %s9305_s29 }
 0x683   :  { %v13311_v8 = vld [vmem:[#allocation2 + $0xe0] sm:$0xff]  ;;  %v5276_v15 = vsel %vm265_vm2, %v5274_v35, %v5275_v50  ;;  %v13317_v20 = vsel %vm216_vm3, %v5226_v25, %v5227_v52  ;;  %v5150_v32 = vld [vmem:[#allocation2 + $0xe8] sm:$0x3] }
 0x684   :  { %5117 = vst.msk [vmem:[#allocation2 + $0xf1] sm:$0xff] %vm32_vm0, %v5064_v19  ;;  %v5039_v2 = vadd.f32 %v12998_v10, %v4894_v57  ;;  %7445 = vmatmul.mubr.msk.f32.gmra.mrb[142].mxu1 %vm32_vm0, %v5276_v15  ;;  %v7138_v18 = vpop.f32.mrb[130].mxu1  ;;  %v9064_v12 = vpack.i.bf16 %v13271_v9, %v13317_v20  ;;  %v5230_v13 = vrot.slane %v5150_v32, 1  ;;  %v5277_v4 = vrot.slane %v13311_v8, 2 }
 0x685   :  { %9060 = vrot.lane.b32.xlu0 %v9059_v54, %s9303_s0  ;;  %v7139_v26 = vpop.f32.mrb[131].mxu1  ;;  %v5278_v53 = vrot.slane %v5150_v32, 2  ;;  %v5229_v45 = vrot.slane %v13311_v8, 1  ;;  %v9069_v33 = vpack.i.bf16 %v13291_v24, %v5276_v15  ;;  %v9074_v48 = vpack.i.bf16 %v13282_v41, %v13311_v8 }
 0x686   :  { %v5065_v0 = vmax.f32 %v5039_v2, 0.0  ;;  %v7140_v55 = vadd.f32 %v7139_v26, %v7138_v18  ;;  %9065 = vrot.lane.b32.xlu1 %v9064_v12, %s9304_s28 }
 0x687   :  { %v5279_v10 = vsel %vm265_vm2, %v5277_v4, %v5278_v53  ;;  %v13334_v27 = vsel %vm216_vm3, %v5229_v45, %v5230_v13 }
 0x688   :  { %5118 = vst.msk [vmem:[#allocation2 + $0x101] sm:$0xff] %vm32_vm0, %v5065_v0  ;;  %7447 = vmatprep.mubr.msk.f32.mxu1 %vm32_vm0, %v5279_v10  ;;  %v4899_v23 = vadd.f32 %v7140_v55, %v13075_v63  ;;  %v9079_v35 = vpack.i.bf16 %v13302_v22, %v13334_v27  ;;  %v9084_v41 = vpack.i.bf16 %v13317_v20, %v5279_v10 }
 0x689   :  { %9070 = vrot.lane.b32.xlu0 %v9069_v33, %s9305_s29  ;;  %v7141_v3 = vpop.f32.mrb[132].mxu1 }
 0x68a   :  { %v5044_v43 = vadd.f32 %v13004_v36, %v4899_v23  ;;  %v7142_v58 = vpop.f32.mrb[133].mxu1  ;;  %9075 = vrot.lane.b32.xlu1 %v9074_v48, %s9303_s0 }
 0x68b   :  { %v13340_v56 = vld [vmem:[#allocation2 + $0xf0] sm:$0xff]  ;;  %v7143_v52 = vadd.f32 %v7142_v58, %v7141_v3  ;;  %v5152_v1 = vld [vmem:[#allocation2 + $0xf8] sm:$0x3] }
 0x68c   :  { %v5066_v50 = vmax.f32 %v5044_v43, 0.0  ;;  %v5233_v25 = vrot.slane %v5152_v1, 1  ;;  %v5280_v19 = vrot.slane %v13340_v56, 2  ;;  %v5281_v36 = vrot.slane %v5152_v1, 2 }
 0x68d   :  { %v4904_v57 = vadd.f32 %v7143_v52, %v13075_v63  ;;  %9080 = vrot.lane.b32.xlu0 %v9079_v35, %s9304_s28  ;;  %v5232_v54 = vrot.slane %v13340_v56, 1  ;;  %v9089_v32 = vpack.i.bf16 %v5276_v15, %v13340_v56 }
 0x68e   :  { %5119 = vst.msk [vmem:[#allocation2 + $0x111] sm:$0xff] %vm32_vm0, %v5066_v50  ;;  %9085 = vrot.lane.b32.xlu1 %v9084_v41, %s9305_s29  ;;  %v5282_v12 = vsel %vm265_vm2, %v5280_v19, %v5281_v36 }
 0x68f   :  { %v13352_v2 = vld [vmem:[#allocation2 + $0x100] sm:$0xff]  ;;  %v5049_v18 = vadd.f32 %v13002_v29, %v4904_v57  ;;  %v13358_v26 = vsel %vm216_vm3, %v5232_v54, %v5233_v25  ;;  %v5154_v63 = vld [vmem:[#allocation2 + $0x108] sm:$0x3]  ;;  %7448 = vmatmul.mubr.msk.f32.gmra.mrb[144].mxu1 %vm32_vm0, %v5282_v12  ;;  %v9099_v0 = vpack.i.bf16 %v13334_v27, %v5282_v12 }
 0x690   :  { %v9094_v13 = vpack.i.bf16 %v13311_v8, %v13358_v26  ;;  %v5236_v4 = vrot.slane %v5154_v63, 1  ;;  %v5283_v15 = vrot.slane %v13352_v2, 2  ;;  %v5284_v29 = vrot.slane %v5154_v63, 2 }
 0x691   :  { %v5067_v53 = vmax.f32 %v5049_v18, 0.0  ;;  %9090 = vrot.lane.b32.xlu0 %v9089_v32, %s9303_s0  ;;  %v5235_v45 = vrot.slane %v13352_v2, 1  ;;  %v9104_v23 = vpack.i.bf16 %v5279_v10, %v13352_v2 }
 0x692   :  { %9095 = vrot.lane.b32.xlu1 %v9094_v13, %s9304_s28  ;;  %v5285_v55 = vsel %vm265_vm2, %v5283_v15, %v5284_v29 }
 0x693   :  { %5120 = vst.msk [vmem:[#allocation2 + $0x121] sm:$0xff] %vm32_vm0, %v5067_v53  ;;  %7450 = vmatprep.mubr.msk.f32.mxu1 %vm32_vm0, %v5285_v55  ;;  %v13372_v33 = vsel %vm216_vm3, %v5235_v45, %v5236_v4  ;;  %v9114_v10 = vpack.i.bf16 %v13358_v26, %v5285_v55  ;;  %v5159_v4 = vld [vmem:[#allocation2 + $0x130] sm:$0xff] }
 0x694   :  { %v9109_v35 = vpack.i.bf16 %v13340_v56, %v13372_v33  ;;  %v5334_v45 = vrot.slane %v5159_v4, 2 }
 0x695   :  { %v13375_v48 = vld [vmem:[#allocation2 + $0x110] sm:$0xff]  ;;  %9100 = vrot.lane.b32.xlu0 %v9099_v0, %s9305_s29  ;;  %v5156_v3 = vld [vmem:[#allocation2 + $0x118] sm:$0x3] }
 0x696   :  { %v5239_v43 = vrot.slane %v5156_v3, 1  ;;  %v5286_v58 = vrot.slane %v13375_v48, 2  ;;  %v5287_v52 = vrot.slane %v5156_v3, 2  ;;  %9105 = vrot.lane.b32.xlu1 %v9104_v23, %s9303_s0  ;;  %v5238_v1 = vrot.slane %v13375_v48, 1 }
 0x697   :  { %v9119_v57 = vpack.i.bf16 %v5282_v12, %v13375_v48  ;;  %v5160_v12 = vld [vmem:[#allocation2 + $0x138] sm:$0x3]  ;;  %v5328_v23 = vrot.slane %v5159_v4, 1 }
 0x698   :  { %v5288_v50 = vsel %vm265_vm2, %v5286_v58, %v5287_v52  ;;  %v13388_v19 = vsel %vm216_vm3, %v5238_v1, %v5239_v43  ;;  %v5335_v0 = vrot.slane %v5160_v12, 2  ;;  %v5329_v3 = vrot.slane %v5160_v12, 1 }
 0x699   :  { %9110 = vrot.lane.b32.xlu0 %v9109_v35, %s9304_s28  ;;  %7451 = vmatmul.mubr.msk.f32.gmra.mrb[146].mxu1 %vm32_vm0, %v5288_v50  ;;  %v9124_v63 = vpack.i.bf16 %v13352_v2, %v13388_v19  ;;  %v9129_v53 = vpack.i.bf16 %v13372_v33, %v5288_v50  ;;  %v9144_v35 = vpack.i.bf16 %v5288_v50, %v5159_v4 }
 0x69a   :  { %v5157_v25 = vld [vmem:[#allocation2 + $0x120] sm:$0xff]  ;;  %v5158_v41 = vld [vmem:[#allocation2 + $0x128] sm:$0x3]  ;;  %9115 = vrot.lane.b32.xlu1 %v9114_v10, %s9305_s29  ;;  %v5336_v58 = vsel %vm265_vm2, %v5334_v45, %v5335_v0 }
 0x69b   :  { %v5318_v36 = vrot.slane %v5157_v25, 2  ;;  %v5319_v54 = vrot.slane %v5158_v41, 2  ;;  %v5297_v32 = vrot.slane %v5158_v41, 1  ;;  %v5296_v18 = vrot.slane %v5157_v25, 1 }
 0x69c   :  { %v9134_v29 = vpack.i.bf16 %v5285_v55, %v5157_v25  ;;  %v5330_v55 = vsel %vm216_vm3, %v5328_v23, %v5329_v3 }
 0x69d   :  { %9120 = vrot.lane.b32.xlu0 %v9119_v57, %s9303_s0  ;;  %v5320_v13 = vsel %vm265_vm2, %v5318_v36, %v5319_v54  ;;  %v13400_v15 = vsel %vm216_vm3, %v5296_v18, %v5297_v32  ;;  %v9154_v1 = vpack.i.bf16 %v5157_v25, %v5330_v55 }
 0x69e   :  { %7453 = vmatprep.mubr.msk.f32.mxu1 %vm32_vm0, %v5320_v13  ;;  %9125 = vrot.lane.b32.xlu1 %v9124_v63, %s9304_s28  ;;  %v9139_v43 = vpack.i.bf16 %v13375_v48, %v13400_v15  ;;  %v9149_v52 = vpack.i.bf16 %v13388_v19, %v5320_v13 }
 0x69f   :  { %7454 = vmatmul.mubr.msk.f32.gmra.mrb[148].mxu1 %vm32_vm0, %v5336_v58 }
 0x6a1   :  { %9130 = vrot.lane.b32.xlu0 %v9129_v53, %s9305_s29 }
 0x6a2   :  { %9135 = vrot.lane.b32.xlu1 %v9134_v29, %s9303_s0 }
 0x6a5   :  { %9140 = vrot.lane.b32.xlu0 %v9139_v43, %s9304_s28 }
 0x6a6   :  { %9150 = vrot.lane.b32.xlu1 %v9149_v52, %s9305_s29 }
 0x6a9   :  { %9145 = vrot.lane.b32.xlu0 %v9144_v35, %s9303_s0 }
 0x6aa   :  { %9155 = vrot.lane.b32.xlu1 %v9154_v1, %s9304_s28 }
 0x6bb   :  { %v8921_v10 = vpop.permute.xlu0 %8920 }
 0x6bc   :  { %v8923_v41 = vunpack.i.h.bf16 %v8921_v10  ;;  %v8922_v57 = vunpack.i.l.bf16 %v8921_v10  ;;  %v8926_v36 = vpop.permute.xlu1 %8925 }
 0x6bd   :  { %v8928_v54 = vunpack.i.h.bf16 %v8926_v36  ;;  %v8927_v32 = vunpack.i.l.bf16 %v8926_v36 }
 0x6be   :  { %v5625_v18 = vsel %vm32_vm0, %v13088_v11, %v8923_v41  ;;  %v5673_v63 = vsel %vm32_vm0, %v13138_v44, %v8922_v57 }
 0x6bf   :  { %v5641_v53 = vsel %vm666_vm4, %v5625_v18, %v8928_v54  ;;  %v5689_v12 = vsel %vm666_vm4, %v5673_v63, %v8927_v32 }
 0x6c0   :  { %v8931_v50 = vpop.permute.xlu0 %8930  ;;  %v8936_v25 = vpop.permute.xlu1 %8935 }
 0x6c1   :  { %v8933_v13 = vunpack.i.h.bf16 %v8931_v50  ;;  %v8932_v4 = vunpack.i.l.bf16 %v8931_v50  ;;  %v8938_v23 = vunpack.i.h.bf16 %v8936_v25  ;;  %v8937_v3 = vunpack.i.l.bf16 %v8936_v25 }
 0x6c3   :  { %v5705_v29 = vsel %vm683_vm5, %v5689_v12, %v8932_v4  ;;  %v5657_v45 = vsel %vm683_vm5, %v5641_v53, %v8933_v13  ;;  %v5674_v35 = vsel %vm32_vm0, %v13141_v7, %v8937_v3  ;;  %v5626_v1 = vsel %vm32_vm0, %v13118_v60, %v8938_v23 }
 0x6c4   :  { %5823 = vmatprep.mubr.f32.mxu0 %v5705_v29  ;;  %v8941_v0 = vpop.permute.xlu0 %8940 }
 0x6c5   :  { %5824 = vmatmul.mubr.f32.vlgmr.msra.gmra.mrb[106].mxu0 %v5657_v45  ;;  %v8943_v11 = vunpack.i.h.bf16 %v8941_v0  ;;  %v8942_v43 = vunpack.i.l.bf16 %v8941_v0 }
 0x6c7   :  { %v5690_v57 = vsel %vm666_vm4, %v5674_v35, %v8942_v43  ;;  %v5642_v36 = vsel %vm666_vm4, %v5626_v1, %v8943_v11 }
 0x6c8   :  { %v8946_v44 = vpop.permute.xlu1 %8945  ;;  %v8951_v58 = vpop.permute.xlu0 %8950 }
 0x6c9   :  { %v8948_v52 = vunpack.i.h.bf16 %v8946_v44  ;;  %v8947_v55 = vunpack.i.l.bf16 %v8946_v44  ;;  %v8953_v10 = vunpack.i.h.bf16 %v8951_v58  ;;  %v8952_v41 = vunpack.i.l.bf16 %v8951_v58 }
 0x6cb   :  { %v5706_v54 = vsel %vm683_vm5, %v5690_v57, %v8947_v55  ;;  %v5658_v32 = vsel %vm683_vm5, %v5642_v36, %v8948_v52  ;;  %v5675_v60 = vsel %vm32_vm0, %v13163_v51, %v8952_v41  ;;  %v5627_v53 = vsel %vm32_vm0, %v13126_v46, %v8953_v10 }
 0x6cc   :  { %v8956_v18 = vpop.permute.xlu1 %8955  ;;  %5828 = vmatprep.mubr.f32.mxu0 %v5706_v54  ;;  %v8961_v63 = vpop.permute.xlu0 %8960 }
 0x6cd   :  { %v8958_v50 = vunpack.i.h.bf16 %v8956_v18  ;;  %v8957_v13 = vunpack.i.l.bf16 %v8956_v18  ;;  %v8963_v4 = vunpack.i.h.bf16 %v8961_v63  ;;  %v8962_v7 = vunpack.i.l.bf16 %v8961_v63  ;;  %5829 = vmatmul.mubr.f32.gmra.mrb[108].mxu0 %v5658_v32 }
 0x6cf   :  { %v5691_v25 = vsel %vm666_vm4, %v5675_v60, %v8957_v13  ;;  %v5643_v12 = vsel %vm666_vm4, %v5627_v53, %v8958_v50 }
 0x6d0   :  { %v8966_v29 = vpop.permute.xlu1 %8965  ;;  %v8971_v45 = vpop.permute.xlu0 %8970  ;;  %v5707_v0 = vsel %vm683_vm5, %v5691_v25, %v8962_v7  ;;  %v5659_v23 = vsel %vm683_vm5, %v5643_v12, %v8963_v4 }
 0x6d1   :  { %v8968_v3 = vunpack.i.h.bf16 %v8966_v29  ;;  %v8967_v11 = vunpack.i.l.bf16 %v8966_v29  ;;  %5833 = vmatprep.mubr.f32.mxu0 %v5707_v0  ;;  %v8973_v43 = vunpack.i.h.bf16 %v8971_v45  ;;  %v8972_v44 = vunpack.i.l.bf16 %v8971_v45 }
 0x6d2   :  { %5834 = vmatmul.mubr.f32.gmra.mrb[110].mxu0 %v5659_v23 }
 0x6d3   :  { %v5676_v51 = vsel %vm32_vm0, %v13177_v6, %v8967_v11  ;;  %v5628_v46 = vsel %vm32_vm0, %v13151_v17, %v8968_v3 }
 0x6d4   :  { %v8976_v58 = vpop.permute.xlu1 %8975  ;;  %v8981_v35 = vpop.permute.xlu0 %8980  ;;  %v5692_v1 = vsel %vm666_vm4, %v5676_v51, %v8972_v44  ;;  %v5644_v10 = vsel %vm666_vm4, %v5628_v46, %v8973_v43 }
 0x6d5   :  { %v8978_v52 = vunpack.i.h.bf16 %v8976_v58  ;;  %v8977_v55 = vunpack.i.l.bf16 %v8976_v58  ;;  %v8983_v36 = vunpack.i.h.bf16 %v8981_v35  ;;  %v8982_v54 = vunpack.i.l.bf16 %v8981_v35 }
 0x6d7   :  { %v5708_v41 = vsel %vm683_vm5, %v5692_v1, %v8977_v55  ;;  %v5660_v57 = vsel %vm683_vm5, %v5644_v10, %v8978_v52  ;;  %v5677_v4 = vsel %vm32_vm0, %v13199_v30, %v8982_v54  ;;  %v5629_v7 = vsel %vm32_vm0, %v13159_v62, %v8983_v36 }
 0x6d8   :  { %v8986_v32 = vpop.permute.xlu1 %8985  ;;  %5838 = vmatprep.mubr.f32.mxu0 %v5708_v41 }
 0x6d9   :  { %v8988_v6 = vunpack.i.h.bf16 %v8986_v32  ;;  %v8987_v18 = vunpack.i.l.bf16 %v8986_v32  ;;  %5839 = vmatmul.mubr.f32.gmra.mrb[112].mxu0 %v5660_v57 }
 0x6db   :  { %v8991_v17 = vpop.permute.xlu0 %8990  ;;  %v5693_v25 = vsel %vm666_vm4, %v5677_v4, %v8987_v18  ;;  %v5645_v12 = vsel %vm666_vm4, %v5629_v7, %v8988_v6 }
 0x6dc   :  { %v8993_v63 = vunpack.i.h.bf16 %v8991_v17  ;;  %v8992_v50 = vunpack.i.l.bf16 %v8991_v17  ;;  %v8996_v13 = vpop.permute.xlu1 %8995 }
 0x6dd   :  { %v8998_v60 = vunpack.i.h.bf16 %v8996_v13  ;;  %v8997_v53 = vunpack.i.l.bf16 %v8996_v13 }
 0x6de   :  { %v5709_v29 = vsel %vm683_vm5, %v5693_v25, %v8992_v50  ;;  %v5661_v45 = vsel %vm683_vm5, %v5645_v12, %v8993_v63 }
 0x6df   :  { %v9001_v0 = vpop.permute.xlu0 %9000  ;;  %5843 = vmatprep.mubr.f32.mxu0 %v5709_v29  ;;  %v5678_v30 = vsel %vm32_vm0, %v13221_v31, %v8997_v53  ;;  %v5630_v62 = vsel %vm32_vm0, %v13188_v34, %v8998_v60 }
 0x6e0   :  { %v9003_v23 = vunpack.i.h.bf16 %v9001_v0  ;;  %v9002_v3 = vunpack.i.l.bf16 %v9001_v0  ;;  %5844 = vmatmul.mubr.f32.gmra.mrb[114].mxu0 %v5661_v45  ;;  %v9006_v11 = vpop.permute.xlu1 %9005 }
 0x6e1   :  { %v9008_v43 = vunpack.i.h.bf16 %v9006_v11  ;;  %v9007_v44 = vunpack.i.l.bf16 %v9006_v11 }
 0x6e2   :  { %v5694_v51 = vsel %vm666_vm4, %v5678_v30, %v9002_v3  ;;  %v5646_v46 = vsel %vm666_vm4, %v5630_v62, %v9003_v23 }
 0x6e3   :  { %v9011_v58 = vpop.permute.xlu0 %9010  ;;  %v5710_v52 = vsel %vm683_vm5, %v5694_v51, %v9007_v44  ;;  %v5662_v55 = vsel %vm683_vm5, %v5646_v46, %v9008_v43 }
 0x6e4   :  { %v9021_v35 = vpop.permute.xlu1 %9020  ;;  %5848 = vmatprep.mubr.f32.mxu0 %v5710_v52  ;;  %v9013_v1 = vunpack.i.h.bf16 %v9011_v58  ;;  %v9012_v10 = vunpack.i.l.bf16 %v9011_v58 }
 0x6e5   :  { %5849 = vmatmul.mubr.f32.gmra.mrb[116].mxu0 %v5662_v55  ;;  %v9023_v41 = vunpack.i.h.bf16 %v9021_v35  ;;  %v9022_v57 = vunpack.i.l.bf16 %v9021_v35 }
 0x6e6   :  { %v5679_v36 = vsel %vm32_vm0, %v13236_v39, %v9012_v10  ;;  %v5631_v54 = vsel %vm32_vm0, %v13207_v61, %v9013_v1 }
 0x6e7   :  { %v9016_v31 = vpop.permute.xlu0 %9015  ;;  %v5695_v63 = vsel %vm666_vm4, %v5679_v36, %v9022_v57  ;;  %v5647_v50 = vsel %vm666_vm4, %v5631_v54, %v9023_v41 }
 0x6e8   :  { %v9026_v34 = vpop.permute.xlu1 %9025  ;;  %v9018_v53 = vunpack.i.h.bf16 %v9016_v31  ;;  %v9017_v25 = vunpack.i.l.bf16 %v9016_v31 }
 0x6e9   :  { %v9027_v39 = vunpack.i.l.bf16 %v9026_v34  ;;  %v9028_v23 = vunpack.i.h.bf16 %v9026_v34 }
 0x6eb   :  { %v9031_v32 = vpop.permute.xlu0 %9030 }
 0x6ec   :  { %v9033_v6 = vunpack.i.h.bf16 %v9031_v32  ;;  %v9032_v18 = vunpack.i.l.bf16 %v9031_v32  ;;  %v9036_v17 = vpop.permute.xlu1 %9035 }
 0x6ed   :  { %v9038_v13 = vunpack.i.h.bf16 %v9036_v17  ;;  %v9037_v4 = vunpack.i.l.bf16 %v9036_v17 }
 0x6ee   :  { %v5711_v7 = vsel %vm683_vm5, %v5695_v63, %v9032_v18  ;;  %v5663_v60 = vsel %vm683_vm5, %v5647_v50, %v9033_v6 }
 0x6ef   :  { %v9041_v12 = vpop.permute.xlu0 %9040  ;;  %5853 = vmatprep.mubr.f32.mxu0 %v5711_v7  ;;  %v5680_v45 = vsel %vm32_vm0, %v13262_v16, %v9037_v4  ;;  %v5632_v0 = vsel %vm32_vm0, %v13223_v5, %v9038_v13 }
 0x6f0   :  { %v9043_v61 = vunpack.i.h.bf16 %v9041_v12  ;;  %v9042_v29 = vunpack.i.l.bf16 %v9041_v12  ;;  %5854 = vmatmul.mubr.f32.gmra.mrb[118].mxu0 %v5663_v60  ;;  %v9046_v3 = vpop.permute.xlu1 %9045  ;;  %v5696_v11 = vsel %vm666_vm4, %v5680_v45, %v9017_v25  ;;  %v5648_v30 = vsel %vm666_vm4, %v5632_v0, %v9018_v53 }
 0x6f1   :  { %v9048_v62 = vunpack.i.h.bf16 %v9046_v3  ;;  %v9047_v43 = vunpack.i.l.bf16 %v9046_v3  ;;  %v5712_v44 = vsel %vm683_vm5, %v5696_v11, %v9027_v39  ;;  %v5664_v46 = vsel %vm683_vm5, %v5648_v30, %v9028_v23 }
 0x6f2   :  { %5858 = vmatprep.mubr.f32.mxu0 %v5712_v44  ;;  %v5681_v16 = vsel %vm32_vm0, %v13297_v28, %v9042_v29  ;;  %v5633_v5 = vsel %vm32_vm0, %v13250_v14, %v9043_v61 }
 0x6f3   :  { %v9051_v51 = vpop.permute.xlu0 %9050  ;;  %v5697_v35 = vsel %vm666_vm4, %v5681_v16, %v9047_v43  ;;  %v5649_v1 = vsel %vm666_vm4, %v5633_v5, %v9048_v62 }
 0x6f4   :  { %v9053_v58 = vunpack.i.h.bf16 %v9051_v51  ;;  %v9052_v52 = vunpack.i.l.bf16 %v9051_v51  ;;  %5859 = vmatmul.mubr.f32.gmra.mrb[120].mxu0 %v5664_v46  ;;  %v9056_v55 = vpop.permute.xlu1 %9055 }
 0x6f5   :  { %v9058_v10 = vunpack.i.h.bf16 %v9056_v55  ;;  %v9057_v31 = vunpack.i.l.bf16 %v9056_v55 }
 0x6f6   :  { %v5713_v41 = vsel %vm683_vm5, %v5697_v35, %v9052_v52  ;;  %v5665_v57 = vsel %vm683_vm5, %v5649_v1, %v9053_v58 }
 0x6f7   :  { %v9061_v34 = vpop.permute.xlu0 %9060  ;;  %5863 = vmatprep.mubr.f32.mxu0 %v5713_v41  ;;  %v5682_v54 = vsel %vm32_vm0, %v13291_v24, %v9057_v31  ;;  %v5634_v32 = vsel %vm32_vm0, %v13257_v49, %v9058_v10 }
 0x6f8   :  { %v9063_v28 = vunpack.i.h.bf16 %v9061_v34  ;;  %v9062_v36 = vunpack.i.l.bf16 %v9061_v34  ;;  %5864 = vmatmul.mubr.f32.gmra.mrb[122].mxu0 %v5665_v57  ;;  %v9066_v14 = vpop.permute.xlu1 %9065 }
 0x6f9   :  { %v9068_v6 = vunpack.i.h.bf16 %v9066_v14  ;;  %v9067_v18 = vunpack.i.l.bf16 %v9066_v14 }
 0x6fa   :  { %v5698_v17 = vsel %vm666_vm4, %v5682_v54, %v9062_v36  ;;  %v5650_v63 = vsel %vm666_vm4, %v5634_v32, %v9063_v28 }
 0x6fb   :  { %v9071_v50 = vpop.permute.xlu0 %9070  ;;  %v5714_v7 = vsel %vm683_vm5, %v5698_v17, %v9067_v18  ;;  %v5666_v60 = vsel %vm683_vm5, %v5650_v63, %v9068_v6 }
 0x6fc   :  { %v9073_v13 = vunpack.i.h.bf16 %v9071_v50  ;;  %v9072_v4 = vunpack.i.l.bf16 %v9071_v50  ;;  %v9076_v53 = vpop.permute.xlu1 %9075  ;;  %5868 = vmatprep.mubr.f32.mxu0 %v5714_v7 }
 0x6fd   :  { %v9078_v25 = vunpack.i.h.bf16 %v9076_v53  ;;  %v9077_v24 = vunpack.i.l.bf16 %v9076_v53  ;;  %5869 = vmatmul.mubr.f32.gmra.mrb[124].mxu0 %v5666_v60 }
 0x6fe   :  { %v5683_v49 = vsel %vm32_vm0, %v13317_v20, %v9072_v4  ;;  %v5635_v39 = vsel %vm32_vm0, %v13271_v9, %v9073_v13 }
 0x6ff   :  { %v9081_v12 = vpop.permute.xlu0 %9080  ;;  %v5699_v0 = vsel %vm666_vm4, %v5683_v49, %v9077_v24  ;;  %v5651_v23 = vsel %vm666_vm4, %v5635_v39, %v9078_v25 }
 0x700   :  { %v9083_v61 = vunpack.i.h.bf16 %v9081_v12  ;;  %v9082_v29 = vunpack.i.l.bf16 %v9081_v12  ;;  %v9086_v45 = vpop.permute.xlu1 %9085 }
 0x701   :  { %v9088_v3 = vunpack.i.h.bf16 %v9086_v45  ;;  %v9087_v11 = vunpack.i.l.bf16 %v9086_v45 }
 0x702   :  { %v5715_v30 = vsel %vm683_vm5, %v5699_v0, %v9082_v29  ;;  %v5667_v62 = vsel %vm683_vm5, %v5651_v23, %v9083_v61 }
 0x703   :  { %5873 = vmatprep.mubr.f32.mxu0 %v5715_v30  ;;  %v9091_v43 = vpop.permute.xlu0 %9090  ;;  %v5684_v51 = vsel %vm32_vm0, %v13334_v27, %v9087_v11  ;;  %v5636_v46 = vsel %vm32_vm0, %v13302_v22, %v9088_v3 }
 0x704   :  { %v9093_v20 = vunpack.i.h.bf16 %v9091_v43  ;;  %v9092_v44 = vunpack.i.l.bf16 %v9091_v43  ;;  %5874 = vmatmul.mubr.f32.gmra.mrb[126].mxu0 %v5667_v62  ;;  %v9096_v9 = vpop.permute.xlu1 %9095 }
 0x705   :  { %v9098_v16 = vunpack.i.h.bf16 %v9096_v9  ;;  %v9097_v5 = vunpack.i.l.bf16 %v9096_v9 }
 0x706   :  { %v5700_v58 = vsel %vm666_vm4, %v5684_v51, %v9092_v44  ;;  %v5652_v52 = vsel %vm666_vm4, %v5636_v46, %v9093_v20 }
 0x707   :  { %v9101_v55 = vpop.permute.xlu0 %9100  ;;  %v5716_v10 = vsel %vm683_vm5, %v5700_v58, %v9097_v5  ;;  %v5668_v31 = vsel %vm683_vm5, %v5652_v52, %v9098_v16 }
 0x708   :  { %v9103_v35 = vunpack.i.h.bf16 %v9101_v55  ;;  %v9102_v1 = vunpack.i.l.bf16 %v9101_v55  ;;  %5878 = vmatprep.mubr.f32.mxu0 %v5716_v10  ;;  %v9106_v41 = vpop.permute.xlu1 %9105 }
 0x709   :  { %v9108_v57 = vunpack.i.h.bf16 %v9106_v41  ;;  %v9107_v27 = vunpack.i.l.bf16 %v9106_v41  ;;  %5879 = vmatmul.mubr.f32.gmra.mrb[128].mxu0 %v5668_v31 }
 0x70a   :  { %v5685_v22 = vsel %vm32_vm0, %v13358_v26, %v9102_v1  ;;  %v5637_v34 = vsel %vm32_vm0, %v13311_v8, %v9103_v35 }
 0x70b   :  { %v9111_v28 = vpop.permute.xlu0 %9110  ;;  %v5701_v32 = vsel %vm666_vm4, %v5685_v22, %v9107_v27  ;;  %v5653_v6 = vsel %vm666_vm4, %v5637_v34, %v9108_v57  ;;  %v9306_v27 = vmov 9   ;;  %v9307_v22 = vmov 8  }
 0x70c   :  { %v9113_v36 = vunpack.i.h.bf16 %v9111_v28  ;;  %v9112_v14 = vunpack.i.l.bf16 %v9111_v28  ;;  %v9116_v54 = vpop.permute.xlu1 %9115  ;;  %9160 = vset.pattern.permute.xlu1 %v9306_v27  ;;  %9159 = vset.pattern.permute.xlu0 %v9307_v22 }
 0x70d   :  { %v9118_v18 = vunpack.i.h.bf16 %v9116_v54  ;;  %v9117_v17 = vunpack.i.l.bf16 %v9116_v54 }
 0x70e   :  { %v5717_v63 = vsel %vm683_vm5, %v5701_v32, %v9112_v14  ;;  %v5669_v50 = vsel %vm683_vm5, %v5653_v6, %v9113_v36 }
 0x70f   :  { %v9121_v13 = vpop.permute.xlu0 %9120  ;;  %5883 = vmatprep.mubr.f32.mxu0 %v5717_v63  ;;  %v5686_v7 = vsel %vm32_vm0, %v13372_v33, %v9117_v17  ;;  %v5638_v60 = vsel %vm32_vm0, %v13340_v56, %v9118_v18 }
 0x710   :  { %v9123_v26 = vunpack.i.h.bf16 %v9121_v13  ;;  %v9122_v4 = vunpack.i.l.bf16 %v9121_v13  ;;  %5884 = vmatmul.mubr.f32.gmra.mrb[130].mxu0 %v5669_v50  ;;  %v9126_v8 = vpop.permute.xlu1 %9125 }
 0x711   :  { %v9128_v53 = vunpack.i.h.bf16 %v9126_v8  ;;  %v9127_v25 = vunpack.i.l.bf16 %v9126_v8 }
 0x712   :  { %v5702_v24 = vsel %vm666_vm4, %v5686_v7, %v9122_v4  ;;  %v5654_v49 = vsel %vm666_vm4, %v5638_v60, %v9123_v26  ;;  %v13567_v7 = vld [vmem:[%s13881_s8] ss:$0 sm:$0xff]  ;;  %s9308_s8 = smov 8  }
 0x713   :  { %v9131_v39 = vpop.permute.xlu0 %9130  ;;  %v5718_v29 = vsel %vm683_vm5, %v5702_v24, %v9127_v25  ;;  %v5670_v45 = vsel %vm683_vm5, %v5654_v49, %v9128_v53 }
 0x714   :  { %v9133_v12 = vunpack.i.h.bf16 %v9131_v39  ;;  %v9132_v61 = vunpack.i.l.bf16 %v9131_v39  ;;  %v9136_v0 = vpop.permute.xlu1 %9135  ;;  %5888 = vmatprep.mubr.f32.mxu0 %v5718_v29 }
 0x715   :  { %v9138_v23 = vunpack.i.h.bf16 %v9136_v0  ;;  %v9137_v33 = vunpack.i.l.bf16 %v9136_v0  ;;  %5889 = vmatmul.mubr.f32.gmra.mrb[132].mxu0 %v5670_v45 }
 0x716   :  { %v5687_v56 = vsel %vm32_vm0, %v13388_v19, %v9132_v61  ;;  %v5639_v3 = vsel %vm32_vm0, %v13352_v2, %v9133_v12 }
 0x717   :  { %v9141_v11 = vpop.permute.xlu0 %9140  ;;  %v5703_v20 = vsel %vm666_vm4, %v5687_v56, %v9137_v33  ;;  %v5655_v44 = vsel %vm666_vm4, %v5639_v3, %v9138_v23 }
 0x718   :  { %v9143_v30 = vunpack.i.h.bf16 %v9141_v11  ;;  %v9142_v62 = vunpack.i.l.bf16 %v9141_v11  ;;  %v9151_v43 = vpop.permute.xlu1 %9150 }
 0x719   :  { %v9153_v9 = vunpack.i.h.bf16 %v9151_v43  ;;  %v9152_v51 = vunpack.i.l.bf16 %v9151_v43 }
 0x71a   :  { %v5719_v46 = vsel %vm683_vm5, %v5703_v20, %v9142_v62  ;;  %v5671_v16 = vsel %vm683_vm5, %v5655_v44, %v9143_v30 }
 0x71b   :  { %v9146_v5 = vpop.permute.xlu0 %9145  ;;  %5893 = vmatprep.mubr.f32.mxu0 %v5719_v46  ;;  %v5688_v52 = vsel %vm32_vm0, %v13400_v15, %v9152_v51  ;;  %v5640_v55 = vsel %vm32_vm0, %v13375_v48, %v9153_v9 }
 0x71c   :  { %v9148_v19 = vunpack.i.h.bf16 %v9146_v5  ;;  %v9147_v58 = vunpack.i.l.bf16 %v9146_v5  ;;  %5894 = vmatmul.mubr.f32.gmra.mrb[134].mxu0 %v5671_v16  ;;  %v9156_v2 = vpop.permute.xlu1 %9155 }
 0x71d   :  { %v9158_v35 = vunpack.i.h.bf16 %v9156_v2  ;;  %v9157_v1 = vunpack.i.l.bf16 %v9156_v2 }
 0x71e   :  { %v5704_v10 = vsel %vm666_vm4, %v5688_v52, %v9147_v58  ;;  %v5656_v31 = vsel %vm666_vm4, %v5640_v55, %v9148_v19 }
 0x71f   :  { %v5720_v41 = vsel %vm683_vm5, %v5704_v10, %v9157_v1  ;;  %v5672_v57 = vsel %vm683_vm5, %v5656_v31, %v9158_v35 }
 0x720   :  { %5898 = vmatprep.mubr.f32.mxu0 %v5720_v41 }
 0x721   :  { %5899 = vmatmul.mubr.f32.gmra.mrb[136].mxu0 %v5672_v57 }
 0x726   :  { %v7434_v15 = vpop.f32.mrb[134].mxu1 }
 0x727   :  { %v5970_v48 = vpop.f32.mrb[135].mxu1 }
 0x733   :  { %v7437_v34 = vpop.f32.mrb[136].mxu1 }
 0x734   :  { %v5980_v28 = vpop.f32.mrb[137].mxu1 }
 0x73f   :  { %v7440_v36 = vpop.f32.mrb[138].mxu1 }
 0x740   :  { %v5990_v14 = vpop.f32.mrb[139].mxu1 }
 0x743   :  { %v13544_v54 = vpop.f32.mrb[140].mxu1 }
 0x744   :  { %v13546_v32 = vpop.f32.mrb[141].mxu1 }
 0x757   :  { %v13548_v6 = vpop.f32.mrb[142].mxu1 }
 0x758   :  { %v13550_v18 = vpop.f32.mrb[143].mxu1 }
 0x762   :  { %v13552_v17 = vpop.f32.mrb[144].mxu1 }
 0x763   :  { %v13554_v63 = vpop.f32.mrb[145].mxu1 }
 0x76c   :  { %v13556_v50 = vpop.f32.mrb[146].mxu1 }
 0x76d   :  { %v13558_v13 = vpop.f32.mrb[147].mxu1 }
 0x772   :  { %v13560_v26 = vpop.f32.mrb[148].mxu1 }
 0x773   :  { %v13562_v4 = vpop.f32.mrb[149].mxu1 }
 0x798   :  { %v7196_v8 = vpop.f32.mrb[106].mxu0 }
 0x799   :  { %v7197_v60 = vpop.f32.mrb[107].mxu0 }
 0x79a   :  { %v7198_v53 = vadd.f32 %v7197_v60, %v7196_v8 }
 0x79c   :  { %v5826_v25 = vadd.f32 %v7198_v53, %v13567_v7 }
 0x79e   :  { %v13570_v24 = vadd.f32 %v5970_v48, %v5826_v25 }
 0x7a0   :  { %v7199_v49 = vpop.f32.mrb[108].mxu0  ;;  %6130 = vperm.xlu1 %9160, %v13570_v24   ;;  %6051 = vperm.xlu0 %9159, %v13570_v24  }
 0x7a1   :  { %v7200_v39 = vpop.f32.mrb[109].mxu0 }
 0x7a2   :  { %v7201_v12 = vadd.f32 %v7200_v39, %v7199_v49 }
 0x7a4   :  { %v5831_v61 = vadd.f32 %v7201_v12, %v13567_v7  ;;  %9161 = vset.pattern.permute.xlu1 %v9307_v22  ;;  %9162 = vset.pattern.permute.xlu0 %v9306_v27 }
 0x7a5   :  { %v7202_v29 = vpop.f32.mrb[110].mxu0 }
 0x7a6   :  { %v13577_v45 = vadd.f32 %v7434_v15, %v5831_v61  ;;  %v7203_v0 = vpop.f32.mrb[111].mxu0 }
 0x7a7   :  { %v7204_v23 = vadd.f32 %v7203_v0, %v7202_v29 }
 0x7a8   :  { %6056 = vperm.xlu1 %9161, %v13577_v45   ;;  %6134 = vperm.xlu0 %9162, %v13577_v45  }
 0x7a9   :  { %v5836_v33 = vadd.f32 %v7204_v23, %v13567_v7 }
 0x7ab   :  { %v13582_v56 = vadd.f32 %v5980_v28, %v5836_v33 }
 0x7ac   :  { %v7205_v3 = vpop.f32.mrb[112].mxu0  ;;  %9164 = vset.pattern.permute.xlu0 %v9307_v22 }
 0x7ad   :  { %v7206_v11 = vpop.f32.mrb[113].mxu0  ;;  %6061 = vperm.xlu1 %9161, %v13582_v56  }
 0x7ae   :  { %v7207_v30 = vadd.f32 %v7206_v11, %v7205_v3 }
 0x7b0   :  { %v5841_v62 = vadd.f32 %v7207_v30, %v13567_v7 }
 0x7b1   :  { %9163 = vset.pattern.permute.xlu1 %v9306_v27 }
 0x7b2   :  { %v13588_v43 = vadd.f32 %v7437_v34, %v5841_v62  ;;  %6138 = vperm.xlu1 %9163, %v13582_v56  }
 0x7b3   :  { %v7208_v20 = vpop.f32.mrb[114].mxu0 }
 0x7b4   :  { %v7209_v44 = vpop.f32.mrb[115].mxu0  ;;  %6066 = vperm.xlu0 %9164, %v13588_v43  }
 0x7b5   :  { %v7210_v9 = vadd.f32 %v7209_v44, %v7208_v20 }
 0x7b6   :  { %6142 = vperm.xlu1 %9163, %v13588_v43  }
 0x7b7   :  { %v5846_v51 = vadd.f32 %v7210_v9, %v13567_v7 }
 0x7b8   :  { %9166 = vset.pattern.permute.xlu0 %v9306_v27  ;;  %v7211_v16 = vpop.f32.mrb[116].mxu0 }
 0x7b9   :  { %v13595_v46 = vadd.f32 %v5990_v14, %v5846_v51  ;;  %v7212_v5 = vpop.f32.mrb[117].mxu0 }
 0x7ba   :  { %9165 = vset.pattern.permute.xlu1 %v9307_v22  ;;  %v7213_v19 = vadd.f32 %v7212_v5, %v7211_v16 }
 0x7bb   :  { %6071 = vperm.xlu1 %9165, %v13595_v46   ;;  %6146 = vperm.xlu0 %9166, %v13595_v46  }
 0x7bc   :  { %v5851_v58 = vadd.f32 %v7213_v19, %v13567_v7 }
 0x7be   :  { %v13601_v2 = vadd.f32 %v7440_v36, %v5851_v58 }
 0x7bf   :  { %9168 = vset.pattern.permute.xlu1 %v9306_v27  ;;  %9167 = vset.pattern.permute.xlu0 %v9307_v22 }
 0x7c0   :  { %6150 = vperm.xlu1 %9168, %v13601_v2   ;;  %6076 = vperm.xlu0 %9167, %v13601_v2  }
 0x7c3   :  { %v7214_v52 = vpop.f32.mrb[118].mxu0 }
 0x7c4   :  { %v7215_v55 = vpop.f32.mrb[119].mxu0  ;;  %9169 = vset.pattern.permute.xlu1 %v9307_v22  ;;  %9170 = vset.pattern.permute.xlu0 %v9306_v27 }
 0x7c5   :  { %v7216_v35 = vadd.f32 %v7215_v55, %v7214_v52 }
 0x7c7   :  { %v5856_v1 = vadd.f32 %v7216_v35, %v13567_v7  ;;  %v7217_v10 = vpop.f32.mrb[120].mxu0 }
 0x7c8   :  { %v7218_v31 = vpop.f32.mrb[121].mxu0 }
 0x7c9   :  { %v13611_v41 = vadd.f32 %v13546_v32, %v5856_v1  ;;  %v7219_v57 = vadd.f32 %v7218_v31, %v7217_v10 }
 0x7cb   :  { %v5861_v15 = vadd.f32 %v7219_v57, %v13567_v7  ;;  %v7220_v48 = vpop.f32.mrb[122].mxu0  ;;  %6081 = vperm.xlu1 %9169, %v13611_v41   ;;  %6154 = vperm.xlu0 %9170, %v13611_v41  }
 0x7cc   :  { %v7221_v34 = vpop.f32.mrb[123].mxu0 }
 0x7cd   :  { %v13617_v28 = vadd.f32 %v13544_v54, %v5861_v15  ;;  %v7222_v36 = vadd.f32 %v7221_v34, %v7220_v48  ;;  %v6228_v48 = vmul.f32 1.442695, %v12221_v42 }
 0x7cf   :  { %v5866_v14 = vadd.f32 %v7222_v36, %v13567_v7  ;;  %9172 = vset.pattern.permute.xlu1 %v9306_v27  ;;  %9171 = vset.pattern.permute.xlu0 %v9307_v22  ;;  %9188 = vpow2.f32 %v6228_v48 }
 0x7d0   :  { %6158 = vperm.xlu1 %9172, %v13617_v28   ;;  %6086 = vperm.xlu0 %9171, %v13617_v28   ;;  %v7223_v8 = vpop.f32.mrb[124].mxu0 }
 0x7d1   :  { %v13625_v32 = vadd.f32 %v13550_v18, %v5866_v14  ;;  %v7224_v60 = vpop.f32.mrb[125].mxu0 }
 0x7d2   :  { %v7225_v53 = vadd.f32 %v7224_v60, %v7223_v8  ;;  %v6232_v8 = vmul.f32 1.442695, %v12245_v38  ;;  %v6226_v60 = vmul.f32 1.442695, %v12217_v40 }
 0x7d4   :  { %9173 = vset.pattern.permute.xlu1 %v9307_v22  ;;  %9174 = vset.pattern.permute.xlu0 %v9306_v27  ;;  %v5871_v54 = vadd.f32 %v7225_v53, %v13567_v7 }
 0x7d5   :  { %6091 = vperm.xlu1 %9173, %v13625_v32   ;;  %6162 = vperm.xlu0 %9174, %v13625_v32  }
 0x7d6   :  { %v13633_v25 = vadd.f32 %v13548_v6, %v5871_v54 }
 0x7d7   :  { %v7226_v49 = vpop.f32.mrb[126].mxu0 }
 0x7d8   :  { %v7227_v39 = vpop.f32.mrb[127].mxu0 }
 0x7d9   :  { %v7228_v18 = vadd.f32 %v7227_v39, %v7226_v49  ;;  %9176 = vset.pattern.permute.xlu1 %v9306_v27  ;;  %9175 = vset.pattern.permute.xlu0 %v9307_v22  ;;  %v6236_v49 = vmul.f32 1.442695, %v12257_v37 }
 0x7da   :  { %6166 = vperm.xlu1 %9176, %v13633_v25   ;;  %6096 = vperm.xlu0 %9175, %v13633_v25  }
 0x7db   :  { %v5876_v12 = vadd.f32 %v7228_v18, %v13567_v7 }
 0x7dc   :  { %v7229_v29 = vpop.f32.mrb[128].mxu0 }
 0x7dd   :  { %v6021_v61 = vadd.f32 %v13554_v63, %v5876_v12  ;;  %v7230_v0 = vpop.f32.mrb[129].mxu0 }
 0x7de   :  { %9177 = vset.pattern.permute.xlu1 %v9307_v22  ;;  %9178 = vset.pattern.permute.xlu0 %v9306_v27  ;;  %v7231_v6 = vadd.f32 %v7230_v0, %v7229_v29  ;;  %v6234_v29 = vmul.f32 1.442695, %v12249_v21 }
 0x7df   :  { %6101 = vperm.xlu1 %9177, %v6021_v61   ;;  %6170 = vperm.xlu0 %9178, %v6021_v61  }
 0x7e0   :  { %v5881_v23 = vadd.f32 %v7231_v6, %v13567_v7 }
 0x7e2   :  { %v6026_v33 = vadd.f32 %v13552_v17, %v5881_v23  ;;  %v6238_v23 = vmul.f32 1.442695, %v12261_v59 }
 0x7e3   :  { %9180 = vset.pattern.permute.xlu1 %v9306_v27  ;;  %9179 = vset.pattern.permute.xlu0 %v9307_v22  ;;  %v7232_v3 = vpop.f32.mrb[130].mxu0 }
 0x7e4   :  { %v7233_v11 = vpop.f32.mrb[131].mxu0  ;;  %6174 = vperm.xlu1 %9180, %v6026_v33   ;;  %6106 = vperm.xlu0 %9179, %v6026_v33  }
 0x7e5   :  { %v7234_v63 = vadd.f32 %v7233_v11, %v7232_v3 }
 0x7e7   :  { %v5886_v30 = vadd.f32 %v7234_v63, %v13567_v7 }
 0x7e8   :  { %v7235_v20 = vpop.f32.mrb[132].mxu0  ;;  %9181 = vset.pattern.permute.xlu1 %v9307_v22  ;;  %9182 = vset.pattern.permute.xlu0 %v9306_v27 }
 0x7e9   :  { %v6031_v62 = vadd.f32 %v13558_v13, %v5886_v30  ;;  %v7236_v44 = vpop.f32.mrb[133].mxu0 }
 0x7ea   :  { %v7237_v17 = vadd.f32 %v7236_v44, %v7235_v20 }
 0x7eb   :  { %6178 = vperm.xlu0 %9182, %v6031_v62   ;;  %6111 = vperm.xlu1 %9181, %v6031_v62  }
 0x7ec   :  { %v5891_v9 = vadd.f32 %v7237_v17, %v13567_v7  ;;  %v14023_v17 = vld [vmem:[#allocation20_spill] sm:$0xff] }
 0x7ee   :  { %v6036_v51 = vadd.f32 %v13556_v50, %v5891_v9  ;;  %v6242_v9 = vmul.f32 1.442695, %v14023_v17 }
 0x7ef   :  { %9183 = vset.pattern.permute.xlu0 %v9307_v22  ;;  %9184 = vset.pattern.permute.xlu1 %v9306_v27  ;;  %v7238_v16 = vpop.f32.mrb[134].mxu0 }
 0x7f0   :  { %v7239_v5 = vpop.f32.mrb[135].mxu0  ;;  %6182 = vperm.xlu1 %9184, %v6036_v51   ;;  %6116 = vperm.xlu0 %9183, %v6036_v51  }
 0x7f1   :  { %v7240_v13 = vadd.f32 %v7239_v5, %v7238_v16 }
 0x7f3   :  { %v5896_v19 = vadd.f32 %v7240_v13, %v13567_v7 }
 0x7f4   :  { %v7241_v58 = vpop.f32.mrb[136].mxu0  ;;  %9185 = vset.pattern.permute.xlu1 %v9307_v22 }
 0x7f5   :  { %v6041_v52 = vadd.f32 %v13562_v4, %v5896_v19  ;;  %v7242_v55 = vpop.f32.mrb[137].mxu0 }
 0x7f6   :  { %v7243_v35 = vadd.f32 %v7242_v55, %v7241_v58 }
 0x7f7   :  { %6121 = vperm.xlu1 %9185, %v6041_v52  }
 0x7f8   :  { %v5901_v50 = vadd.f32 %v7243_v35, %v13567_v7 }
 0x7fa   :  { %v6046_v1 = vadd.f32 %v13560_v26, %v5901_v50 }
 0x7fb   :  { %9187 = vset.pattern.permute.xlu1 %v9306_v27 }
 0x7fc   :  { %6190 = vperm.xlu1 %9187, %v6046_v1   ;;  %6126 = vperm.xlu0 %9183, %v6046_v1  }
 0x800   :  { %6404 = vrot.lane.b32.xlu1 %v13577_v45, %s9308_s8  ;;  %9186 = vset.pattern.permute.xlu0 %v9306_v27 }
 0x801   :  { %6186 = vperm.xlu0 %9186, %v6041_v52  }
 0x804   :  { %6408 = vrot.lane.b32.xlu1 %v13588_v43, %s9308_s8 }
 0x805   :  { %6402 = vrot.lane.b32.xlu0 %v13570_v24, %s9308_s8 }
 0x808   :  { %6412 = vrot.lane.b32.xlu1 %v13601_v2, %s9308_s8 }
 0x809   :  { %6406 = vrot.lane.b32.xlu0 %v13582_v56, %s9308_s8 }
 0x80c   :  { %6416 = vrot.lane.b32.xlu1 %v13617_v28, %s9308_s8 }
 0x80d   :  { %6410 = vrot.lane.b32.xlu0 %v13595_v46, %s9308_s8 }
 0x810   :  { %6420 = vrot.lane.b32.xlu1 %v13633_v25, %s9308_s8  ;;  %v6230_v25 = vmul.f32 1.442695, %v12225_v47 }
 0x811   :  { %6414 = vrot.lane.b32.xlu0 %v13611_v41, %s9308_s8 }
 0x814   :  { %6424 = vrot.lane.b32.xlu1 %v6026_v33, %s9308_s8  ;;  %v9189_v33 = vpop.eup %9188 }
 0x815   :  { %6418 = vrot.lane.b32.xlu0 %v13625_v32, %s9308_s8  ;;  %v6259_v16 = vmin.f32 %v9189_v33, 1e+08 }
 0x818   :  { %6428 = vrot.lane.b32.xlu1 %v6036_v51, %s9308_s8 }
 0x819   :  { %6422 = vrot.lane.b32.xlu0 %v6021_v61, %s9308_s8 }
 0x81c   :  { %6432 = vrot.lane.b32.xlu1 %v6046_v1, %s9308_s8  ;;  %v14025_v1 = vld [vmem:[#allocation17_spill] sm:$0xff] }
 0x81d   :  { %6426 = vrot.lane.b32.xlu0 %v6031_v62, %s9308_s8  ;;  %v14022_v62 = vld [vmem:[#allocation18_spill] sm:$0xff] }
 0x81e   :  { %v6240_v20 = vmul.f32 1.442695, %v14022_v62 }
 0x81f   :  { %v6131_v27 = vpop.permute.xlu1 %6130  ;;  %v6052_v4 = vpop.permute.xlu0 %6051 }
 0x820   :  { %v13685_v53 = vsel %vm6193_vm6, %v6052_v4, %v6131_v27  ;;  %v6248_v27 = vmul.f32 1.442695, %v14025_v1 }
 0x821   :  { %6430 = vrot.lane.b32.xlu0 %v6041_v52, %s9308_s8  ;;  %v6290_v61 = vmul.f32 1.442695, %v13685_v53  ;;  %v14024_v52 = vld [vmem:[#allocation21_spill] sm:$0xff] }
 0x822   :  { %v6244_v55 = vmul.f32 1.442695, %v14024_v52 }
 0x827   :  { %v6057_v22 = vpop.permute.xlu1 %6056  ;;  %v6135_v24 = vpop.permute.xlu0 %6134 }
 0x828   :  { %v13674_v34 = vsel %vm6193_vm6, %v6057_v22, %v6135_v24  ;;  %v6275_v24 = vadd.f32 1.0, %v6259_v16 }
 0x829   :  { %v6292_v28 = vmul.f32 1.442695, %v13674_v34 }
 0x82b   :  { %9190 = vpow2.f32 %v6292_v28 }
 0x82c   :  { %v6062_v26 = vpop.permute.xlu1 %6061  ;;  %9192 = vpow2.f32 %v6232_v8 }
 0x82d   :  { %9194 = vpow2.f32 %v6226_v60 }
 0x831   :  { %v6139_v7 = vpop.permute.xlu1 %6138 }
 0x832   :  { %v13696_v0 = vsel %vm6193_vm6, %v6062_v26, %v6139_v7 }
 0x833   :  { %v6067_v56 = vpop.permute.xlu0 %6066  ;;  %v6294_v3 = vmul.f32 1.442695, %v13696_v0 }
 0x835   :  { %v6143_v45 = vpop.permute.xlu1 %6142  ;;  %v9191_v51 = vpop.eup %9190 }
 0x836   :  { %v13678_v36 = vsel %vm6193_vm6, %v6067_v56, %v6143_v45  ;;  %v9193_v58 = vpop.eup %9192  ;;  %v6323_v22 = vmin.f32 %v9191_v51, 1e+08 }
 0x837   :  { %v6296_v54 = vmul.f32 1.442695, %v13678_v36  ;;  %v9195_v50 = vpop.eup %9194 }
 0x838   :  { %v6258_v48 = vmin.f32 %v9195_v50, 1e+08  ;;  %v6339_v28 = vadd.f32 %v6323_v22, %v6275_v24 }
 0x839   :  { %9196 = vpow2.f32 %v6296_v54 }
 0x83a   :  { %v6072_v43 = vpop.permute.xlu1 %6071  ;;  %v6147_v46 = vpop.permute.xlu0 %6146  ;;  %9198 = vpow2.f32 %v6230_v25 }
 0x83b   :  { %9200 = vpow2.f32 %v6236_v49  ;;  %v13706_v44 = vsel %vm6193_vm6, %v6072_v43, %v6147_v46  ;;  %v6261_v43 = vmin.f32 %v9193_v58, 1e+08 }
 0x83c   :  { %9202 = vpow2.f32 %v6290_v61  ;;  %v6298_v13 = vmul.f32 1.442695, %v13706_v44 }
 0x83d   :  { %9204 = vpow2.f32 %v6234_v29 }
 0x83f   :  { %v6151_v2 = vpop.permute.xlu1 %6150  ;;  %v6077_v10 = vpop.permute.xlu0 %6076 }
 0x840   :  { %v13691_v39 = vsel %vm6193_vm6, %v6077_v10, %v6151_v2 }
 0x841   :  { %v6300_v6 = vmul.f32 1.442695, %v13691_v39 }
 0x843   :  { %9206 = vpow2.f32 %v6300_v6  ;;  %v9197_v7 = vpop.eup %9196 }
 0x844   :  { %9208 = vpow2.f32 %v6238_v23  ;;  %v9199_v56 = vpop.eup %9198  ;;  %v6325_v8 = vmin.f32 %v9197_v7, 1e+08 }
 0x845   :  { %9210 = vpow2.f32 %v6294_v3  ;;  %v9201_v10 = vpop.eup %9200  ;;  %v6260_v16 = vmin.f32 %v9199_v56, 1e+08 }
 0x846   :  { %9212 = vpow2.f32 %v6240_v20  ;;  %v6263_v49 = vmin.f32 %v9201_v10, 1e+08  ;;  %v6274_v20 = vadd.f32 1.0, %v6258_v48 }
 0x847   :  { %9214 = vpow2.f32 %v6242_v9 }
 0x848   :  { %v6279_v50 = vadd.f32 1.0, %v6263_v49 }
 0x84a   :  { %v6082_v31 = vpop.permute.xlu1 %6081  ;;  %v6155_v41 = vpop.permute.xlu0 %6154 }
 0x84b   :  { %v13716_v35 = vsel %vm6193_vm6, %v6082_v31, %v6155_v41  ;;  %v14026_v31 = vld [vmem:[#allocation22_spill] sm:$0xff] }
 0x84c   :  { %v6302_v46 = vmul.f32 1.442695, %v13716_v35  ;;  %v6246_v41 = vmul.f32 1.442695, %v14026_v31 }
 0x84f   :  { %v6159_v57 = vpop.permute.xlu1 %6158  ;;  %v6087_v15 = vpop.permute.xlu0 %6086 }
 0x850   :  { %v13702_v11 = vsel %vm6193_vm6, %v6087_v15, %v6159_v57  ;;  %v9203_v15 = vpop.eup %9202 }
 0x851   :  { %v6304_v5 = vmul.f32 1.442695, %v13702_v11  ;;  %v9205_v60 = vpop.eup %9204  ;;  %v6322_v23 = vmin.f32 %v9203_v15, 1e+08 }
 0x852   :  { %v9207_v25 = vpop.eup %9206  ;;  %v6262_v7 = vmin.f32 %v9205_v60, 1e+08 }
 0x853   :  { %9216 = vpow2.f32 %v6304_v5  ;;  %v13731_v6 = vpop.eup %9208  ;;  %v14028_v5 = vld [vmem:[#allocation14_spill] sm:$0xff]  ;;  %v6327_v58 = vmin.f32 %v9207_v25, 1e+08 }
 0x854   :  { %v13680_v14 = vpop.permute.xlu1 %6091  ;;  %v6163_v32 = vpop.permute.xlu0 %6162  ;;  %9218 = vpow2.f32 %v6298_v13  ;;  %v6250_v13 = vmul.f32 1.442695, %v14028_v5 }
 0x855   :  { %9220 = vpow2.f32 %v6244_v55  ;;  %v13727_v57 = vsel %vm6193_vm6, %v13680_v14, %v6163_v32  ;;  %v14027_v14 = vld [vmem:[#allocation12_spill] sm:$0xff]  ;;  %v9211_v3 = vpop.eup %9210  ;;  %v6343_v10 = vadd.f32 %v6327_v58, %v6279_v50 }
 0x856   :  { %9222 = vpow2.f32 %v6248_v27  ;;  %v6252_v32 = vmul.f32 1.442695, %v14027_v14  ;;  %v9213_v51 = vpop.eup %9212 }
 0x857   :  { %v9215_v55 = vpop.eup %9214  ;;  %v6265_v24 = vmin.f32 %v9213_v51, 1e+08 }
 0x859   :  { %v6167_v18 = vpop.permute.xlu1 %6166  ;;  %v6097_v12 = vpop.permute.xlu0 %6096 }
 0x85a   :  { %v13712_v19 = vsel %vm6193_vm6, %v6097_v12, %v6167_v18  ;;  %v6277_v18 = vadd.f32 1.0, %v6261_v43  ;;  %v6306_v12 = vmul.f32 1.442695, %v13727_v57 }
 0x85b   :  { %v6308_v45 = vmul.f32 1.442695, %v13712_v19 }
 0x85c   :  { %v6341_v9 = vadd.f32 %v6325_v8, %v6277_v18 }
 0x85d   :  { %9224 = vpow2.f32 %v6308_v45  ;;  %v9217_v22 = vpop.eup %9216 }
 0x85e   :  { %v6102_v63 = vpop.permute.xlu1 %6101  ;;  %v6171_v30 = vpop.permute.xlu0 %6170  ;;  %9226 = vpow2.f32 %v6302_v46  ;;  %v6276_v46 = vadd.f32 1.0, %v6260_v16  ;;  %v6329_v48 = vmin.f32 %v9217_v22, 1e+08 }
 0x85f   :  { %9228 = vpow2.f32 %v6246_v41  ;;  %v13735_v33 = vsel %vm6193_vm6, %v6102_v63, %v6171_v30  ;;  %v6324_v63 = vmin.f32 %v9211_v3, 1e+08  ;;  %v14029_v3 = vld [vmem:[#allocation3_spill] sm:$0xff] }
 0x860   :  { %9230 = vlog2.f32 %v6339_v28  ;;  %v6310_v27 = vmul.f32 1.442695, %v13735_v33 }
 0x861   :  { %v6340_v60 = vadd.f32 %v6324_v63, %v6276_v46  ;;  %v14030_v63 = vld [vmem:[#allocation24_spill] sm:$0xff] }
 0x863   :  { %v6175_v26 = vpop.permute.xlu1 %6174  ;;  %v6107_v4 = vpop.permute.xlu0 %6106 }
 0x864   :  { %v13722_v2 = vsel %vm6193_vm6, %v6107_v4, %v6175_v26  ;;  %v6338_v26 = vadd.f32 %v6322_v23, %v6274_v20  ;;  %v9219_v4 = vpop.eup %9218  ;;  %v6266_v23 = vmin.f32 %v9215_v55, 1e+08  ;;  %v6256_v20 = vmul.f32 1.442695, %v14029_v3 }
 0x865   :  { %v6312_v54 = vmul.f32 1.442695, %v13722_v2  ;;  %v9221_v43 = vpop.eup %9220  ;;  %v6326_v25 = vmin.f32 %v9219_v4, 1e+08  ;;  %v6254_v4 = vmul.f32 1.442695, %v14030_v63 }
 0x866   :  { %v9223_v15 = vpop.eup %9222  ;;  %v6267_v18 = vmin.f32 %v9221_v43, 1e+08 }
 0x867   :  { %9232 = vpow2.f32 %v6312_v54  ;;  %v9225_v54 = vpop.eup %9224  ;;  %v6269_v50 = vmin.f32 %v9223_v15, 1e+08 }
 0x868   :  { %9234 = vpow2.f32 %v6306_v12  ;;  %v9227_v49 = vpop.eup %9226  ;;  %v6278_v12 = vadd.f32 1.0, %v6262_v7  ;;  %v6331_v16 = vmin.f32 %v9225_v54, 1e+08  ;;  %v6283_v7 = vadd.f32 1.0, %v6267_v18 }
 0x869   :  { %9236 = vpow2.f32 %v6252_v32  ;;  %v6264_v32 = vmin.f32 %v13731_v6, 1e+08  ;;  %v6328_v22 = vmin.f32 %v9227_v49, 1e+08 }
 0x86a   :  { %v6179_v61 = vpop.permute.xlu0 %6178  ;;  %v6112_v29 = vpop.permute.xlu1 %6111  ;;  %9238 = vlog2.f32 %v6341_v9  ;;  %v6347_v46 = vadd.f32 %v6331_v16, %v6283_v7  ;;  %v6210_v7 = vadd.f32 %v13685_v53, %v12217_v40 }
 0x86b   :  { %v13740_v30 = vsel %vm6193_vm6, %v6112_v29, %v6179_v61  ;;  %9240 = vpow2.f32 %v6250_v13  ;;  %v6281_v61 = vadd.f32 1.0, %v6265_v24  ;;  %v9229_v29 = vpop.eup %9228  ;;  %v6280_v24 = vadd.f32 1.0, %v6264_v32 }
 0x86c   :  { %9242 = vpow2.f32 %v6310_v27  ;;  %v6314_v28 = vmul.f32 1.442695, %v13740_v30  ;;  %v9231_v9 = vpop.eup %9230  ;;  %v6342_v27 = vadd.f32 %v6326_v25, %v6278_v12  ;;  %v6268_v55 = vmin.f32 %v9229_v29, 1e+08 }
 0x86d   :  { %9244 = vlog2.f32 %v6338_v26  ;;  %v6345_v51 = vadd.f32 %v6329_v48, %v6281_v61  ;;  %v6357_v43 = vmul.f32 0.6931472, %v9231_v9  ;;  %v6344_v15 = vadd.f32 %v6328_v22, %v6280_v24 }
 0x86e   :  { %v6211_v25 = vadd.f32 %v13674_v34, %v12221_v42  ;;  %v6213_v61 = vadd.f32 %v13678_v36, %v12245_v38  ;;  %v6284_v22 = vadd.f32 1.0, %v6268_v55 }
 0x86f   :  { %v6183_v45 = vpop.permute.xlu1 %6182  ;;  %v6117_v56 = vpop.permute.xlu0 %6116 }
 0x870   :  { %v13743_v41 = vsel %vm6193_vm6, %v6117_v56, %v6183_v45  ;;  %v6282_v45 = vadd.f32 1.0, %v6266_v23 }
 0x871   :  { %v6316_v8 = vmul.f32 1.442695, %v13743_v41  ;;  %v9233_v58 = vpop.eup %9232 }
 0x872   :  { %v9235_v26 = vpop.eup %9234 }
 0x873   :  { %9246 = vpow2.f32 %v6316_v8  ;;  %v9237_v6 = vpop.eup %9236  ;;  %v6285_v8 = vadd.f32 1.0, %v6269_v50 }
 0x874   :  { %9248 = vlog2.f32 %v6343_v10  ;;  %v9239_v56 = vpop.eup %9238  ;;  %v6333_v10 = vmin.f32 %v9233_v58, 1e+08 }
 0x875   :  { %9250 = vpow2.f32 %v6314_v28  ;;  %v9241_v48 = vpop.eup %9240  ;;  %v6330_v28 = vmin.f32 %v9235_v26, 1e+08  ;;  %v6361_v29 = vmul.f32 0.6931472, %v9239_v56 }
 0x876   :  { %v13749_v13 = vpop.permute.xlu1 %6121  ;;  %9252 = vlog2.f32 %v6340_v60  ;;  %v9243_v54 = vpop.eup %9242  ;;  %v6271_v60 = vmin.f32 %v9237_v6, 1e+08  ;;  %v6349_v9 = vadd.f32 %v6333_v10, %v6285_v8 }
 0x877   :  { %9254 = vpow2.f32 %v6256_v20  ;;  %v9245_v12 = vpop.eup %9244  ;;  %v6387_v20 = vsub.f32 %v6211_v25, %v6357_v43  ;;  %v6346_v42 = vadd.f32 %v6330_v28, %v6282_v45  ;;  %v6332_v34 = vmin.f32 %v9243_v54, 1e+08 }
 0x878   :  { %9256 = vlog2.f32 %v6345_v51  ;;  %v6287_v38 = vadd.f32 1.0, %v6271_v60  ;;  %v6389_v6 = vsub.f32 %v6213_v61, %v6361_v29  ;;  %v6215_v60 = vadd.f32 %v13691_v39, %v12257_v37 }
 0x879   :  { %9258 = vlog2.f32 %v6342_v27  ;;  %v6355_v27 = vmul.f32 0.6931472, %v9245_v12  ;;  %v6348_v10 = vadd.f32 %v6332_v34, %v6284_v22  ;;  %v6212_v61 = vadd.f32 %v13696_v0, %v12225_v47 }
 0x87a   :  { %9260 = vpow2.f32 %v6254_v4  ;;  %v6270_v4 = vmin.f32 %v9241_v48, 1e+08 }
 0x87b   :  { %v6191_v49 = vpop.permute.xlu1 %6190  ;;  %v6127_v18 = vpop.permute.xlu0 %6126  ;;  %9262 = vlog2.f32 %v6347_v46 }
 0x87c   :  { %v13757_v32 = vsel %vm6193_vm6, %v6127_v18, %v6191_v49  ;;  %9264 = vlog2.f32 %v6344_v15  ;;  %v6386_v15 = vsub.f32 %v6210_v7, %v6355_v27  ;;  %v6286_v25 = vadd.f32 1.0, %v6270_v4 }
 0x87d   :  { %v9247_v23 = vpop.eup %9246  ;;  %v6320_v51 = vmul.f32 1.442695, %v13757_v32 }
 0x87e   :  { %v9249_v16 = vpop.eup %9248  ;;  %v6335_v58 = vmin.f32 %v9247_v23, 1e+08 }
 0x87f   :  { %v9251_v50 = vpop.eup %9250  ;;  %9266 = vpow2.f32 %v6320_v51  ;;  %v6405_v36 = vpop.permute.xlu1 %6404  ;;  %v6365_v43 = vmul.f32 0.6931472, %v9249_v16  ;;  %v6217_v16 = vadd.f32 %v13702_v11, %v14022_v62 }
 0x880   :  { %v9253_v26 = vpop.eup %9252  ;;  %v6452_v24 = vsel %vm6450_vm7, %v6387_v20, %v6405_v36  ;;  %v6187_v56 = vpop.permute.xlu0 %6186  ;;  %9268 = vlog2.f32 %v6349_v9  ;;  %v6351_v45 = vadd.f32 %v6335_v58, %v6287_v38  ;;  %v6334_v40 = vmin.f32 %v9251_v50, 1e+08 }
 0x881   :  { %6469 = vst.msk [vmem:[%s13882_s9 + $0x8] sm:$0xff] %vm6467_vm8, %v6452_v24  ;;  %v13769_v55 = vsel %vm6193_vm6, %v13749_v13, %v6187_v56  ;;  %v9255_v46 = vpop.eup %9254  ;;  %9270 = vlog2.f32 %v6346_v42  ;;  %v6359_v28 = vmul.f32 0.6931472, %v9253_v26  ;;  %v6391_v23 = vsub.f32 %v6215_v60, %v6365_v43 }
 0x882   :  { %v6318_v53 = vmul.f32 1.442695, %v13769_v55  ;;  %v9257_v48 = vpop.eup %9256  ;;  %v6273_v12 = vmin.f32 %v9255_v46, 1e+08  ;;  %v6350_v39 = vadd.f32 %v6334_v40, %v6286_v25  ;;  %v6214_v50 = vadd.f32 %v13706_v44, %v12249_v21 }
 0x883   :  { %v6409_v8 = vpop.permute.xlu1 %6408  ;;  %v9259_v54 = vpop.eup %9258  ;;  %v6369_v37 = vmul.f32 0.6931472, %v9257_v48  ;;  %v6388_v9 = vsub.f32 %v6212_v61, %v6359_v28  ;;  %v6218_v25 = vadd.f32 %v13727_v57, %v14023_v17  ;;  %v6223_v57 = vadd.f32 %v13743_v41, %v14027_v14 }
 0x884   :  { %9272 = vpow2.f32 %v6318_v53  ;;  %v6454_v49 = vsel %vm6450_vm7, %v6389_v6, %v6409_v8  ;;  %v6403_v13 = vpop.permute.xlu0 %6402  ;;  %v9261_v18 = vpop.eup %9260  ;;  %v6363_v47 = vmul.f32 0.6931472, %v9259_v54  ;;  %v6289_v27 = vadd.f32 1.0, %v6273_v12 }
 0x885   :  { %9274 = vlog2.f32 %v6351_v45  ;;  %6471 = vst.msk [vmem:[%s13882_s9 + $0x18] sm:$0xff] %vm6467_vm8, %v6454_v49  ;;  %v6451_v29 = vsel %vm6450_vm7, %v6386_v15, %v6403_v13  ;;  %v9263_v20 = vpop.eup %9262  ;;  %v6393_v38 = vsub.f32 %v6217_v16, %v6369_v37  ;;  %v6272_v62 = vmin.f32 %v9261_v18, 1e+08 }
 0x886   :  { %9276 = vlog2.f32 %v6348_v10  ;;  %6468 = vst.msk [vmem:[%s13882_s9] sm:$0xff] %vm6467_vm8, %v6451_v29  ;;  %v9265_v51 = vpop.eup %9264  ;;  %v6373_v36 = vmul.f32 0.6931472, %v9263_v20  ;;  %v6390_v21 = vsub.f32 %v6214_v50, %v6363_v47  ;;  %v6219_v6 = vadd.f32 %v13712_v19, %v14024_v52 }
 0x887   :  { %v6413_v0 = vpop.permute.xlu1 %6412  ;;  %9278 = vlog2.f32 %v6350_v39  ;;  %v6367_v44 = vmul.f32 0.6931472, %v9265_v51  ;;  %v6216_v45 = vadd.f32 %v13716_v35, %v12261_v59  ;;  %v6288_v59 = vadd.f32 1.0, %v6272_v62 }
 0x888   :  { %v6456_v42 = vsel %vm6450_vm7, %v6391_v23, %v6413_v0  ;;  %v6407_v34 = vpop.permute.xlu0 %6406  ;;  %v6395_v40 = vsub.f32 %v6219_v6, %v6373_v36  ;;  %v6221_v8 = vadd.f32 %v13722_v2, %v14025_v1  ;;  %v6220_v37 = vadd.f32 %v13735_v33, %v14026_v31 }
 0x889   :  { %v9267_v58 = vpop.eup %9266  ;;  %6473 = vst.msk [vmem:[%s13882_s9 + $0x28] sm:$0xff] %vm6467_vm8, %v6456_v42  ;;  %v6453_v22 = vsel %vm6450_vm7, %v6388_v9, %v6407_v34  ;;  %v6392_v52 = vsub.f32 %v6216_v45, %v6367_v44  ;;  %v6222_v33 = vadd.f32 %v13740_v30, %v14028_v5  ;;  %v6225_v51 = vadd.f32 %v13757_v32, %v14029_v3 }
 0x88a   :  { %v6337_v26 = vmin.f32 %v9267_v58, 1e+08  ;;  %6470 = vst.msk [vmem:[%s13882_s9 + $0x10] sm:$0xff] %vm6467_vm8, %v6453_v22  ;;  %v9269_v11 = vpop.eup %9268 }
 0x88b   :  { %v6417_v4 = vpop.permute.xlu1 %6416  ;;  %v9271_v7 = vpop.eup %9270  ;;  %v6377_v53 = vmul.f32 0.6931472, %v9269_v11 }
 0x88c   :  { %v6353_v24 = vadd.f32 %v6337_v26, %v6289_v27  ;;  %v6458_v56 = vsel %vm6450_vm7, %v6393_v38, %v6417_v4  ;;  %v6411_v43 = vpop.permute.xlu0 %6410  ;;  %v6371_v48 = vmul.f32 0.6931472, %v9271_v7  ;;  %v6224_v27 = vadd.f32 %v13769_v55, %v14030_v63 }
 0x88d   :  { %6475 = vst.msk [vmem:[%s13882_s9 + $0x38] sm:$0xff] %vm6467_vm8, %v6458_v56  ;;  %v6455_v46 = vsel %vm6450_vm7, %v6390_v21, %v6411_v43  ;;  %v6397_v18 = vsub.f32 %v6221_v8, %v6377_v53 }
 0x88e   :  { %v9273_v10 = vpop.eup %9272  ;;  %9280 = vlog2.f32 %v6353_v24  ;;  %6472 = vst.msk [vmem:[%s13882_s9 + $0x20] sm:$0xff] %vm6467_vm8, %v6455_v46  ;;  %v6394_v1 = vsub.f32 %v6218_v25, %v6371_v48 }
 0x88f   :  { %v9275_v19 = vpop.eup %9274  ;;  %v6336_v35 = vmin.f32 %v9273_v10, 1e+08  ;;  %v6421_v15 = vpop.permute.xlu1 %6420 }
 0x890   :  { %v9277_v28 = vpop.eup %9276  ;;  %v6460_v54 = vsel %vm6450_vm7, %v6395_v40, %v6421_v15  ;;  %v6415_v60 = vpop.permute.xlu0 %6414  ;;  %v6381_v12 = vmul.f32 0.6931472, %v9275_v19 }
 0x891   :  { %v6352_v49 = vadd.f32 %v6336_v35, %v6288_v59  ;;  %6477 = vst.msk [vmem:[%s13882_s9 + $0x48] sm:$0xff] %vm6467_vm8, %v6460_v54  ;;  %v6457_v13 = vsel %vm6450_vm7, %v6392_v52, %v6415_v60  ;;  %v6375_v2 = vmul.f32 0.6931472, %v9277_v28  ;;  %v9279_v17 = vpop.eup %9278 }
 0x892   :  { %6474 = vst.msk [vmem:[%s13882_s9 + $0x30] sm:$0xff] %vm6467_vm8, %v6457_v13  ;;  %v6399_v20 = vsub.f32 %v6223_v57, %v6381_v12  ;;  %v6379_v41 = vmul.f32 0.6931472, %v9279_v17 }
 0x893   :  { %9282 = vlog2.f32 %v6352_v49  ;;  %v6425_v61 = vpop.permute.xlu1 %6424  ;;  %v6396_v14 = vsub.f32 %v6220_v37, %v6375_v2 }
 0x894   :  { %v6462_v29 = vsel %vm6450_vm7, %v6397_v18, %v6425_v61  ;;  %v6419_v23 = vpop.permute.xlu0 %6418  ;;  %v6398_v34 = vsub.f32 %v6222_v33, %v6379_v41 }
 0x895   :  { %6479 = vst.msk [vmem:[%s13882_s9 + $0x58] sm:$0xff] %vm6467_vm8, %v6462_v29  ;;  %v6459_v39 = vsel %vm6450_vm7, %v6394_v1, %v6419_v23 }
 0x896   :  { %6476 = vst.msk [vmem:[%s13882_s9 + $0x40] sm:$0xff] %vm6467_vm8, %v6459_v39 }
 0x897   :  { %v6429_v9 = vpop.permute.xlu1 %6428 }
 0x898   :  { %v9281_v47 = vpop.eup %9280  ;;  %v6464_v0 = vsel %vm6450_vm7, %v6399_v20, %v6429_v9  ;;  %v6423_v31 = vpop.permute.xlu0 %6422 }
 0x899   :  { %v6385_v16 = vmul.f32 0.6931472, %v9281_v47  ;;  %6481 = vst.msk [vmem:[%s13882_s9 + $0x68] sm:$0xff] %vm6467_vm8, %v6464_v0  ;;  %v6461_v42 = vsel %vm6450_vm7, %v6396_v14, %v6423_v31 }
 0x89a   :  { %6478 = vst.msk [vmem:[%s13882_s9 + $0x50] sm:$0xff] %vm6467_vm8, %v6461_v42 }
 0x89b   :  { %v6401_v58 = vsub.f32 %v6225_v51, %v6385_v16  ;;  %v6433_v50 = vpop.permute.xlu1 %6432 }
 0x89c   :  { %v6427_v5 = vpop.permute.xlu0 %6426 }
 0x89d   :  { %v9283_v30 = vpop.eup %9282  ;;  %v6466_v3 = vsel %vm6450_vm7, %v6401_v58, %v6433_v50  ;;  %v6463_v32 = vsel %vm6450_vm7, %v6398_v34, %v6427_v5 }
 0x89e   :  { %v6383_v22 = vmul.f32 0.6931472, %v9283_v30  ;;  %6483 = vst.msk [vmem:[%s13882_s9 + $0x78] sm:$0xff] %vm6467_vm8, %v6466_v3  ;;  %6480 = vst.msk [vmem:[%s13882_s9 + $0x60] sm:$0xff] %vm6467_vm8, %v6463_v32 }
 0x8a0   :  { %v6400_v38 = vsub.f32 %v6224_v27, %v6383_v22  ;;  %v6431_v36 = vpop.permute.xlu0 %6430 }
 0x8a2   :  { %v6465_v26 = vsel %vm6450_vm7, %v6400_v38, %v6431_v36 }
 0x8a3   :  { %6482 = vst.msk [vmem:[%s13882_s9 + $0x70] sm:$0xff] %vm6467_vm8, %v6465_v26 }

</bundles_post_ra>
